<compile_context>
chip_gen: v7x
topology: tpu7x:2x2x1
jax: 0.10.0
libtpu: 0.0.40
codegen_flags: <defaults>
</compile_context>

<pallas_src>
import functools

import jax
import jax.numpy as jnp
from jax.experimental import pallas as pl
from jax.experimental.pallas import tpu as pltpu


C_PAD = 128     # lane-dense channel width for all intermediate activations
W_HALO = 16     # left/right halo on W (bf16 sublane tile) -> aligned stores


def _fused_unetpp_kernel(xp_ref, w0_ref, b0_ref, wm_ref, bm_ref, wl_ref, bl_ref,
                         o_ref, act_a, act_b, *, H, W, C, R, NC_PAD):
    """All four conv layers for one batch element; activations stay in VMEM.

    xp_ref: (1, H*W, K0)      layer-0 im2col patches (bf16, built outside)
    w0_ref: (K0, C)           layer-0 im2col weights (bf16)
    b0_ref: (1, C)            layer-0 bias (f32)
    wm_ref: (2, 9, C, C)      layers 1-2 per-tap weights (bf16)
    bm_ref: (2, 1, C)         layers 1-2 biases (f32)
    wl_ref: (9, C, NC_PAD)    layer-3 per-tap weights (bf16)
    bl_ref: (1, NC_PAD)       layer-3 bias (f32)
    o_ref:  (1, H, W, NC_PAD) final output (f32, narrow cout -> masked vst)
    act_a/act_b: (H+2, W+2*W_HALO, C) bf16 ping-pong activation buffers
    """
    n_chunks = H // R

    # Zero both buffers so the 1-row / W_HALO-col halos provide SAME zero
    # padding (interiors are always rewritten before being read).  Done every
    # grid step because the batch axis may be megacore-sharded.
    act_a[...] = jnp.zeros(act_a.shape, act_a.dtype)
    act_b[...] = jnp.zeros(act_b.shape, act_b.dtype)

    # ---- layer 0: cin=1, so the conv is one (R*W, K0) @ (K0, C) matmul ------
    for c in range(n_chunks):
        r0 = c * R
        a0 = jnp.dot(xp_ref[0, r0 * W:(r0 + R) * W, :], w0_ref[...],
                     preferred_element_type=jnp.float32)
        a0 = jnp.maximum(a0 + b0_ref[...], 0.0)
        act_a[1 + r0:1 + r0 + R, W_HALO:W_HALO + W, :] = (
            a0.reshape(R, W, C).astype(act_a.dtype))

    # ---- layers 1..3: 9 per-tap matmuls, fp32 register accumulation ---------
    def conv3x3(src, get_w, bias, store, relu):
        for c in range(n_chunks):
            r0 = c * R
            acc = None
            for ky in range(3):
                for kx in range(3):
                    col0 = W_HALO - 1 + kx          # 15 / 16 / 17
                    slab = src[r0 + ky:r0 + ky + R, col0:col0 + W, :]
                    slab = slab.reshape(R * W, C)
                    d = jnp.dot(slab, get_w(ky * 3 + kx),
                                preferred_element_type=jnp.float32)
                    acc = d if acc is None else acc + d
            a = acc + bias
            if relu:
                a = jnp.maximum(a, 0.0)
            store(r0, a)

    def store_into(dst):
        def _store(r0, a):
            dst[1 + r0:1 + r0 + R, W_HALO:W_HALO + W, :] = (
                a.reshape(R, W, C).astype(dst.dtype))
        return _store

    def store_out(r0, a):
        o_ref[0, r0:r0 + R, :, :] = a.reshape(R, W, NC_PAD).astype(o_ref.dtype)

    conv3x3(act_a, lambda t: wm_ref[0, t], bm_ref[0], store_into(act_b), True)
    conv3x3(act_b, lambda t: wm_ref[1, t], bm_ref[1], store_into(act_a), True)
    conv3x3(act_a, lambda t: wl_ref[t],    bl_ref[...], store_out,       False)


def _round_up(x, m):
    return ((x + m - 1) // m) * m


def _pick_chunk_rows(H, W):
    """Rows per register-accumulated chunk (~128 output pixels, divides H)."""
    r = max(1, min(H, 128 // max(W, 1)))
    while H % r:
        r -= 1
    return r


def _pack_params(params, C, K0_PAD, num_classes):
    """Pack the 4 conv layers into bf16 kernel operands (biases stay f32)."""
    (w0_, b0_), (w1_, b1_), (w2_, b2_), (w3_, b3_) = params

    # Layer 0: im2col rows ordered (ky, kx, cin); cout padded to lane width.
    kh, kw, cin0, cout0 = w0_.shape
    w0 = w0_.reshape(kh * kw * cin0, cout0)
    w0 = jnp.pad(w0, ((0, K0_PAD - kh * kw * cin0), (0, C - cout0)))
    b0 = jnp.pad(b0_, (0, C - cout0)).reshape(1, C)

    def per_tap(w, b, cout_pad):
        kh, kw, cin, cout = w.shape
        wt = jnp.pad(w, ((0, 0), (0, 0), (0, C - cin), (0, cout_pad - cout)))
        bt = jnp.pad(b, (0, cout_pad - cout)).reshape(1, cout_pad)
        return wt.reshape(kh * kw, C, cout_pad), bt

    nc_pad = max(8, _round_up(num_classes, 8))   # narrow last-layer cout
    w1, bm1 = per_tap(w1_, b1_, C)
    w2, bm2 = per_tap(w2_, b2_, C)
    wl, bl = per_tap(w3_, b3_, nc_pad)

    bf = jnp.bfloat16
    return (w0.astype(bf), b0.astype(jnp.float32),
            jnp.stack([w1, w2]).astype(bf),
            jnp.stack([bm1, bm2]).astype(jnp.float32),
            wl.astype(bf), bl.astype(jnp.float32), nc_pad)


def _vmem_limit_bytes():
    # ~3/4 of physical VMEM: ~96 MiB on v5e/v6e (128 MiB), 48 MiB on v7x (64).
    try:
        cap = pltpu.get_tpu_info().vmem_capacity_bytes
    except Exception:
        cap = 64 * 1024 * 1024
    return int(min(cap * 3 // 4, 96 * 1024 * 1024))


def unetplusplus_forward(x, _unused, params, num_classes=1):
    """Mirrors UNetPlusPlus.forward(x, _): x (N,1,1,H,W) -> (N,num_classes,H,W)."""
    x = jnp.squeeze(x, axis=1)                       # (N, 1, H, W)  NCHW
    h = jnp.transpose(x, (0, 2, 3, 1))               # (N, H, W, 1)  NHWC
    N, H, W, cin0 = h.shape
    C = C_PAD

    # Layer-0 im2col in plain JAX: real K is only 9*cin0 (=9), so there is no
    # point padding cin to 128 and burning 128x the MXU work in the kernel.
    hp = jnp.pad(h, ((0, 0), (1, 1), (1, 1), (0, 0)))
    taps = [hp[:, ky:ky + H, kx:kx + W, :] for ky in range(3) for kx in range(3)]
    patch0 = jnp.stack(taps, axis=3).reshape(N, H * W, 9 * cin0)
    K0_PAD = _round_up(9 * cin0, 16)
    patch0 = jnp.pad(patch0, ((0, 0), (0, 0), (0, K0_PAD - 9 * cin0)))
    patch0 = patch0.astype(jnp.bfloat16)

    w0, b0, wm, bm, wl, bl, NC_PAD = _pack_params(params, C, K0_PAD, num_classes)
    R = _pick_chunk_rows(H, W)

    kernel = functools.partial(_fused_unetpp_kernel, H=H, W=W, C=C, R=R,
                               NC_PAD=NC_PAD)

    flops = 2 * N * H * W * (K0_PAD * C + 2 * 9 * C * C + 9 * C * NC_PAD)
    operands = (patch0, w0, b0, wm, bm, wl, bl)
    bytes_accessed = sum(int(a.size) * a.dtype.itemsize for a in operands)
    bytes_accessed += N * H * W * NC_PAD * 4

    out = pl.pallas_call(
        kernel,
        out_shape=jax.ShapeDtypeStruct((N, H, W, NC_PAD), jnp.float32),
        grid=(N,),
        in_specs=[
            pl.BlockSpec((1, H * W, K0_PAD), lambda n: (n, 0, 0)),
            pl.BlockSpec((K0_PAD, C), lambda n: (0, 0)),
            pl.BlockSpec((1, C), lambda n: (0, 0)),
            pl.BlockSpec((2, 9, C, C), lambda n: (0, 0, 0, 0)),
            pl.BlockSpec((2, 1, C), lambda n: (0, 0, 0)),
            pl.BlockSpec((9, C, NC_PAD), lambda n: (0, 0, 0)),
            pl.BlockSpec((1, NC_PAD), lambda n: (0, 0)),
        ],
        out_specs=pl.BlockSpec((1, H, W, NC_PAD), lambda n: (n, 0, 0, 0)),
        scratch_shapes=[
            pltpu.VMEM((H + 2, W + 2 * W_HALO, C), jnp.bfloat16),   # act_a
            pltpu.VMEM((H + 2, W + 2 * W_HALO, C), jnp.bfloat16),   # act_b
        ],
        compiler_params=pltpu.CompilerParams(
            dimension_semantics=("parallel",),
            vmem_limit_bytes=_vmem_limit_bytes(),
        ),
        cost_estimate=pl.CostEstimate(
            flops=flops, transcendentals=0, bytes_accessed=bytes_accessed),
    )(patch0, w0, b0, wm, bm, wl, bl)

    out = out[..., :num_classes]                     # drop cout padding (<=8)
    return jnp.transpose(out, (0, 3, 1, 2))          # back to NCHW


def init_params(key, num_classes=1):
    """Deterministic init matching the PyTorch module's parameter shapes.

    Conv2d weight (Cout, Cin, 3, 3) is stored here as HWIO (3, 3, Cin, Cout).
    """
    layer_dims = [(1, 64), (64, 128), (128, 64), (64, num_classes)]
    params = []
    for (cin, cout) in layer_dims:
        key, kw, kb = jax.random.split(key, 3)
        fan_in = cin * 3 * 3
        bound = 1.0 / jnp.sqrt(jnp.float32(fan_in))
        w = jax.random.uniform(kw, (3, 3, cin, cout), jnp.float32, -bound, bound)
        b = jax.random.uniform(kb, (cout,), jnp.float32, -bound, bound)
        params.append((w, b))
    return params


def _reference_forward(x, params):
    """Pure-JAX reference using the same bf16 weight/activation quantization."""
    x = jnp.squeeze(x, axis=1)
    h = jnp.transpose(x, (0, 2, 3, 1))
    h = h.astype(jnp.bfloat16).astype(jnp.float32)
    relus = [True, True, True, False]
    for (w, b), r in zip(params, relus):
        wq = w.astype(jnp.bfloat16).astype(jnp.float32)
        dn = jax.lax.conv_dimension_numbers(h.shape, wq.shape,
                                            ("NHWC", "HWIO", "NHWC"))
        h = jax.lax.conv_general_dilated(h, wq, (1, 1), "SAME",
                                         dimension_numbers=dn,
                                         precision=jax.lax.Precision.HIGHEST)
        h = h + b[None, None, None, :]
        if r:
            h = jnp.maximum(h, 0.0)
            h = h.astype(jnp.bfloat16).astype(jnp.float32)
    return jnp.transpose(h, (0, 3, 1, 2))


if __name__ == "__main__":
    key = jax.random.PRNGKey(0)
    key, kx = jax.random.split(key)

    N, H, W = 2, 16, 16
    # 5-D input so that x.squeeze(1) yields a valid (N, 1, H, W) conv input.
    x = jax.random.normal(kx, (N, 1, 1, H, W), jnp.float32)
    dummy = jnp.zeros((1,), jnp.float32)        # the unused second forward arg

    params = init_params(jax.random.PRNGKey(42), num_classes=1)

    fwd = jax.jit(unetplusplus_forward)
    out = fwd(x, dummy, params)
    out = jax.block_until_ready(out)

    ref = _reference_forward(x, params)
    assert out.shape == (N, 1, H, W), out.shape
    assert jnp.allclose(out, ref, rtol=2e-2, atol=2e-2), "mismatch vs reference"

    print("KERNEL_OK")
</pallas_src>

<mosaic_0001>
module attributes {stable_mosaic.version = 11 : i64} {
  func.func @_fused_unetpp_kernel(%arg0: i32, %arg1: memref<1x256x16xbf16, #tpu.memory_space<vmem>>, %arg2: memref<16x128xbf16, #tpu.memory_space<vmem>>, %arg3: memref<1x128xf32, #tpu.memory_space<vmem>>, %arg4: memref<2x9x128x128xbf16, #tpu.memory_space<vmem>>, %arg5: memref<2x1x128xf32, #tpu.memory_space<vmem>>, %arg6: memref<9x128x8xbf16, #tpu.memory_space<vmem>>, %arg7: memref<1x8xf32, #tpu.memory_space<vmem>>, %arg8: memref<1x16x16x8xf32, #tpu.memory_space<vmem>>, %arg9: memref<18x48x128xbf16, #tpu.memory_space<vmem>>, %arg10: memref<18x48x128xbf16, #tpu.memory_space<vmem>>) attributes {dimension_semantics = [#tpu.dimension_semantics<parallel>], iteration_bounds = array<i64: 2>, scalar_prefetch = 0 : i64, scratch_operands = 2 : i64, tpu.core_type = #tpu.core_type<tc>, window_params = [{transform_indices = @transform_0, window_bounds = array<i64: 1, 256, 16>}, {pipeline_mode = #tpu.pipeline_mode<synchronous>, transform_indices = @transform_1, window_bounds = array<i64: 16, 128>}, {pipeline_mode = #tpu.pipeline_mode<synchronous>, transform_indices = @transform_2, window_bounds = array<i64: 1, 128>}, {pipeline_mode = #tpu.pipeline_mode<synchronous>, transform_indices = @transform_3, window_bounds = array<i64: 2, 9, 128, 128>}, {pipeline_mode = #tpu.pipeline_mode<synchronous>, transform_indices = @transform_4, window_bounds = array<i64: 2, 1, 128>}, {pipeline_mode = #tpu.pipeline_mode<synchronous>, transform_indices = @transform_5, window_bounds = array<i64: 9, 128, 8>}, {pipeline_mode = #tpu.pipeline_mode<synchronous>, transform_indices = @transform_6, window_bounds = array<i64: 1, 8>}, {transform_indices = @transform_7, window_bounds = array<i64: 1, 16, 16, 8>}]} {
    %cst = arith.constant 0.000000e+00 : bf16
    %0 = vector.broadcast %cst : bf16 to vector<18x48x128xbf16>
    %c0 = arith.constant 0 : index
    %c0_0 = arith.constant 0 : index
    %c0_1 = arith.constant 0 : index
    %1 = vector.load %arg9[%c0, %c0_0, %c0_1] : memref<18x48x128xbf16, #tpu.memory_space<vmem>>, vector<18x48x128xbf16>
    tpu.vector_store %arg9[%c0, %c0_0, %c0_1], %0 {strides = array<i32>} : memref<18x48x128xbf16, #tpu.memory_space<vmem>>, vector<18x48x128xbf16>,
    %cst_2 = arith.constant 0.000000e+00 : bf16
    %2 = vector.broadcast %cst_2 : bf16 to vector<18x48x128xbf16>
    %c0_3 = arith.constant 0 : index
    %c0_4 = arith.constant 0 : index
    %c0_5 = arith.constant 0 : index
    %3 = vector.load %arg10[%c0_3, %c0_4, %c0_5] : memref<18x48x128xbf16, #tpu.memory_space<vmem>>, vector<18x48x128xbf16>
    tpu.vector_store %arg10[%c0_3, %c0_4, %c0_5], %2 {strides = array<i32>} : memref<18x48x128xbf16, #tpu.memory_space<vmem>>, vector<18x48x128xbf16>,
    %c0_6 = arith.constant 0 : index
    %c0_7 = arith.constant 0 : index
    %c0_8 = arith.constant 0 : index
    %4 = vector.load %arg1[%c0_6, %c0_7, %c0_8] : memref<1x256x16xbf16, #tpu.memory_space<vmem>>, vector<1x128x16xbf16>
    %5 = vector.shape_cast %4 : vector<1x128x16xbf16> to vector<128x16xbf16>
    %c0_9 = arith.constant 0 : index
    %c0_10 = arith.constant 0 : index
    %6 = vector.load %arg2[%c0_9, %c0_10] : memref<16x128xbf16, #tpu.memory_space<vmem>>, vector<16x128xbf16>
    %cst_11 = arith.constant dense<0.000000e+00> : vector<128x128xf32>
    %7 = tpu.matmul %5, %6, %cst_11 {dimension_numbers = #tpu.dot_dimension_numbers<[1], [0], [0], [1], [0, 0, 1, 1], [], []>} : vector<128x16xbf16>, vector<16x128xbf16>, vector<128x128xf32> -> vector<128x128xf32>
    %c0_12 = arith.constant 0 : index
    %c0_13 = arith.constant 0 : index
    %8 = vector.load %arg3[%c0_12, %c0_13] : memref<1x128xf32, #tpu.memory_space<vmem>>, vector<1x128xf32>
    %9 = vector.broadcast %8 : vector<1x128xf32> to vector<128x128xf32>
    %10 = arith.addf %7, %9 : vector<128x128xf32>
    %cst_14 = arith.constant 0.000000e+00 : f32
    %11 = vector.broadcast %cst_14 : f32 to vector<128x128xf32>
    %12 = arith.maximumf %10, %11 : vector<128x128xf32>
    %13 = vector.shape_cast %12 : vector<128x128xf32> to vector<8x16x128xf32>
    %14 = arith.truncf %13 : vector<8x16x128xf32> to vector<8x16x128xbf16>
    %c1 = arith.constant 1 : index
    %c16 = arith.constant 16 : index
    %c0_15 = arith.constant 0 : index
    %15 = vector.load %arg9[%c1, %c16, %c0_15] : memref<18x48x128xbf16, #tpu.memory_space<vmem>>, vector<8x16x128xbf16>
    tpu.vector_store %arg9[%c1, %c16, %c0_15], %14 {strides = array<i32>} : memref<18x48x128xbf16, #tpu.memory_space<vmem>>, vector<8x16x128xbf16>,
    %c0_16 = arith.constant 0 : index
    %c128 = arith.constant 128 : index
    %c0_17 = arith.constant 0 : index
    %16 = vector.load %arg1[%c0_16, %c128, %c0_17] : memref<1x256x16xbf16, #tpu.memory_space<vmem>>, vector<1x128x16xbf16>
    %17 = vector.shape_cast %16 : vector<1x128x16xbf16> to vector<128x16xbf16>
    %c0_18 = arith.constant 0 : index
    %c0_19 = arith.constant 0 : index
    %18 = vector.load %arg2[%c0_18, %c0_19] : memref<16x128xbf16, #tpu.memory_space<vmem>>, vector<16x128xbf16>
    %cst_20 = arith.constant dense<0.000000e+00> : vector<128x128xf32>
    %19 = tpu.matmul %17, %18, %cst_20 {dimension_numbers = #tpu.dot_dimension_numbers<[1], [0], [0], [1], [0, 0, 1, 1], [], []>} : vector<128x16xbf16>, vector<16x128xbf16>, vector<128x128xf32> -> vector<128x128xf32>
    %c0_21 = arith.constant 0 : index
    %c0_22 = arith.constant 0 : index
    %20 = vector.load %arg3[%c0_21, %c0_22] : memref<1x128xf32, #tpu.memory_space<vmem>>, vector<1x128xf32>
    %21 = vector.broadcast %20 : vector<1x128xf32> to vector<128x128xf32>
    %22 = arith.addf %19, %21 : vector<128x128xf32>
    %cst_23 = arith.constant 0.000000e+00 : f32
    %23 = vector.broadcast %cst_23 : f32 to vector<128x128xf32>
    %24 = arith.maximumf %22, %23 : vector<128x128xf32>
    %25 = vector.shape_cast %24 : vector<128x128xf32> to vector<8x16x128xf32>
    %26 = arith.truncf %25 : vector<8x16x128xf32> to vector<8x16x128xbf16>
    %c9 = arith.constant 9 : index
    %c16_24 = arith.constant 16 : index
    %c0_25 = arith.constant 0 : index
    %27 = vector.load %arg9[%c9, %c16_24, %c0_25] : memref<18x48x128xbf16, #tpu.memory_space<vmem>>, vector<8x16x128xbf16>
    tpu.vector_store %arg9[%c9, %c16_24, %c0_25], %26 {strides = array<i32>} : memref<18x48x128xbf16, #tpu.memory_space<vmem>>, vector<8x16x128xbf16>,
    %c0_26 = arith.constant 0 : index
    %c0_27 = arith.constant 0 : index
    %c0_28 = arith.constant 0 : index
    %28 = vector.load %arg5[%c0_26, %c0_27, %c0_28] : memref<2x1x128xf32, #tpu.memory_space<vmem>>, vector<1x1x128xf32>
    %29 = vector.shape_cast %28 : vector<1x1x128xf32> to vector<1x128xf32>
    %c0_29 = arith.constant 0 : index
    %c15 = arith.constant 15 : index
    %c0_30 = arith.constant 0 : index
    %30 = vector.load %arg9[%c0_29, %c15, %c0_30] : memref<18x48x128xbf16, #tpu.memory_space<vmem>>, vector<8x16x128xbf16>
    %31 = vector.shape_cast %30 : vector<8x16x128xbf16> to vector<128x128xbf16>
    %c0_31 = arith.constant 0 : index
    %c0_32 = arith.constant 0 : index
    %c0_33 = arith.constant 0 : index
    %c0_34 = arith.constant 0 : index
    %32 = vector.load %arg4[%c0_31, %c0_32, %c0_33, %c0_34] : memref<2x9x128x128xbf16, #tpu.memory_space<vmem>>, vector<1x1x128x128xbf16>
    %33 = vector.shape_cast %32 : vector<1x1x128x128xbf16> to vector<128x128xbf16>
    %cst_35 = arith.constant dense<0.000000e+00> : vector<128x128xf32>
    %34 = tpu.matmul %31, %33, %cst_35 {dimension_numbers = #tpu.dot_dimension_numbers<[1], [0], [0], [1], [0, 0, 1, 1], [], []>} : vector<128x128xbf16>, vector<128x128xbf16>, vector<128x128xf32> -> vector<128x128xf32>
    %c0_36 = arith.constant 0 : index
    %c16_37 = arith.constant 16 : index
    %c0_38 = arith.constant 0 : index
    %35 = vector.load %arg9[%c0_36, %c16_37, %c0_38] : memref<18x48x128xbf16, #tpu.memory_space<vmem>>, vector<8x16x128xbf16>
    %36 = vector.shape_cast %35 : vector<8x16x128xbf16> to vector<128x128xbf16>
    %c0_39 = arith.constant 0 : index
    %c1_40 = arith.constant 1 : index
    %c0_41 = arith.constant 0 : index
    %c0_42 = arith.constant 0 : index
    %37 = vector.load %arg4[%c0_39, %c1_40, %c0_41, %c0_42] : memref<2x9x128x128xbf16, #tpu.memory_space<vmem>>, vector<1x1x128x128xbf16>
    %38 = vector.shape_cast %37 : vector<1x1x128x128xbf16> to vector<128x128xbf16>
    %cst_43 = arith.constant dense<0.000000e+00> : vector<128x128xf32>
    %39 = tpu.matmul %36, %38, %cst_43 {dimension_numbers = #tpu.dot_dimension_numbers<[1], [0], [0], [1], [0, 0, 1, 1], [], []>} : vector<128x128xbf16>, vector<128x128xbf16>, vector<128x128xf32> -> vector<128x128xf32>
    %40 = arith.addf %34, %39 : vector<128x128xf32>
    %c0_44 = arith.constant 0 : index
    %c17 = arith.constant 17 : index
    %c0_45 = arith.constant 0 : index
    %41 = vector.load %arg9[%c0_44, %c17, %c0_45] : memref<18x48x128xbf16, #tpu.memory_space<vmem>>, vector<8x16x128xbf16>
    %42 = vector.shape_cast %41 : vector<8x16x128xbf16> to vector<128x128xbf16>
    %c0_46 = arith.constant 0 : index
    %c2 = arith.constant 2 : index
    %c0_47 = arith.constant 0 : index
    %c0_48 = arith.constant 0 : index
    %43 = vector.load %arg4[%c0_46, %c2, %c0_47, %c0_48] : memref<2x9x128x128xbf16, #tpu.memory_space<vmem>>, vector<1x1x128x128xbf16>
    %44 = vector.shape_cast %43 : vector<1x1x128x128xbf16> to vector<128x128xbf16>
    %cst_49 = arith.constant dense<0.000000e+00> : vector<128x128xf32>
    %45 = tpu.matmul %42, %44, %cst_49 {dimension_numbers = #tpu.dot_dimension_numbers<[1], [0], [0], [1], [0, 0, 1, 1], [], []>} : vector<128x128xbf16>, vector<128x128xbf16>, vector<128x128xf32> -> vector<128x128xf32>
    %46 = arith.addf %40, %45 : vector<128x128xf32>
    %c1_50 = arith.constant 1 : index
    %c15_51 = arith.constant 15 : index
    %c0_52 = arith.constant 0 : index
    %47 = vector.load %arg9[%c1_50, %c15_51, %c0_52] : memref<18x48x128xbf16, #tpu.memory_space<vmem>>, vector<8x16x128xbf16>
    %48 = vector.shape_cast %47 : vector<8x16x128xbf16> to vector<128x128xbf16>
    %c0_53 = arith.constant 0 : index
    %c3 = arith.constant 3 : index
    %c0_54 = arith.constant 0 : index
    %c0_55 = arith.constant 0 : index
    %49 = vector.load %arg4[%c0_53, %c3, %c0_54, %c0_55] : memref<2x9x128x128xbf16, #tpu.memory_space<vmem>>, vector<1x1x128x128xbf16>
    %50 = vector.shape_cast %49 : vector<1x1x128x128xbf16> to vector<128x128xbf16>
    %cst_56 = arith.constant dense<0.000000e+00> : vector<128x128xf32>
    %51 = tpu.matmul %48, %50, %cst_56 {dimension_numbers = #tpu.dot_dimension_numbers<[1], [0], [0], [1], [0, 0, 1, 1], [], []>} : vector<128x128xbf16>, vector<128x128xbf16>, vector<128x128xf32> -> vector<128x128xf32>
    %52 = arith.addf %46, %51 : vector<128x128xf32>
    %c1_57 = arith.constant 1 : index
    %c16_58 = arith.constant 16 : index
    %c0_59 = arith.constant 0 : index
    %53 = vector.load %arg9[%c1_57, %c16_58, %c0_59] : memref<18x48x128xbf16, #tpu.memory_space<vmem>>, vector<8x16x128xbf16>
    %54 = vector.shape_cast %53 : vector<8x16x128xbf16> to vector<128x128xbf16>
    %c0_60 = arith.constant 0 : index
    %c4 = arith.constant 4 : index
    %c0_61 = arith.constant 0 : index
    %c0_62 = arith.constant 0 : index
    %55 = vector.load %arg4[%c0_60, %c4, %c0_61, %c0_62] : memref<2x9x128x128xbf16, #tpu.memory_space<vmem>>, vector<1x1x128x128xbf16>
    %56 = vector.shape_cast %55 : vector<1x1x128x128xbf16> to vector<128x128xbf16>
    %cst_63 = arith.constant dense<0.000000e+00> : vector<128x128xf32>
    %57 = tpu.matmul %54, %56, %cst_63 {dimension_numbers = #tpu.dot_dimension_numbers<[1], [0], [0], [1], [0, 0, 1, 1], [], []>} : vector<128x128xbf16>, vector<128x128xbf16>, vector<128x128xf32> -> vector<128x128xf32>
    %58 = arith.addf %52, %57 : vector<128x128xf32>
    %c1_64 = arith.constant 1 : index
    %c17_65 = arith.constant 17 : index
    %c0_66 = arith.constant 0 : index
    %59 = vector.load %arg9[%c1_64, %c17_65, %c0_66] : memref<18x48x128xbf16, #tpu.memory_space<vmem>>, vector<8x16x128xbf16>
    %60 = vector.shape_cast %59 : vector<8x16x128xbf16> to vector<128x128xbf16>
    %c0_67 = arith.constant 0 : index
    %c5 = arith.constant 5 : index
    %c0_68 = arith.constant 0 : index
    %c0_69 = arith.constant 0 : index
    %61 = vector.load %arg4[%c0_67, %c5, %c0_68, %c0_69] : memref<2x9x128x128xbf16, #tpu.memory_space<vmem>>, vector<1x1x128x128xbf16>
    %62 = vector.shape_cast %61 : vector<1x1x128x128xbf16> to vector<128x128xbf16>
    %cst_70 = arith.constant dense<0.000000e+00> : vector<128x128xf32>
    %63 = tpu.matmul %60, %62, %cst_70 {dimension_numbers = #tpu.dot_dimension_numbers<[1], [0], [0], [1], [0, 0, 1, 1], [], []>} : vector<128x128xbf16>, vector<128x128xbf16>, vector<128x128xf32> -> vector<128x128xf32>
    %64 = arith.addf %58, %63 : vector<128x128xf32>
    %c2_71 = arith.constant 2 : index
    %c15_72 = arith.constant 15 : index
    %c0_73 = arith.constant 0 : index
    %65 = vector.load %arg9[%c2_71, %c15_72, %c0_73] : memref<18x48x128xbf16, #tpu.memory_space<vmem>>, vector<8x16x128xbf16>
    %66 = vector.shape_cast %65 : vector<8x16x128xbf16> to vector<128x128xbf16>
    %c0_74 = arith.constant 0 : index
    %c6 = arith.constant 6 : index
    %c0_75 = arith.constant 0 : index
    %c0_76 = arith.constant 0 : index
    %67 = vector.load %arg4[%c0_74, %c6, %c0_75, %c0_76] : memref<2x9x128x128xbf16, #tpu.memory_space<vmem>>, vector<1x1x128x128xbf16>
    %68 = vector.shape_cast %67 : vector<1x1x128x128xbf16> to vector<128x128xbf16>
    %cst_77 = arith.constant dense<0.000000e+00> : vector<128x128xf32>
    %69 = tpu.matmul %66, %68, %cst_77 {dimension_numbers = #tpu.dot_dimension_numbers<[1], [0], [0], [1], [0, 0, 1, 1], [], []>} : vector<128x128xbf16>, vector<128x128xbf16>, vector<128x128xf32> -> vector<128x128xf32>
    %70 = arith.addf %64, %69 : vector<128x128xf32>
    %c2_78 = arith.constant 2 : index
    %c16_79 = arith.constant 16 : index
    %c0_80 = arith.constant 0 : index
    %71 = vector.load %arg9[%c2_78, %c16_79, %c0_80] : memref<18x48x128xbf16, #tpu.memory_space<vmem>>, vector<8x16x128xbf16>
    %72 = vector.shape_cast %71 : vector<8x16x128xbf16> to vector<128x128xbf16>
    %c0_81 = arith.constant 0 : index
    %c7 = arith.constant 7 : index
    %c0_82 = arith.constant 0 : index
    %c0_83 = arith.constant 0 : index
    %73 = vector.load %arg4[%c0_81, %c7, %c0_82, %c0_83] : memref<2x9x128x128xbf16, #tpu.memory_space<vmem>>, vector<1x1x128x128xbf16>
    %74 = vector.shape_cast %73 : vector<1x1x128x128xbf16> to vector<128x128xbf16>
    %cst_84 = arith.constant dense<0.000000e+00> : vector<128x128xf32>
    %75 = tpu.matmul %72, %74, %cst_84 {dimension_numbers = #tpu.dot_dimension_numbers<[1], [0], [0], [1], [0, 0, 1, 1], [], []>} : vector<128x128xbf16>, vector<128x128xbf16>, vector<128x128xf32> -> vector<128x128xf32>
    %76 = arith.addf %70, %75 : vector<128x128xf32>
    %c2_85 = arith.constant 2 : index
    %c17_86 = arith.constant 17 : index
    %c0_87 = arith.constant 0 : index
    %77 = vector.load %arg9[%c2_85, %c17_86, %c0_87] : memref<18x48x128xbf16, #tpu.memory_space<vmem>>, vector<8x16x128xbf16>
    %78 = vector.shape_cast %77 : vector<8x16x128xbf16> to vector<128x128xbf16>
    %c0_88 = arith.constant 0 : index
    %c8 = arith.constant 8 : index
    %c0_89 = arith.constant 0 : index
    %c0_90 = arith.constant 0 : index
    %79 = vector.load %arg4[%c0_88, %c8, %c0_89, %c0_90] : memref<2x9x128x128xbf16, #tpu.memory_space<vmem>>, vector<1x1x128x128xbf16>
    %80 = vector.shape_cast %79 : vector<1x1x128x128xbf16> to vector<128x128xbf16>
    %cst_91 = arith.constant dense<0.000000e+00> : vector<128x128xf32>
    %81 = tpu.matmul %78, %80, %cst_91 {dimension_numbers = #tpu.dot_dimension_numbers<[1], [0], [0], [1], [0, 0, 1, 1], [], []>} : vector<128x128xbf16>, vector<128x128xbf16>, vector<128x128xf32> -> vector<128x128xf32>
    %82 = arith.addf %76, %81 : vector<128x128xf32>
    %83 = vector.broadcast %29 : vector<1x128xf32> to vector<128x128xf32>
    %84 = arith.addf %82, %83 : vector<128x128xf32>
    %cst_92 = arith.constant 0.000000e+00 : f32
    %85 = vector.broadcast %cst_92 : f32 to vector<128x128xf32>
    %86 = arith.maximumf %84, %85 : vector<128x128xf32>
    %87 = vector.shape_cast %86 : vector<128x128xf32> to vector<8x16x128xf32>
    %88 = arith.truncf %87 : vector<8x16x128xf32> to vector<8x16x128xbf16>
    %c1_93 = arith.constant 1 : index
    %c16_94 = arith.constant 16 : index
    %c0_95 = arith.constant 0 : index
    %89 = vector.load %arg10[%c1_93, %c16_94, %c0_95] : memref<18x48x128xbf16, #tpu.memory_space<vmem>>, vector<8x16x128xbf16>
    tpu.vector_store %arg10[%c1_93, %c16_94, %c0_95], %88 {strides = array<i32>} : memref<18x48x128xbf16, #tpu.memory_space<vmem>>, vector<8x16x128xbf16>,
    %c8_96 = arith.constant 8 : index
    %c15_97 = arith.constant 15 : index
    %c0_98 = arith.constant 0 : index
    %90 = vector.load %arg9[%c8_96, %c15_97, %c0_98] : memref<18x48x128xbf16, #tpu.memory_space<vmem>>, vector<8x16x128xbf16>
    %91 = vector.shape_cast %90 : vector<8x16x128xbf16> to vector<128x128xbf16>
    %c0_99 = arith.constant 0 : index
    %c0_100 = arith.constant 0 : index
    %c0_101 = arith.constant 0 : index
    %c0_102 = arith.constant 0 : index
    %92 = vector.load %arg4[%c0_99, %c0_100, %c0_101, %c0_102] : memref<2x9x128x128xbf16, #tpu.memory_space<vmem>>, vector<1x1x128x128xbf16>
    %93 = vector.shape_cast %92 : vector<1x1x128x128xbf16> to vector<128x128xbf16>
    %cst_103 = arith.constant dense<0.000000e+00> : vector<128x128xf32>
    %94 = tpu.matmul %91, %93, %cst_103 {dimension_numbers = #tpu.dot_dimension_numbers<[1], [0], [0], [1], [0, 0, 1, 1], [], []>} : vector<128x128xbf16>, vector<128x128xbf16>, vector<128x128xf32> -> vector<128x128xf32>
    %c8_104 = arith.constant 8 : index
    %c16_105 = arith.constant 16 : index
    %c0_106 = arith.constant 0 : index
    %95 = vector.load %arg9[%c8_104, %c16_105, %c0_106] : memref<18x48x128xbf16, #tpu.memory_space<vmem>>, vector<8x16x128xbf16>
    %96 = vector.shape_cast %95 : vector<8x16x128xbf16> to vector<128x128xbf16>
    %c0_107 = arith.constant 0 : index
    %c1_108 = arith.constant 1 : index
    %c0_109 = arith.constant 0 : index
    %c0_110 = arith.constant 0 : index
    %97 = vector.load %arg4[%c0_107, %c1_108, %c0_109, %c0_110] : memref<2x9x128x128xbf16, #tpu.memory_space<vmem>>, vector<1x1x128x128xbf16>
    %98 = vector.shape_cast %97 : vector<1x1x128x128xbf16> to vector<128x128xbf16>
    %cst_111 = arith.constant dense<0.000000e+00> : vector<128x128xf32>
    %99 = tpu.matmul %96, %98, %cst_111 {dimension_numbers = #tpu.dot_dimension_numbers<[1], [0], [0], [1], [0, 0, 1, 1], [], []>} : vector<128x128xbf16>, vector<128x128xbf16>, vector<128x128xf32> -> vector<128x128xf32>
    %100 = arith.addf %94, %99 : vector<128x128xf32>
    %c8_112 = arith.constant 8 : index
    %c17_113 = arith.constant 17 : index
    %c0_114 = arith.constant 0 : index
    %101 = vector.load %arg9[%c8_112, %c17_113, %c0_114] : memref<18x48x128xbf16, #tpu.memory_space<vmem>>, vector<8x16x128xbf16>
    %102 = vector.shape_cast %101 : vector<8x16x128xbf16> to vector<128x128xbf16>
    %c0_115 = arith.constant 0 : index
    %c2_116 = arith.constant 2 : index
    %c0_117 = arith.constant 0 : index
    %c0_118 = arith.constant 0 : index
    %103 = vector.load %arg4[%c0_115, %c2_116, %c0_117, %c0_118] : memref<2x9x128x128xbf16, #tpu.memory_space<vmem>>, vector<1x1x128x128xbf16>
    %104 = vector.shape_cast %103 : vector<1x1x128x128xbf16> to vector<128x128xbf16>
    %cst_119 = arith.constant dense<0.000000e+00> : vector<128x128xf32>
    %105 = tpu.matmul %102, %104, %cst_119 {dimension_numbers = #tpu.dot_dimension_numbers<[1], [0], [0], [1], [0, 0, 1, 1], [], []>} : vector<128x128xbf16>, vector<128x128xbf16>, vector<128x128xf32> -> vector<128x128xf32>
    %106 = arith.addf %100, %105 : vector<128x128xf32>
    %c9_120 = arith.constant 9 : index
    %c15_121 = arith.constant 15 : index
    %c0_122 = arith.constant 0 : index
    %107 = vector.load %arg9[%c9_120, %c15_121, %c0_122] : memref<18x48x128xbf16, #tpu.memory_space<vmem>>, vector<8x16x128xbf16>
    %108 = vector.shape_cast %107 : vector<8x16x128xbf16> to vector<128x128xbf16>
    %c0_123 = arith.constant 0 : index
    %c3_124 = arith.constant 3 : index
    %c0_125 = arith.constant 0 : index
    %c0_126 = arith.constant 0 : index
    %109 = vector.load %arg4[%c0_123, %c3_124, %c0_125, %c0_126] : memref<2x9x128x128xbf16, #tpu.memory_space<vmem>>, vector<1x1x128x128xbf16>
    %110 = vector.shape_cast %109 : vector<1x1x128x128xbf16> to vector<128x128xbf16>
    %cst_127 = arith.constant dense<0.000000e+00> : vector<128x128xf32>
    %111 = tpu.matmul %108, %110, %cst_127 {dimension_numbers = #tpu.dot_dimension_numbers<[1], [0], [0], [1], [0, 0, 1, 1], [], []>} : vector<128x128xbf16>, vector<128x128xbf16>, vector<128x128xf32> -> vector<128x128xf32>
    %112 = arith.addf %106, %111 : vector<128x128xf32>
    %c9_128 = arith.constant 9 : index
    %c16_129 = arith.constant 16 : index
    %c0_130 = arith.constant 0 : index
    %113 = vector.load %arg9[%c9_128, %c16_129, %c0_130] : memref<18x48x128xbf16, #tpu.memory_space<vmem>>, vector<8x16x128xbf16>
    %114 = vector.shape_cast %113 : vector<8x16x128xbf16> to vector<128x128xbf16>
    %c0_131 = arith.constant 0 : index
    %c4_132 = arith.constant 4 : index
    %c0_133 = arith.constant 0 : index
    %c0_134 = arith.constant 0 : index
    %115 = vector.load %arg4[%c0_131, %c4_132, %c0_133, %c0_134] : memref<2x9x128x128xbf16, #tpu.memory_space<vmem>>, vector<1x1x128x128xbf16>
    %116 = vector.shape_cast %115 : vector<1x1x128x128xbf16> to vector<128x128xbf16>
    %cst_135 = arith.constant dense<0.000000e+00> : vector<128x128xf32>
    %117 = tpu.matmul %114, %116, %cst_135 {dimension_numbers = #tpu.dot_dimension_numbers<[1], [0], [0], [1], [0, 0, 1, 1], [], []>} : vector<128x128xbf16>, vector<128x128xbf16>, vector<128x128xf32> -> vector<128x128xf32>
    %118 = arith.addf %112, %117 : vector<128x128xf32>
    %c9_136 = arith.constant 9 : index
    %c17_137 = arith.constant 17 : index
    %c0_138 = arith.constant 0 : index
    %119 = vector.load %arg9[%c9_136, %c17_137, %c0_138] : memref<18x48x128xbf16, #tpu.memory_space<vmem>>, vector<8x16x128xbf16>
    %120 = vector.shape_cast %119 : vector<8x16x128xbf16> to vector<128x128xbf16>
    %c0_139 = arith.constant 0 : index
    %c5_140 = arith.constant 5 : index
    %c0_141 = arith.constant 0 : index
    %c0_142 = arith.constant 0 : index
    %121 = vector.load %arg4[%c0_139, %c5_140, %c0_141, %c0_142] : memref<2x9x128x128xbf16, #tpu.memory_space<vmem>>, vector<1x1x128x128xbf16>
    %122 = vector.shape_cast %121 : vector<1x1x128x128xbf16> to vector<128x128xbf16>
    %cst_143 = arith.constant dense<0.000000e+00> : vector<128x128xf32>
    %123 = tpu.matmul %120, %122, %cst_143 {dimension_numbers = #tpu.dot_dimension_numbers<[1], [0], [0], [1], [0, 0, 1, 1], [], []>} : vector<128x128xbf16>, vector<128x128xbf16>, vector<128x128xf32> -> vector<128x128xf32>
    %124 = arith.addf %118, %123 : vector<128x128xf32>
    %c10 = arith.constant 10 : index
    %c15_144 = arith.constant 15 : index
    %c0_145 = arith.constant 0 : index
    %125 = vector.load %arg9[%c10, %c15_144, %c0_145] : memref<18x48x128xbf16, #tpu.memory_space<vmem>>, vector<8x16x128xbf16>
    %126 = vector.shape_cast %125 : vector<8x16x128xbf16> to vector<128x128xbf16>
    %c0_146 = arith.constant 0 : index
    %c6_147 = arith.constant 6 : index
    %c0_148 = arith.constant 0 : index
    %c0_149 = arith.constant 0 : index
    %127 = vector.load %arg4[%c0_146, %c6_147, %c0_148, %c0_149] : memref<2x9x128x128xbf16, #tpu.memory_space<vmem>>, vector<1x1x128x128xbf16>
    %128 = vector.shape_cast %127 : vector<1x1x128x128xbf16> to vector<128x128xbf16>
    %cst_150 = arith.constant dense<0.000000e+00> : vector<128x128xf32>
    %129 = tpu.matmul %126, %128, %cst_150 {dimension_numbers = #tpu.dot_dimension_numbers<[1], [0], [0], [1], [0, 0, 1, 1], [], []>} : vector<128x128xbf16>, vector<128x128xbf16>, vector<128x128xf32> -> vector<128x128xf32>
    %130 = arith.addf %124, %129 : vector<128x128xf32>
    %c10_151 = arith.constant 10 : index
    %c16_152 = arith.constant 16 : index
    %c0_153 = arith.constant 0 : index
    %131 = vector.load %arg9[%c10_151, %c16_152, %c0_153] : memref<18x48x128xbf16, #tpu.memory_space<vmem>>, vector<8x16x128xbf16>
    %132 = vector.shape_cast %131 : vector<8x16x128xbf16> to vector<128x128xbf16>
    %c0_154 = arith.constant 0 : index
    %c7_155 = arith.constant 7 : index
    %c0_156 = arith.constant 0 : index
    %c0_157 = arith.constant 0 : index
    %133 = vector.load %arg4[%c0_154, %c7_155, %c0_156, %c0_157] : memref<2x9x128x128xbf16, #tpu.memory_space<vmem>>, vector<1x1x128x128xbf16>
    %134 = vector.shape_cast %133 : vector<1x1x128x128xbf16> to vector<128x128xbf16>
    %cst_158 = arith.constant dense<0.000000e+00> : vector<128x128xf32>
    %135 = tpu.matmul %132, %134, %cst_158 {dimension_numbers = #tpu.dot_dimension_numbers<[1], [0], [0], [1], [0, 0, 1, 1], [], []>} : vector<128x128xbf16>, vector<128x128xbf16>, vector<128x128xf32> -> vector<128x128xf32>
    %136 = arith.addf %130, %135 : vector<128x128xf32>
    %c10_159 = arith.constant 10 : index
    %c17_160 = arith.constant 17 : index
    %c0_161 = arith.constant 0 : index
    %137 = vector.load %arg9[%c10_159, %c17_160, %c0_161] : memref<18x48x128xbf16, #tpu.memory_space<vmem>>, vector<8x16x128xbf16>
    %138 = vector.shape_cast %137 : vector<8x16x128xbf16> to vector<128x128xbf16>
    %c0_162 = arith.constant 0 : index
    %c8_163 = arith.constant 8 : index
    %c0_164 = arith.constant 0 : index
    %c0_165 = arith.constant 0 : index
    %139 = vector.load %arg4[%c0_162, %c8_163, %c0_164, %c0_165] : memref<2x9x128x128xbf16, #tpu.memory_space<vmem>>, vector<1x1x128x128xbf16>
    %140 = vector.shape_cast %139 : vector<1x1x128x128xbf16> to vector<128x128xbf16>
    %cst_166 = arith.constant dense<0.000000e+00> : vector<128x128xf32>
    %141 = tpu.matmul %138, %140, %cst_166 {dimension_numbers = #tpu.dot_dimension_numbers<[1], [0], [0], [1], [0, 0, 1, 1], [], []>} : vector<128x128xbf16>, vector<128x128xbf16>, vector<128x128xf32> -> vector<128x128xf32>
    %142 = arith.addf %136, %141 : vector<128x128xf32>
    %143 = vector.broadcast %29 : vector<1x128xf32> to vector<128x128xf32>
    %144 = arith.addf %142, %143 : vector<128x128xf32>
    %cst_167 = arith.constant 0.000000e+00 : f32
    %145 = vector.broadcast %cst_167 : f32 to vector<128x128xf32>
    %146 = arith.maximumf %144, %145 : vector<128x128xf32>
    %147 = vector.shape_cast %146 : vector<128x128xf32> to vector<8x16x128xf32>
    %148 = arith.truncf %147 : vector<8x16x128xf32> to vector<8x16x128xbf16>
    %c9_168 = arith.constant 9 : index
    %c16_169 = arith.constant 16 : index
    %c0_170 = arith.constant 0 : index
    %149 = vector.load %arg10[%c9_168, %c16_169, %c0_170] : memref<18x48x128xbf16, #tpu.memory_space<vmem>>, vector<8x16x128xbf16>
    tpu.vector_store %arg10[%c9_168, %c16_169, %c0_170], %148 {strides = array<i32>} : memref<18x48x128xbf16, #tpu.memory_space<vmem>>, vector<8x16x128xbf16>,
    %c1_171 = arith.constant 1 : index
    %c0_172 = arith.constant 0 : index
    %c0_173 = arith.constant 0 : index
    %150 = vector.load %arg5[%c1_171, %c0_172, %c0_173] : memref<2x1x128xf32, #tpu.memory_space<vmem>>, vector<1x1x128xf32>
    %151 = vector.shape_cast %150 : vector<1x1x128xf32> to vector<1x128xf32>
    %c0_174 = arith.constant 0 : index
    %c15_175 = arith.constant 15 : index
    %c0_176 = arith.constant 0 : index
    %152 = vector.load %arg10[%c0_174, %c15_175, %c0_176] : memref<18x48x128xbf16, #tpu.memory_space<vmem>>, vector<8x16x128xbf16>
    %153 = vector.shape_cast %152 : vector<8x16x128xbf16> to vector<128x128xbf16>
    %c1_177 = arith.constant 1 : index
    %c0_178 = arith.constant 0 : index
    %c0_179 = arith.constant 0 : index
    %c0_180 = arith.constant 0 : index
    %154 = vector.load %arg4[%c1_177, %c0_178, %c0_179, %c0_180] : memref<2x9x128x128xbf16, #tpu.memory_space<vmem>>, vector<1x1x128x128xbf16>
    %155 = vector.shape_cast %154 : vector<1x1x128x128xbf16> to vector<128x128xbf16>
    %cst_181 = arith.constant dense<0.000000e+00> : vector<128x128xf32>
    %156 = tpu.matmul %153, %155, %cst_181 {dimension_numbers = #tpu.dot_dimension_numbers<[1], [0], [0], [1], [0, 0, 1, 1], [], []>} : vector<128x128xbf16>, vector<128x128xbf16>, vector<128x128xf32> -> vector<128x128xf32>
    %c0_182 = arith.constant 0 : index
    %c16_183 = arith.constant 16 : index
    %c0_184 = arith.constant 0 : index
    %157 = vector.load %arg10[%c0_182, %c16_183, %c0_184] : memref<18x48x128xbf16, #tpu.memory_space<vmem>>, vector<8x16x128xbf16>
    %158 = vector.shape_cast %157 : vector<8x16x128xbf16> to vector<128x128xbf16>
    %c1_185 = arith.constant 1 : index
    %c1_186 = arith.constant 1 : index
    %c0_187 = arith.constant 0 : index
    %c0_188 = arith.constant 0 : index
    %159 = vector.load %arg4[%c1_185, %c1_186, %c0_187, %c0_188] : memref<2x9x128x128xbf16, #tpu.memory_space<vmem>>, vector<1x1x128x128xbf16>
    %160 = vector.shape_cast %159 : vector<1x1x128x128xbf16> to vector<128x128xbf16>
    %cst_189 = arith.constant dense<0.000000e+00> : vector<128x128xf32>
    %161 = tpu.matmul %158, %160, %cst_189 {dimension_numbers = #tpu.dot_dimension_numbers<[1], [0], [0], [1], [0, 0, 1, 1], [], []>} : vector<128x128xbf16>, vector<128x128xbf16>, vector<128x128xf32> -> vector<128x128xf32>
    %162 = arith.addf %156, %161 : vector<128x128xf32>
    %c0_190 = arith.constant 0 : index
    %c17_191 = arith.constant 17 : index
    %c0_192 = arith.constant 0 : index
    %163 = vector.load %arg10[%c0_190, %c17_191, %c0_192] : memref<18x48x128xbf16, #tpu.memory_space<vmem>>, vector<8x16x128xbf16>
    %164 = vector.shape_cast %163 : vector<8x16x128xbf16> to vector<128x128xbf16>
    %c1_193 = arith.constant 1 : index
    %c2_194 = arith.constant 2 : index
    %c0_195 = arith.constant 0 : index
    %c0_196 = arith.constant 0 : index
    %165 = vector.load %arg4[%c1_193, %c2_194, %c0_195, %c0_196] : memref<2x9x128x128xbf16, #tpu.memory_space<vmem>>, vector<1x1x128x128xbf16>
    %166 = vector.shape_cast %165 : vector<1x1x128x128xbf16> to vector<128x128xbf16>
    %cst_197 = arith.constant dense<0.000000e+00> : vector<128x128xf32>
    %167 = tpu.matmul %164, %166, %cst_197 {dimension_numbers = #tpu.dot_dimension_numbers<[1], [0], [0], [1], [0, 0, 1, 1], [], []>} : vector<128x128xbf16>, vector<128x128xbf16>, vector<128x128xf32> -> vector<128x128xf32>
    %168 = arith.addf %162, %167 : vector<128x128xf32>
    %c1_198 = arith.constant 1 : index
    %c15_199 = arith.constant 15 : index
    %c0_200 = arith.constant 0 : index
    %169 = vector.load %arg10[%c1_198, %c15_199, %c0_200] : memref<18x48x128xbf16, #tpu.memory_space<vmem>>, vector<8x16x128xbf16>
    %170 = vector.shape_cast %169 : vector<8x16x128xbf16> to vector<128x128xbf16>
    %c1_201 = arith.constant 1 : index
    %c3_202 = arith.constant 3 : index
    %c0_203 = arith.constant 0 : index
    %c0_204 = arith.constant 0 : index
    %171 = vector.load %arg4[%c1_201, %c3_202, %c0_203, %c0_204] : memref<2x9x128x128xbf16, #tpu.memory_space<vmem>>, vector<1x1x128x128xbf16>
    %172 = vector.shape_cast %171 : vector<1x1x128x128xbf16> to vector<128x128xbf16>
    %cst_205 = arith.constant dense<0.000000e+00> : vector<128x128xf32>
    %173 = tpu.matmul %170, %172, %cst_205 {dimension_numbers = #tpu.dot_dimension_numbers<[1], [0], [0], [1], [0, 0, 1, 1], [], []>} : vector<128x128xbf16>, vector<128x128xbf16>, vector<128x128xf32> -> vector<128x128xf32>
    %174 = arith.addf %168, %173 : vector<128x128xf32>
    %c1_206 = arith.constant 1 : index
    %c16_207 = arith.constant 16 : index
    %c0_208 = arith.constant 0 : index
    %175 = vector.load %arg10[%c1_206, %c16_207, %c0_208] : memref<18x48x128xbf16, #tpu.memory_space<vmem>>, vector<8x16x128xbf16>
    %176 = vector.shape_cast %175 : vector<8x16x128xbf16> to vector<128x128xbf16>
    %c1_209 = arith.constant 1 : index
    %c4_210 = arith.constant 4 : index
    %c0_211 = arith.constant 0 : index
    %c0_212 = arith.constant 0 : index
    %177 = vector.load %arg4[%c1_209, %c4_210, %c0_211, %c0_212] : memref<2x9x128x128xbf16, #tpu.memory_space<vmem>>, vector<1x1x128x128xbf16>
    %178 = vector.shape_cast %177 : vector<1x1x128x128xbf16> to vector<128x128xbf16>
    %cst_213 = arith.constant dense<0.000000e+00> : vector<128x128xf32>
    %179 = tpu.matmul %176, %178, %cst_213 {dimension_numbers = #tpu.dot_dimension_numbers<[1], [0], [0], [1], [0, 0, 1, 1], [], []>} : vector<128x128xbf16>, vector<128x128xbf16>, vector<128x128xf32> -> vector<128x128xf32>
    %180 = arith.addf %174, %179 : vector<128x128xf32>
    %c1_214 = arith.constant 1 : index
    %c17_215 = arith.constant 17 : index
    %c0_216 = arith.constant 0 : index
    %181 = vector.load %arg10[%c1_214, %c17_215, %c0_216] : memref<18x48x128xbf16, #tpu.memory_space<vmem>>, vector<8x16x128xbf16>
    %182 = vector.shape_cast %181 : vector<8x16x128xbf16> to vector<128x128xbf16>
    %c1_217 = arith.constant 1 : index
    %c5_218 = arith.constant 5 : index
    %c0_219 = arith.constant 0 : index
    %c0_220 = arith.constant 0 : index
    %183 = vector.load %arg4[%c1_217, %c5_218, %c0_219, %c0_220] : memref<2x9x128x128xbf16, #tpu.memory_space<vmem>>, vector<1x1x128x128xbf16>
    %184 = vector.shape_cast %183 : vector<1x1x128x128xbf16> to vector<128x128xbf16>
    %cst_221 = arith.constant dense<0.000000e+00> : vector<128x128xf32>
    %185 = tpu.matmul %182, %184, %cst_221 {dimension_numbers = #tpu.dot_dimension_numbers<[1], [0], [0], [1], [0, 0, 1, 1], [], []>} : vector<128x128xbf16>, vector<128x128xbf16>, vector<128x128xf32> -> vector<128x128xf32>
    %186 = arith.addf %180, %185 : vector<128x128xf32>
    %c2_222 = arith.constant 2 : index
    %c15_223 = arith.constant 15 : index
    %c0_224 = arith.constant 0 : index
    %187 = vector.load %arg10[%c2_222, %c15_223, %c0_224] : memref<18x48x128xbf16, #tpu.memory_space<vmem>>, vector<8x16x128xbf16>
    %188 = vector.shape_cast %187 : vector<8x16x128xbf16> to vector<128x128xbf16>
    %c1_225 = arith.constant 1 : index
    %c6_226 = arith.constant 6 : index
    %c0_227 = arith.constant 0 : index
    %c0_228 = arith.constant 0 : index
    %189 = vector.load %arg4[%c1_225, %c6_226, %c0_227, %c0_228] : memref<2x9x128x128xbf16, #tpu.memory_space<vmem>>, vector<1x1x128x128xbf16>
    %190 = vector.shape_cast %189 : vector<1x1x128x128xbf16> to vector<128x128xbf16>
    %cst_229 = arith.constant dense<0.000000e+00> : vector<128x128xf32>
    %191 = tpu.matmul %188, %190, %cst_229 {dimension_numbers = #tpu.dot_dimension_numbers<[1], [0], [0], [1], [0, 0, 1, 1], [], []>} : vector<128x128xbf16>, vector<128x128xbf16>, vector<128x128xf32> -> vector<128x128xf32>
    %192 = arith.addf %186, %191 : vector<128x128xf32>
    %c2_230 = arith.constant 2 : index
    %c16_231 = arith.constant 16 : index
    %c0_232 = arith.constant 0 : index
    %193 = vector.load %arg10[%c2_230, %c16_231, %c0_232] : memref<18x48x128xbf16, #tpu.memory_space<vmem>>, vector<8x16x128xbf16>
    %194 = vector.shape_cast %193 : vector<8x16x128xbf16> to vector<128x128xbf16>
    %c1_233 = arith.constant 1 : index
    %c7_234 = arith.constant 7 : index
    %c0_235 = arith.constant 0 : index
    %c0_236 = arith.constant 0 : index
    %195 = vector.load %arg4[%c1_233, %c7_234, %c0_235, %c0_236] : memref<2x9x128x128xbf16, #tpu.memory_space<vmem>>, vector<1x1x128x128xbf16>
    %196 = vector.shape_cast %195 : vector<1x1x128x128xbf16> to vector<128x128xbf16>
    %cst_237 = arith.constant dense<0.000000e+00> : vector<128x128xf32>
    %197 = tpu.matmul %194, %196, %cst_237 {dimension_numbers = #tpu.dot_dimension_numbers<[1], [0], [0], [1], [0, 0, 1, 1], [], []>} : vector<128x128xbf16>, vector<128x128xbf16>, vector<128x128xf32> -> vector<128x128xf32>
    %198 = arith.addf %192, %197 : vector<128x128xf32>
    %c2_238 = arith.constant 2 : index
    %c17_239 = arith.constant 17 : index
    %c0_240 = arith.constant 0 : index
    %199 = vector.load %arg10[%c2_238, %c17_239, %c0_240] : memref<18x48x128xbf16, #tpu.memory_space<vmem>>, vector<8x16x128xbf16>
    %200 = vector.shape_cast %199 : vector<8x16x128xbf16> to vector<128x128xbf16>
    %c1_241 = arith.constant 1 : index
    %c8_242 = arith.constant 8 : index
    %c0_243 = arith.constant 0 : index
    %c0_244 = arith.constant 0 : index
    %201 = vector.load %arg4[%c1_241, %c8_242, %c0_243, %c0_244] : memref<2x9x128x128xbf16, #tpu.memory_space<vmem>>, vector<1x1x128x128xbf16>
    %202 = vector.shape_cast %201 : vector<1x1x128x128xbf16> to vector<128x128xbf16>
    %cst_245 = arith.constant dense<0.000000e+00> : vector<128x128xf32>
    %203 = tpu.matmul %200, %202, %cst_245 {dimension_numbers = #tpu.dot_dimension_numbers<[1], [0], [0], [1], [0, 0, 1, 1], [], []>} : vector<128x128xbf16>, vector<128x128xbf16>, vector<128x128xf32> -> vector<128x128xf32>
    %204 = arith.addf %198, %203 : vector<128x128xf32>
    %205 = vector.broadcast %151 : vector<1x128xf32> to vector<128x128xf32>
    %206 = arith.addf %204, %205 : vector<128x128xf32>
    %cst_246 = arith.constant 0.000000e+00 : f32
    %207 = vector.broadcast %cst_246 : f32 to vector<128x128xf32>
    %208 = arith.maximumf %206, %207 : vector<128x128xf32>
    %209 = vector.shape_cast %208 : vector<128x128xf32> to vector<8x16x128xf32>
    %210 = arith.truncf %209 : vector<8x16x128xf32> to vector<8x16x128xbf16>
    %c1_247 = arith.constant 1 : index
    %c16_248 = arith.constant 16 : index
    %c0_249 = arith.constant 0 : index
    %211 = vector.load %arg9[%c1_247, %c16_248, %c0_249] : memref<18x48x128xbf16, #tpu.memory_space<vmem>>, vector<8x16x128xbf16>
    tpu.vector_store %arg9[%c1_247, %c16_248, %c0_249], %210 {strides = array<i32>} : memref<18x48x128xbf16, #tpu.memory_space<vmem>>, vector<8x16x128xbf16>,
    %c8_250 = arith.constant 8 : index
    %c15_251 = arith.constant 15 : index
    %c0_252 = arith.constant 0 : index
    %212 = vector.load %arg10[%c8_250, %c15_251, %c0_252] : memref<18x48x128xbf16, #tpu.memory_space<vmem>>, vector<8x16x128xbf16>
    %213 = vector.shape_cast %212 : vector<8x16x128xbf16> to vector<128x128xbf16>
    %c1_253 = arith.constant 1 : index
    %c0_254 = arith.constant 0 : index
    %c0_255 = arith.constant 0 : index
    %c0_256 = arith.constant 0 : index
    %214 = vector.load %arg4[%c1_253, %c0_254, %c0_255, %c0_256] : memref<2x9x128x128xbf16, #tpu.memory_space<vmem>>, vector<1x1x128x128xbf16>
    %215 = vector.shape_cast %214 : vector<1x1x128x128xbf16> to vector<128x128xbf16>
    %cst_257 = arith.constant dense<0.000000e+00> : vector<128x128xf32>
    %216 = tpu.matmul %213, %215, %cst_257 {dimension_numbers = #tpu.dot_dimension_numbers<[1], [0], [0], [1], [0, 0, 1, 1], [], []>} : vector<128x128xbf16>, vector<128x128xbf16>, vector<128x128xf32> -> vector<128x128xf32>
    %c8_258 = arith.constant 8 : index
    %c16_259 = arith.constant 16 : index
    %c0_260 = arith.constant 0 : index
    %217 = vector.load %arg10[%c8_258, %c16_259, %c0_260] : memref<18x48x128xbf16, #tpu.memory_space<vmem>>, vector<8x16x128xbf16>
    %218 = vector.shape_cast %217 : vector<8x16x128xbf16> to vector<128x128xbf16>
    %c1_261 = arith.constant 1 : index
    %c1_262 = arith.constant 1 : index
    %c0_263 = arith.constant 0 : index
    %c0_264 = arith.constant 0 : index
    %219 = vector.load %arg4[%c1_261, %c1_262, %c0_263, %c0_264] : memref<2x9x128x128xbf16, #tpu.memory_space<vmem>>, vector<1x1x128x128xbf16>
    %220 = vector.shape_cast %219 : vector<1x1x128x128xbf16> to vector<128x128xbf16>
    %cst_265 = arith.constant dense<0.000000e+00> : vector<128x128xf32>
    %221 = tpu.matmul %218, %220, %cst_265 {dimension_numbers = #tpu.dot_dimension_numbers<[1], [0], [0], [1], [0, 0, 1, 1], [], []>} : vector<128x128xbf16>, vector<128x128xbf16>, vector<128x128xf32> -> vector<128x128xf32>
    %222 = arith.addf %216, %221 : vector<128x128xf32>
    %c8_266 = arith.constant 8 : index
    %c17_267 = arith.constant 17 : index
    %c0_268 = arith.constant 0 : index
    %223 = vector.load %arg10[%c8_266, %c17_267, %c0_268] : memref<18x48x128xbf16, #tpu.memory_space<vmem>>, vector<8x16x128xbf16>
    %224 = vector.shape_cast %223 : vector<8x16x128xbf16> to vector<128x128xbf16>
    %c1_269 = arith.constant 1 : index
    %c2_270 = arith.constant 2 : index
    %c0_271 = arith.constant 0 : index
    %c0_272 = arith.constant 0 : index
    %225 = vector.load %arg4[%c1_269, %c2_270, %c0_271, %c0_272] : memref<2x9x128x128xbf16, #tpu.memory_space<vmem>>, vector<1x1x128x128xbf16>
    %226 = vector.shape_cast %225 : vector<1x1x128x128xbf16> to vector<128x128xbf16>
    %cst_273 = arith.constant dense<0.000000e+00> : vector<128x128xf32>
    %227 = tpu.matmul %224, %226, %cst_273 {dimension_numbers = #tpu.dot_dimension_numbers<[1], [0], [0], [1], [0, 0, 1, 1], [], []>} : vector<128x128xbf16>, vector<128x128xbf16>, vector<128x128xf32> -> vector<128x128xf32>
    %228 = arith.addf %222, %227 : vector<128x128xf32>
    %c9_274 = arith.constant 9 : index
    %c15_275 = arith.constant 15 : index
    %c0_276 = arith.constant 0 : index
    %229 = vector.load %arg10[%c9_274, %c15_275, %c0_276] : memref<18x48x128xbf16, #tpu.memory_space<vmem>>, vector<8x16x128xbf16>
    %230 = vector.shape_cast %229 : vector<8x16x128xbf16> to vector<128x128xbf16>
    %c1_277 = arith.constant 1 : index
    %c3_278 = arith.constant 3 : index
    %c0_279 = arith.constant 0 : index
    %c0_280 = arith.constant 0 : index
    %231 = vector.load %arg4[%c1_277, %c3_278, %c0_279, %c0_280] : memref<2x9x128x128xbf16, #tpu.memory_space<vmem>>, vector<1x1x128x128xbf16>
    %232 = vector.shape_cast %231 : vector<1x1x128x128xbf16> to vector<128x128xbf16>
    %cst_281 = arith.constant dense<0.000000e+00> : vector<128x128xf32>
    %233 = tpu.matmul %230, %232, %cst_281 {dimension_numbers = #tpu.dot_dimension_numbers<[1], [0], [0], [1], [0, 0, 1, 1], [], []>} : vector<128x128xbf16>, vector<128x128xbf16>, vector<128x128xf32> -> vector<128x128xf32>
    %234 = arith.addf %228, %233 : vector<128x128xf32>
    %c9_282 = arith.constant 9 : index
    %c16_283 = arith.constant 16 : index
    %c0_284 = arith.constant 0 : index
    %235 = vector.load %arg10[%c9_282, %c16_283, %c0_284] : memref<18x48x128xbf16, #tpu.memory_space<vmem>>, vector<8x16x128xbf16>
    %236 = vector.shape_cast %235 : vector<8x16x128xbf16> to vector<128x128xbf16>
    %c1_285 = arith.constant 1 : index
    %c4_286 = arith.constant 4 : index
    %c0_287 = arith.constant 0 : index
    %c0_288 = arith.constant 0 : index
    %237 = vector.load %arg4[%c1_285, %c4_286, %c0_287, %c0_288] : memref<2x9x128x128xbf16, #tpu.memory_space<vmem>>, vector<1x1x128x128xbf16>
    %238 = vector.shape_cast %237 : vector<1x1x128x128xbf16> to vector<128x128xbf16>
    %cst_289 = arith.constant dense<0.000000e+00> : vector<128x128xf32>
    %239 = tpu.matmul %236, %238, %cst_289 {dimension_numbers = #tpu.dot_dimension_numbers<[1], [0], [0], [1], [0, 0, 1, 1], [], []>} : vector<128x128xbf16>, vector<128x128xbf16>, vector<128x128xf32> -> vector<128x128xf32>
    %240 = arith.addf %234, %239 : vector<128x128xf32>
    %c9_290 = arith.constant 9 : index
    %c17_291 = arith.constant 17 : index
    %c0_292 = arith.constant 0 : index
    %241 = vector.load %arg10[%c9_290, %c17_291, %c0_292] : memref<18x48x128xbf16, #tpu.memory_space<vmem>>, vector<8x16x128xbf16>
    %242 = vector.shape_cast %241 : vector<8x16x128xbf16> to vector<128x128xbf16>
    %c1_293 = arith.constant 1 : index
    %c5_294 = arith.constant 5 : index
    %c0_295 = arith.constant 0 : index
    %c0_296 = arith.constant 0 : index
    %243 = vector.load %arg4[%c1_293, %c5_294, %c0_295, %c0_296] : memref<2x9x128x128xbf16, #tpu.memory_space<vmem>>, vector<1x1x128x128xbf16>
    %244 = vector.shape_cast %243 : vector<1x1x128x128xbf16> to vector<128x128xbf16>
    %cst_297 = arith.constant dense<0.000000e+00> : vector<128x128xf32>
    %245 = tpu.matmul %242, %244, %cst_297 {dimension_numbers = #tpu.dot_dimension_numbers<[1], [0], [0], [1], [0, 0, 1, 1], [], []>} : vector<128x128xbf16>, vector<128x128xbf16>, vector<128x128xf32> -> vector<128x128xf32>
    %246 = arith.addf %240, %245 : vector<128x128xf32>
    %c10_298 = arith.constant 10 : index
    %c15_299 = arith.constant 15 : index
    %c0_300 = arith.constant 0 : index
    %247 = vector.load %arg10[%c10_298, %c15_299, %c0_300] : memref<18x48x128xbf16, #tpu.memory_space<vmem>>, vector<8x16x128xbf16>
    %248 = vector.shape_cast %247 : vector<8x16x128xbf16> to vector<128x128xbf16>
    %c1_301 = arith.constant 1 : index
    %c6_302 = arith.constant 6 : index
    %c0_303 = arith.constant 0 : index
    %c0_304 = arith.constant 0 : index
    %249 = vector.load %arg4[%c1_301, %c6_302, %c0_303, %c0_304] : memref<2x9x128x128xbf16, #tpu.memory_space<vmem>>, vector<1x1x128x128xbf16>
    %250 = vector.shape_cast %249 : vector<1x1x128x128xbf16> to vector<128x128xbf16>
    %cst_305 = arith.constant dense<0.000000e+00> : vector<128x128xf32>
    %251 = tpu.matmul %248, %250, %cst_305 {dimension_numbers = #tpu.dot_dimension_numbers<[1], [0], [0], [1], [0, 0, 1, 1], [], []>} : vector<128x128xbf16>, vector<128x128xbf16>, vector<128x128xf32> -> vector<128x128xf32>
    %252 = arith.addf %246, %251 : vector<128x128xf32>
    %c10_306 = arith.constant 10 : index
    %c16_307 = arith.constant 16 : index
    %c0_308 = arith.constant 0 : index
    %253 = vector.load %arg10[%c10_306, %c16_307, %c0_308] : memref<18x48x128xbf16, #tpu.memory_space<vmem>>, vector<8x16x128xbf16>
    %254 = vector.shape_cast %253 : vector<8x16x128xbf16> to vector<128x128xbf16>
    %c1_309 = arith.constant 1 : index
    %c7_310 = arith.constant 7 : index
    %c0_311 = arith.constant 0 : index
    %c0_312 = arith.constant 0 : index
    %255 = vector.load %arg4[%c1_309, %c7_310, %c0_311, %c0_312] : memref<2x9x128x128xbf16, #tpu.memory_space<vmem>>, vector<1x1x128x128xbf16>
    %256 = vector.shape_cast %255 : vector<1x1x128x128xbf16> to vector<128x128xbf16>
    %cst_313 = arith.constant dense<0.000000e+00> : vector<128x128xf32>
    %257 = tpu.matmul %254, %256, %cst_313 {dimension_numbers = #tpu.dot_dimension_numbers<[1], [0], [0], [1], [0, 0, 1, 1], [], []>} : vector<128x128xbf16>, vector<128x128xbf16>, vector<128x128xf32> -> vector<128x128xf32>
    %258 = arith.addf %252, %257 : vector<128x128xf32>
    %c10_314 = arith.constant 10 : index
    %c17_315 = arith.constant 17 : index
    %c0_316 = arith.constant 0 : index
    %259 = vector.load %arg10[%c10_314, %c17_315, %c0_316] : memref<18x48x128xbf16, #tpu.memory_space<vmem>>, vector<8x16x128xbf16>
    %260 = vector.shape_cast %259 : vector<8x16x128xbf16> to vector<128x128xbf16>
    %c1_317 = arith.constant 1 : index
    %c8_318 = arith.constant 8 : index
    %c0_319 = arith.constant 0 : index
    %c0_320 = arith.constant 0 : index
    %261 = vector.load %arg4[%c1_317, %c8_318, %c0_319, %c0_320] : memref<2x9x128x128xbf16, #tpu.memory_space<vmem>>, vector<1x1x128x128xbf16>
    %262 = vector.shape_cast %261 : vector<1x1x128x128xbf16> to vector<128x128xbf16>
    %cst_321 = arith.constant dense<0.000000e+00> : vector<128x128xf32>
    %263 = tpu.matmul %260, %262, %cst_321 {dimension_numbers = #tpu.dot_dimension_numbers<[1], [0], [0], [1], [0, 0, 1, 1], [], []>} : vector<128x128xbf16>, vector<128x128xbf16>, vector<128x128xf32> -> vector<128x128xf32>
    %264 = arith.addf %258, %263 : vector<128x128xf32>
    %265 = vector.broadcast %151 : vector<1x128xf32> to vector<128x128xf32>
    %266 = arith.addf %264, %265 : vector<128x128xf32>
    %cst_322 = arith.constant 0.000000e+00 : f32
    %267 = vector.broadcast %cst_322 : f32 to vector<128x128xf32>
    %268 = arith.maximumf %266, %267 : vector<128x128xf32>
    %269 = vector.shape_cast %268 : vector<128x128xf32> to vector<8x16x128xf32>
    %270 = arith.truncf %269 : vector<8x16x128xf32> to vector<8x16x128xbf16>
    %c9_323 = arith.constant 9 : index
    %c16_324 = arith.constant 16 : index
    %c0_325 = arith.constant 0 : index
    %271 = vector.load %arg9[%c9_323, %c16_324, %c0_325] : memref<18x48x128xbf16, #tpu.memory_space<vmem>>, vector<8x16x128xbf16>
    tpu.vector_store %arg9[%c9_323, %c16_324, %c0_325], %270 {strides = array<i32>} : memref<18x48x128xbf16, #tpu.memory_space<vmem>>, vector<8x16x128xbf16>,
    %c0_326 = arith.constant 0 : index
    %c0_327 = arith.constant 0 : index
    %272 = vector.load %arg7[%c0_326, %c0_327] : memref<1x8xf32, #tpu.memory_space<vmem>>, vector<1x8xf32>
    %c0_328 = arith.constant 0 : index
    %c15_329 = arith.constant 15 : index
    %c0_330 = arith.constant 0 : index
    %273 = vector.load %arg9[%c0_328, %c15_329, %c0_330] : memref<18x48x128xbf16, #tpu.memory_space<vmem>>, vector<8x16x128xbf16>
    %274 = vector.shape_cast %273 : vector<8x16x128xbf16> to vector<128x128xbf16>
    %c0_331 = arith.constant 0 : index
    %c0_332 = arith.constant 0 : index
    %c0_333 = arith.constant 0 : index
    %275 = vector.load %arg6[%c0_331, %c0_332, %c0_333] : memref<9x128x8xbf16, #tpu.memory_space<vmem>>, vector<1x128x8xbf16>
    %276 = vector.shape_cast %275 : vector<1x128x8xbf16> to vector<128x8xbf16>
    %cst_334 = arith.constant dense<0.000000e+00> : vector<128x8xf32>
    %277 = tpu.matmul %274, %276, %cst_334 {dimension_numbers = #tpu.dot_dimension_numbers<[1], [0], [0], [1], [0, 0, 1, 1], [], []>} : vector<128x128xbf16>, vector<128x8xbf16>, vector<128x8xf32> -> vector<128x8xf32>
    %c0_335 = arith.constant 0 : index
    %c16_336 = arith.constant 16 : index
    %c0_337 = arith.constant 0 : index
    %278 = vector.load %arg9[%c0_335, %c16_336, %c0_337] : memref<18x48x128xbf16, #tpu.memory_space<vmem>>, vector<8x16x128xbf16>
    %279 = vector.shape_cast %278 : vector<8x16x128xbf16> to vector<128x128xbf16>
    %c1_338 = arith.constant 1 : index
    %c0_339 = arith.constant 0 : index
    %c0_340 = arith.constant 0 : index
    %280 = vector.load %arg6[%c1_338, %c0_339, %c0_340] : memref<9x128x8xbf16, #tpu.memory_space<vmem>>, vector<1x128x8xbf16>
    %281 = vector.shape_cast %280 : vector<1x128x8xbf16> to vector<128x8xbf16>
    %cst_341 = arith.constant dense<0.000000e+00> : vector<128x8xf32>
    %282 = tpu.matmul %279, %281, %cst_341 {dimension_numbers = #tpu.dot_dimension_numbers<[1], [0], [0], [1], [0, 0, 1, 1], [], []>} : vector<128x128xbf16>, vector<128x8xbf16>, vector<128x8xf32> -> vector<128x8xf32>
    %283 = arith.addf %277, %282 : vector<128x8xf32>
    %c0_342 = arith.constant 0 : index
    %c17_343 = arith.constant 17 : index
    %c0_344 = arith.constant 0 : index
    %284 = vector.load %arg9[%c0_342, %c17_343, %c0_344] : memref<18x48x128xbf16, #tpu.memory_space<vmem>>, vector<8x16x128xbf16>
    %285 = vector.shape_cast %284 : vector<8x16x128xbf16> to vector<128x128xbf16>
    %c2_345 = arith.constant 2 : index
    %c0_346 = arith.constant 0 : index
    %c0_347 = arith.constant 0 : index
    %286 = vector.load %arg6[%c2_345, %c0_346, %c0_347] : memref<9x128x8xbf16, #tpu.memory_space<vmem>>, vector<1x128x8xbf16>
    %287 = vector.shape_cast %286 : vector<1x128x8xbf16> to vector<128x8xbf16>
    %cst_348 = arith.constant dense<0.000000e+00> : vector<128x8xf32>
    %288 = tpu.matmul %285, %287, %cst_348 {dimension_numbers = #tpu.dot_dimension_numbers<[1], [0], [0], [1], [0, 0, 1, 1], [], []>} : vector<128x128xbf16>, vector<128x8xbf16>, vector<128x8xf32> -> vector<128x8xf32>
    %289 = arith.addf %283, %288 : vector<128x8xf32>
    %c1_349 = arith.constant 1 : index
    %c15_350 = arith.constant 15 : index
    %c0_351 = arith.constant 0 : index
    %290 = vector.load %arg9[%c1_349, %c15_350, %c0_351] : memref<18x48x128xbf16, #tpu.memory_space<vmem>>, vector<8x16x128xbf16>
    %291 = vector.shape_cast %290 : vector<8x16x128xbf16> to vector<128x128xbf16>
    %c3_352 = arith.constant 3 : index
    %c0_353 = arith.constant 0 : index
    %c0_354 = arith.constant 0 : index
    %292 = vector.load %arg6[%c3_352, %c0_353, %c0_354] : memref<9x128x8xbf16, #tpu.memory_space<vmem>>, vector<1x128x8xbf16>
    %293 = vector.shape_cast %292 : vector<1x128x8xbf16> to vector<128x8xbf16>
    %cst_355 = arith.constant dense<0.000000e+00> : vector<128x8xf32>
    %294 = tpu.matmul %291, %293, %cst_355 {dimension_numbers = #tpu.dot_dimension_numbers<[1], [0], [0], [1], [0, 0, 1, 1], [], []>} : vector<128x128xbf16>, vector<128x8xbf16>, vector<128x8xf32> -> vector<128x8xf32>
    %295 = arith.addf %289, %294 : vector<128x8xf32>
    %c1_356 = arith.constant 1 : index
    %c16_357 = arith.constant 16 : index
    %c0_358 = arith.constant 0 : index
    %296 = vector.load %arg9[%c1_356, %c16_357, %c0_358] : memref<18x48x128xbf16, #tpu.memory_space<vmem>>, vector<8x16x128xbf16>
    %297 = vector.shape_cast %296 : vector<8x16x128xbf16> to vector<128x128xbf16>
    %c4_359 = arith.constant 4 : index
    %c0_360 = arith.constant 0 : index
    %c0_361 = arith.constant 0 : index
    %298 = vector.load %arg6[%c4_359, %c0_360, %c0_361] : memref<9x128x8xbf16, #tpu.memory_space<vmem>>, vector<1x128x8xbf16>
    %299 = vector.shape_cast %298 : vector<1x128x8xbf16> to vector<128x8xbf16>
    %cst_362 = arith.constant dense<0.000000e+00> : vector<128x8xf32>
    %300 = tpu.matmul %297, %299, %cst_362 {dimension_numbers = #tpu.dot_dimension_numbers<[1], [0], [0], [1], [0, 0, 1, 1], [], []>} : vector<128x128xbf16>, vector<128x8xbf16>, vector<128x8xf32> -> vector<128x8xf32>
    %301 = arith.addf %295, %300 : vector<128x8xf32>
    %c1_363 = arith.constant 1 : index
    %c17_364 = arith.constant 17 : index
    %c0_365 = arith.constant 0 : index
    %302 = vector.load %arg9[%c1_363, %c17_364, %c0_365] : memref<18x48x128xbf16, #tpu.memory_space<vmem>>, vector<8x16x128xbf16>
    %303 = vector.shape_cast %302 : vector<8x16x128xbf16> to vector<128x128xbf16>
    %c5_366 = arith.constant 5 : index
    %c0_367 = arith.constant 0 : index
    %c0_368 = arith.constant 0 : index
    %304 = vector.load %arg6[%c5_366, %c0_367, %c0_368] : memref<9x128x8xbf16, #tpu.memory_space<vmem>>, vector<1x128x8xbf16>
    %305 = vector.shape_cast %304 : vector<1x128x8xbf16> to vector<128x8xbf16>
    %cst_369 = arith.constant dense<0.000000e+00> : vector<128x8xf32>
    %306 = tpu.matmul %303, %305, %cst_369 {dimension_numbers = #tpu.dot_dimension_numbers<[1], [0], [0], [1], [0, 0, 1, 1], [], []>} : vector<128x128xbf16>, vector<128x8xbf16>, vector<128x8xf32> -> vector<128x8xf32>
    %307 = arith.addf %301, %306 : vector<128x8xf32>
    %c2_370 = arith.constant 2 : index
    %c15_371 = arith.constant 15 : index
    %c0_372 = arith.constant 0 : index
    %308 = vector.load %arg9[%c2_370, %c15_371, %c0_372] : memref<18x48x128xbf16, #tpu.memory_space<vmem>>, vector<8x16x128xbf16>
    %309 = vector.shape_cast %308 : vector<8x16x128xbf16> to vector<128x128xbf16>
    %c6_373 = arith.constant 6 : index
    %c0_374 = arith.constant 0 : index
    %c0_375 = arith.constant 0 : index
    %310 = vector.load %arg6[%c6_373, %c0_374, %c0_375] : memref<9x128x8xbf16, #tpu.memory_space<vmem>>, vector<1x128x8xbf16>
    %311 = vector.shape_cast %310 : vector<1x128x8xbf16> to vector<128x8xbf16>
    %cst_376 = arith.constant dense<0.000000e+00> : vector<128x8xf32>
    %312 = tpu.matmul %309, %311, %cst_376 {dimension_numbers = #tpu.dot_dimension_numbers<[1], [0], [0], [1], [0, 0, 1, 1], [], []>} : vector<128x128xbf16>, vector<128x8xbf16>, vector<128x8xf32> -> vector<128x8xf32>
    %313 = arith.addf %307, %312 : vector<128x8xf32>
    %c2_377 = arith.constant 2 : index
    %c16_378 = arith.constant 16 : index
    %c0_379 = arith.constant 0 : index
    %314 = vector.load %arg9[%c2_377, %c16_378, %c0_379] : memref<18x48x128xbf16, #tpu.memory_space<vmem>>, vector<8x16x128xbf16>
    %315 = vector.shape_cast %314 : vector<8x16x128xbf16> to vector<128x128xbf16>
    %c7_380 = arith.constant 7 : index
    %c0_381 = arith.constant 0 : index
    %c0_382 = arith.constant 0 : index
    %316 = vector.load %arg6[%c7_380, %c0_381, %c0_382] : memref<9x128x8xbf16, #tpu.memory_space<vmem>>, vector<1x128x8xbf16>
    %317 = vector.shape_cast %316 : vector<1x128x8xbf16> to vector<128x8xbf16>
    %cst_383 = arith.constant dense<0.000000e+00> : vector<128x8xf32>
    %318 = tpu.matmul %315, %317, %cst_383 {dimension_numbers = #tpu.dot_dimension_numbers<[1], [0], [0], [1], [0, 0, 1, 1], [], []>} : vector<128x128xbf16>, vector<128x8xbf16>, vector<128x8xf32> -> vector<128x8xf32>
    %319 = arith.addf %313, %318 : vector<128x8xf32>
    %c2_384 = arith.constant 2 : index
    %c17_385 = arith.constant 17 : index
    %c0_386 = arith.constant 0 : index
    %320 = vector.load %arg9[%c2_384, %c17_385, %c0_386] : memref<18x48x128xbf16, #tpu.memory_space<vmem>>, vector<8x16x128xbf16>
    %321 = vector.shape_cast %320 : vector<8x16x128xbf16> to vector<128x128xbf16>
    %c8_387 = arith.constant 8 : index
    %c0_388 = arith.constant 0 : index
    %c0_389 = arith.constant 0 : index
    %322 = vector.load %arg6[%c8_387, %c0_388, %c0_389] : memref<9x128x8xbf16, #tpu.memory_space<vmem>>, vector<1x128x8xbf16>
    %323 = vector.shape_cast %322 : vector<1x128x8xbf16> to vector<128x8xbf16>
    %cst_390 = arith.constant dense<0.000000e+00> : vector<128x8xf32>
    %324 = tpu.matmul %321, %323, %cst_390 {dimension_numbers = #tpu.dot_dimension_numbers<[1], [0], [0], [1], [0, 0, 1, 1], [], []>} : vector<128x128xbf16>, vector<128x8xbf16>, vector<128x8xf32> -> vector<128x8xf32>
    %325 = arith.addf %319, %324 : vector<128x8xf32>
    %326 = vector.broadcast %272 : vector<1x8xf32> to vector<128x8xf32>
    %327 = arith.addf %325, %326 : vector<128x8xf32>
    %328 = vector.shape_cast %327 : vector<128x8xf32> to vector<8x16x8xf32>
    %c0_391 = arith.constant 0 : index
    %c0_392 = arith.constant 0 : index
    %c0_393 = arith.constant 0 : index
    %c0_394 = arith.constant 0 : index
    %329 = vector.load %arg8[%c0_391, %c0_392, %c0_393, %c0_394] : memref<1x16x16x8xf32, #tpu.memory_space<vmem>>, vector<1x8x16x8xf32>
    %330 = vector.shape_cast %329 : vector<1x8x16x8xf32> to vector<8x16x8xf32>
    %331 = vector.shape_cast %328 : vector<8x16x8xf32> to vector<1x8x16x8xf32>
    tpu.vector_store %arg8[%c0_391, %c0_392, %c0_393, %c0_394], %331 {strides = array<i32>} : memref<1x16x16x8xf32, #tpu.memory_space<vmem>>, vector<1x8x16x8xf32>,
    %c8_395 = arith.constant 8 : index
    %c15_396 = arith.constant 15 : index
    %c0_397 = arith.constant 0 : index
    %332 = vector.load %arg9[%c8_395, %c15_396, %c0_397] : memref<18x48x128xbf16, #tpu.memory_space<vmem>>, vector<8x16x128xbf16>
    %333 = vector.shape_cast %332 : vector<8x16x128xbf16> to vector<128x128xbf16>
    %c0_398 = arith.constant 0 : index
    %c0_399 = arith.constant 0 : index
    %c0_400 = arith.constant 0 : index
    %334 = vector.load %arg6[%c0_398, %c0_399, %c0_400] : memref<9x128x8xbf16, #tpu.memory_space<vmem>>, vector<1x128x8xbf16>
    %335 = vector.shape_cast %334 : vector<1x128x8xbf16> to vector<128x8xbf16>
    %cst_401 = arith.constant dense<0.000000e+00> : vector<128x8xf32>
    %336 = tpu.matmul %333, %335, %cst_401 {dimension_numbers = #tpu.dot_dimension_numbers<[1], [0], [0], [1], [0, 0, 1, 1], [], []>} : vector<128x128xbf16>, vector<128x8xbf16>, vector<128x8xf32> -> vector<128x8xf32>
    %c8_402 = arith.constant 8 : index
    %c16_403 = arith.constant 16 : index
    %c0_404 = arith.constant 0 : index
    %337 = vector.load %arg9[%c8_402, %c16_403, %c0_404] : memref<18x48x128xbf16, #tpu.memory_space<vmem>>, vector<8x16x128xbf16>
    %338 = vector.shape_cast %337 : vector<8x16x128xbf16> to vector<128x128xbf16>
    %c1_405 = arith.constant 1 : index
    %c0_406 = arith.constant 0 : index
    %c0_407 = arith.constant 0 : index
    %339 = vector.load %arg6[%c1_405, %c0_406, %c0_407] : memref<9x128x8xbf16, #tpu.memory_space<vmem>>, vector<1x128x8xbf16>
    %340 = vector.shape_cast %339 : vector<1x128x8xbf16> to vector<128x8xbf16>
    %cst_408 = arith.constant dense<0.000000e+00> : vector<128x8xf32>
    %341 = tpu.matmul %338, %340, %cst_408 {dimension_numbers = #tpu.dot_dimension_numbers<[1], [0], [0], [1], [0, 0, 1, 1], [], []>} : vector<128x128xbf16>, vector<128x8xbf16>, vector<128x8xf32> -> vector<128x8xf32>
    %342 = arith.addf %336, %341 : vector<128x8xf32>
    %c8_409 = arith.constant 8 : index
    %c17_410 = arith.constant 17 : index
    %c0_411 = arith.constant 0 : index
    %343 = vector.load %arg9[%c8_409, %c17_410, %c0_411] : memref<18x48x128xbf16, #tpu.memory_space<vmem>>, vector<8x16x128xbf16>
    %344 = vector.shape_cast %343 : vector<8x16x128xbf16> to vector<128x128xbf16>
    %c2_412 = arith.constant 2 : index
    %c0_413 = arith.constant 0 : index
    %c0_414 = arith.constant 0 : index
    %345 = vector.load %arg6[%c2_412, %c0_413, %c0_414] : memref<9x128x8xbf16, #tpu.memory_space<vmem>>, vector<1x128x8xbf16>
    %346 = vector.shape_cast %345 : vector<1x128x8xbf16> to vector<128x8xbf16>
    %cst_415 = arith.constant dense<0.000000e+00> : vector<128x8xf32>
    %347 = tpu.matmul %344, %346, %cst_415 {dimension_numbers = #tpu.dot_dimension_numbers<[1], [0], [0], [1], [0, 0, 1, 1], [], []>} : vector<128x128xbf16>, vector<128x8xbf16>, vector<128x8xf32> -> vector<128x8xf32>
    %348 = arith.addf %342, %347 : vector<128x8xf32>
    %c9_416 = arith.constant 9 : index
    %c15_417 = arith.constant 15 : index
    %c0_418 = arith.constant 0 : index
    %349 = vector.load %arg9[%c9_416, %c15_417, %c0_418] : memref<18x48x128xbf16, #tpu.memory_space<vmem>>, vector<8x16x128xbf16>
    %350 = vector.shape_cast %349 : vector<8x16x128xbf16> to vector<128x128xbf16>
    %c3_419 = arith.constant 3 : index
    %c0_420 = arith.constant 0 : index
    %c0_421 = arith.constant 0 : index
    %351 = vector.load %arg6[%c3_419, %c0_420, %c0_421] : memref<9x128x8xbf16, #tpu.memory_space<vmem>>, vector<1x128x8xbf16>
    %352 = vector.shape_cast %351 : vector<1x128x8xbf16> to vector<128x8xbf16>
    %cst_422 = arith.constant dense<0.000000e+00> : vector<128x8xf32>
    %353 = tpu.matmul %350, %352, %cst_422 {dimension_numbers = #tpu.dot_dimension_numbers<[1], [0], [0], [1], [0, 0, 1, 1], [], []>} : vector<128x128xbf16>, vector<128x8xbf16>, vector<128x8xf32> -> vector<128x8xf32>
    %354 = arith.addf %348, %353 : vector<128x8xf32>
    %c9_423 = arith.constant 9 : index
    %c16_424 = arith.constant 16 : index
    %c0_425 = arith.constant 0 : index
    %355 = vector.load %arg9[%c9_423, %c16_424, %c0_425] : memref<18x48x128xbf16, #tpu.memory_space<vmem>>, vector<8x16x128xbf16>
    %356 = vector.shape_cast %355 : vector<8x16x128xbf16> to vector<128x128xbf16>
    %c4_426 = arith.constant 4 : index
    %c0_427 = arith.constant 0 : index
    %c0_428 = arith.constant 0 : index
    %357 = vector.load %arg6[%c4_426, %c0_427, %c0_428] : memref<9x128x8xbf16, #tpu.memory_space<vmem>>, vector<1x128x8xbf16>
    %358 = vector.shape_cast %357 : vector<1x128x8xbf16> to vector<128x8xbf16>
    %cst_429 = arith.constant dense<0.000000e+00> : vector<128x8xf32>
    %359 = tpu.matmul %356, %358, %cst_429 {dimension_numbers = #tpu.dot_dimension_numbers<[1], [0], [0], [1], [0, 0, 1, 1], [], []>} : vector<128x128xbf16>, vector<128x8xbf16>, vector<128x8xf32> -> vector<128x8xf32>
    %360 = arith.addf %354, %359 : vector<128x8xf32>
    %c9_430 = arith.constant 9 : index
    %c17_431 = arith.constant 17 : index
    %c0_432 = arith.constant 0 : index
    %361 = vector.load %arg9[%c9_430, %c17_431, %c0_432] : memref<18x48x128xbf16, #tpu.memory_space<vmem>>, vector<8x16x128xbf16>
    %362 = vector.shape_cast %361 : vector<8x16x128xbf16> to vector<128x128xbf16>
    %c5_433 = arith.constant 5 : index
    %c0_434 = arith.constant 0 : index
    %c0_435 = arith.constant 0 : index
    %363 = vector.load %arg6[%c5_433, %c0_434, %c0_435] : memref<9x128x8xbf16, #tpu.memory_space<vmem>>, vector<1x128x8xbf16>
    %364 = vector.shape_cast %363 : vector<1x128x8xbf16> to vector<128x8xbf16>
    %cst_436 = arith.constant dense<0.000000e+00> : vector<128x8xf32>
    %365 = tpu.matmul %362, %364, %cst_436 {dimension_numbers = #tpu.dot_dimension_numbers<[1], [0], [0], [1], [0, 0, 1, 1], [], []>} : vector<128x128xbf16>, vector<128x8xbf16>, vector<128x8xf32> -> vector<128x8xf32>
    %366 = arith.addf %360, %365 : vector<128x8xf32>
    %c10_437 = arith.constant 10 : index
    %c15_438 = arith.constant 15 : index
    %c0_439 = arith.constant 0 : index
    %367 = vector.load %arg9[%c10_437, %c15_438, %c0_439] : memref<18x48x128xbf16, #tpu.memory_space<vmem>>, vector<8x16x128xbf16>
    %368 = vector.shape_cast %367 : vector<8x16x128xbf16> to vector<128x128xbf16>
    %c6_440 = arith.constant 6 : index
    %c0_441 = arith.constant 0 : index
    %c0_442 = arith.constant 0 : index
    %369 = vector.load %arg6[%c6_440, %c0_441, %c0_442] : memref<9x128x8xbf16, #tpu.memory_space<vmem>>, vector<1x128x8xbf16>
    %370 = vector.shape_cast %369 : vector<1x128x8xbf16> to vector<128x8xbf16>
    %cst_443 = arith.constant dense<0.000000e+00> : vector<128x8xf32>
    %371 = tpu.matmul %368, %370, %cst_443 {dimension_numbers = #tpu.dot_dimension_numbers<[1], [0], [0], [1], [0, 0, 1, 1], [], []>} : vector<128x128xbf16>, vector<128x8xbf16>, vector<128x8xf32> -> vector<128x8xf32>
    %372 = arith.addf %366, %371 : vector<128x8xf32>
    %c10_444 = arith.constant 10 : index
    %c16_445 = arith.constant 16 : index
    %c0_446 = arith.constant 0 : index
    %373 = vector.load %arg9[%c10_444, %c16_445, %c0_446] : memref<18x48x128xbf16, #tpu.memory_space<vmem>>, vector<8x16x128xbf16>
    %374 = vector.shape_cast %373 : vector<8x16x128xbf16> to vector<128x128xbf16>
    %c7_447 = arith.constant 7 : index
    %c0_448 = arith.constant 0 : index
    %c0_449 = arith.constant 0 : index
    %375 = vector.load %arg6[%c7_447, %c0_448, %c0_449] : memref<9x128x8xbf16, #tpu.memory_space<vmem>>, vector<1x128x8xbf16>
    %376 = vector.shape_cast %375 : vector<1x128x8xbf16> to vector<128x8xbf16>
    %cst_450 = arith.constant dense<0.000000e+00> : vector<128x8xf32>
    %377 = tpu.matmul %374, %376, %cst_450 {dimension_numbers = #tpu.dot_dimension_numbers<[1], [0], [0], [1], [0, 0, 1, 1], [], []>} : vector<128x128xbf16>, vector<128x8xbf16>, vector<128x8xf32> -> vector<128x8xf32>
    %378 = arith.addf %372, %377 : vector<128x8xf32>
    %c10_451 = arith.constant 10 : index
    %c17_452 = arith.constant 17 : index
    %c0_453 = arith.constant 0 : index
    %379 = vector.load %arg9[%c10_451, %c17_452, %c0_453] : memref<18x48x128xbf16, #tpu.memory_space<vmem>>, vector<8x16x128xbf16>
    %380 = vector.shape_cast %379 : vector<8x16x128xbf16> to vector<128x128xbf16>
    %c8_454 = arith.constant 8 : index
    %c0_455 = arith.constant 0 : index
    %c0_456 = arith.constant 0 : index
    %381 = vector.load %arg6[%c8_454, %c0_455, %c0_456] : memref<9x128x8xbf16, #tpu.memory_space<vmem>>, vector<1x128x8xbf16>
    %382 = vector.shape_cast %381 : vector<1x128x8xbf16> to vector<128x8xbf16>
    %cst_457 = arith.constant dense<0.000000e+00> : vector<128x8xf32>
    %383 = tpu.matmul %380, %382, %cst_457 {dimension_numbers = #tpu.dot_dimension_numbers<[1], [0], [0], [1], [0, 0, 1, 1], [], []>} : vector<128x128xbf16>, vector<128x8xbf16>, vector<128x8xf32> -> vector<128x8xf32>
    %384 = arith.addf %378, %383 : vector<128x8xf32>
    %385 = vector.broadcast %272 : vector<1x8xf32> to vector<128x8xf32>
    %386 = arith.addf %384, %385 : vector<128x8xf32>
    %387 = vector.shape_cast %386 : vector<128x8xf32> to vector<8x16x8xf32>
    %c0_458 = arith.constant 0 : index
    %c8_459 = arith.constant 8 : index
    %c0_460 = arith.constant 0 : index
    %c0_461 = arith.constant 0 : index
    %388 = vector.load %arg8[%c0_458, %c8_459, %c0_460, %c0_461] : memref<1x16x16x8xf32, #tpu.memory_space<vmem>>, vector<1x8x16x8xf32>
    %389 = vector.shape_cast %388 : vector<1x8x16x8xf32> to vector<8x16x8xf32>
    %390 = vector.shape_cast %387 : vector<8x16x8xf32> to vector<1x8x16x8xf32>
    tpu.vector_store %arg8[%c0_458, %c8_459, %c0_460, %c0_461], %390 {strides = array<i32>} : memref<1x16x16x8xf32, #tpu.memory_space<vmem>>, vector<1x8x16x8xf32>,
    return
  }
  func.func @transform_0(%arg0: i32) -> (i32, i32, i32) {
    %c0_i32 = arith.constant 0 : i32
    %c0_i32_0 = arith.constant 0 : i32
    %c0_i32_1 = arith.constant 0 : i32
    return %arg0, %c0_i32, %c0_i32_0 : i32, i32, i32
  }
  func.func @transform_1(%arg0: i32) -> (i32, i32) {
    %c0_i32 = arith.constant 0 : i32
    %c0_i32_0 = arith.constant 0 : i32
    %c0_i32_1 = arith.constant 0 : i32
    return %c0_i32, %c0_i32_0 : i32, i32
  }
  func.func @transform_2(%arg0: i32) -> (i32, i32) {
    %c0_i32 = arith.constant 0 : i32
    %c0_i32_0 = arith.constant 0 : i32
    %c0_i32_1 = arith.constant 0 : i32
    return %c0_i32, %c0_i32_0 : i32, i32
  }
  func.func @transform_3(%arg0: i32) -> (i32, i32, i32, i32) {
    %c0_i32 = arith.constant 0 : i32
    %c0_i32_0 = arith.constant 0 : i32
    %c0_i32_1 = arith.constant 0 : i32
    %c0_i32_2 = arith.constant 0 : i32
    %c0_i32_3 = arith.constant 0 : i32
    return %c0_i32, %c0_i32_0, %c0_i32_1, %c0_i32_2 : i32, i32, i32, i32
  }
  func.func @transform_4(%arg0: i32) -> (i32, i32, i32) {
    %c0_i32 = arith.constant 0 : i32
    %c0_i32_0 = arith.constant 0 : i32
    %c0_i32_1 = arith.constant 0 : i32
    %c0_i32_2 = arith.constant 0 : i32
    return %c0_i32, %c0_i32_0, %c0_i32_1 : i32, i32, i32
  }
  func.func @transform_5(%arg0: i32) -> (i32, i32, i32) {
    %c0_i32 = arith.constant 0 : i32
    %c0_i32_0 = arith.constant 0 : i32
    %c0_i32_1 = arith.constant 0 : i32
    %c0_i32_2 = arith.constant 0 : i32
    return %c0_i32, %c0_i32_0, %c0_i32_1 : i32, i32, i32
  }
  func.func @transform_6(%arg0: i32) -> (i32, i32) {
    %c0_i32 = arith.constant 0 : i32
    %c0_i32_0 = arith.constant 0 : i32
    %c0_i32_1 = arith.constant 0 : i32
    return %c0_i32, %c0_i32_0 : i32, i32
  }
  func.func @transform_7(%arg0: i32) -> (i32, i32, i32, i32) {
    %c0_i32 = arith.constant 0 : i32
    %c0_i32_0 = arith.constant 0 : i32
    %c0_i32_1 = arith.constant 0 : i32
    %c0_i32_2 = arith.constant 0 : i32
    return %arg0, %c0_i32, %c0_i32_0, %c0_i32_1 : i32, i32, i32, i32
  }
}

</mosaic_0001>

<bundles_post_ra>
// kernel: unetplusplus_forward.1
= control target key start
LH: loop header
LB: loop body
LE: loop exit
PB: predicated region body
PF: predicated region fallthrough
CT: control target
= control target key end

     0   :  { %s20142_s24 = smov 0   ;;  %s24284_s0 = inlined_call_operand.vmem [shape: bf16[2,256,16], index: 0, kind: input, shape index: {}]   ;;  %s24285_s1 = inlined_call_operand.vmem [shape: bf16[16,128], index: 1, kind: input, shape index: {}]   ;;  %s24286_s2 = inlined_call_operand.vmem [shape: f32[1,128], index: 2, kind: input, shape index: {}]   ;;  %s24287_s3 = inlined_call_operand.vmem [shape: bf16[2,9,128,128], index: 3, kind: input, shape index: {}]   ;;  %s24288_s4 = inlined_call_operand.vmem [shape: f32[2,1,128], index: 4, kind: input, shape index: {}]   ;;  %s24289_s5 = inlined_call_operand.vmem [shape: bf16[9,128,8], index: 5, kind: input, shape index: {}]   ;;  %s24290_s6 = inlined_call_operand.vmem [shape: f32[1,8], index: 6, kind: input, shape index: {}]   ;;  %s24291_s7 = inlined_call_operand.vmem [shape: f32[2,16,16,8], index: 7, kind: output, shape index: {}]  }
   0x1 LB: > { %s14895_s25 = sadd.s32 4294967295, %s20099_s24   ;;  %p14899_p0 = scmp.ge.s32.totalorder %s20099_s24, 1  ;;  %s20099_s24 = sphi %s20142_s24, %s17_s24  }
   0x2   : > { %p237_p1 = scmp.lt.s32.totalorder %s20099_s24, 3 }
   0x4   : > { %p238_p2 = pnand %p14899_p0, %p237_p1 }
   0x6   : > { %241 = sbr.rel (%p238_p2) target bundleno = 1717 (0x6b5), region = 48 }
   0xd   : > { %v19619_v0 = vld [vmem:[%s24285_s1] sm:$0xff]   ;;  %p269_p3 = scmp.lt.s32.totalorder %s14895_s25, 1  ;;  %vm459_vm0 = vcmask 130048   ;;  %v19638_v3 = vld [vmem:[%s24287_s3 + $0x48] sm:$0xff]   ;;  %v19639_v7 = vld [vmem:[%s24287_s3 + $0x50] sm:$0xff]   ;;  %v20101_v26 = vmov 0  }
   0xe   : > { %v19625_v1 = vld [vmem:[%s24285_s1] sm:$0xff]   ;;  %17078 = vmatprep.subr.bf16.mxu0 %v19619_v0  ;;  %v19640_v12 = vld [vmem:[%s24287_s3 + $0x58] sm:$0xff]   ;;  %v19642_v23 = vld [vmem:[%s24287_s3 + $0x68] sm:$0xff]   ;;  %280 = vst [vmem:[#allocation2] sm:$0xff] %v20101_v26  ;;  %v20340_v62 = vrot.slane %v20101_v26, 7  ;;  %vm12509_vm3 = vcmask 64512  }
   0xf   : > { %s24533_s25 = smov (!%p269_p3, %s14895_s25), 1  ;;  %v19637_v2 = vld [vmem:[%s24287_s3 + $0x40] sm:$0xff]   ;;  %17079 = vmatpush3.bf16.msra.mxu0 %v19619_v0  ;;  %17096 = vmatprep.subr.bf16.mxu1 %v19625_v1  ;;  %v20217_v24 = vld [vmem:[%s24287_s3 + $0x70] sm:$0xff]   ;;  %282 = vst [vmem:[#allocation2 + $0x10] sm:$0xff] %v20101_v26  ;;  %283 = vst [vmem:[#allocation2 + $0x18] sm:$0xff] %v20101_v26 }
  0x10   : > { %s16194_s9 = sshll.u32 %s24533_s25, 7  ;;  %17097 = vmatpush3.bf16.msra.mxu1 %v19625_v1  ;;  %17114 = vmatprep.subr.bf16.mxu0 %v19637_v2  ;;  %v19641_v22 = vld [vmem:[%s24287_s3 + $0x60] sm:$0xff]   ;;  %285 = vst [vmem:[#allocation2 + $0x28] sm:$0xff] %v20101_v26  ;;  %286 = vst [vmem:[#allocation2 + $0x30] sm:$0xff] %v20101_v26  ;;  %v19645_v27 = vld [vmem:[%s24287_s3 + $0x78] sm:$0xff]   ;;  %s16195_s20 = sshll.u32 %s24533_s25, 8 }
  0x11   : > { %s20165_s12 = scalar_lea.vmem %s24284_s0, %s16194_s9  ;;  %v20222_v25 = vld [vmem:[%s24287_s3 + $0x40] sm:$0xff]   ;;  %288 = vst [vmem:[#allocation2 + $0x40] sm:$0xff] %v20101_v26  ;;  %289 = vst [vmem:[#allocation2 + $0x48] sm:$0xff] %v20101_v26  ;;  %v19646_v28 = vld [vmem:[%s24287_s3 + $0x48] sm:$0xff]   ;;  %vm856_vm1 = vsmask.f32 256  ;;  %s24183_s27 = scalar_lea.vmem %s24291_s7, %s16195_s20 }
  0x12   : > { %v19620_v4 = vld [vmem:[%s20165_s12] sm:$0xff]   ;;  %v19621_v5 = vld [vmem:[%s20165_s12 + $0x8] sm:$0xff]   ;;  %v19622_v6 = vld [vmem:[%s20165_s12 + $0x10] sm:$0xff]   ;;  %17402 = vmatprep.subr.bf16.mxu1 %v20222_v25  ;;  %291 = vst [vmem:[#allocation2 + $0x58] sm:$0xff] %v20101_v26  ;;  %vm1300_vm2 = vsmask.f32 7424 }
  0x13   : > { %17080 = vmatprep.mubr.msk.bf16.mxu0 %vm459_vm0, %v19620_v4  ;;  %v19623_v8 = vld [vmem:[%s20165_s12 + $0x18] sm:$0xff]   ;;  %v19627_v9 = vld [vmem:[%s20165_s12 + $0x40] sm:$0xff]   ;;  %v19628_v10 = vld [vmem:[%s20165_s12 + $0x48] sm:$0xff]   ;;  %292 = vst [vmem:[#allocation2 + $0x60] sm:$0xff] %v20101_v26 }
  0x14   : > { %17081 = vmatmul.mubr.msk.bf16.vlgmr.msra.gmra.mrb[0].mxu0 %vm459_vm0, %v19621_v5  ;;  %v19624_v11 = vld [vmem:[%s20165_s12 + $0x20] sm:$0xff]   ;;  %17098 = vmatprep.mubr.msk.bf16.mxu1 %vm459_vm0, %v19627_v9  ;;  %v19631_v13 = vld [vmem:[%s20165_s12 + $0x50] sm:$0xff]   ;;  %v19626_v14 = vld [vmem:[%s20165_s12 + $0x28] sm:$0xff]   ;;  %294 = vst [vmem:[#allocation2 + $0x70] sm:$0xff] %v20101_v26 }
  0x15   : > { %17084 = vmatprep.mubr.msk.bf16.mxu0 %vm459_vm0, %v19622_v6  ;;  %17115 = vmatpush3.bf16.msra.mxu0 %v19637_v2  ;;  %v19632_v15 = vld [vmem:[%s20165_s12 + $0x58] sm:$0xff]   ;;  %v19633_v16 = vld [vmem:[%s20165_s12 + $0x60] sm:$0xff]   ;;  %v19629_v17 = vld [vmem:[%s20165_s12 + $0x30] sm:$0xff]   ;;  %295 = vst [vmem:[#allocation2 + $0x78] sm:$0xff] %v20101_v26 }
  0x16   : > { %17116 = vmatprep.subr.bf16.mxu0 %v19638_v3  ;;  %17099 = vmatmul.mubr.msk.bf16.vlgmr.msra.gmra.mrb[0].mxu1 %vm459_vm0, %v19628_v10  ;;  %v19634_v18 = vld [vmem:[%s20165_s12 + $0x68] sm:$0xff]   ;;  %v19635_v19 = vld [vmem:[%s20165_s12 + $0x70] sm:$0xff]   ;;  %v19630_v20 = vld [vmem:[%s20165_s12 + $0x38] sm:$0xff]   ;;  %297 = vst [vmem:[#allocation2 + $0x88] sm:$0xff] %v20101_v26 }
  0x17   : > { %17102 = vmatprep.mubr.msk.bf16.mxu1 %vm459_vm0, %v19631_v13  ;;  %v19636_v21 = vld [vmem:[%s20165_s12 + $0x78] sm:$0xff]   ;;  %298 = vst [vmem:[#allocation2 + $0x90] sm:$0xff] %v20101_v26  ;;  %300 = vst [vmem:[#allocation2 + $0xa0] sm:$0xff] %v20101_v26  ;;  %17403 = vmatpush3.bf16.msra.mxu1 %v20222_v25  ;;  %v20310_v29 = vld [vmem:[%s24287_s3] sm:$0xff]  }
  0x18   : > { %301 = vst [vmem:[#allocation2 + $0xa8] sm:$0xff] %v20101_v26  ;;  %303 = vst [vmem:[#allocation2 + $0xb8] sm:$0xff] %v20101_v26  ;;  %17404 = vmatprep.subr.bf16.mxu1 %v19646_v28  ;;  %v19648_v30 = vld [vmem:[%s24287_s3 + $0x50] sm:$0xff]   ;;  %v19650_v31 = vld [vmem:[%s24287_s3 + $0x58] sm:$0xff]  }
  0x19   : > { %17117 = vmatpush3.bf16.msra.mxu0 %v19638_v3  ;;  %304 = vst [vmem:[#allocation2 + $0xc0] sm:$0xff] %v20101_v26  ;;  %306 = vst [vmem:[#allocation2 + $0xd0] sm:$0xff] %v20101_v26  ;;  %v19652_v32 = vld [vmem:[%s24287_s3 + $0x60] sm:$0xff]   ;;  %v19654_v33 = vld [vmem:[%s24287_s3 + $0x68] sm:$0xff]  }
  0x1a   : > { %17118 = vmatprep.subr.bf16.mxu0 %v19639_v7  ;;  %307 = vst [vmem:[#allocation2 + $0xd8] sm:$0xff] %v20101_v26  ;;  %309 = vst [vmem:[#allocation2 + $0xe8] sm:$0xff] %v20101_v26  ;;  %v19656_v34 = vld [vmem:[%s24287_s3 + $0x70] sm:$0xff]   ;;  %v19658_v35 = vld [vmem:[%s24287_s3 + $0x78] sm:$0xff]  }
  0x1b   : > { %310 = vst [vmem:[#allocation2 + $0xf0] sm:$0xff] %v20101_v26  ;;  %312 = vst [vmem:[#allocation2 + $0x100] sm:$0xff] %v20101_v26  ;;  %17405 = vmatpush3.bf16.msra.mxu1 %v19646_v28  ;;  %v20334_v36 = vld [vmem:[%s24287_s3] sm:$0xff]   ;;  %v844_v37 = vld [vmem:[#allocation2 + $0x30] sm:$0x80] }
  0x1c   : > { %17085 = vmatmul.mubr.msk.bf16.gmra.mrb[4].mxu0 %vm459_vm0, %v19623_v8  ;;  %313 = vst [vmem:[#allocation2 + $0x108] sm:$0xff] %v20101_v26  ;;  %315 = vst [vmem:[#allocation2 + $0x118] sm:$0xff] %v20101_v26  ;;  %17406 = vmatprep.subr.bf16.mxu1 %v19648_v30  ;;  %v882_v38 = vshrl.u32 %v844_v37, 16  ;;  %v842_v39 = vld [vmem:[#allocation2 + $0x18] sm:$0x80] }
  0x1d   : > { %17088 = vmatprep.mubr.msk.bf16.mxu0 %vm459_vm0, %v19624_v11  ;;  %17119 = vmatpush3.bf16.msra.mxu0 %v19639_v7  ;;  %316 = vst [vmem:[#allocation2 + $0x120] sm:$0xff] %v20101_v26  ;;  %318 = vst [vmem:[#allocation2 + $0x130] sm:$0xff] %v20101_v26  ;;  %v840_v40 = vld [vmem:[#allocation2] sm:$0x80]  ;;  %v846_v41 = vld [vmem:[#allocation2 + $0x48] sm:$0x80] }
  0x1e   : > { %17120 = vmatprep.subr.bf16.mxu0 %v19640_v12  ;;  %17103 = vmatmul.mubr.msk.bf16.gmra.mrb[4].mxu1 %vm459_vm0, %v19632_v15  ;;  %319 = vst [vmem:[#allocation2 + $0x138] sm:$0xff] %v20101_v26  ;;  %321 = vst [vmem:[#allocation2 + $0x148] sm:$0xff] %v20101_v26  ;;  %v848_v42 = vld [vmem:[#allocation2 + $0x60] sm:$0x80]  ;;  %v870_v43 = vshrl.u32 %v842_v39, 16  ;;  %v20337_v44 = vrot.slane %v882_v38, 7 }
  0x1f   : > { %17106 = vmatprep.mubr.msk.bf16.mxu1 %vm459_vm0, %v19633_v16  ;;  %322 = vst [vmem:[#allocation2 + $0x150] sm:$0xff] %v20101_v26  ;;  %324 = vst [vmem:[#allocation2 + $0x160] sm:$0xff] %v20101_v26  ;;  %17407 = vmatpush3.bf16.msra.mxu1 %v19648_v30  ;;  %v858_v45 = vshrl.u32 %v840_v40, 16  ;;  %v894_v46 = vshrl.u32 %v846_v41, 16  ;;  %v906_v47 = vshrl.u32 %v848_v42, 16 }
  0x20   : > { %325 = vst [vmem:[#allocation2 + $0x168] sm:$0xff] %v20101_v26  ;;  %327 = vst [vmem:[#allocation2 + $0x178] sm:$0xff] %v20101_v26  ;;  %17408 = vmatprep.subr.bf16.mxu1 %v19650_v31  ;;  %v1287_v48 = vld [vmem:[#allocation2 + $0x28] sm:$0x1]  ;;  %v850_v49 = vld [vmem:[#allocation2 + $0x78] sm:$0x80] }
  0x21   : > { %17121 = vmatpush3.bf16.msra.mxu0 %v19640_v12  ;;  %328 = vst [vmem:[#allocation2 + $0x180] sm:$0xff] %v20101_v26  ;;  %330 = vst [vmem:[#allocation2 + $0x190] sm:$0xff] %v20101_v26  ;;  %v852_v50 = vld [vmem:[#allocation2 + $0x90] sm:$0x80]  ;;  %v3190_v51 = vld [vmem:[#allocation2 + $0xd8] sm:$0x80] }
  0x22   : > { %17122 = vmatprep.subr.bf16.mxu0 %v19641_v22  ;;  %331 = vst [vmem:[#allocation2 + $0x198] sm:$0xff] %v20101_v26  ;;  %333 = vst [vmem:[#allocation2 + $0x1a8] sm:$0xff] %v20101_v26  ;;  %v3192_v52 = vld [vmem:[#allocation2 + $0xf0] sm:$0x80]  ;;  %v1289_v53 = vld [vmem:[#allocation2 + $0x40] sm:$0x1] }
  0x23   : > { %334 = vst [vmem:[#allocation3] sm:$0xff] %v20101_v26  ;;  %336 = vst [vmem:[#allocation3 + $0x10] sm:$0xff] %v20101_v26  ;;  %17409 = vmatpush3.bf16.msra.mxu1 %v19650_v31  ;;  %v930_v54 = vshrl.u32 %v852_v50, 16  ;;  %v1321_v55 = vshll.u32 %v1287_v48, 16  ;;  %v1293_v56 = vld [vmem:[#allocation2 + $0x70] sm:$0x1] }
  0x24   : > { %17089 = vmatmul.mubr.msk.bf16.gmra.mrb[8].mxu0 %vm459_vm0, %v19626_v14  ;;  %337 = vst [vmem:[#allocation3 + $0x18] sm:$0xff] %v20101_v26  ;;  %339 = vst [vmem:[#allocation3 + $0x28] sm:$0xff] %v20101_v26  ;;  %17410 = vmatprep.subr.bf16.mxu1 %v19652_v32  ;;  %v918_v57 = vshrl.u32 %v850_v49, 16  ;;  %v3217_v58 = vshrl.u32 %v3190_v51, 16  ;;  %v1291_v59 = vld [vmem:[#allocation2 + $0x58] sm:$0x1] }
  0x25   : > { %17092 = vmatprep.mubr.msk.bf16.mxu0 %vm459_vm0, %v19629_v17  ;;  %17123 = vmatpush3.bf16.msra.mxu0 %v19641_v22  ;;  %340 = vst [vmem:[#allocation3 + $0x30] sm:$0xff] %v20101_v26  ;;  %342 = vst [vmem:[#allocation3 + $0x40] sm:$0xff] %v20101_v26  ;;  %v3229_v60 = vshrl.u32 %v3192_v52, 16  ;;  %v1333_v61 = vshll.u32 %v1289_v53, 16  ;;  %v20342_v63 = vrot.slane %v870_v43, 7  ;;  %v1357_v0 = vshll.u32 %v1293_v56, 16 }
  0x26   : > { %17107 = vmatmul.mubr.msk.bf16.gmra.mrb[8].mxu1 %vm459_vm0, %v19634_v18  ;;  %17124 = vmatprep.subr.bf16.mxu0 %v19642_v23  ;;  %343 = vst [vmem:[#allocation3 + $0x48] sm:$0xff] %v20101_v26  ;;  %345 = vst [vmem:[#allocation3 + $0x58] sm:$0xff] %v20101_v26  ;;  %v20344_v1 = vrot.slane %v858_v45, 7  ;;  %v20346_v2 = vrot.slane %v894_v46, 7  ;;  %v20348_v3 = vrot.slane %v906_v47, 7  ;;  %v1345_v4 = vshll.u32 %v1291_v59, 16 }
  0x27   : > { %17110 = vmatprep.mubr.msk.bf16.mxu1 %vm459_vm0, %v19635_v19  ;;  %346 = vst [vmem:[#allocation3 + $0x60] sm:$0xff] %v20101_v26  ;;  %348 = vst [vmem:[#allocation3 + $0x70] sm:$0xff] %v20101_v26  ;;  %17411 = vmatpush3.bf16.msra.mxu1 %v19652_v32  ;;  %v1583_v5 = vld [vmem:[#allocation2 + $0x18] sm:$0x80]  ;;  %v20350_v6 = vrot.slane %v930_v54, 7  ;;  %v20352_v8 = vrot.slane %v1321_v55, 1 }
  0x28   : > { %349 = vst [vmem:[#allocation3 + $0x78] sm:$0xff] %v20101_v26  ;;  %351 = vst [vmem:[#allocation3 + $0x88] sm:$0xff] %v20101_v26  ;;  %17412 = vmatprep.subr.bf16.mxu1 %v19654_v33  ;;  %v3188_v7 = vld [vmem:[#allocation2 + $0xc0] sm:$0x80]  ;;  %v20354_v9 = vrot.slane %v918_v57, 7  ;;  %v20356_v10 = vrot.slane %v3217_v58, 7 }
  0x29   : > { %17125 = vmatpush3.bf16.msra.mxu0 %v19642_v23  ;;  %352 = vst [vmem:[#allocation3 + $0x90] sm:$0xff] %v20101_v26  ;;  %354 = vst [vmem:[#allocation3 + $0xa0] sm:$0xff] %v20101_v26  ;;  %v20358_v11 = vrot.slane %v3229_v60, 7  ;;  %v20360_v12 = vrot.slane %v1333_v61, 1  ;;  %v20362_v13 = vrot.slane %v1357_v0, 1  ;;  %v1600_v14 = vshrl.u32 %v1583_v5, 16 }
  0x2a   : > { %17126 = vmatprep.subr.bf16.mxu0 %v20217_v24  ;;  %355 = vst [vmem:[#allocation3 + $0xa8] sm:$0xff] %v20101_v26  ;;  %357 = vst [vmem:[#allocation3 + $0xb8] sm:$0xff] %v20101_v26  ;;  %v3205_v15 = vshrl.u32 %v3188_v7, 16  ;;  %v854_v16 = vld [vmem:[#allocation2 + $0xa8] sm:$0x80]  ;;  %v20364_v17 = vrot.slane %v1345_v4, 1 }
  0x2b   : > { %358 = vst [vmem:[#allocation3 + $0xc0] sm:$0xff] %v20101_v26  ;;  %360 = vst [vmem:[#allocation3 + $0xd0] sm:$0xff] %v20101_v26  ;;  %17413 = vmatpush3.bf16.msra.mxu1 %v19654_v33  ;;  %v1295_v18 = vld [vmem:[#allocation2 + $0x88] sm:$0x1]  ;;  %v1585_v19 = vld [vmem:[#allocation2 + $0x30] sm:$0x80] }
  0x2c   : > { %17093 = vmatmul.mubr.msk.bf16.gmra.mrb[12].mxu0 %vm459_vm0, %v19630_v20  ;;  %361 = vst [vmem:[#allocation3 + $0xd8] sm:$0xff] %v20101_v26  ;;  %363 = vst [vmem:[#allocation3 + $0xe8] sm:$0xff] %v20101_v26  ;;  %17414 = vmatprep.subr.bf16.mxu1 %v19656_v34  ;;  %v1589_v20 = vld [vmem:[#allocation2 + $0x60] sm:$0x80]  ;;  %v3631_v22 = vld [vmem:[#allocation2 + $0xd0] sm:$0x1] }
  0x2d   : > { %364 = vst [vmem:[#allocation3 + $0xf0] sm:$0xff] %v20101_v26  ;;  %366 = vst [vmem:[#allocation3 + $0x100] sm:$0xff] %v20101_v26  ;;  %17127 = vmatpush3.bf16.msra.mxu0 %v20217_v24  ;;  %17130 = vmatprep.mubr.bf16.mxu0 %v20101_v26  ;;  %v1587_v23 = vld [vmem:[#allocation2 + $0x48] sm:$0x80]  ;;  %v942_v24 = vshrl.u32 %v854_v16, 16  ;;  %v1369_v25 = vshll.u32 %v1295_v18, 16 }
  0x2e   : > { %17111 = vmatmul.mubr.msk.bf16.gmra.mrb[12].mxu1 %vm459_vm0, %v19636_v21  ;;  %367 = vst [vmem:[#allocation3 + $0x108] sm:$0xff] %v20101_v26  ;;  %369 = vst [vmem:[#allocation3 + $0x118] sm:$0xff] %v20101_v26  ;;  %17128 = vmatprep.subr.bf16.mxu0 %v19645_v27  ;;  %v1297_v21 = vld [vmem:[#allocation2 + $0xa0] sm:$0x1]  ;;  %v1612_v28 = vshrl.u32 %v1585_v19, 16  ;;  %v3654_v33 = vshll.u32 %v3631_v22, 16 }
  0x2f   : > { %370 = vst [vmem:[#allocation3 + $0x120] sm:$0xff] %v20101_v26  ;;  %372 = vst [vmem:[#allocation3 + $0x130] sm:$0xff] %v20101_v26  ;;  %17415 = vmatpush3.bf16.msra.mxu1 %v19656_v34  ;;  %v3194_v30 = vld [vmem:[#allocation2 + $0x108] sm:$0x80]  ;;  %v1299_v31 = vld [vmem:[#allocation2 + $0xb8] sm:$0x1] }
  0x30   : > { %373 = vst [vmem:[#allocation3 + $0x138] sm:$0xff] %v20101_v26  ;;  %375 = vst [vmem:[#allocation3 + $0x148] sm:$0xff] %v20101_v26  ;;  %17416 = vmatprep.subr.bf16.mxu1 %v19658_v35  ;;  %v1381_v32 = vshll.u32 %v1297_v21, 16  ;;  %v1624_v34 = vshrl.u32 %v1587_v23, 16  ;;  %v3196_v37 = vld [vmem:[#allocation2 + $0x120] sm:$0x80] }
  0x31   : > { %376 = vst [vmem:[#allocation3 + $0x150] sm:$0xff] %v20101_v26  ;;  %378 = vst [vmem:[#allocation3 + $0x160] sm:$0xff] %v20101_v26  ;;  %17129 = vmatpush3.bf16.msra.mxu0 %v19645_v27  ;;  %v20366_v27 = vrot.slane %v1600_v14, 7  ;;  %v3241_v38 = vshrl.u32 %v3194_v30, 16  ;;  %v1393_v39 = vshll.u32 %v1299_v31, 16  ;;  %v20373_v45 = vrot.slane %v3205_v15, 7 }
  0x32   : > { %379 = vst [vmem:[#allocation3 + $0x168] sm:$0xff] %v20101_v26  ;;  %381 = vst [vmem:[#allocation3 + $0x178] sm:$0xff] %v20101_v26  ;;  %17146 = vmatprep.subr.bf16.mxu0 %v20310_v29  ;;  %v3633_v40 = vld [vmem:[#allocation2 + $0xe8] sm:$0x1]  ;;  %v1593_v41 = vld [vmem:[#allocation2 + $0x90] sm:$0x80] }
  0x33   : > { %382 = vst [vmem:[#allocation3 + $0x180] sm:$0xff] %v20101_v26  ;;  %384 = vst [vmem:[#allocation3 + $0x190] sm:$0xff] %v20101_v26  ;;  %17417 = vmatpush3.bf16.msra.mxu1 %v19658_v35  ;;  %v1636_v35 = vshrl.u32 %v1589_v20, 16  ;;  %v1591_v42 = vld [vmem:[#allocation2 + $0x78] sm:$0x80]  ;;  %v20375_v46 = vrot.slane %v942_v24, 7 }
  0x34   : > { %385 = vst [vmem:[#allocation3 + $0x198] sm:$0xff] %v20101_v26  ;;  %387 = vst [vmem:[#allocation3 + $0x1a8] sm:$0xff] %v20101_v26  ;;  %17434 = vmatprep.subr.bf16.mxu1 %v20334_v36  ;;  %v20371_v43 = vld [vmem:[%s24286_s2] ss:$0 sm:$0xff]  ;;  %v3253_v47 = vshrl.u32 %v3196_v37, 16  ;;  %v20377_v48 = vrot.slane %v1612_v28, 7 }
  0x35   : > { %24321 = vst [vmem:[#allocation4_spill] sm:$0xff] %v20366_v27  ;;  %v20379_v49 = vrot.slane %v1369_v25, 1  ;;  %v3666_v50 = vshll.u32 %v3633_v40, 16  ;;  %v20381_v51 = vrot.slane %v1624_v34, 7  ;;  %v20383_v52 = vrot.slane %v1636_v35, 7  ;;  %v19649_v40 = vld [vmem:[%s24287_s3 + $0x8] sm:$0xff]  }
  0x36   : > { %24322 = vst [vmem:[#allocation5_spill] sm:$0xff] %v20377_v48  ;;  %v1285_v54 = vld [vmem:[#allocation2 + $0x10] sm:$0x1]  ;;  %v20385_v55 = vrot.slane %v1381_v32, 1  ;;  %v1648_v56 = vshrl.u32 %v1591_v42, 16  ;;  %v1660_v57 = vshrl.u32 %v1593_v41, 16 }
  0x37   : > { %24323 = vst [vmem:[#allocation6_spill] sm:$0xff] %v20379_v49  ;;  %24324 = vst [vmem:[#allocation7_spill] sm:$0xff] %v20381_v51  ;;  %v20388_v60 = vrot.slane %v3241_v38, 7  ;;  %v20390_v61 = vrot.slane %v3654_v33, 1  ;;  %v20392_v0 = vrot.slane %v1393_v39, 1  ;;  %v20395_v14 = vrot.slane %v3253_v47, 7 }
  0x38   : > { %24325 = vst [vmem:[#allocation8_spill] sm:$0xff] %v20383_v52  ;;  %24326 = vst [vmem:[#allocation9_spill] sm:$0xff] %v20385_v55  ;;  %v3635_v4 = vld [vmem:[#allocation2 + $0x100] sm:$0x1]  ;;  %v3198_v15 = vld [vmem:[#allocation2 + $0x138] sm:$0x80] }
  0x39   : > { %24327 = vst [vmem:[#allocation10_spill] sm:$0xff] %v20390_v61  ;;  %24328 = vst [vmem:[#allocation11_spill] sm:$0xff] %v20392_v0  ;;  %v3200_v16 = vld [vmem:[#allocation2 + $0x150] sm:$0x80]  ;;  %v20399_v20 = vrot.slane %v20101_v26, 1  ;;  %v1309_v21 = vshll.u32 %v1285_v54, 16 }
  0x3a   : > { %v20401_v22 = vrot.slane %v3666_v50, 1  ;;  %v3927_v23 = vld [vmem:[#allocation2 + $0xd8] sm:$0x80]  ;;  %v3678_v25 = vshll.u32 %v3635_v4, 16  ;;  %v20404_v28 = vrot.slane %v1648_v56, 7  ;;  %v20406_v30 = vrot.slane %v1660_v57, 7 }
  0x3b   : > { %v3929_v31 = vld [vmem:[#allocation2 + $0xf0] sm:$0x80]  ;;  %v20408_v32 = vld [vmem:[#allocation2 + $0x28] sm:$0x1]  ;;  %v3265_v35 = vshrl.u32 %v3198_v15, 16  ;;  %v3277_v37 = vshrl.u32 %v3200_v16, 16 }
  0x3c   : > { %24329 = vst [vmem:[#allocation12_spill] sm:$0xff] %v20401_v22  ;;  %24330 = vst [vmem:[#allocation13_spill] sm:$0xff] %v20404_v28  ;;  %v3944_v41 = vshrl.u32 %v3927_v23, 16  ;;  %v20418_v54 = vld [vmem:[#allocation2 + $0xa8] sm:$0x80]  ;;  %v19663_v55 = vld [vmem:[%s24287_s3 + $0x80] sm:$0xff]  }
  0x3d   : > { %24331 = vst [vmem:[#allocation14_spill] sm:$0xff] %v20406_v30  ;;  %v20420_v56 = vld [vmem:[#allocation2 + $0xc0] sm:$0x80]  ;;  %v20427_v15 = vld [vmem:[#allocation2 + $0x40] sm:$0x1]  ;;  %v20433_v23 = vrot.slane %v3277_v37, 7 }
  0x3e   : > { %v2095_v30 = vshll.u32 %v20427_v15, 16 }
  0x3f   : > { %24333 = vst [vmem:[#allocation16_spill] sm:$0xff] %v20433_v23 }
  0xe7   : > { %v17082_v53 = vpop.f32.mrb[0].mxu0 }
  0xe8   : > { %v527_v58 = vadd.f32 %v17082_v53, %v20371_v43  ;;  %v518_v59 = vpop.f32.mrb[1].mxu0  ;;  %v20416_v53 = vrot.slane %v1309_v21, 1  ;;  %v20431_v21 = vrot.slane %v3265_v35, 7  ;;  %v1684_v35 = vshrl.u32 %v20420_v56, 16  ;;  %v20454_v56 = vld [vmem:[#allocation2 + $0x130] sm:$0x1] }
  0xe9   : > { %v519_v5 = vadd.f32 %v20371_v43, %v518_v59  ;;  %v17083_v7 = vpop.f32.mrb[2].mxu0  ;;  %v17100_v39 = vpop.f32.mrb[0].mxu1 }
  0xea   : > { %v530_v18 = vadd.f32 %v17083_v7, %v20371_v43  ;;  %v521_v19 = vpop.f32.mrb[3].mxu0  ;;  %v583_v33 = vmax.f32 %v527_v58, 0.0  ;;  %v752_v47 = vadd.f32 %v17100_v39, %v20371_v43  ;;  %v743_v50 = vpop.f32.mrb[1].mxu1  ;;  %v3956_v7 = vshrl.u32 %v3929_v31, 16  ;;  %v19651_v31 = vld [vmem:[%s24287_s3 + $0x10] sm:$0xff]  }
  0xeb   : > { %v522_v24 = vadd.f32 %v20371_v43, %v521_v19  ;;  %v581_v26 = vmax.f32 %v519_v5, 0.0  ;;  %v744_v59 = vadd.f32 %v20371_v43, %v743_v50  ;;  %v17101_v4 = vpop.f32.mrb[2].mxu1  ;;  %v20425_v5 = vrot.slane %v3678_v25, 1  ;;  %v2358_v50 = vld [vmem:[#allocation2 + $0x30] sm:$0x80] }
  0xec   : > { %v584_v34 = vmax.f32 %v530_v18, 0.0  ;;  %v746_v19 = vpop.f32.mrb[3].mxu1  ;;  %v755_v39 = vadd.f32 %v17101_v4, %v20371_v43 }
  0xed   : > { %v582_v38 = vmax.f32 %v522_v24, 0.0  ;;  %24332 = vst [vmem:[#allocation15_spill] sm:$0xff] %v20425_v5  ;;  %v2083_v24 = vshll.u32 %v20408_v32, 16  ;;  %v20464_v5 = vld [vmem:[#allocation2 + $0x108] sm:$0x80] }
  0xee   : > { %v20413_v42 = vpack.c.bf16 %v584_v34, %v583_v33  ;;  %v1672_v34 = vshrl.u32 %v20418_v54, 16  ;;  %v20452_v54 = vld [vmem:[#allocation2 + $0x118] sm:$0x1] }
  0xef   : > { %v20422_v57 = vpack.c.bf16 %v582_v38, %v581_v26  ;;  %v17086_v58 = vpop.f32.mrb[4].mxu0  ;;  %v20443_v26 = vrot.slane %v3944_v41, 7  ;;  %v808_v38 = vmax.f32 %v752_v47, 0.0  ;;  %v747_v41 = vadd.f32 %v20371_v43, %v746_v19 }
  0xf0   : > { %607 = vst [vmem:[#allocation2 + $0x38] sm:$0xff] %v20413_v42  ;;  %v543_v16 = vadd.f32 %v17086_v58, %v20371_v43  ;;  %v534_v18 = vpop.f32.mrb[5].mxu0  ;;  %v809_v47 = vmax.f32 %v755_v39, 0.0  ;;  %v3702_v39 = vshll.u32 %v20454_v56, 16 }
  0xf1   : > { %606 = vst [vmem:[#allocation2 + $0x20] sm:$0xff] %v20422_v57  ;;  %v535_v25 = vadd.f32 %v20371_v43, %v534_v18  ;;  %v17087_v33 = vpop.f32.mrb[6].mxu0  ;;  %17131 = vmatmul.mubr.bf16.vlgmr.msra.gmra.mrb[16].mxu0 %v20422_v57  ;;  %24334 = vst [vmem:[#allocation17_spill] sm:$0xff] %v20443_v26  ;;  %v806_v18 = vmax.f32 %v744_v59, 0.0  ;;  %v807_v52 = vmax.f32 %v747_v41, 0.0  ;;  %v17104_v51 = vpop.f32.mrb[4].mxu1 }
  0xf2   : > { %v546_v37 = vadd.f32 %v17087_v33, %v20371_v43  ;;  %v537_v32 = vpop.f32.mrb[7].mxu0  ;;  %17147 = vmatpush3.bf16.msra.mxu0 %v20310_v29  ;;  %17134 = vmatprep.mubr.bf16.mxu0 %v20413_v42  ;;  %v20456_v33 = vrot.slane %v3956_v7, 7  ;;  %v587_v26 = vmax.f32 %v543_v16, 0.0  ;;  %v20461_v59 = vpack.c.bf16 %v809_v47, %v808_v38  ;;  %v759_v48 = vpop.f32.mrb[5].mxu1  ;;  %v3202_v41 = vld [vmem:[#allocation2 + $0x168] sm:$0x80] }
  0xf3   : > { %v538_v58 = vadd.f32 %v20371_v43, %v537_v32  ;;  %17148 = vmatprep.subr.bf16.mxu0 %v19649_v40  ;;  %v585_v28 = vmax.f32 %v535_v25, 0.0  ;;  %v768_v19 = vadd.f32 %v17104_v51, %v20371_v43  ;;  %v20466_v7 = vrot.slane %v2083_v24, 1 }
  0xf4   : > { %24335 = vst [vmem:[#allocation18_spill] sm:$0xff] %v20456_v33  ;;  %v588_v29 = vmax.f32 %v546_v37, 0.0  ;;  %v20470_v15 = vpack.c.bf16 %v807_v52, %v806_v18  ;;  %v760_v25 = vadd.f32 %v20371_v43, %v759_v48  ;;  %v2375_v38 = vshrl.u32 %v2358_v50, 16  ;;  %832 = vst [vmem:[#allocation2 + $0xf8] sm:$0xff] %v20461_v59  ;;  %v19655_v50 = vld [vmem:[%s24287_s3 + $0x20] sm:$0xff]  }
  0xf5   : > { %v586_v4 = vmax.f32 %v538_v58, 0.0  ;;  %24336 = vst [vmem:[#allocation19_spill] sm:$0xff] %v20466_v7  ;;  %v3690_v52 = vshll.u32 %v20452_v54, 16  ;;  %v20481_v58 = vrot.slane %v1672_v34, 7  ;;  %v3968_v54 = vshrl.u32 %v20464_v5, 16 }
  0xf6   : > { %v20459_v32 = vpack.c.bf16 %v588_v29, %v587_v26  ;;  %17149 = vmatpush3.bf16.msra.mxu0 %v19649_v40  ;;  %v17105_v26 = vpop.f32.mrb[6].mxu1  ;;  %v19653_v40 = vld [vmem:[%s24287_s3 + $0x18] sm:$0xff]   ;;  %831 = vst [vmem:[#allocation2 + $0xe0] sm:$0xff] %v20470_v15  ;;  %v20490_v29 = vrot.slane %v1684_v35, 7  ;;  %v20493_v34 = vrot.slane %v2095_v30, 1  ;;  %v810_v33 = vmax.f32 %v760_v25, 0.0 }
  0xf7   : > { %v20468_v16 = vpack.c.bf16 %v586_v4, %v585_v28  ;;  %v17090_v37 = vpop.f32.mrb[8].mxu0  ;;  %17150 = vmatprep.subr.bf16.mxu0 %v19651_v31  ;;  %v762_v28 = vpop.f32.mrb[7].mxu1  ;;  %24337 = vst [vmem:[#allocation20_spill] sm:$0xff] %v20481_v58  ;;  %v812_v4 = vmax.f32 %v768_v19, 0.0  ;;  %v20500_v5 = vrot.slane %v2375_v38, 7 }
  0xf8   : > { %609 = vst [vmem:[#allocation2 + $0x68] sm:$0xff] %v20459_v32  ;;  %v559_v51 = vadd.f32 %v17090_v37, %v20371_v43  ;;  %v550_v24 = vpop.f32.mrb[9].mxu0  ;;  %24338 = vst [vmem:[#allocation21_spill] sm:$0xff] %v20490_v29  ;;  %v771_v37 = vadd.f32 %v17105_v26, %v20371_v43  ;;  %v763_v35 = vadd.f32 %v20371_v43, %v762_v28  ;;  %v2066_v29 = vld [vmem:[#allocation2 + $0x70] sm:$0x1]  ;;  %v24292_v23 = vshrl.u32 %v20459_v32, 16 }
  0xf9   : > { %608 = vst [vmem:[#allocation2 + $0x50] sm:$0xff] %v20468_v16  ;;  %v551_v48 = vadd.f32 %v20371_v43, %v550_v24  ;;  %v17091_v18 = vpop.f32.mrb[10].mxu0  ;;  %17135 = vmatmul.mubr.bf16.gmra.mrb[20].mxu0 %v20468_v16  ;;  %24339 = vst [vmem:[#allocation22_spill] sm:$0xff] %v20493_v34  ;;  %v3933_v24 = vld [vmem:[#allocation2 + $0x120] sm:$0x80]  ;;  %v17108_v22 = vpop.f32.mrb[8].mxu1 }
  0xfa   : > { %v562_v56 = vadd.f32 %v17091_v18, %v20371_v43  ;;  %v553_v47 = vpop.f32.mrb[11].mxu0  ;;  %17151 = vmatpush3.bf16.msra.mxu0 %v19651_v31  ;;  %17138 = vmatprep.mubr.bf16.mxu0 %v20459_v32  ;;  %24340 = vst [vmem:[#allocation23_spill] sm:$0xff] %v20500_v5  ;;  %v591_v30 = vmax.f32 %v559_v51, 0.0  ;;  %v813_v18 = vmax.f32 %v771_v37, 0.0  ;;  %v3289_v31 = vshrl.u32 %v3202_v41, 16  ;;  %v775_v28 = vpop.f32.mrb[9].mxu1 }
  0xfb   : > { %v554_v7 = vadd.f32 %v20371_v43, %v553_v47  ;;  %17152 = vmatprep.subr.bf16.mxu0 %v19653_v40  ;;  %v589_v19 = vmax.f32 %v551_v48, 0.0  ;;  %v811_v27 = vmax.f32 %v763_v35, 0.0  ;;  %v3980_v26 = vshrl.u32 %v3933_v24, 16  ;;  %v20507_v38 = vld [vmem:[#allocation2 + $0x58] sm:$0x1]  ;;  %v17109_v48 = vpop.f32.mrb[10].mxu1 }
  0xfc   : > { %v592_v34 = vmax.f32 %v562_v56, 0.0  ;;  %v20504_v47 = vpack.c.bf16 %v813_v18, %v812_v4  ;;  %v784_v25 = vadd.f32 %v17108_v22, %v20371_v43  ;;  %v2119_v51 = vshll.u32 %v2066_v29, 16 }
  0xfd   : > { %v590_v58 = vmax.f32 %v554_v7, 0.0  ;;  %v20511_v41 = vpack.c.bf16 %v811_v27, %v810_v33  ;;  %v776_v7 = vadd.f32 %v20371_v43, %v775_v28  ;;  %v20522_v27 = vrot.slane %v3702_v39, 1  ;;  %v20524_v33 = vld [vmem:[#allocation2 + $0x148] sm:$0x1] }
  0xfe   : > { %v20502_v0 = vpack.c.bf16 %v592_v34, %v591_v30  ;;  %17153 = vmatpush3.bf16.msra.mxu0 %v19653_v40  ;;  %v19657_v34 = vld [vmem:[%s24287_s3 + $0x28] sm:$0xff]   ;;  %v20517_v40 = vrot.slane %v3690_v52, 1  ;;  %834 = vst [vmem:[#allocation2 + $0x128] sm:$0xff] %v20504_v47  ;;  %v20526_v4 = vrot.slane %v3968_v54, 7  ;;  %v20532_v35 = vrot.slane %v3289_v31, 7 }
  0xff   : > { %v20509_v56 = vpack.c.bf16 %v590_v58, %v589_v19  ;;  %v17094_v37 = vpop.f32.mrb[12].mxu0  ;;  %17154 = vmatprep.subr.bf16.mxu0 %v19655_v50  ;;  %v778_v58 = vpop.f32.mrb[11].mxu1  ;;  %24342 = vst [vmem:[#allocation25_spill] sm:$0xff] %v20522_v27  ;;  %833 = vst [vmem:[#allocation2 + $0x110] sm:$0xff] %v20511_v41  ;;  %v20534_v30 = vrot.slane %v3980_v26, 7  ;;  %v816_v54 = vmax.f32 %v784_v25, 0.0  ;;  %v787_v28 = vadd.f32 %v17109_v48, %v20371_v43 }
 0x100   : > { %24341 = vst [vmem:[#allocation24_spill] sm:$0xff] %v20517_v40  ;;  %611 = vst [vmem:[#allocation2 + $0x98] sm:$0xff] %v20502_v0  ;;  %v575_v22 = vadd.f32 %v17094_v37, %v20371_v43  ;;  %v566_v29 = vpop.f32.mrb[13].mxu0  ;;  %v20540_v37 = vrot.slane %v2119_v51, 1  ;;  %v814_v5 = vmax.f32 %v776_v7, 0.0  ;;  %v779_v31 = vadd.f32 %v20371_v43, %v778_v58  ;;  %v19659_v26 = vld [vmem:[%s24287_s3 + $0x30] sm:$0xff]  }
 0x101   : > { %24343 = vst [vmem:[#allocation26_spill] sm:$0xff] %v20526_v4  ;;  %610 = vst [vmem:[#allocation2 + $0x80] sm:$0xff] %v20509_v56  ;;  %v567_v24 = vadd.f32 %v20371_v43, %v566_v29  ;;  %v17095_v52 = vpop.f32.mrb[14].mxu0  ;;  %17139 = vmatmul.mubr.bf16.gmra.mrb[24].mxu0 %v20509_v56  ;;  %v817_v51 = vmax.f32 %v787_v28, 0.0  ;;  %v17112_v4 = vpop.f32.mrb[12].mxu1  ;;  %v868_v58 = vsel %vm856_vm1, %v20344_v1, %v20340_v62 }
 0x102   : > { %24344 = vst [vmem:[#allocation27_spill] sm:$0xff] %v20532_v35  ;;  %24345 = vst [vmem:[#allocation28_spill] sm:$0xff] %v20534_v30  ;;  %v578_v18 = vadd.f32 %v17095_v52, %v20371_v43  ;;  %v569_v19 = vpop.f32.mrb[15].mxu0  ;;  %17155 = vmatpush3.bf16.msra.mxu0 %v19655_v50  ;;  %17142 = vmatprep.mubr.bf16.mxu0 %v20502_v0  ;;  %v20548_v50 = vld [vmem:[#allocation2 + $0x160] sm:$0x1]  ;;  %v595_v39 = vmax.f32 %v575_v22, 0.0  ;;  %v800_v22 = vadd.f32 %v17112_v4, %v20371_v43 }
 0x103   : > { %24346 = vst [vmem:[#allocation29_spill] sm:$0xff] %v20540_v37  ;;  %v570_v29 = vadd.f32 %v20371_v43, %v569_v19  ;;  %17156 = vmatprep.subr.bf16.mxu0 %v19657_v34  ;;  %v20551_v37 = vld [vmem:[#allocation2 + $0x138] sm:$0x80]  ;;  %v593_v19 = vmax.f32 %v567_v24, 0.0  ;;  %v815_v30 = vmax.f32 %v779_v31, 0.0  ;;  %v886_v52 = vshrl.u32 %v20413_v42, 16 }
 0x104   : > { %v596_v48 = vmax.f32 %v578_v18, 0.0  ;;  %v20556_v27 = vld [vmem:[#allocation2 + $0x150] sm:$0x80]  ;;  %v20561_v25 = vpack.c.bf16 %v817_v51, %v816_v54  ;;  %v791_v18 = vpop.f32.mrb[13].mxu1  ;;  %v20564_v24 = vld [vmem:[#allocation2 + $0x60] sm:$0x80] }
 0x105   : > { %v594_v7 = vmax.f32 %v570_v29, 0.0  ;;  %v20568_v29 = vpack.c.bf16 %v815_v30, %v814_v5  ;;  %v792_v62 = vadd.f32 %v20371_v43, %v791_v18  ;;  %v17113_v1 = vpop.f32.mrb[14].mxu1  ;;  %v3726_v4 = vshll.u32 %v20548_v50, 16  ;;  %v20578_v54 = vld [vmem:[#allocation2 + $0x48] sm:$0x80] }
 0x106   : > { %v20559_v40 = vpack.c.bf16 %v596_v48, %v595_v39  ;;  %17157 = vmatpush3.bf16.msra.mxu0 %v19657_v34  ;;  %v19661_v39 = vld [vmem:[%s24287_s3 + $0x38] sm:$0xff]   ;;  %v19662_v34 = vld [vmem:[%s24287_s3 + $0x8] sm:$0xff]   ;;  %v24347_v31 = vshrl.u32 %v20422_v57, 16  ;;  %836 = vst [vmem:[#allocation2 + $0x158] sm:$0xff] %v20561_v25  ;;  %v820_v30 = vmax.f32 %v800_v22, 0.0  ;;  %v803_v48 = vadd.f32 %v17113_v1, %v20371_v43  ;;  %v794_v51 = vpop.f32.mrb[15].mxu1 }
 0x107   : > { %v20566_v28 = vpack.c.bf16 %v594_v7, %v593_v19  ;;  %17158 = vmatprep.subr.bf16.mxu0 %v19659_v26  ;;  %v3992_v19 = vshrl.u32 %v20551_v37, 16  ;;  %v2070_v7 = vld [vmem:[#allocation2 + $0xa0] sm:$0x1]  ;;  %835 = vst [vmem:[#allocation2 + $0x140] sm:$0xff] %v20568_v29  ;;  %v818_v50 = vmax.f32 %v792_v62, 0.0  ;;  %v795_v18 = vadd.f32 %v20371_v43, %v794_v51  ;;  %v19664_v62 = vld [vmem:[%s24287_s3 + $0x10] sm:$0xff]  }
 0x108   : > { %v876_v5 = vrot.slane %v24347_v31, 7  ;;  %613 = vst [vmem:[#allocation2 + $0xc8] sm:$0xff] %v20559_v40  ;;  %17418 = vmatprep.mubr.bf16.mxu1 %v20559_v40  ;;  %v4004_v31 = vshrl.u32 %v20556_v27, 16  ;;  %v2399_v22 = vshrl.u32 %v20564_v24, 16  ;;  %v24297_v1 = vshll.u32 %v20422_v57, 16 }
 0x109   : > { %612 = vst [vmem:[#allocation2 + $0xb0] sm:$0xff] %v20566_v28  ;;  %17143 = vmatmul.mubr.bf16.gmra.mrb[28].mxu0 %v20566_v28  ;;  %17419 = vmatmul.mubr.bf16.vlgmr.msra.gmra.mrb[16].mxu1 %v20470_v15  ;;  %v888_v61 = vrot.slane %v886_v52, 7  ;;  %v821_v37 = vmax.f32 %v803_v48, 0.0  ;;  %v2387_v43 = vshrl.u32 %v20578_v54, 16  ;;  %v819_v27 = vmax.f32 %v795_v18, 0.0 }
 0x10a   : > { %17159 = vmatpush3.bf16.msra.mxu0 %v19659_v26  ;;  %17435 = vmatpush3.bf16.msra.mxu1 %v20334_v36  ;;  %v2068_v24 = vld [vmem:[#allocation2 + $0x88] sm:$0x1]  ;;  %v2143_v52 = vshll.u32 %v2070_v7, 16  ;;  %v889_v26 = vshll.u32 %v20413_v42, 16  ;;  %v24293_v36 = vshrl.u32 %v20468_v16, 16  ;;  %v879_v51 = vor.u32 %v24297_v1, %v876_v5 }
 0x10b   : > { %17422 = vmatprep.mubr.bf16.mxu1 %v20461_v59  ;;  %17160 = vmatprep.subr.bf16.mxu0 %v19661_v39  ;;  %v829_v48 = vpack.c.bf16 %v821_v37, %v820_v30  ;;  %v3645_v35 = vld [vmem:[#allocation2 + $0x178] sm:$0x1]  ;;  %v20608_v49 = vpack.c.bf16 %v819_v27, %v818_v50  ;;  %v3939_v54 = vld [vmem:[#allocation2 + $0x168] sm:$0x80]  ;;  %v24348_v42 = vshll.u32 %v20507_v38, 16  ;;  %v24349_v5 = vshll.u32 %v20524_v33, 16 }
 0x10c   : > { %17436 = vmatprep.subr.bf16.mxu1 %v19662_v34  ;;  %17162 = vmatprep.mubr.bf16.mxu0 %v868_v58  ;;  %v891_v7 = vor.u32 %v889_v26, %v888_v61  ;;  %v19665_v58 = vld [vmem:[%s24287_s3 + $0x88] sm:$0xff]   ;;  %v20623_v50 = vrot.slane %v3726_v4, 1  ;;  %v2131_v61 = vshll.u32 %v2068_v24, 16  ;;  %v900_v38 = vrot.slane %v24293_v36, 7  ;;  %v19666_v37 = vld [vmem:[%s24287_s3 + $0x18] sm:$0xff]   ;;  %v19667_v4 = vld [vmem:[%s24287_s3 + $0x90] sm:$0xff]  }
 0x10d   : > { %838 = vst [vmem:[#allocation2 + $0x188] sm:$0xff] %v829_v48  ;;  %v20613_v18 = vrot.slane %v24348_v42, 1  ;;  %837 = vst [vmem:[#allocation2 + $0x170] sm:$0xff] %v20608_v49  ;;  %v20621_v30 = vrot.slane %v24349_v5, 1  ;;  %v20634_v27 = vrot.slane %v4004_v31, 7  ;;  %v20636_v26 = vrot.slane %v2399_v22, 7 }
 0x10e   : > { %17161 = vmatpush3.bf16.msra.mxu0 %v19661_v39  ;;  %17437 = vmatpush3.bf16.msra.mxu1 %v19662_v34  ;;  %v20625_v39 = vrot.slane %v3992_v19, 7  ;;  %v880_v34 = vsel %vm856_vm1, %v20342_v63, %v879_v51  ;;  %v3941_v33 = vld [vmem:[#allocation2 + $0x180] sm:$0x80]  ;;  %v3738_v19 = vshll.u32 %v3645_v35, 16  ;;  %v4016_v24 = vshrl.u32 %v3939_v54, 16 }
 0x10f   : > { %17178 = vmatprep.subr.bf16.mxu0 %v19663_v55  ;;  %17438 = vmatprep.subr.bf16.mxu1 %v19664_v62  ;;  %24350 = vst [vmem:[#allocation30_spill] sm:$0xff] %v20636_v26  ;;  %v19668_v63 = vld [vmem:[%s24287_s3 + $0x20] sm:$0xff]   ;;  %v20645_v48 = vrot.slane %v2143_v52, 1  ;;  %v4402_v31 = vld [vmem:[#allocation2 + $0xe8] sm:$0x1]  ;;  %v20647_v51 = vrot.slane %v2387_v43, 7  ;;  %v892_v5 = vsel %vm856_vm1, %v20337_v44, %v891_v7 }
 0x110   : > { %v24296_v22 = vshll.u32 %v20468_v16, 16  ;;  %v912_v42 = vrot.slane %v24292_v23, 7  ;;  %v4028_v35 = vshrl.u32 %v3941_v33, 16  ;;  %v20655_v54 = vrot.slane %v2131_v61, 1  ;;  %v20663_v44 = vld [vmem:[#allocation2 + $0x78] sm:$0x80] }
 0x111   : > { %17163 = vmatmul.mubr.bf16.vlgmr.msra.gmra.mrb[16].mxu0 %v880_v34  ;;  %17423 = vmatmul.mubr.bf16.gmra.mrb[20].mxu1 %v20511_v41  ;;  %24351 = vst [vmem:[#allocation31_spill] sm:$0xff] %v20645_v48  ;;  %24352 = vst [vmem:[#allocation32_spill] sm:$0xff] %v20647_v51  ;;  %v24294_v52 = vshll.u32 %v20459_v32, 16  ;;  %v24295_v43 = vshrl.u32 %v20509_v56, 16  ;;  %v4425_v23 = vshll.u32 %v4402_v31, 16  ;;  %v934_v7 = vshrl.u32 %v20502_v0, 16 }
 0x112   : > { %17179 = vmatpush3.bf16.msra.mxu0 %v19663_v55  ;;  %17439 = vmatpush3.bf16.msra.mxu1 %v19664_v62  ;;  %v903_v34 = vor.u32 %v24296_v22, %v900_v38  ;;  %v4404_v55 = vld [vmem:[#allocation2 + $0x100] sm:$0x1]  ;;  %v20661_v62 = vrot.slane %v3738_v19, 1  ;;  %v24298_v61 = vshrl.u32 %v20559_v40, 16  ;;  %v19670_v38 = vld [vmem:[%s24287_s3 + $0x28] sm:$0xff]   ;;  %v20675_v19 = vrot.slane %v4016_v24, 7 }
 0x113   : > { %17166 = vmatprep.mubr.bf16.mxu0 %v892_v5  ;;  %17426 = vmatprep.mubr.bf16.mxu1 %v20504_v47  ;;  %v915_v33 = vor.u32 %v24294_v52, %v912_v42  ;;  %v19669_v5 = vld [vmem:[%s24287_s3 + $0x98] sm:$0xff]   ;;  %v20677_v31 = vrot.slane %v4028_v35, 7  ;;  %v4437_v36 = vshll.u32 %v4404_v55, 16  ;;  %v2411_v42 = vshrl.u32 %v20663_v44, 16  ;;  %v19671_v24 = vld [vmem:[%s24287_s3 + $0xa0] sm:$0xff]   ;;  %v19672_v35 = vld [vmem:[%s24287_s3 + $0x30] sm:$0xff]  }
 0x114   : > { %17180 = vmatprep.subr.bf16.mxu0 %v19665_v58  ;;  %17440 = vmatprep.subr.bf16.mxu1 %v19666_v37  ;;  %v20692_v55 = vrot.slane %v4425_v23, 1  ;;  %v936_v22 = vrot.slane %v934_v7, 7  ;;  %v3221_v44 = vshrl.u32 %v20470_v15, 16  ;;  %v937_v23 = vshll.u32 %v20502_v0, 16  ;;  %v19673_v0 = vld [vmem:[%s24287_s3 + $0xa8] sm:$0xff]  }
 0x115   : > { %v20700_v1 = vrot.slane %v4437_v36, 1  ;;  %v24299_v7 = vshll.u32 %v20559_v40, 16  ;;  %v20716_v26 = vld [vmem:[#allocation2 + $0xf0] sm:$0x80]  ;;  %v24300_v51 = vshll.u32 %v20566_v28, 16 }
 0x116   : > { %17181 = vmatpush3.bf16.msra.mxu0 %v19665_v58  ;;  %17441 = vmatpush3.bf16.msra.mxu1 %v19666_v37  ;;  %v924_v58 = vrot.slane %v24295_v43, 7  ;;  %v904_v37 = vsel %vm856_vm1, %v20346_v2, %v903_v34  ;;  %24353 = vst [vmem:[#allocation33_spill] sm:$0xff] %v20692_v55  ;;  %v2366_v43 = vld [vmem:[#allocation2 + $0x90] sm:$0x80]  ;;  %v3211_v2 = vrot.slane %v24298_v61, 7  ;;  %v916_v34 = vsel %vm856_vm1, %v20348_v3, %v915_v33  ;;  %v19674_v61 = vld [vmem:[%s24287_s3 + $0x38] sm:$0xff]  }
 0x117   : > { %17182 = vmatprep.subr.bf16.mxu0 %v19667_v4  ;;  %17442 = vmatprep.subr.bf16.mxu1 %v19668_v63  ;;  %24354 = vst [vmem:[#allocation34_spill] sm:$0xff] %v20700_v1  ;;  %v2072_v3 = vld [vmem:[#allocation2 + $0xb8] sm:$0x1]  ;;  %v3233_v33 = vshrl.u32 %v20461_v59, 16  ;;  %v2423_v52 = vshrl.u32 %v2366_v43, 16 }
 0x118   : > { %v3214_v36 = vor.u32 %v24299_v7, %v3211_v2  ;;  %v3236_v7 = vshll.u32 %v20461_v59, 16  ;;  %v2155_v43 = vshll.u32 %v2072_v3, 16 }
 0x119   : > { %17167 = vmatmul.mubr.bf16.gmra.mrb[20].mxu0 %v904_v37  ;;  %17427 = vmatmul.mubr.bf16.gmra.mrb[24].mxu1 %v20568_v29  ;;  %v2074_v37 = vld [vmem:[#allocation2 + $0xd0] sm:$0x1]  ;;  %v3235_v1 = vrot.slane %v3233_v33, 7 }
 0x11a   : > { %17183 = vmatpush3.bf16.msra.mxu0 %v19667_v4  ;;  %17443 = vmatpush3.bf16.msra.mxu1 %v19668_v63  ;;  %v24355_v4 = vshll.u32 %v20509_v56, 16  ;;  %v3215_v59 = vsel %vm856_vm1, %v20373_v45, %v3214_v36 }
 0x11b   : > { %17170 = vmatprep.mubr.bf16.mxu0 %v916_v34  ;;  %17430 = vmatprep.mubr.bf16.mxu1 %v20561_v25  ;;  %v939_v34 = vor.u32 %v937_v23, %v936_v22  ;;  %v20719_v22 = vld [vmem:[#allocation2 + $0xd8] sm:$0x80]  ;;  %v3223_v23 = vrot.slane %v3221_v44, 7  ;;  %v19676_v44 = vld [vmem:[%s24287_s3 + $0x80] sm:$0xff]  }
 0x11c   : > { %17184 = vmatprep.subr.bf16.mxu0 %v19669_v5  ;;  %17444 = vmatprep.subr.bf16.mxu1 %v19670_v38  ;;  %v927_v63 = vor.u32 %v24355_v4, %v924_v58  ;;  %v3224_v58 = vshll.u32 %v20470_v15, 16  ;;  %v19675_v15 = vld [vmem:[%s24287_s3 + $0xb0] sm:$0xff]   ;;  %v2459_v36 = vshrl.u32 %v20719_v22, 16  ;;  %v24361_v22 = vshll.u32 %v20422_v57, 16 }
 0x11e   : > { %17185 = vmatpush3.bf16.msra.mxu0 %v19669_v5  ;;  %17445 = vmatpush3.bf16.msra.mxu1 %v19670_v38  ;;  %v2167_v5 = vshll.u32 %v2074_v37, 16  ;;  %v24356_v38 = vshrl.u32 %v20566_v28, 16  ;;  %v928_v4 = vsel %vm856_vm1, %v20354_v9, %v927_v63  ;;  %v2370_v37 = vld [vmem:[#allocation2 + $0xc0] sm:$0x80]  ;;  %v940_v9 = vsel %vm856_vm1, %v20350_v6, %v939_v34  ;;  %v20738_v63 = vld [vmem:[#allocation2 + $0x38] sm:$0xff] }
 0x11f   : > { %17186 = vmatprep.subr.bf16.mxu0 %v19671_v24  ;;  %17446 = vmatprep.subr.bf16.mxu1 %v19672_v35  ;;  %v3245_v6 = vshrl.u32 %v20511_v41, 16  ;;  %v3226_v33 = vor.u32 %v3224_v58, %v3223_v23  ;;  %v2368_v34 = vld [vmem:[#allocation2 + $0xa8] sm:$0x80]  ;;  %v24309_v58 = vshll.u32 %v20738_v63, 16  ;;  %v4406_v23 = vld [vmem:[#allocation2 + $0x118] sm:$0x1] }
 0x120   : > { %v948_v2 = vrot.slane %v24356_v38, 7  ;;  %v20740_v3 = vrot.slane %v2167_v5, 1  ;;  %v20742_v38 = vrot.slane %v2411_v42, 7  ;;  %v19677_v42 = vld [vmem:[%s24287_s3 + $0xb8] sm:$0xff]   ;;  %v20754_v5 = vrot.slane %v2155_v43, 1 }
 0x121   : > { %17171 = vmatmul.mubr.bf16.gmra.mrb[24].mxu0 %v928_v4  ;;  %17431 = vmatmul.mubr.bf16.gmra.mrb[28].mxu1 %v20608_v49  ;;  %v3238_v4 = vor.u32 %v3236_v7, %v3235_v1  ;;  %v2435_v43 = vshrl.u32 %v2368_v34, 16  ;;  %v3227_v1 = vsel %vm856_vm1, %v20356_v10, %v3226_v33  ;;  %v4408_v7 = vld [vmem:[#allocation2 + $0x130] sm:$0x1]  ;;  %v20788_v34 = vrot.slane %v2459_v36, 7 }
 0x122   : > { %17187 = vmatpush3.bf16.msra.mxu0 %v19671_v24  ;;  %17447 = vmatpush3.bf16.msra.mxu1 %v19672_v35  ;;  %24357 = vst [vmem:[#allocation35_spill] sm:$0xff] %v20740_v3  ;;  %24358 = vst [vmem:[#allocation36_spill] sm:$0xff] %v20742_v38  ;;  %v20744_v24 = vrot.slane %v2423_v52, 7  ;;  %v4716_v35 = vshrl.u32 %v20716_v26, 16  ;;  %v951_v45 = vor.u32 %v24300_v51, %v948_v2  ;;  %v2447_v52 = vshrl.u32 %v2370_v37, 16  ;;  %v19678_v2 = vld [vmem:[%s24287_s3 + $0x88] sm:$0xff]  }
 0x123   : > { %17174 = vmatprep.mubr.bf16.mxu0 %v940_v9  ;;  %17450 = vmatprep.mubr.bf16.mxu1 %v3215_v59  ;;  %24360 = vst [vmem:[#allocation38_spill] sm:$0xff] %v20754_v5  ;;  %v3257_v26 = vshrl.u32 %v20504_v47, 16  ;;  %v1318_v9 = vrot.slane %v24361_v22, 1  ;;  %v3247_v59 = vrot.slane %v3245_v6, 7  ;;  %v3248_v37 = vshll.u32 %v20511_v41, 16  ;;  %v19679_v41 = vld [vmem:[%s24287_s3 + $0xc0] sm:$0xff]  }
 0x124   : > { %24359 = vst [vmem:[#allocation37_spill] sm:$0xff] %v20744_v24  ;;  %17188 = vmatprep.subr.bf16.mxu0 %v19673_v0  ;;  %17448 = vmatprep.subr.bf16.mxu1 %v19674_v61  ;;  %v3260_v51 = vshll.u32 %v20504_v47, 16  ;;  %v1312_v22 = vsel %vm1300_vm2, %v20399_v20, %v20416_v53  ;;  %v4449_v6 = vshll.u32 %v4406_v23, 16  ;;  %v3239_v47 = vsel %vm856_vm1, %v20358_v11, %v3238_v4  ;;  %v4703_v23 = vld [vmem:[#allocation2 + $0x120] sm:$0x80]  ;;  %v24418_v24 = vld [vmem:[#allocation13_spill] sm:$0xff] }
 0x125   : > { %v3259_v10 = vrot.slane %v3257_v26, 7  ;;  %v20782_v20 = vrot.slane %v2435_v43, 7  ;;  %v20784_v53 = vrot.slane %v2447_v52, 7  ;;  %v20786_v33 = vrot.slane %v4716_v35, 7  ;;  %24365 = vst [vmem:[#allocation42_spill] sm:$0xff] %v20788_v34 }
 0x126   : > { %17189 = vmatpush3.bf16.msra.mxu0 %v19673_v0  ;;  %17449 = vmatpush3.bf16.msra.mxu1 %v19674_v61  ;;  %v952_v61 = vsel %vm856_vm1, %v20375_v46, %v951_v45  ;;  %v4701_v0 = vld [vmem:[#allocation2 + $0x108] sm:$0x80]  ;;  %v19680_v46 = vld [vmem:[%s24287_s3 + $0x90] sm:$0xff]   ;;  %v1330_v45 = vrot.slane %v24309_v58, 1  ;;  %v3269_v26 = vshrl.u32 %v20568_v29, 16  ;;  %v1326_v4 = vshrl.u32 %v20738_v63, 16 }
 0x127   : > { %17190 = vmatprep.subr.bf16.mxu0 %v19675_v15  ;;  %17466 = vmatprep.subr.bf16.mxu1 %v19676_v44  ;;  %24362 = vst [vmem:[#allocation39_spill] sm:$0xff] %v20782_v20  ;;  %24363 = vst [vmem:[#allocation40_spill] sm:$0xff] %v20784_v53  ;;  %v4728_v43 = vshrl.u32 %v4701_v0, 16  ;;  %v3281_v52 = vshrl.u32 %v20561_v25, 16  ;;  %v3262_v36 = vor.u32 %v3260_v51, %v3259_v10  ;;  %v3284_v10 = vshll.u32 %v20561_v25, 16  ;;  %v20970_v58 = vld [vmem:[#allocation2 + $0x158] sm:$0xff] }
 0x128   : > { %24364 = vst [vmem:[#allocation41_spill] sm:$0xff] %v20786_v33  ;;  %v1331_v35 = vor.u32 %v1330_v45, %v1326_v4  ;;  %v24370_v45 = vshll.u32 %v20459_v32, 16  ;;  %v21048_v33 = vld [vmem:[#allocation2 + $0x38] sm:$0xff] }
 0x129   : > { %17175 = vmatmul.mubr.bf16.gmra.mrb[28].mxu0 %v952_v61  ;;  %17451 = vmatmul.mubr.bf16.vlgmr.msra.gmra.mrb[16].mxu1 %v3227_v1  ;;  %v4461_v61 = vshll.u32 %v4408_v7, 16  ;;  %v19681_v1 = vld [vmem:[%s24287_s3 + $0xc8] sm:$0xff]   ;;  %v24368_v7 = vshll.u32 %v20468_v16, 16  ;;  %v3263_v25 = vsel %vm856_vm1, %v20395_v14, %v3262_v36  ;;  %v24433_v5 = vshrl.u32 %v21048_v33, 16 }
 0x12a   : > { %17191 = vmatpush3.bf16.msra.mxu0 %v19675_v15  ;;  %17467 = vmatpush3.bf16.msra.mxu1 %v19676_v44  ;;  %v24366_v15 = vshrl.u32 %v20422_v57, 16  ;;  %v3250_v44 = vor.u32 %v3248_v37, %v3247_v59  ;;  %v19682_v57 = vld [vmem:[%s24287_s3 + $0x98] sm:$0xff]   ;;  %v3272_v59 = vshll.u32 %v20568_v29, 16  ;;  %v19683_v29 = vld [vmem:[%s24287_s3 + $0xd0] sm:$0xff]  }
 0x12b   : > { %17454 = vmatprep.mubr.bf16.mxu1 %v3239_v47  ;;  %17192 = vmatprep.subr.bf16.mxu0 %v19677_v42  ;;  %v1342_v0 = vrot.slane %v24368_v7, 1  ;;  %v3283_v47 = vrot.slane %v3281_v52, 7  ;;  %v4707_v52 = vld [vmem:[#allocation2 + $0x150] sm:$0x80]  ;;  %v19685_v7 = vld [vmem:[%s24287_s3 + $0xd8] sm:$0xff]   ;;  %v21167_v48 = vrot.slane %v24433_v5, 7 }
 0x12c   : > { %17468 = vmatprep.subr.bf16.mxu1 %v19678_v2  ;;  %17194 = vmatprep.mubr.bf16.mxu0 %v1312_v22  ;;  %v1319_v11 = vor.u32 %v1318_v9, %v24366_v15  ;;  %v20803_v9 = vrot.slane %v4449_v6, 1  ;;  %v3251_v51 = vsel %vm856_vm1, %v20388_v60, %v3250_v44  ;;  %v4410_v22 = vld [vmem:[#allocation2 + $0x148] sm:$0x1]  ;;  %v19684_v6 = vld [vmem:[%s24287_s3 + $0xa0] sm:$0xff]   ;;  %v1336_v60 = vsel %vm1300_vm2, %v1331_v35, %v20360_v12  ;;  %v19707_v5 = vld [vmem:[%s24287_s3 + $0x130] sm:$0xff]  }
 0x12d   : > { %v4412_v15 = vld [vmem:[#allocation2 + $0x160] sm:$0x1]  ;;  %v20829_v44 = vrot.slane %v4728_v43, 7  ;;  %v24372_v12 = vshrl.u32 %v20468_v16, 16  ;;  %v4473_v35 = vshll.u32 %v4410_v22, 16  ;;  %v19686_v16 = vld [vmem:[%s24287_s3 + $0xa8] sm:$0xff]  }
 0x12e   : > { %17193 = vmatpush3.bf16.msra.mxu0 %v19677_v42  ;;  %17469 = vmatpush3.bf16.msra.mxu1 %v19678_v2  ;;  %24367 = vst [vmem:[#allocation43_spill] sm:$0xff] %v20803_v9  ;;  %v4740_v42 = vshrl.u32 %v4703_v23, 16  ;;  %v3271_v2 = vrot.slane %v3269_v26, 7  ;;  %v1324_v37 = vsel %vm1300_vm2, %v1319_v11, %v20352_v8  ;;  %v20819_v8 = vrot.slane %v4461_v61, 1  ;;  %v20827_v11 = vld [vmem:[#allocation2 + $0x98] sm:$0xff]  ;;  %v24435_v9 = vld [vmem:[#allocation20_spill] sm:$0xff] }
 0x12f   : > { %17210 = vmatprep.subr.bf16.mxu0 %v19679_v41  ;;  %17470 = vmatprep.subr.bf16.mxu1 %v19680_v46  ;;  %v1354_v26 = vrot.slane %v24370_v45, 1  ;;  %24371 = vst [vmem:[#allocation45_spill] sm:$0xff] %v20829_v44  ;;  %v4705_v23 = vld [vmem:[#allocation2 + $0x138] sm:$0x80]  ;;  %v4485_v36 = vshll.u32 %v4412_v15, 16  ;;  %v24375_v22 = vshll.u32 %v20509_v56, 16 }
 0x130   : > { %24369 = vst [vmem:[#allocation44_spill] sm:$0xff] %v20819_v8  ;;  %v3274_v61 = vor.u32 %v3272_v59, %v3271_v2  ;;  %v20834_v14 = vrot.slane %v4740_v42, 7  ;;  %v24305_v59 = vshll.u32 %v20827_v11, 16  ;;  %v4752_v42 = vshrl.u32 %v4705_v23, 16  ;;  %v21039_v44 = vld [vmem:[#allocation2 + $0x188] sm:$0xff] }
 0x131   : > { %17195 = vmatmul.mubr.bf16.vlgmr.msra.gmra.mrb[16].mxu0 %v1324_v37  ;;  %17455 = vmatmul.mubr.bf16.gmra.mrb[20].mxu1 %v3251_v51  ;;  %v24374_v37 = vshrl.u32 %v20459_v32, 16  ;;  %v3286_v51 = vor.u32 %v3284_v10, %v3283_v47  ;;  %v3296_v2 = vshll.u32 %v20608_v49, 16  ;;  %v1366_v10 = vrot.slane %v24375_v22, 1  ;;  %v19687_v47 = vld [vmem:[%s24287_s3 + $0xe0] sm:$0xff]  }
 0x132   : > { %17211 = vmatpush3.bf16.msra.mxu0 %v19679_v41  ;;  %17471 = vmatpush3.bf16.msra.mxu1 %v19680_v46  ;;  %v3293_v41 = vshrl.u32 %v20608_v49, 16  ;;  %v1343_v46 = vor.u32 %v1342_v0, %v24372_v12  ;;  %24373 = vst [vmem:[#allocation46_spill] sm:$0xff] %v20834_v14  ;;  %v3275_v0 = vsel %vm856_vm1, %v20431_v21, %v3274_v61  ;;  %v19688_v49 = vld [vmem:[%s24287_s3 + $0xb0] sm:$0xff]   ;;  %v24377_v21 = vld [vmem:[#allocation16_spill] sm:$0xff]  ;;  %v24378_v15 = vshll.u32 %v20559_v40, 16 }
 0x133   : > { %17198 = vmatprep.mubr.bf16.mxu0 %v1336_v60  ;;  %17458 = vmatprep.mubr.bf16.mxu1 %v3263_v25  ;;  %v1355_v43 = vor.u32 %v1354_v26, %v24374_v37  ;;  %v20858_v60 = vld [vmem:[#allocation2 + $0xe0] sm:$0xff]  ;;  %v20860_v25 = vrot.slane %v4473_v35, 1  ;;  %v3287_v45 = vsel %vm856_vm1, %v24377_v21, %v3286_v51  ;;  %v1378_v26 = vrot.slane %v24305_v59, 1  ;;  %v4709_v51 = vld [vmem:[#allocation2 + $0x168] sm:$0x80]  ;;  %v24385_v21 = vld [vmem:[#allocation6_spill] sm:$0xff] }
 0x134   : > { %17212 = vmatprep.subr.bf16.mxu0 %v19681_v1  ;;  %17472 = vmatprep.subr.bf16.mxu1 %v19682_v57  ;;  %v1348_v32 = vsel %vm1300_vm2, %v1343_v46, %v20364_v17  ;;  %v3651_v23 = vrot.slane %v24378_v15, 1  ;;  %v20870_v12 = vld [vmem:[#allocation2 + $0x20] sm:$0xff]  ;;  %v20872_v46 = vld [vmem:[#allocation2 + $0xf8] sm:$0xff]  ;;  %v24308_v35 = vshrl.u32 %v20827_v11, 16  ;;  %v24303_v37 = vshll.u32 %v20858_v60, 16 }
 0x135   : > { %24376 = vst [vmem:[#allocation47_spill] sm:$0xff] %v20860_v25  ;;  %v1360_v17 = vsel %vm1300_vm2, %v1355_v43, %v20362_v13  ;;  %v24381_v13 = vshrl.u32 %v20509_v56, 16  ;;  %v4416_v43 = vld [vmem:[#allocation2 + $0x190] sm:$0x1]  ;;  %v19689_v56 = vld [vmem:[%s24287_s3 + $0xe8] sm:$0xff]   ;;  %v24302_v22 = vshll.u32 %v20872_v46, 16 }
 0x136   : > { %17213 = vmatpush3.bf16.msra.mxu0 %v19681_v1  ;;  %17473 = vmatpush3.bf16.msra.mxu1 %v19682_v57  ;;  %v4764_v1 = vshrl.u32 %v4707_v52, 16  ;;  %v3295_v57 = vrot.slane %v3293_v41, 7  ;;  %v4414_v41 = vld [vmem:[#allocation2 + $0x178] sm:$0x1]  ;;  %v24413_v53 = vshrl.u32 %v20858_v60, 16  ;;  %v24419_v38 = vshll.u32 %v20827_v11, 16 }
 0x137   : > { %17214 = vmatprep.subr.bf16.mxu0 %v19683_v29  ;;  %17474 = vmatprep.subr.bf16.mxu1 %v19684_v6  ;;  %v1367_v61 = vor.u32 %v1366_v10, %v24381_v13  ;;  %v4497_v10 = vshll.u32 %v4414_v41, 16  ;;  %v20904_v13 = vld [vmem:[#allocation2 + $0x110] sm:$0xff]  ;;  %v4776_v41 = vshrl.u32 %v4709_v51, 16  ;;  %v24420_v25 = vshrl.u32 %v21039_v44, 16 }
 0x138   : > { %v3298_v52 = vor.u32 %v3296_v2, %v3295_v57  ;;  %v19690_v2 = vld [vmem:[%s24287_s3 + $0xb8] sm:$0xff]   ;;  %v24301_v57 = vshrl.u32 %v20870_v12, 16  ;;  %v24432_v55 = vshll.u32 %v20858_v60, 16 }
 0x139   : > { %17199 = vmatmul.mubr.bf16.gmra.mrb[20].mxu0 %v1348_v32  ;;  %17459 = vmatmul.mubr.bf16.gmra.mrb[24].mxu1 %v3275_v0  ;;  %v4711_v32 = vld [vmem:[#allocation2 + $0x180] sm:$0x80]  ;;  %v21101_v8 = vrot.slane %v24420_v25, 7  ;;  %v24421_v25 = vshll.u32 %v20870_v12, 16 }
 0x13a   : > { %17215 = vmatpush3.bf16.msra.mxu0 %v19683_v29  ;;  %17475 = vmatpush3.bf16.msra.mxu1 %v19684_v6  ;;  %v20874_v29 = vrot.slane %v4485_v36, 1  ;;  %v20876_v6 = vrot.slane %v4752_v42, 7  ;;  %v1379_v36 = vor.u32 %v1378_v26, %v24308_v35  ;;  %v24382_v42 = vshrl.u32 %v20559_v40, 16  ;;  %v24386_v26 = vld [vmem:[#allocation27_spill] sm:$0xff]  ;;  %v19697_v35 = vld [vmem:[%s24287_s3 + $0x108] sm:$0xff]  }
 0x13b   : > { %17202 = vmatprep.mubr.bf16.mxu0 %v1360_v17  ;;  %17462 = vmatprep.mubr.bf16.mxu1 %v3287_v45  ;;  %v4509_v40 = vshll.u32 %v4416_v43, 16  ;;  %v20896_v17 = vrot.slane %v4764_v1, 7  ;;  %v1372_v45 = vsel %vm1300_vm2, %v1367_v61, %v24385_v21  ;;  %v3299_v15 = vsel %vm856_vm1, %v24386_v26, %v3298_v52  ;;  %v24387_v43 = vld [vmem:[#allocation9_spill] sm:$0xff]  ;;  %v24388_v21 = vld [vmem:[#allocation10_spill] sm:$0xff] }
 0x13c   : > { %24379 = vst [vmem:[#allocation16_spill] sm:$0xff] %v20874_v29  ;;  %24380 = vst [vmem:[#allocation48_spill] sm:$0xff] %v20876_v6  ;;  %17216 = vmatprep.subr.bf16.mxu0 %v19685_v7  ;;  %17476 = vmatprep.subr.bf16.mxu1 %v19686_v16  ;;  %v3652_v0 = vor.u32 %v3651_v23, %v24382_v42  ;;  %v3663_v23 = vrot.slane %v24303_v37, 1  ;;  %v24307_v42 = vshrl.u32 %v20858_v60, 16  ;;  %v4788_v1 = vshrl.u32 %v4711_v32, 16  ;;  %v19691_v26 = vld [vmem:[%s24287_s3 + $0xf0] sm:$0xff]  }
 0x13d   : > { %24384 = vst [vmem:[#allocation49_spill] sm:$0xff] %v20896_v17  ;;  %v1384_v61 = vsel %vm1300_vm2, %v1379_v36, %v24387_v43  ;;  %v1606_v51 = vrot.slane %v24301_v57, 7  ;;  %v24311_v36 = vshll.u32 %v20904_v13, 16  ;;  %v20930_v43 = vrot.slane %v4509_v40, 1  ;;  %v20961_v37 = vld [vmem:[#allocation2 + $0x80] sm:$0xff]  ;;  %v24406_v17 = vld [vmem:[#allocation7_spill] sm:$0xff] }
 0x13e   : > { %17217 = vmatpush3.bf16.msra.mxu0 %v19685_v7  ;;  %17477 = vmatpush3.bf16.msra.mxu1 %v19686_v16  ;;  %v24383_v7 = vshll.u32 %v20566_v28, 16  ;;  %v3657_v52 = vsel %vm1300_vm2, %v3652_v0, %v24388_v21  ;;  %v20926_v0 = vld [vmem:[#allocation2 + $0x128] sm:$0xff]  ;;  %v3664_v21 = vor.u32 %v3663_v23, %v24307_v42  ;;  %v24304_v57 = vshll.u32 %v20870_v12, 16  ;;  %v19693_v23 = vld [vmem:[%s24287_s3 + $0xf8] sm:$0xff]  }
 0x13f   : > { %17218 = vmatprep.subr.bf16.mxu0 %v19687_v47  ;;  %17478 = vmatprep.subr.bf16.mxu1 %v19688_v49  ;;  %24391 = vst [vmem:[#allocation27_spill] sm:$0xff] %v20930_v43 }
 0x140   : > { %v1390_v16 = vrot.slane %v24383_v7, 1  ;;  %v20907_v7 = vld [vmem:[#allocation2 + $0x50] sm:$0xff] }
 0x141   : > { %17203 = vmatmul.mubr.bf16.gmra.mrb[24].mxu0 %v1372_v45  ;;  %17463 = vmatmul.mubr.bf16.gmra.mrb[28].mxu1 %v3299_v15  ;;  %v19692_v45 = vld [vmem:[%s24287_s3 + $0xc0] sm:$0xff]   ;;  %v20928_v15 = vrot.slane %v4497_v10, 1  ;;  %v1609_v10 = vor.u32 %v24304_v57, %v1606_v51  ;;  %v24394_v57 = vld [vmem:[#allocation11_spill] sm:$0xff]  ;;  %v24398_v51 = vshll.u32 %v20738_v63, 16 }
 0x142   : > { %17219 = vmatpush3.bf16.msra.mxu0 %v19687_v47  ;;  %17479 = vmatpush3.bf16.msra.mxu1 %v19688_v49  ;;  %v3675_v47 = vrot.slane %v24302_v22, 1  ;;  %v24389_v49 = vshrl.u32 %v20566_v28, 16  ;;  %v24310_v28 = vshrl.u32 %v20907_v7, 16  ;;  %v24312_v22 = vshll.u32 %v20926_v0, 16 }
 0x143   : > { %17206 = vmatprep.mubr.bf16.mxu0 %v1384_v61  ;;  %17482 = vmatprep.mubr.bf16.mxu1 %v3657_v52  ;;  %24390 = vst [vmem:[#allocation6_spill] sm:$0xff] %v20928_v15  ;;  %v24306_v61 = vshrl.u32 %v20872_v46, 16  ;;  %v20939_v52 = vrot.slane %v4776_v41, 7  ;;  %v20952_v41 = vld [vmem:[#allocation2 + $0x140] sm:$0xff] }
 0x144   : > { %v1391_v32 = vor.u32 %v1390_v16, %v24389_v49  ;;  %17220 = vmatprep.subr.bf16.mxu0 %v19689_v56  ;;  %17480 = vmatprep.subr.bf16.mxu1 %v19690_v2  ;;  %v20937_v16 = vld [vmem:[#allocation2 + $0x68] sm:$0xff] }
 0x145   : > { %24392 = vst [vmem:[#allocation9_spill] sm:$0xff] %v20939_v52  ;;  %v3676_v40 = vor.u32 %v3675_v47, %v24306_v61  ;;  %v19694_v49 = vld [vmem:[%s24287_s3 + $0xc8] sm:$0xff]   ;;  %v3687_v47 = vrot.slane %v24311_v36, 1  ;;  %v24395_v61 = vld [vmem:[#allocation12_spill] sm:$0xff]  ;;  %v24397_v36 = vld [vmem:[#allocation15_spill] sm:$0xff]  ;;  %v24401_v63 = vshrl.u32 %v20937_v16, 16 }
 0x146   : > { %17221 = vmatpush3.bf16.msra.mxu0 %v19689_v56  ;;  %17481 = vmatpush3.bf16.msra.mxu1 %v19690_v2  ;;  %v20954_v56 = vrot.slane %v4788_v1, 7  ;;  %v1618_v2 = vrot.slane %v1326_v4, 7  ;;  %v1396_v59 = vsel %vm1300_vm2, %v1391_v32, %v24394_v57  ;;  %v3669_v42 = vsel %vm1300_vm2, %v3664_v21, %v24395_v61  ;;  %v19695_v4 = vld [vmem:[%s24287_s3 + $0x100] sm:$0xff]   ;;  %v19696_v57 = vld [vmem:[%s24287_s3 + $0xd0] sm:$0xff]  }
 0x147   : > { %17222 = vmatprep.subr.bf16.mxu0 %v19691_v26  ;;  %17498 = vmatprep.subr.bf16.mxu1 %v19692_v45  ;;  %v1630_v1 = vrot.slane %v24310_v28, 7  ;;  %v24396_v61 = vld [vmem:[#allocation4_spill] sm:$0xff]  ;;  %v24399_v21 = vshrl.u32 %v20904_v13, 16  ;;  %v24407_v14 = vshll.u32 %v20937_v16, 16 }
 0x148   : > { %24393 = vst [vmem:[#allocation10_spill] sm:$0xff] %v20954_v56  ;;  %v1610_v28 = vsel %vm856_vm1, %v24396_v61, %v1609_v10  ;;  %v1621_v32 = vor.u32 %v1618_v2, %v24398_v51  ;;  %v20993_v61 = vld [vmem:[#allocation2 + $0x170] sm:$0xff]  ;;  %v1642_v2 = vrot.slane %v24401_v63, 7  ;;  %v3707_v51 = vshrl.u32 %v20952_v41, 16 }
 0x149   : > { %17207 = vmatmul.mubr.bf16.gmra.mrb[28].mxu0 %v1396_v59  ;;  %17483 = vmatmul.mubr.bf16.vlgmr.msra.gmra.mrb[16].mxu1 %v3669_v42  ;;  %v3681_v59 = vsel %vm1300_vm2, %v3676_v40, %v24397_v36  ;;  %v3699_v42 = vrot.slane %v24312_v22, 1  ;;  %v20995_v36 = vld [vmem:[#allocation2 + $0xb0] sm:$0xff]  ;;  %v20997_v40 = vld [vmem:[#allocation2 + $0xc8] sm:$0xff]  ;;  %v24313_v22 = vshll.u32 %v20961_v37, 16  ;;  %v3719_v56 = vshrl.u32 %v20970_v58, 16 }
 0x14a   : > { %17223 = vmatpush3.bf16.msra.mxu0 %v19691_v26  ;;  %17499 = vmatpush3.bf16.msra.mxu1 %v19692_v45  ;;  %v3688_v26 = vor.u32 %v3687_v47, %v24399_v21  ;;  %v3695_v45 = vshrl.u32 %v20926_v0, 16  ;;  %v24402_v47 = vshll.u32 %v20952_v41, 16  ;;  %v21074_v20 = vrot.slane %v3707_v51, 7 }
 0x14b   : > { %17226 = vmatprep.mubr.bf16.mxu0 %v1610_v28  ;;  %17486 = vmatprep.mubr.bf16.mxu1 %v3681_v59  ;;  %v24400_v28 = vshll.u32 %v20907_v7, 16 }
 0x14c   : > { %17224 = vmatprep.subr.bf16.mxu0 %v19693_v23  ;;  %17500 = vmatprep.subr.bf16.mxu1 %v19694_v49  ;;  %v3711_v21 = vrot.slane %v24402_v47, 1  ;;  %v3700_v10 = vor.u32 %v3699_v42, %v3695_v45  ;;  %v24404_v47 = vld [vmem:[#allocation5_spill] sm:$0xff]  ;;  %v21071_v43 = vrot.slane %v3695_v45, 7 }
 0x14d   : > { %v1633_v59 = vor.u32 %v24400_v28, %v1630_v1  ;;  %v19698_v1 = vld [vmem:[%s24287_s3 + $0xd8] sm:$0xff]   ;;  %v24403_v28 = vshrl.u32 %v20961_v37, 16 }
 0x14e   : > { %17225 = vmatpush3.bf16.msra.mxu0 %v19693_v23  ;;  %17501 = vmatpush3.bf16.msra.mxu1 %v19694_v49  ;;  %v1622_v23 = vsel %vm856_vm1, %v24404_v47, %v1621_v32  ;;  %v24405_v49 = vld [vmem:[#allocation24_spill] sm:$0xff]  ;;  %v19699_v32 = vld [vmem:[%s24287_s3 + $0x110] sm:$0xff]   ;;  %v3712_v47 = vor.u32 %v3711_v21, %v3707_v51  ;;  %v24411_v21 = vshll.u32 %v20993_v61, 16 }
 0x14f   : > { %v1654_v63 = vrot.slane %v24403_v28, 7  ;;  %17242 = vmatprep.subr.bf16.mxu0 %v19695_v4  ;;  %17502 = vmatprep.subr.bf16.mxu1 %v19696_v57  ;;  %v3693_v42 = vsel %vm1300_vm2, %v3688_v26, %v24405_v49  ;;  %v1634_v6 = vsel %vm856_vm1, %v24406_v17, %v1633_v59  ;;  %v1645_v28 = vor.u32 %v24407_v14, %v1642_v2  ;;  %v19700_v26 = vld [vmem:[%s24287_s3 + $0xe0] sm:$0xff]  }
 0x150   : > { %v24408_v17 = vshll.u32 %v20970_v58, 16  ;;  %v24409_v14 = vshrl.u32 %v20827_v11, 16  ;;  %v3731_v49 = vshrl.u32 %v20993_v61, 16  ;;  %v3735_v34 = vrot.slane %v24411_v21, 1  ;;  %v21061_v21 = vld [vmem:[#allocation2 + $0xe0] sm:$0xff] }
 0x151   : > { %17227 = vmatmul.mubr.bf16.vlgmr.msra.gmra.mrb[16].mxu0 %v1622_v23  ;;  %17487 = vmatmul.mubr.bf16.gmra.mrb[20].mxu1 %v3693_v42  ;;  %v24410_v23 = vld [vmem:[#allocation25_spill] sm:$0xff]  ;;  %v1657_v52 = vor.u32 %v24313_v22, %v1654_v63  ;;  %v24414_v63 = vshrl.u32 %v20872_v46, 16  ;;  %v24417_v51 = vld [vmem:[#allocation8_spill] sm:$0xff] }
 0x152   : > { %v3723_v59 = vrot.slane %v24408_v17, 1  ;;  %v1666_v2 = vrot.slane %v24409_v14, 7  ;;  %17243 = vmatpush3.bf16.msra.mxu0 %v19695_v4  ;;  %17503 = vmatpush3.bf16.msra.mxu1 %v19696_v57  ;;  %v3705_v42 = vsel %vm1300_vm2, %v3700_v10, %v24410_v23  ;;  %v21050_v14 = vld [vmem:[#allocation2 + $0x98] sm:$0xff]  ;;  %v24412_v4 = vshrl.u32 %v20995_v36, 16 }
 0x153   : > { %17230 = vmatprep.mubr.bf16.mxu0 %v1634_v6  ;;  %17490 = vmatprep.mubr.bf16.mxu1 %v3705_v42  ;;  %v3950_v10 = vrot.slane %v24413_v53, 7  ;;  %v21059_v22 = vrot.slane %v24414_v63, 7  ;;  %v24415_v17 = vshrl.u32 %v20997_v40, 16  ;;  %v24416_v42 = vshrl.u32 %v20904_v13, 16  ;;  %v21093_v53 = vld [vmem:[#allocation2 + $0xf8] sm:$0xff] }
 0x154   : > { %v1678_v57 = vrot.slane %v24412_v4, 7  ;;  %17244 = vmatprep.subr.bf16.mxu0 %v19697_v35  ;;  %17504 = vmatprep.subr.bf16.mxu1 %v19698_v1  ;;  %v3724_v23 = vor.u32 %v3723_v59, %v3719_v56  ;;  %v21076_v63 = vrot.slane %v3719_v56, 7  ;;  %v21084_v15 = vrot.slane %v3731_v49, 7 }
 0x155   : > { %v21065_v6 = vrot.slane %v24415_v17, 7  ;;  %v21069_v4 = vrot.slane %v24416_v42, 7  ;;  %v19701_v17 = vld [vmem:[%s24287_s3 + $0x118] sm:$0xff]   ;;  %v19702_v42 = vld [vmem:[%s24287_s3 + $0xe8] sm:$0xff]   ;;  %v1646_v56 = vsel %vm856_vm1, %v24417_v51, %v1645_v28  ;;  %v24315_v59 = vshll.u32 %v21050_v14, 16  ;;  %v21104_v51 = vld [vmem:[#allocation2 + $0x110] sm:$0xff] }
 0x156   : > { %17245 = vmatpush3.bf16.msra.mxu0 %v19697_v35  ;;  %17505 = vmatpush3.bf16.msra.mxu1 %v19698_v1  ;;  %v3717_v35 = vsel %vm1300_vm2, %v3712_v47, %v20621_v30  ;;  %v24314_v1 = vshll.u32 %v21048_v33, 16  ;;  %v1658_v29 = vsel %vm856_vm1, %v24418_v24, %v1657_v52  ;;  %v1669_v45 = vor.u32 %v1666_v2, %v24419_v38  ;;  %v19703_v24 = vld [vmem:[%s24287_s3 + $0x120] sm:$0xff]   ;;  %v19704_v38 = vld [vmem:[%s24287_s3 + $0xf0] sm:$0xff]   ;;  %v21134_v28 = vld [vmem:[#allocation2 + $0x128] sm:$0xff] }
 0x157   : > { %17246 = vmatprep.subr.bf16.mxu0 %v19699_v32  ;;  %17506 = vmatprep.subr.bf16.mxu1 %v19700_v26  ;;  %v3729_v30 = vsel %vm1300_vm2, %v3724_v23, %v20623_v50  ;;  %v3736_v11 = vor.u32 %v3735_v34, %v3731_v49  ;;  %v21116_v52 = vrot.slane %v24421_v25, 1  ;;  %v21119_v2 = vld [vmem:[#allocation2 + $0x50] sm:$0xff]  ;;  %v24423_v50 = vshll.u32 %v20907_v7, 16  ;;  %v21136_v47 = vld [vmem:[#allocation2 + $0x68] sm:$0xff] }
 0x158   : > { %24422 = vst [vmem:[#allocation11_spill] sm:$0xff] %v21119_v2  ;;  %v24425_v34 = vshll.u32 %v20961_v37, 16  ;;  %24426 = vst [vmem:[#allocation12_spill] sm:$0xff] %v21136_v47  ;;  %v24428_v25 = vshll.u32 %v21061_v21, 16 }
 0x159   : > { %17231 = vmatmul.mubr.bf16.gmra.mrb[20].mxu0 %v1646_v56  ;;  %17491 = vmatmul.mubr.bf16.gmra.mrb[24].mxu1 %v3717_v35  ;;  %v21123_v23 = vrot.slane %v24423_v50, 1  ;;  %v24424_v56 = vshll.u32 %v20937_v16, 16  ;;  %v24427_v50 = vshll.u32 %v20995_v36, 16 }
 0x15a   : > { %17247 = vmatpush3.bf16.msra.mxu0 %v19699_v32  ;;  %17507 = vmatpush3.bf16.msra.mxu1 %v19700_v26  ;;  %v21131_v49 = vrot.slane %v24425_v34, 1  ;;  %v21140_v32 = vrot.slane %v24314_v1, 1  ;;  %v21144_v26 = vrot.slane %v24315_v59, 1  ;;  %v3953_v34 = vor.u32 %v3950_v10, %v24432_v55  ;;  %v24436_v55 = vld [vmem:[#allocation17_spill] sm:$0xff]  ;;  %v19708_v10 = vld [vmem:[%s24287_s3 + $0x100] sm:$0xff]  }
 0x15b   : > { %v21127_v35 = vrot.slane %v24424_v56, 1  ;;  %17234 = vmatprep.mubr.bf16.mxu0 %v1658_v29  ;;  %17494 = vmatprep.mubr.bf16.mxu1 %v3729_v30  ;;  %v21148_v56 = vrot.slane %v24427_v50, 1  ;;  %v21153_v29 = vrot.slane %v24428_v25, 1  ;;  %v24430_v30 = vshll.u32 %v20997_v40, 16 }
 0x15c   : > { %17248 = vmatprep.subr.bf16.mxu0 %v19701_v17  ;;  %17508 = vmatprep.subr.bf16.mxu1 %v19702_v42  ;;  %v24431_v3 = vmov %v24427_v50  ;;  %v3741_v25 = vsel %vm1300_vm2, %v3736_v11, %v20661_v62  ;;  %v24437_v62 = vshll.u32 %v21093_v53, 16 }
 0x15d   : > { %24429 = vst [vmem:[#allocation4_spill] sm:$0xff] %v21153_v29  ;;  %v21157_v1 = vrot.slane %v24430_v30, 1  ;;  %v1681_v50 = vor.u32 %v24431_v3, %v1678_v57  ;;  %v21170_v29 = vld [vmem:[#allocation2 + $0x140] sm:$0xff]  ;;  %v19705_v30 = vld [vmem:[%s24287_s3 + $0x128] sm:$0xff]   ;;  %v19706_v3 = vld [vmem:[%s24287_s3 + $0xf8] sm:$0xff]   ;;  %v3954_v57 = vsel %vm856_vm1, %v24436_v55, %v3953_v34 }
 0x15e   : > { %17249 = vmatpush3.bf16.msra.mxu0 %v19701_v17  ;;  %17509 = vmatpush3.bf16.msra.mxu1 %v19702_v42  ;;  %v24434_v17 = vld [vmem:[#allocation14_spill] sm:$0xff]  ;;  %v21200_v11 = vrot.slane %v24437_v62, 1  ;;  %v21208_v55 = vld [vmem:[#allocation2 + $0x158] sm:$0xff] }
 0x15f   : > { %17250 = vmatprep.subr.bf16.mxu0 %v19703_v24  ;;  %17510 = vmatprep.subr.bf16.mxu1 %v19704_v38  ;;  %v1670_v42 = vsel %vm856_vm1, %v24434_v17, %v1669_v45  ;;  %v1682_v59 = vsel %vm856_vm1, %v24435_v9, %v1681_v50  ;;  %v21196_v45 = vld [vmem:[#allocation2 + $0x80] sm:$0xff]  ;;  %v24438_v9 = vshll.u32 %v21104_v51, 16  ;;  %v24439_v17 = vshrl.u32 %v21119_v2, 16 }
 0x161   : > { %17235 = vmatmul.mubr.bf16.gmra.mrb[24].mxu0 %v1670_v42  ;;  %17495 = vmatmul.mubr.bf16.gmra.mrb[28].mxu1 %v3741_v25  ;;  %v21204_v50 = vrot.slane %v24438_v9, 1  ;;  %v24440_v42 = vshll.u32 %v20997_v40, 16  ;;  %v24441_v9 = vshll.u32 %v20872_v46, 16 }
 0x162   : > { %17251 = vmatpush3.bf16.msra.mxu0 %v19703_v24  ;;  %17511 = vmatpush3.bf16.msra.mxu1 %v19704_v38  ;;  %v21212_v24 = vrot.slane %v24439_v17, 7  ;;  %v24443_v38 = vshrl.u32 %v21136_v47, 16 }
 0x163   : > { %17238 = vmatprep.mubr.bf16.mxu0 %v1682_v59  ;;  %17514 = vmatprep.mubr.bf16.mxu1 %v3954_v57  ;;  %v1693_v62 = vor.u32 %v24440_v42, %v21065_v6  ;;  %v3965_v34 = vor.u32 %v21059_v22, %v24441_v9  ;;  %v24442_v57 = vshll.u32 %v21134_v28, 16  ;;  %v24444_v6 = vshll.u32 %v20904_v13, 16  ;;  %v19709_v22 = vld [vmem:[%s24287_s3 + $0x138] sm:$0xff]   ;;  %v19710_v42 = vld [vmem:[%s24287_s3 + $0x108] sm:$0xff]   ;;  %v24447_v59 = vld [vmem:[#allocation18_spill] sm:$0xff] }
 0x164   : > { %17252 = vmatprep.subr.bf16.mxu0 %v19705_v30  ;;  %17512 = vmatprep.subr.bf16.mxu1 %v19706_v3  ;;  %v21229_v2 = vrot.slane %v24443_v38, 7  ;;  %v24445_v9 = vshll.u32 %v21170_v29, 16 }
 0x165   : > { %v21225_v17 = vrot.slane %v24442_v57, 1  ;;  %v3977_v46 = vor.u32 %v21069_v4, %v24444_v6  ;;  %v24446_v6 = vld [vmem:[#allocation21_spill] sm:$0xff]  ;;  %v3966_v47 = vsel %vm856_vm1, %v24447_v59, %v3965_v34  ;;  %v24448_v4 = vld [vmem:[#allocation26_spill] sm:$0xff]  ;;  %v24449_v34 = vshrl.u32 %v21196_v45, 16 }
 0x166   : > { %17253 = vmatpush3.bf16.msra.mxu0 %v19705_v30  ;;  %17513 = vmatpush3.bf16.msra.mxu1 %v19706_v3  ;;  %v21242_v57 = vrot.slane %v24445_v9, 1  ;;  %v21247_v3 = vld [vmem:[#allocation2 + $0x170] sm:$0xff]  ;;  %v1694_v25 = vsel %vm856_vm1, %v24446_v6, %v1693_v62  ;;  %v19711_v9 = vld [vmem:[%s24287_s3 + $0x140] sm:$0xff]   ;;  %v24450_v62 = vshll.u32 %v20926_v0, 16  ;;  %v19713_v6 = vld [vmem:[%s24287_s3 + $0x148] sm:$0xff]  }
 0x167   : > { %17254 = vmatprep.subr.bf16.mxu0 %v19707_v5  ;;  %17530 = vmatprep.subr.bf16.mxu1 %v19708_v10  ;;  %v19712_v30 = vld [vmem:[%s24287_s3 + $0x110] sm:$0xff]   ;;  %v3978_v38 = vsel %vm856_vm1, %v24448_v4, %v3977_v46 }
 0x168   : > { %v3989_v59 = vor.u32 %v21071_v43, %v24450_v62  ;;  %v19714_v43 = vld [vmem:[%s24287_s3 + $0x118] sm:$0xff]   ;;  %v19715_v46 = vld [vmem:[%s24287_s3 + $0x150] sm:$0xff]  }
 0x169   : > { %17239 = vmatmul.mubr.bf16.gmra.mrb[28].mxu0 %v1694_v25  ;;  %17515 = vmatmul.mubr.bf16.vlgmr.msra.gmra.mrb[16].mxu1 %v3966_v47  ;;  %v21264_v25 = vrot.slane %v24449_v34, 7  ;;  %v24453_v34 = vshll.u32 %v21208_v55, 16 }
 0x16a   : > { %17255 = vmatpush3.bf16.msra.mxu0 %v19707_v5  ;;  %17531 = vmatpush3.bf16.msra.mxu1 %v19708_v10  ;;  %v24451_v5 = vshrl.u32 %v21050_v14, 16 }
 0x16b   : > { %17258 = vmatprep.mubr.bf16.mxu0 %v20870_v12  ;;  %17518 = vmatprep.mubr.bf16.mxu1 %v3978_v38  ;;  %v24452_v38 = vshll.u32 %v20952_v41, 16  ;;  %v21286_v62 = vrot.slane %v24453_v34, 1  ;;  %v19716_v34 = vld [vmem:[%s24287_s3 + $0x120] sm:$0xff]  }
 0x16c   : > { %17256 = vmatprep.subr.bf16.mxu0 %v19709_v22  ;;  %17532 = vmatprep.subr.bf16.mxu1 %v19710_v42  ;;  %v21272_v10 = vrot.slane %v24451_v5, 7  ;;  %v24320_v5 = vshll.u32 %v21247_v3, 16 }
 0x16d   : > { %v4001_v4 = vor.u32 %v21074_v20, %v24452_v38  ;;  %v20069_v38 = vld [vmem:[#allocation2 + $0x38] sm:$0xff] }
 0x16e   : > { %17257 = vmatpush3.bf16.msra.mxu0 %v19709_v22  ;;  %17533 = vmatpush3.bf16.msra.mxu1 %v19710_v42  ;;  %v21289_v22 = vld [vmem:[#allocation2 + $0xb0] sm:$0xff]  ;;  %v24454_v42 = vld [vmem:[#allocation28_spill] sm:$0xff] }
 0x16f   : > { %17274 = vmatprep.subr.bf16.mxu0 %v19711_v9  ;;  %17534 = vmatprep.subr.bf16.mxu1 %v19712_v30  ;;  %v3990_v20 = vsel %vm856_vm1, %v24454_v42, %v3989_v59  ;;  %v4002_v47 = vsel %vm856_vm1, %v20625_v39, %v4001_v4  ;;  %v21304_v59 = vrot.slane %v24320_v5, 1  ;;  %v2439_v42 = vshrl.u32 %v21289_v22, 16 }
 0x170   : > { %v2442_v4 = vshll.u32 %v21289_v22, 16  ;;  %v19780_v22 = vld [vmem:[%s24287_s3 + $0x238] sm:$0xff]  }
 0x171   : > { %17259 = vmatmul.mubr.bf16.vlgmr.msra.gmra.mrb[16].mxu0 %v20069_v38  ;;  %17519 = vmatmul.mubr.bf16.gmra.mrb[20].mxu1 %v3990_v20  ;;  %v24455_v20 = vshll.u32 %v20970_v58, 16  ;;  %v24457_v58 = vshll.u32 %v21039_v44, 16 }
 0x172   : > { %17275 = vmatpush3.bf16.msra.mxu0 %v19711_v9  ;;  %17535 = vmatpush3.bf16.msra.mxu1 %v19712_v30  ;;  %v24456_v30 = vshll.u32 %v20993_v61, 16  ;;  %v19717_v9 = vld [vmem:[%s24287_s3 + $0x158] sm:$0xff]  }
 0x173   : > { %17262 = vmatprep.mubr.bf16.mxu0 %v20907_v7  ;;  %17522 = vmatprep.mubr.bf16.mxu1 %v4002_v47  ;;  %v4013_v38 = vor.u32 %v21076_v63, %v24455_v20  ;;  %v19718_v47 = vld [vmem:[%s24287_s3 + $0x128] sm:$0xff]   ;;  %v21322_v5 = vrot.slane %v24457_v58, 1 }
 0x174   : > { %17276 = vmatprep.subr.bf16.mxu0 %v19713_v6  ;;  %17536 = vmatprep.subr.bf16.mxu1 %v19714_v43  ;;  %v4025_v39 = vor.u32 %v21084_v15, %v24456_v30  ;;  %v21324_v63 = vld [vmem:[#allocation2 + $0xc8] sm:$0xff]  ;;  %v24458_v30 = vmov %v24457_v58 }
 0x175   : > { %v4014_v15 = vsel %vm856_vm1, %v20634_v27, %v4013_v38  ;;  %v21340_v27 = vrot.slane %v2439_v42, 7  ;;  %v2451_v38 = vshrl.u32 %v21324_v63, 16  ;;  %v4037_v58 = vor.u32 %v24458_v30, %v21101_v8 }
 0x176   : > { %17277 = vmatpush3.bf16.msra.mxu0 %v19713_v6  ;;  %17537 = vmatpush3.bf16.msra.mxu1 %v19714_v43  ;;  %v19719_v6 = vld [vmem:[%s24287_s3 + $0x160] sm:$0xff]   ;;  %v19720_v43 = vld [vmem:[%s24287_s3 + $0x130] sm:$0xff]   ;;  %v4026_v20 = vsel %vm856_vm1, %v20675_v19, %v4025_v39  ;;  %v19721_v19 = vld [vmem:[%s24287_s3 + $0x168] sm:$0xff]   ;;  %v24459_v39 = vshrl.u32 %v21093_v53, 16  ;;  %v24460_v30 = vshrl.u32 %v21061_v21, 16 }
 0x177   : > { %17278 = vmatprep.subr.bf16.mxu0 %v19715_v46  ;;  %17538 = vmatprep.subr.bf16.mxu1 %v19716_v34  ;;  %v4038_v8 = vsel %vm856_vm1, %v20677_v31, %v4037_v58  ;;  %v21369_v31 = vrot.slane %v2451_v38, 7 }
 0x178   : > { %v21373_v58 = vrot.slane %v24460_v30, 7 }
 0x179   : > { %17263 = vmatmul.mubr.bf16.gmra.mrb[20].mxu0 %v20937_v16  ;;  %17523 = vmatmul.mubr.bf16.gmra.mrb[24].mxu1 %v4014_v15  ;;  %v21355_v15 = vrot.slane %v24459_v39, 7  ;;  %v24461_v39 = vshrl.u32 %v20870_v12, 16  ;;  %v19727_v12 = vld [vmem:[%s24287_s3 + $0x180] sm:$0xff]  }
 0x17a   : > { %17279 = vmatpush3.bf16.msra.mxu0 %v19715_v46  ;;  %17539 = vmatpush3.bf16.msra.mxu1 %v19716_v34  ;;  %v19722_v46 = vld [vmem:[%s24287_s3 + $0x138] sm:$0xff]   ;;  %v2454_v34 = vshll.u32 %v21324_v63, 16 }
 0x17b   : > { %17266 = vmatprep.mubr.bf16.mxu0 %v20961_v37  ;;  %17526 = vmatprep.mubr.bf16.mxu1 %v4026_v20  ;;  %v19724_v20 = vld [vmem:[%s24287_s3 + $0x140] sm:$0xff]  }
 0x17c   : > { %17280 = vmatprep.subr.bf16.mxu0 %v19717_v9  ;;  %17540 = vmatprep.subr.bf16.mxu1 %v19718_v47 }
 0x17e   : > { %17281 = vmatpush3.bf16.msra.mxu0 %v19717_v9  ;;  %17541 = vmatpush3.bf16.msra.mxu1 %v19718_v47  ;;  %v20070_v9 = vld [vmem:[#allocation2 + $0x98] sm:$0xff]  ;;  %v19723_v47 = vld [vmem:[%s24287_s3 + $0x170] sm:$0xff]  }
 0x17f   : > { %17282 = vmatprep.subr.bf16.mxu0 %v19719_v6  ;;  %17542 = vmatprep.subr.bf16.mxu1 %v19720_v43 }
 0x181   : > { %17267 = vmatmul.mubr.bf16.gmra.mrb[24].mxu0 %v20070_v9  ;;  %17527 = vmatmul.mubr.bf16.gmra.mrb[28].mxu1 %v4038_v8  ;;  %v20071_v8 = vld [vmem:[#allocation2 + $0xf8] sm:$0xff]  ;;  %v24463_v9 = vshrl.u32 %v21048_v33, 16 }
 0x182   : > { %17283 = vmatpush3.bf16.msra.mxu0 %v19719_v6  ;;  %17543 = vmatpush3.bf16.msra.mxu1 %v19720_v43  ;;  %v2081_v6 = vor.u32 %v21116_v52, %v24461_v39  ;;  %v19726_v43 = vld [vmem:[%s24287_s3 + $0x148] sm:$0xff]   ;;  %v19728_v52 = vld [vmem:[%s24287_s3 + $0x150] sm:$0xff]   ;;  %v24464_v39 = vshrl.u32 %v20907_v7, 16 }
 0x183   : > { %17270 = vmatprep.mubr.bf16.mxu0 %v20995_v36  ;;  %17546 = vmatprep.mubr.bf16.mxu1 %v20858_v60  ;;  %v19725_v60 = vld [vmem:[%s24287_s3 + $0x178] sm:$0xff]   ;;  %v2093_v30 = vor.u32 %v21140_v32, %v24463_v9  ;;  %v19731_v7 = vld [vmem:[%s24287_s3 + $0x190] sm:$0xff]   ;;  %v24469_v9 = vshrl.u32 %v21104_v51, 16 }
 0x184   : > { %17284 = vmatprep.subr.bf16.mxu0 %v19721_v19  ;;  %17544 = vmatprep.subr.bf16.mxu1 %v19722_v46 }
 0x186   : > { %17285 = vmatpush3.bf16.msra.mxu0 %v19721_v19  ;;  %17545 = vmatpush3.bf16.msra.mxu1 %v19722_v46  ;;  %v24462_v19 = vld [vmem:[#allocation19_spill] sm:$0xff] }
 0x187   : > { %17286 = vmatprep.subr.bf16.mxu0 %v19723_v47  ;;  %17562 = vmatprep.subr.bf16.mxu1 %v19724_v20  ;;  %v2086_v46 = vsel %vm1300_vm2, %v2081_v6, %v24462_v19 }
 0x189   : > { %17271 = vmatmul.mubr.bf16.gmra.mrb[28].mxu0 %v20997_v40  ;;  %17547 = vmatmul.mubr.bf16.vlgmr.msra.gmra.mrb[16].mxu1 %v20071_v8  ;;  %v2105_v8 = vor.u32 %v21123_v23, %v24464_v39  ;;  %v19732_v23 = vld [vmem:[%s24287_s3 + $0x160] sm:$0xff]   ;;  %v24470_v39 = vshrl.u32 %v21134_v28, 16 }
 0x18a   : > { %17287 = vmatpush3.bf16.msra.mxu0 %v19723_v47  ;;  %17563 = vmatpush3.bf16.msra.mxu1 %v19724_v20  ;;  %v19729_v47 = vld [vmem:[%s24287_s3 + $0x188] sm:$0xff]   ;;  %v24465_v20 = vld [vmem:[#allocation22_spill] sm:$0xff] }
 0x18b   : > { %17290 = vmatprep.mubr.bf16.mxu0 %v2086_v46  ;;  %17550 = vmatprep.mubr.bf16.mxu1 %v20904_v13  ;;  %v19730_v13 = vld [vmem:[%s24287_s3 + $0x158] sm:$0xff]   ;;  %v2098_v6 = vsel %vm1300_vm2, %v2093_v30, %v24465_v20  ;;  %v2110_v32 = vsel %vm1300_vm2, %v2105_v8, %v20613_v18  ;;  %v19734_v18 = vld [vmem:[%s24287_s3 + $0x168] sm:$0xff]   ;;  %v21444_v30 = vrot.slane %v24469_v9, 7  ;;  %v21448_v8 = vrot.slane %v24470_v39, 7 }
 0x18c   : > { %17288 = vmatprep.subr.bf16.mxu0 %v19725_v60  ;;  %17564 = vmatprep.subr.bf16.mxu1 %v19726_v43  ;;  %v24478_v39 = vld [vmem:[#allocation33_spill] sm:$0xff] }
 0x18e   : > { %17289 = vmatpush3.bf16.msra.mxu0 %v19725_v60  ;;  %17565 = vmatpush3.bf16.msra.mxu1 %v19726_v43  ;;  %v24467_v43 = vshrl.u32 %v20961_v37, 16  ;;  %v19735_v37 = vld [vmem:[%s24287_s3 + $0x1a0] sm:$0xff]  }
 0x18f   : > { %17306 = vmatprep.subr.bf16.mxu0 %v19727_v12  ;;  %17566 = vmatprep.subr.bf16.mxu1 %v19728_v52 }
 0x190   : > { %v2129_v19 = vor.u32 %v21131_v49, %v24467_v43  ;;  %v19736_v49 = vld [vmem:[%s24287_s3 + $0x170] sm:$0xff]  }
 0x191   : > { %17291 = vmatmul.mubr.bf16.vlgmr.msra.gmra.mrb[16].mxu0 %v2098_v6  ;;  %17551 = vmatmul.mubr.bf16.gmra.mrb[20].mxu1 %v20926_v0  ;;  %v24466_v0 = vshrl.u32 %v20937_v16, 16  ;;  %v24468_v16 = vld [vmem:[#allocation29_spill] sm:$0xff] }
 0x192   : > { %17307 = vmatpush3.bf16.msra.mxu0 %v19727_v12  ;;  %17567 = vmatpush3.bf16.msra.mxu1 %v19728_v52  ;;  %v19733_v12 = vld [vmem:[%s24287_s3 + $0x198] sm:$0xff]   ;;  %v2134_v46 = vsel %vm1300_vm2, %v2129_v19, %v20655_v54  ;;  %v24472_v54 = vshrl.u32 %v21050_v14, 16  ;;  %v21465_v19 = vld [vmem:[#allocation2] sm:$0xff] }
 0x193   : > { %17294 = vmatprep.mubr.bf16.mxu0 %v2110_v32  ;;  %17554 = vmatprep.mubr.bf16.mxu1 %v20952_v41  ;;  %v2117_v60 = vor.u32 %v21127_v35, %v24466_v0  ;;  %v21430_v41 = vld [vmem:[#allocation2 + $0x188] sm:$0xff]  ;;  %v20072_v52 = vld [vmem:[#allocation2 + $0x158] sm:$0xff]  ;;  %v24474_v0 = vshrl.u32 %v21061_v21, 16 }
 0x194   : > { %17308 = vmatprep.subr.bf16.mxu0 %v19729_v47  ;;  %17568 = vmatprep.subr.bf16.mxu1 %v19730_v13  ;;  %v4792_v6 = vshrl.u32 %v21430_v41, 16 }
 0x195   : > { %v2122_v35 = vsel %vm1300_vm2, %v2117_v60, %v24468_v16  ;;  %v24475_v60 = vld [vmem:[#allocation4_spill] sm:$0xff]  ;;  %v4804_v16 = vshrl.u32 %v21465_v19, 16 }
 0x196   : > { %17309 = vmatpush3.bf16.msra.mxu0 %v19729_v47  ;;  %17569 = vmatpush3.bf16.msra.mxu1 %v19730_v13  ;;  %v4713_v47 = vld [vmem:[#allocation2 + $0x198] sm:$0x80]  ;;  %v24471_v13 = vshrl.u32 %v21170_v29, 16 }
 0x197   : > { %17310 = vmatprep.subr.bf16.mxu0 %v19731_v7  ;;  %17570 = vmatprep.subr.bf16.mxu1 %v19732_v23  ;;  %v4800_v43 = vshrl.u32 %v4713_v47, 16  ;;  %v19740_v47 = vld [vmem:[%s24287_s3 + $0x180] sm:$0xff]  }
 0x198   : > { %v21453_v20 = vrot.slane %v24471_v13, 7  ;;  %v24479_v13 = vshrl.u32 %v21208_v55, 16 }
 0x199   : > { %17295 = vmatmul.mubr.bf16.gmra.mrb[20].mxu0 %v2122_v35  ;;  %17555 = vmatmul.mubr.bf16.gmra.mrb[24].mxu1 %v20072_v52  ;;  %v21468_v35 = vld [vmem:[#allocation2 + $0x38] sm:$0xff] }
 0x19a   : > { %17311 = vmatpush3.bf16.msra.mxu0 %v19731_v7  ;;  %17571 = vmatpush3.bf16.msra.mxu1 %v19732_v23  ;;  %v2141_v7 = vor.u32 %v21144_v26, %v24472_v54  ;;  %v24473_v23 = vshrl.u32 %v20995_v36, 16  ;;  %v19737_v26 = vld [vmem:[%s24287_s3 + $0x1a8] sm:$0xff]   ;;  %v19738_v36 = vld [vmem:[%s24287_s3 + $0x178] sm:$0xff]   ;;  %v21491_v54 = vrot.slane %v24479_v13, 7 }
 0x19b   : > { %17298 = vmatprep.mubr.bf16.mxu0 %v2134_v46  ;;  %17558 = vmatprep.mubr.bf16.mxu1 %v20993_v61  ;;  %v4423_v61 = vor.u32 %v24475_v60, %v24474_v0  ;;  %v24477_v46 = vld [vmem:[#allocation38_spill] sm:$0xff]  ;;  %v4795_v0 = vshll.u32 %v21430_v41, 16  ;;  %v21502_v60 = vrot.slane %v4800_v43, 7  ;;  %v24483_v43 = vshll.u32 %v21048_v33, 16  ;;  %v19785_v41 = vld [vmem:[%s24287_s3 + $0x2a0] sm:$0xff]  }
 0x19c   : > { %17312 = vmatprep.subr.bf16.mxu0 %v19733_v12  ;;  %17572 = vmatprep.subr.bf16.mxu1 %v19734_v18  ;;  %v2153_v32 = vor.u32 %v21148_v56, %v24473_v23  ;;  %v24476_v56 = vld [vmem:[#allocation31_spill] sm:$0xff]  ;;  %v24486_v33 = vld [vmem:[#allocation34_spill] sm:$0xff] }
 0x19d   : > { %v2146_v52 = vsel %vm1300_vm2, %v2141_v7, %v24476_v56  ;;  %v24480_v7 = vshrl.u32 %v21247_v3, 16  ;;  %v4807_v56 = vshll.u32 %v21465_v19, 16  ;;  %v2384_v13 = vor.u32 %v21167_v48, %v24483_v43  ;;  %v24489_v43 = vld [vmem:[#allocation11_spill] sm:$0xff]  ;;  %v19787_v19 = vld [vmem:[%s24287_s3 + $0x2b0] sm:$0xff]  }
 0x19e   : > { %17313 = vmatpush3.bf16.msra.mxu0 %v19733_v12  ;;  %17573 = vmatpush3.bf16.msra.mxu1 %v19734_v18  ;;  %v2158_v9 = vsel %vm1300_vm2, %v2153_v32, %v24477_v46  ;;  %v4428_v12 = vsel %vm1300_vm2, %v4423_v61, %v24478_v39  ;;  %v19739_v18 = vld [vmem:[%s24287_s3 + $0x1b0] sm:$0xff]   ;;  %v21499_v32 = vrot.slane %v4792_v6, 7  ;;  %v21506_v61 = vrot.slane %v4804_v16, 7 }
 0x19f   : > { %17314 = vmatprep.subr.bf16.mxu0 %v19735_v37  ;;  %17574 = vmatprep.subr.bf16.mxu1 %v19736_v49  ;;  %v21495_v23 = vrot.slane %v24480_v7, 7  ;;  %v24481_v46 = vshrl.u32 %v20997_v40, 16  ;;  %v19741_v40 = vld [vmem:[%s24287_s3 + $0x1b8] sm:$0xff]  }
 0x1a0   : > { %v24487_v7 = vld [vmem:[#allocation23_spill] sm:$0xff] }
 0x1a1   : > { %17299 = vmatmul.mubr.bf16.gmra.mrb[24].mxu0 %v2146_v52  ;;  %17559 = vmatmul.mubr.bf16.gmra.mrb[28].mxu1 %v21039_v44  ;;  %v2853_v52 = vshll.u32 %v21468_v35, 16  ;;  %v2165_v39 = vor.u32 %v21157_v1, %v24481_v46  ;;  %v19742_v1 = vld [vmem:[%s24287_s3 + $0x188] sm:$0xff]   ;;  %v2385_v46 = vsel %vm856_vm1, %v24487_v7, %v2384_v13  ;;  %v24496_v7 = vld [vmem:[#allocation44_spill] sm:$0xff] }
 0x1a2   : > { %17315 = vmatpush3.bf16.msra.mxu0 %v19735_v37  ;;  %17575 = vmatpush3.bf16.msra.mxu1 %v19736_v49  ;;  %v24482_v37 = vshrl.u32 %v21093_v53, 16 }
 0x1a3   : > { %17302 = vmatprep.mubr.bf16.mxu0 %v2158_v9  ;;  %17578 = vmatprep.mubr.bf16.mxu1 %v4428_v12  ;;  %v24484_v9 = vshrl.u32 %v21104_v51, 16 }
 0x1a4   : > { %17316 = vmatprep.subr.bf16.mxu0 %v19737_v26  ;;  %17576 = vmatprep.subr.bf16.mxu1 %v19738_v36  ;;  %v21516_v49 = vor.u32 %v21200_v11, %v24482_v37  ;;  %v24485_v11 = vld [vmem:[#allocation35_spill] sm:$0xff] }
 0x1a5   : > { %v4447_v12 = vor.u32 %v21204_v50, %v24484_v9  ;;  %v19743_v50 = vld [vmem:[%s24287_s3 + $0x1c0] sm:$0xff]   ;;  %v24490_v9 = vshll.u32 %v24489_v43, 16 }
 0x1a6   : > { %17317 = vmatpush3.bf16.msra.mxu0 %v19737_v26  ;;  %17577 = vmatpush3.bf16.msra.mxu1 %v19738_v36  ;;  %v2170_v26 = vsel %vm1300_vm2, %v2165_v39, %v24485_v11  ;;  %v4440_v48 = vsel %vm1300_vm2, %v21516_v49, %v24486_v33  ;;  %v19744_v36 = vld [vmem:[%s24287_s3 + $0x190] sm:$0xff]   ;;  %v24488_v39 = vld [vmem:[#allocation43_spill] sm:$0xff] }
 0x1a7   : > { %17318 = vmatprep.subr.bf16.mxu0 %v19739_v18  ;;  %17594 = vmatprep.subr.bf16.mxu1 %v19740_v47  ;;  %v4452_v37 = vsel %vm1300_vm2, %v4447_v12, %v24488_v39  ;;  %v2396_v11 = vor.u32 %v24490_v9, %v21212_v24  ;;  %v24494_v12 = vshrl.u32 %v21170_v29, 16  ;;  %v19745_v24 = vld [vmem:[%s24287_s3 + $0x1c8] sm:$0xff]   ;;  %v24497_v39 = vld [vmem:[#allocation30_spill] sm:$0xff]  ;;  %v24498_v9 = vld [vmem:[#allocation47_spill] sm:$0xff] }
 0x1a9   : > { %17303 = vmatmul.mubr.bf16.gmra.mrb[28].mxu0 %v2170_v26  ;;  %17579 = vmatmul.mubr.bf16.vlgmr.msra.gmra.mrb[16].mxu1 %v4440_v48  ;;  %v24491_v26 = vshrl.u32 %v21134_v28, 16  ;;  %v21559_v48 = vor.u32 %v21242_v57, %v24494_v12  ;;  %v19747_v57 = vld [vmem:[%s24287_s3 + $0x1d0] sm:$0xff]   ;;  %v24500_v12 = vshrl.u32 %v21208_v55, 16 }
 0x1aa   : > { %17319 = vmatpush3.bf16.msra.mxu0 %v19739_v18  ;;  %17595 = vmatpush3.bf16.msra.mxu1 %v19740_v47  ;;  %v24492_v18 = vld [vmem:[#allocation12_spill] sm:$0xff] }
 0x1ab   : > { %17322 = vmatprep.mubr.bf16.mxu0 %v2385_v46  ;;  %17582 = vmatprep.mubr.bf16.mxu1 %v4452_v37  ;;  %v21551_v33 = vor.u32 %v21225_v17, %v24491_v26  ;;  %v24493_v47 = vshll.u32 %v24492_v18, 16  ;;  %v19746_v17 = vld [vmem:[%s24287_s3 + $0x198] sm:$0xff]   ;;  %v19748_v46 = vld [vmem:[%s24287_s3 + $0x1a0] sm:$0xff]   ;;  %v24499_v26 = vshll.u32 %v21196_v45, 16 }
 0x1ac   : > { %17320 = vmatprep.subr.bf16.mxu0 %v19741_v40  ;;  %17596 = vmatprep.subr.bf16.mxu1 %v19742_v1 }
 0x1ad   : > { %v2408_v13 = vor.u32 %v24493_v47, %v21229_v2  ;;  %v4464_v2 = vsel %vm1300_vm2, %v21551_v33, %v24496_v7  ;;  %v2420_v47 = vor.u32 %v24499_v26, %v21264_v25  ;;  %v19749_v25 = vld [vmem:[%s24287_s3 + $0x1d8] sm:$0xff]   ;;  %v19752_v7 = vld [vmem:[%s24287_s3 + $0x1b0] sm:$0xff]   ;;  %v24507_v26 = vshrl.u32 %v21039_v44, 16 }
 0x1ae   : > { %17321 = vmatpush3.bf16.msra.mxu0 %v19741_v40  ;;  %17597 = vmatpush3.bf16.msra.mxu1 %v19742_v1  ;;  %v24495_v40 = vld [vmem:[#allocation32_spill] sm:$0xff]  ;;  %v19754_v44 = vld [vmem:[%s24287_s3 + $0x1b8] sm:$0xff]  }
 0x1af   : > { %17338 = vmatprep.subr.bf16.mxu0 %v19743_v50  ;;  %17598 = vmatprep.subr.bf16.mxu1 %v19744_v36  ;;  %v2397_v1 = vsel %vm856_vm1, %v24495_v40, %v2396_v11  ;;  %v2409_v37 = vsel %vm856_vm1, %v24497_v39, %v2408_v13  ;;  %v4476_v11 = vsel %vm1300_vm2, %v21559_v48, %v24498_v9  ;;  %v24502_v40 = vshrl.u32 %v21247_v3, 16 }
 0x1b1   : > { %17323 = vmatmul.mubr.bf16.vlgmr.msra.gmra.mrb[16].mxu0 %v2397_v1  ;;  %17583 = vmatmul.mubr.bf16.gmra.mrb[20].mxu1 %v4464_v2  ;;  %v21597_v1 = vor.u32 %v21304_v59, %v24502_v40  ;;  %v19751_v59 = vld [vmem:[%s24287_s3 + $0x1e0] sm:$0xff]   ;;  %v24505_v2 = vld [vmem:[#allocation37_spill] sm:$0xff] }
 0x1b2   : > { %17339 = vmatpush3.bf16.msra.mxu0 %v19743_v50  ;;  %17599 = vmatpush3.bf16.msra.mxu1 %v19744_v36  ;;  %v21589_v50 = vor.u32 %v21286_v62, %v24500_v12  ;;  %v24501_v36 = vshll.u32 %v21050_v14, 16  ;;  %v19750_v62 = vld [vmem:[%s24287_s3 + $0x1a8] sm:$0xff]   ;;  %v24511_v40 = vld [vmem:[#allocation40_spill] sm:$0xff] }
 0x1b3   : > { %17326 = vmatprep.mubr.bf16.mxu0 %v2409_v37  ;;  %17586 = vmatprep.mubr.bf16.mxu1 %v4476_v11  ;;  %v24506_v37 = vld [vmem:[#allocation6_spill] sm:$0xff]  ;;  %v2444_v11 = vor.u32 %v2442_v4, %v21340_v27 }
 0x1b4   : > { %17340 = vmatprep.subr.bf16.mxu0 %v19745_v24  ;;  %17600 = vmatprep.subr.bf16.mxu1 %v19746_v17  ;;  %v2432_v13 = vor.u32 %v21272_v10, %v24501_v36  ;;  %v4500_v9 = vsel %vm1300_vm2, %v21597_v1, %v24506_v37  ;;  %v19753_v36 = vld [vmem:[%s24287_s3 + $0x1e8] sm:$0xff]  }
 0x1b5   : > { %v19758_v37 = vld [vmem:[%s24287_s3 + $0x1c8] sm:$0xff]  }
 0x1b6   : > { %17341 = vmatpush3.bf16.msra.mxu0 %v19745_v24  ;;  %17601 = vmatpush3.bf16.msra.mxu1 %v19746_v17  ;;  %v24503_v24 = vld [vmem:[#allocation36_spill] sm:$0xff]  ;;  %v2433_v39 = vsel %vm856_vm1, %v24505_v2, %v2432_v13  ;;  %v24510_v13 = vld [vmem:[#allocation27_spill] sm:$0xff] }
 0x1b7   : > { %17342 = vmatprep.subr.bf16.mxu0 %v19747_v57  ;;  %17602 = vmatprep.subr.bf16.mxu1 %v19748_v46  ;;  %v2421_v14 = vsel %vm856_vm1, %v24503_v24, %v2420_v47  ;;  %v24504_v17 = vld [vmem:[#allocation16_spill] sm:$0xff]  ;;  %v24508_v47 = vshll.u32 %v21093_v53, 16  ;;  %v19755_v53 = vld [vmem:[%s24287_s3 + $0x1f0] sm:$0xff]  }
 0x1b8   : > { %v4488_v10 = vsel %vm1300_vm2, %v21589_v50, %v24504_v17 }
 0x1b9   : > { %17327 = vmatmul.mubr.bf16.gmra.mrb[20].mxu0 %v2421_v14  ;;  %17587 = vmatmul.mubr.bf16.gmra.mrb[24].mxu1 %v4488_v10  ;;  %v4725_v12 = vor.u32 %v21355_v15, %v24508_v47  ;;  %v19756_v15 = vld [vmem:[%s24287_s3 + $0x1c0] sm:$0xff]   ;;  %v24513_v14 = vshll.u32 %v21061_v21, 16  ;;  %v24514_v10 = vshll.u32 %v21104_v51, 16  ;;  %v24516_v21 = vld [vmem:[#allocation42_spill] sm:$0xff]  ;;  %v24520_v47 = vshll.u32 %v21208_v55, 16 }
 0x1ba   : > { %17343 = vmatpush3.bf16.msra.mxu0 %v19747_v57  ;;  %17603 = vmatpush3.bf16.msra.mxu1 %v19748_v46  ;;  %v4507_v57 = vor.u32 %v21322_v5, %v24507_v26  ;;  %v2456_v46 = vor.u32 %v2454_v34, %v21369_v31  ;;  %v24509_v5 = vld [vmem:[#allocation39_spill] sm:$0xff]  ;;  %v19763_v55 = vld [vmem:[%s24287_s3 + $0x210] sm:$0xff]  }
 0x1bb   : > { %17330 = vmatprep.mubr.bf16.mxu0 %v2433_v39  ;;  %17590 = vmatprep.mubr.bf16.mxu1 %v4500_v9  ;;  %v2445_v27 = vsel %vm856_vm1, %v24509_v5, %v2444_v11  ;;  %v2468_v17 = vor.u32 %v24513_v14, %v21373_v58  ;;  %v4737_v2 = vor.u32 %v21444_v30, %v24514_v10  ;;  %v19757_v39 = vld [vmem:[%s24287_s3 + $0x1f8] sm:$0xff]   ;;  %v24517_v58 = vld [vmem:[#allocation45_spill] sm:$0xff]  ;;  %v24518_v9 = vld [vmem:[#allocation46_spill] sm:$0xff] }
 0x1bc   : > { %17344 = vmatprep.subr.bf16.mxu0 %v19749_v25  ;;  %17604 = vmatprep.subr.bf16.mxu1 %v19750_v62  ;;  %v4512_v31 = vsel %vm1300_vm2, %v4507_v57, %v24510_v13  ;;  %v20074_v26 = vld [vmem:[#allocation2 + $0x38] sm:$0xff]  ;;  %v24519_v57 = vshll.u32 %v21170_v29, 16  ;;  %v24521_v5 = vld [vmem:[#allocation48_spill] sm:$0xff]  ;;  %v19768_v14 = vld [vmem:[%s24287_s3 + $0x1f0] sm:$0xff]  }
 0x1bd   : > { %v2469_v51 = vsel %vm856_vm1, %v24516_v21, %v2468_v17  ;;  %v4738_v30 = vsel %vm856_vm1, %v24517_v58, %v4737_v2  ;;  %v24525_v17 = vld [vmem:[#allocation10_spill] sm:$0xff]  ;;  %v21727_v2 = vor.u32 %v4807_v56, %v21506_v61  ;;  %v19770_v61 = vld [vmem:[%s24287_s3 + $0x1f8] sm:$0xff]  }
 0x1be   : > { %17345 = vmatpush3.bf16.msra.mxu0 %v19749_v25  ;;  %17605 = vmatpush3.bf16.msra.mxu1 %v19750_v62  ;;  %v2457_v25 = vsel %vm856_vm1, %v24511_v40, %v2456_v46  ;;  %v24512_v62 = vld [vmem:[#allocation41_spill] sm:$0xff]  ;;  %v4761_v46 = vor.u32 %v21453_v20, %v24519_v57  ;;  %v20075_v20 = vld [vmem:[#allocation2 + $0x50] sm:$0xff]  ;;  %v4797_v40 = vor.u32 %v4795_v0, %v21499_v32  ;;  %v19767_v32 = vld [vmem:[%s24287_s3 + $0x220] sm:$0xff]  }
 0x1bf   : > { %17346 = vmatprep.subr.bf16.mxu0 %v19751_v59  ;;  %17606 = vmatprep.subr.bf16.mxu1 %v19752_v7  ;;  %v4726_v24 = vsel %vm856_vm1, %v24512_v62, %v4725_v12  ;;  %v4773_v12 = vor.u32 %v21491_v54, %v24520_v47  ;;  %v19764_v54 = vld [vmem:[%s24287_s3 + $0x1e0] sm:$0xff]   ;;  %v19766_v62 = vld [vmem:[%s24287_s3 + $0x1e8] sm:$0xff]   ;;  %v20079_v21 = vld [vmem:[#allocation2 + $0xb0] sm:$0xff] }
 0x1c0   : > { %v4762_v29 = vsel %vm856_vm1, %v24521_v5, %v4761_v46  ;;  %v4798_v10 = vsel %vm856_vm1, %v24525_v17, %v4797_v40  ;;  %v2839_v57 = vld [vmem:[#allocation2 + $0x70] sm:$0x1]  ;;  %v19773_v46 = vld [vmem:[%s24287_s3 + $0x238] sm:$0xff]   ;;  %v19774_v47 = vld [vmem:[%s24287_s3 + $0x208] sm:$0xff]  }
 0x1c1   : > { %17331 = vmatmul.mubr.bf16.gmra.mrb[24].mxu0 %v2445_v27  ;;  %17591 = vmatmul.mubr.bf16.gmra.mrb[28].mxu1 %v4512_v31  ;;  %v24522_v27 = vld [vmem:[#allocation49_spill] sm:$0xff]  ;;  %v20083_v5 = vld [vmem:[#allocation2 + $0x110] sm:$0xff]  ;;  %v19776_v17 = vld [vmem:[%s24287_s3 + $0x218] sm:$0xff]  }
 0x1c2   : > { %17347 = vmatpush3.bf16.msra.mxu0 %v19751_v59  ;;  %17607 = vmatpush3.bf16.msra.mxu1 %v19752_v7  ;;  %v24515_v59 = vshll.u32 %v21134_v28, 16  ;;  %v19759_v28 = vld [vmem:[%s24287_s3 + $0x200] sm:$0xff]   ;;  %v4774_v13 = vsel %vm856_vm1, %v24522_v27, %v4773_v12  ;;  %v20076_v31 = vld [vmem:[#allocation2 + $0x68] sm:$0xff]  ;;  %v24526_v12 = vshll.u32 %v24489_v43, 16  ;;  %v2842_v27 = vld [vmem:[#allocation2 + $0x98] sm:$0xff] }
 0x1c3   : > { %17334 = vmatprep.mubr.bf16.mxu0 %v2457_v25  ;;  %17610 = vmatprep.mubr.bf16.mxu1 %v4726_v24  ;;  %v19765_v25 = vld [vmem:[%s24287_s3 + $0x218] sm:$0xff]   ;;  %v24524_v24 = vld [vmem:[#allocation9_spill] sm:$0xff] }
 0x1c4   : > { %17348 = vmatprep.subr.bf16.mxu0 %v19753_v36  ;;  %17608 = vmatprep.subr.bf16.mxu1 %v19754_v44  ;;  %v4749_v7 = vor.u32 %v21448_v8, %v24515_v59  ;;  %v19760_v8 = vld [vmem:[%s24287_s3 + $0x1d0] sm:$0xff]   ;;  %v20078_v59 = vld [vmem:[#allocation2 + $0x98] sm:$0xff] }
 0x1c6   : > { %17349 = vmatpush3.bf16.msra.mxu0 %v19753_v36  ;;  %17609 = vmatpush3.bf16.msra.mxu1 %v19754_v44  ;;  %v4750_v11 = vsel %vm856_vm1, %v24518_v9, %v4749_v7  ;;  %v19761_v36 = vld [vmem:[%s24287_s3 + $0x208] sm:$0xff]   ;;  %v19762_v44 = vld [vmem:[%s24287_s3 + $0x1d8] sm:$0xff]   ;;  %v2835_v7 = vld [vmem:[#allocation2 + $0x40] sm:$0x1]  ;;  %v2851_v9 = vshrl.u32 %v21468_v35, 16 }
 0x1c7   : > { %17350 = vmatprep.subr.bf16.mxu0 %v19755_v53  ;;  %17626 = vmatprep.subr.bf16.mxu1 %v19756_v15  ;;  %v2858_v58 = vshll.u32 %v2835_v7, 16 }
 0x1c9   : > { %17335 = vmatmul.mubr.bf16.gmra.mrb[28].mxu0 %v2469_v51  ;;  %17611 = vmatmul.mubr.bf16.vlgmr.msra.gmra.mrb[16].mxu1 %v4738_v30  ;;  %v2855_v51 = vrot.slane %v2853_v52, 1  ;;  %v20081_v30 = vld [vmem:[#allocation2 + $0xf8] sm:$0xff] }
 0x1ca   : > { %17351 = vmatpush3.bf16.msra.mxu0 %v19755_v53  ;;  %17627 = vmatpush3.bf16.msra.mxu1 %v19756_v15  ;;  %v24523_v53 = vshll.u32 %v21247_v3, 16 }
 0x1cb   : > { %17354 = vmatprep.mubr.bf16.mxu0 %v20074_v26  ;;  %17614 = vmatprep.mubr.bf16.mxu1 %v4750_v11  ;;  %v2837_v11 = vld [vmem:[#allocation2 + $0x58] sm:$0x1]  ;;  %v2856_v52 = vor.u32 %v2855_v51, %v2851_v9  ;;  %v2860_v26 = vrot.slane %v2858_v58, 1  ;;  %v19777_v58 = vld [vmem:[%s24287_s3 + $0x220] sm:$0xff]  }
 0x1cc   : > { %17352 = vmatprep.subr.bf16.mxu0 %v19757_v39  ;;  %17628 = vmatprep.subr.bf16.mxu1 %v19758_v37  ;;  %v4785_v15 = vor.u32 %v21495_v23, %v24523_v53  ;;  %v20077_v23 = vld [vmem:[#allocation2 + $0x80] sm:$0xff]  ;;  %v2870_v35 = vshll.u32 %v2837_v11, 16  ;;  %v20086_v51 = vld [vmem:[#allocation2 + $0x158] sm:$0xff] }
 0x1cd   : > { %v19781_v53 = vld [vmem:[%s24287_s3 + $0x280] sm:$0xff]  }
 0x1ce   : > { %17353 = vmatpush3.bf16.msra.mxu0 %v19757_v39  ;;  %17629 = vmatpush3.bf16.msra.mxu1 %v19758_v37  ;;  %v4786_v3 = vsel %vm856_vm1, %v24524_v24, %v4785_v15  ;;  %v4810_v39 = vsel %vm856_vm1, %v21502_v60, %v21727_v2  ;;  %v19769_v37 = vld [vmem:[%s24287_s3 + $0x228] sm:$0xff]   ;;  %v24528_v15 = vshrl.u32 %v24489_v43, 16  ;;  %v24530_v43 = vshll.u32 %v21196_v45, 16 }
 0x1cf   : > { %17370 = vmatprep.subr.bf16.mxu0 %v19759_v28  ;;  %17630 = vmatprep.subr.bf16.mxu1 %v19760_v8  ;;  %v20080_v60 = vld [vmem:[#allocation2 + $0xc8] sm:$0xff] }
 0x1d1   : > { %17355 = vmatmul.mubr.bf16.vlgmr.msra.gmra.mrb[16].mxu0 %v20075_v20  ;;  %17615 = vmatmul.mubr.bf16.gmra.mrb[20].mxu1 %v4762_v29  ;;  %v24527_v29 = vshll.u32 %v24492_v18, 16 }
 0x1d2   : > { %17371 = vmatpush3.bf16.msra.mxu0 %v19759_v28  ;;  %17631 = vmatpush3.bf16.msra.mxu1 %v19760_v8  ;;  %v19771_v28 = vld [vmem:[%s24287_s3 + $0x230] sm:$0xff]   ;;  %v19772_v8 = vld [vmem:[%s24287_s3 + $0x200] sm:$0xff]  }
 0x1d3   : > { %17358 = vmatprep.mubr.bf16.mxu0 %v20076_v31  ;;  %17618 = vmatprep.mubr.bf16.mxu1 %v4774_v13  ;;  %v2879_v20 = vrot.slane %v24527_v29, 1  ;;  %v20084_v13 = vld [vmem:[#allocation2 + $0x128] sm:$0xff]  ;;  %v19775_v31 = vld [vmem:[%s24287_s3 + $0x210] sm:$0xff]  }
 0x1d4   : > { %17372 = vmatprep.subr.bf16.mxu0 %v19761_v36  ;;  %17632 = vmatprep.subr.bf16.mxu1 %v19762_v44 }
 0x1d6   : > { %17373 = vmatpush3.bf16.msra.mxu0 %v19761_v36  ;;  %17633 = vmatpush3.bf16.msra.mxu1 %v19762_v44  ;;  %v2867_v36 = vrot.slane %v24526_v12, 1  ;;  %v20082_v44 = vld [vmem:[#allocation2 + $0xe0] sm:$0xff] }
 0x1d7   : > { %17374 = vmatprep.subr.bf16.mxu0 %v19763_v55  ;;  %17634 = vmatprep.subr.bf16.mxu1 %v19764_v54 }
 0x1d8   : > { %v2868_v40 = vor.u32 %v2867_v36, %v24528_v15  ;;  %v19783_v36 = vld [vmem:[%s24287_s3 + $0x290] sm:$0xff]  }
 0x1d9   : > { %17359 = vmatmul.mubr.bf16.gmra.mrb[20].mxu0 %v20077_v23  ;;  %17619 = vmatmul.mubr.bf16.gmra.mrb[24].mxu1 %v4786_v3  ;;  %v2841_v23 = vld [vmem:[#allocation2 + $0x88] sm:$0x1] }
 0x1da   : > { %17375 = vmatpush3.bf16.msra.mxu0 %v19763_v55  ;;  %17635 = vmatpush3.bf16.msra.mxu1 %v19764_v54  ;;  %v2882_v55 = vshll.u32 %v2839_v57, 16  ;;  %v2861_v54 = vsel %vm1300_vm2, %v2856_v52, %v2860_v26  ;;  %v2894_v7 = vshll.u32 %v2841_v23, 16  ;;  %v2845_v52 = vld [vmem:[#allocation2 + $0xb8] sm:$0x1]  ;;  %v2847_v26 = vld [vmem:[#allocation2 + $0xd0] sm:$0x1] }
 0x1db   : > { %17362 = vmatprep.mubr.bf16.mxu0 %v20078_v59  ;;  %17622 = vmatprep.mubr.bf16.mxu1 %v4798_v10  ;;  %v2891_v59 = vrot.slane %v24530_v43, 1  ;;  %v19778_v57 = vld [vmem:[%s24287_s3 + $0x228] sm:$0xff]   ;;  %v2918_v12 = vshll.u32 %v2845_v52, 16  ;;  %v2930_v29 = vshll.u32 %v2847_v26, 16  ;;  %v5178_v23 = vld [vmem:[#allocation2 + $0x130] sm:$0x1] }
 0x1dc   : > { %17376 = vmatprep.subr.bf16.mxu0 %v19765_v25  ;;  %17636 = vmatprep.subr.bf16.mxu1 %v19766_v62  ;;  %v2884_v3 = vrot.slane %v2882_v55, 1  ;;  %v5175_v55 = vld [vmem:[#allocation2 + $0x110] sm:$0xff]  ;;  %v5184_v26 = vld [vmem:[#allocation2 + $0x178] sm:$0x1] }
 0x1dd   : > { %v5202_v43 = vshrl.u32 %v5175_v55, 16 }
 0x1de   : > { %17377 = vmatpush3.bf16.msra.mxu0 %v19765_v25  ;;  %17637 = vmatpush3.bf16.msra.mxu1 %v19766_v62  ;;  %v2872_v25 = vrot.slane %v2870_v35, 1  ;;  %v24529_v62 = vshrl.u32 %v24492_v18, 16  ;;  %v20085_v18 = vld [vmem:[#allocation2 + $0x140] sm:$0xff]  ;;  %v20087_v35 = vld [vmem:[#allocation2 + $0x170] sm:$0xff] }
 0x1df   : > { %17378 = vmatprep.subr.bf16.mxu0 %v19767_v32  ;;  %17638 = vmatprep.subr.bf16.mxu1 %v19768_v14 }
 0x1e0   : > { %v2880_v24 = vor.u32 %v2879_v20, %v24529_v62  ;;  %v2873_v10 = vsel %vm1300_vm2, %v2868_v40, %v2872_v25  ;;  %v2848_v20 = vld [vmem:[#allocation2 + $0xe0] sm:$0xff]  ;;  %v5176_v40 = vld [vmem:[#allocation2 + $0x118] sm:$0x1]  ;;  %v5204_v25 = vshll.u32 %v5175_v55, 16 }
 0x1e1   : > { %17363 = vmatmul.mubr.bf16.gmra.mrb[24].mxu0 %v20079_v21  ;;  %17623 = vmatmul.mubr.bf16.gmra.mrb[28].mxu1 %v4810_v39  ;;  %v19782_v21 = vld [vmem:[%s24287_s3 + $0x288] sm:$0xff]   ;;  %v2937_v15 = vshll.u32 %v2848_v20, 16 }
 0x1e2   : > { %17379 = vmatpush3.bf16.msra.mxu0 %v19767_v32  ;;  %17639 = vmatpush3.bf16.msra.mxu1 %v19768_v14  ;;  %v2901_v32 = vshll.u32 %v2842_v27, 16  ;;  %v2843_v14 = vld [vmem:[#allocation2 + $0xa0] sm:$0x1]  ;;  %v2885_v39 = vsel %vm1300_vm2, %v2880_v24, %v2884_v3  ;;  %v2932_v24 = vrot.slane %v2930_v29, 1  ;;  %v5206_v63 = vrot.slane %v5204_v25, 1 }
 0x1e3   : > { %17366 = vmatprep.mubr.bf16.mxu0 %v20080_v60  ;;  %17642 = vmatprep.mubr.bf16.mxu1 %v20081_v30  ;;  %v2899_v60 = vshrl.u32 %v2842_v27, 16  ;;  %v24531_v30 = vshrl.u32 %v21196_v45, 16  ;;  %v2915_v45 = vrot.slane %v2442_v4, 1  ;;  %v20088_v27 = vld [vmem:[#allocation2 + $0x188] sm:$0xff]  ;;  %v5278_v29 = vrot.slane %v4807_v56, 1  ;;  %v19789_v56 = vld [vmem:[%s24287_s3 + $0x2b8] sm:$0xff]  }
 0x1e4   : > { %17380 = vmatprep.subr.bf16.mxu0 %v19769_v37  ;;  %17640 = vmatprep.subr.bf16.mxu1 %v19770_v61  ;;  %v21884_v25 = vld [vmem:[%s24288_s4] ss:$0 sm:$0xff] }
 0x1e6   : > { %17381 = vmatpush3.bf16.msra.mxu0 %v19769_v37  ;;  %17641 = vmatpush3.bf16.msra.mxu1 %v19770_v61  ;;  %v2903_v37 = vrot.slane %v2901_v32, 1  ;;  %v2906_v61 = vshll.u32 %v2843_v14, 16  ;;  %v5209_v14 = vshll.u32 %v5176_v40, 16  ;;  %v21878_v40 = vld [vmem:[%s24287_s3 + $0x240] sm:$0xff]  }
 0x1e7   : > { %17382 = vmatprep.subr.bf16.mxu0 %v19771_v28  ;;  %17658 = vmatprep.subr.bf16.mxu1 %v19772_v8 }
 0x1e8   : > { %v2904_v9 = vor.u32 %v2903_v37, %v2899_v60  ;;  %v2908_v11 = vrot.slane %v2906_v61, 1  ;;  %v5207_v61 = vor.u32 %v5206_v63, %v5202_v43  ;;  %v5182_v60 = vld [vmem:[#allocation2 + $0x160] sm:$0x1] }
 0x1e9   : > { %17367 = vmatmul.mubr.bf16.gmra.mrb[28].mxu0 %v20082_v44  ;;  %17643 = vmatmul.mubr.bf16.vlgmr.msra.gmra.mrb[16].mxu1 %v20083_v5  ;;  %v2927_v5 = vrot.slane %v2454_v34, 1  ;;  %v2916_v34 = vor.u32 %v2915_v45, %v2439_v42  ;;  %v2935_v42 = vshrl.u32 %v2848_v20, 16 }
 0x1ea   : > { %17383 = vmatpush3.bf16.msra.mxu0 %v19771_v28  ;;  %17659 = vmatpush3.bf16.msra.mxu1 %v19772_v8  ;;  %v2892_v28 = vor.u32 %v2891_v59, %v24531_v30  ;;  %v2896_v8 = vrot.slane %v2894_v7, 1  ;;  %v2909_v44 = vsel %vm1300_vm2, %v2904_v9, %v2908_v11  ;;  %v5221_v7 = vshll.u32 %v5178_v23, 16 }
 0x1eb   : > { %17386 = vmatprep.mubr.bf16.mxu0 %v2861_v54  ;;  %17646 = vmatprep.mubr.bf16.mxu1 %v20084_v13  ;;  %v19784_v54 = vld [vmem:[%s24287_s3 + $0x298] sm:$0xff]   ;;  %v19779_v13 = vld [vmem:[%s24287_s3 + $0x230] sm:$0xff]   ;;  %v2928_v62 = vor.u32 %v2927_v5, %v2451_v38  ;;  %v21809_v38 = vld [vmem:[#allocation2] sm:$0xff]  ;;  %v5245_v9 = vshll.u32 %v5182_v60, 16 }
 0x1ec   : > { %17384 = vmatprep.subr.bf16.mxu0 %v19773_v46  ;;  %17660 = vmatprep.subr.bf16.mxu1 %v19774_v47 }
 0x1ed   : > { %v2933_v59 = vsel %vm1300_vm2, %v2928_v62, %v2932_v24  ;;  %v5247_v52 = vrot.slane %v5245_v9, 1 }
 0x1ee   : > { %17385 = vmatpush3.bf16.msra.mxu0 %v19773_v46  ;;  %17661 = vmatpush3.bf16.msra.mxu1 %v19774_v47  ;;  %v5174_v46 = vld [vmem:[#allocation2 + $0x100] sm:$0x1]  ;;  %v2897_v47 = vsel %vm1300_vm2, %v2892_v28, %v2896_v8 }
 0x1ef   : > { %17662 = vmatprep.subr.bf16.mxu1 %v19775_v31  ;;  %17690 = vmatprep.subr.bf16.mxu0 %v19781_v53  ;;  %v5197_v4 = vshll.u32 %v5174_v46, 16  ;;  %v5248_v45 = vsel %vm1300_vm2, %v21589_v50, %v5247_v52 }
 0x1f1   : > { %17387 = vmatmul.mubr.bf16.vlgmr.msra.gmra.mrb[16].mxu0 %v2873_v10  ;;  %17647 = vmatmul.mubr.bf16.gmra.mrb[20].mxu1 %v20085_v18  ;;  %v5199_v3 = vrot.slane %v5197_v4, 1  ;;  %v2939_v10 = vrot.slane %v2937_v15, 1  ;;  %v19802_v15 = vld [vmem:[%s24287_s3 + $0x2b8] sm:$0xff]  }
 0x1f2   : > { %17663 = vmatpush3.bf16.msra.mxu1 %v19775_v31  ;;  %17390 = vmatprep.mubr.bf16.mxu0 %v2885_v39  ;;  %v2849_v31 = vld [vmem:[#allocation2 + $0xe8] sm:$0x1] }
 0x1f3   : > { %17650 = vmatprep.mubr.bf16.mxu1 %v20086_v51  ;;  %17664 = vmatprep.subr.bf16.mxu1 %v19776_v17  ;;  %v2942_v32 = vshll.u32 %v2849_v31, 16  ;;  %v5200_v18 = vsel %vm1300_vm2, %v21516_v49, %v5199_v3  ;;  %v2940_v39 = vor.u32 %v2939_v10, %v2935_v42  ;;  %v5223_v51 = vrot.slane %v5221_v7, 1  ;;  %v19796_v31 = vld [vmem:[%s24287_s3 + $0x2a0] sm:$0xff]  }
 0x1f4   : > { %17691 = vmatpush3.bf16.msra.mxu0 %v19781_v53  ;;  %v2920_v53 = vrot.slane %v2918_v12, 1  ;;  %v5266_v12 = vrot.slane %v4795_v0, 1  ;;  %v5279_v0 = vor.u32 %v5278_v29, %v4804_v16  ;;  %v19788_v16 = vld [vmem:[%s24287_s3 + $0x280] sm:$0xff]  }
 0x1f5   : > { %17692 = vmatprep.subr.bf16.mxu0 %v19782_v21  ;;  %v2944_v37 = vrot.slane %v2942_v32, 1  ;;  %v5224_v49 = vsel %vm1300_vm2, %v21551_v33, %v5223_v51 }
 0x1f6   : > { %17665 = vmatpush3.bf16.msra.mxu1 %v19776_v17  ;;  %v2921_v17 = vsel %vm1300_vm2, %v2916_v34, %v2920_v53  ;;  %v19798_v34 = vld [vmem:[%s24287_s3 + $0x2a8] sm:$0xff]   ;;  %v19800_v53 = vld [vmem:[%s24287_s3 + $0x2b0] sm:$0xff]  }
 0x1f7   : > { %17666 = vmatprep.subr.bf16.mxu1 %v19777_v58  ;;  %v2945_v30 = vsel %vm1300_vm2, %v2940_v39, %v2944_v37  ;;  %v19793_v39 = vld [vmem:[%s24287_s3 + $0x248] sm:$0xff]  }
 0x1f8   : > { %17693 = vmatpush3.bf16.msra.mxu0 %v19782_v21  ;;  %v5211_v21 = vrot.slane %v5209_v14, 1 }
 0x1f9   : > { %17391 = vmatmul.mubr.bf16.gmra.mrb[20].mxu0 %v2897_v47  ;;  %17651 = vmatmul.mubr.bf16.gmra.mrb[24].mxu1 %v20087_v35  ;;  %v5257_v47 = vshll.u32 %v5184_v26, 16 }
 0x1fa   : > { %17667 = vmatpush3.bf16.msra.mxu1 %v19777_v58  ;;  %17394 = vmatprep.mubr.bf16.mxu0 %v2909_v44  ;;  %v5180_v58 = vld [vmem:[#allocation2 + $0x148] sm:$0x1]  ;;  %v5212_v28 = vsel %vm1300_vm2, %v5207_v61, %v5211_v21  ;;  %v5267_v44 = vor.u32 %v5266_v12, %v4792_v6 }
 0x1fb   : > { %17654 = vmatprep.mubr.bf16.mxu1 %v20088_v27  ;;  %17668 = vmatprep.subr.bf16.mxu1 %v19778_v57  ;;  %v5233_v8 = vshll.u32 %v5180_v58, 16  ;;  %v5259_v35 = vrot.slane %v5257_v47, 1  ;;  %v19786_v6 = vld [vmem:[%s24287_s3 + $0x2a8] sm:$0xff]   ;;  %v19792_v27 = vld [vmem:[%s24287_s3 + $0x290] sm:$0xff]  }
 0x1fc   : > { %17694 = vmatprep.subr.bf16.mxu0 %v19783_v36 }
 0x1fd   : > { %17695 = vmatpush3.bf16.msra.mxu0 %v19783_v36  ;;  %v5235_v11 = vrot.slane %v5233_v8, 1  ;;  %v5188_v36 = vld [vmem:[#allocation2 + $0x1a8] sm:$0x1]  ;;  %v5260_v20 = vsel %vm1300_vm2, %v21597_v1, %v5259_v35 }
 0x1fe   : > { %17669 = vmatpush3.bf16.msra.mxu1 %v19778_v57  ;;  %17696 = vmatprep.subr.bf16.mxu0 %v19784_v54  ;;  %v5186_v57 = vld [vmem:[#allocation2 + $0x190] sm:$0x1]  ;;  %v19790_v1 = vld [vmem:[%s24287_s3 + $0x288] sm:$0xff]  }
 0x1ff   : > { %17670 = vmatprep.subr.bf16.mxu1 %v19779_v13  ;;  %v5236_v46 = vsel %vm1300_vm2, %v21559_v48, %v5235_v11  ;;  %v5269_v33 = vshll.u32 %v5186_v57, 16  ;;  %v5281_v48 = vshll.u32 %v5188_v36, 16 }
 0x201   : > { %17395 = vmatmul.mubr.bf16.gmra.mrb[24].mxu0 %v2921_v17  ;;  %17655 = vmatmul.mubr.bf16.gmra.mrb[28].mxu1 %v21809_v38  ;;  %v5271_v5 = vrot.slane %v5269_v33, 1  ;;  %v5283_v55 = vrot.slane %v5281_v48, 1 }
 0x202   : > { %17671 = vmatpush3.bf16.msra.mxu1 %v19779_v13  ;;  %17398 = vmatprep.mubr.bf16.mxu0 %v2933_v59  ;;  %v19794_v13 = vld [vmem:[%s24287_s3 + $0x298] sm:$0xff]  }
 0x203   : > { %17674 = vmatprep.mubr.bf16.mxu1 %v5200_v18  ;;  %17672 = vmatprep.subr.bf16.mxu1 %v19780_v22  ;;  %v5272_v50 = vsel %vm1300_vm2, %v5267_v44, %v5271_v5  ;;  %v5284_v4 = vsel %vm1300_vm2, %v5279_v0, %v5283_v55  ;;  %v19799_v5 = vld [vmem:[%s24287_s3 + $0x260] sm:$0xff]  }
 0x204   : > { %17697 = vmatpush3.bf16.msra.mxu0 %v19784_v54  ;;  %v19791_v54 = vld [vmem:[%s24287_s3 + $0x240] sm:$0xff]  }
 0x205   : > { %17698 = vmatprep.subr.bf16.mxu0 %v19785_v41 }
 0x206   : > { %17673 = vmatpush3.bf16.msra.mxu1 %v19780_v22 }
 0x207   : > { %17978 = vmatprep.subr.bf16.mxu1 %v19788_v16 }
 0x208   : > { %17699 = vmatpush3.bf16.msra.mxu0 %v19785_v41 }
 0x209   : > { %17399 = vmatmul.mubr.bf16.gmra.mrb[28].mxu0 %v2945_v30  ;;  %17675 = vmatmul.mubr.bf16.vlgmr.msra.gmra.mrb[16].mxu1 %v5212_v28  ;;  %v19795_v28 = vld [vmem:[%s24287_s3 + $0x250] sm:$0xff]  }
 0x20a   : > { %17678 = vmatprep.mubr.bf16.mxu1 %v5224_v49  ;;  %17706 = vmatprep.mubr.bf16.mxu0 %v21809_v38 }
 0x20b   : > { %17700 = vmatprep.subr.bf16.mxu0 %v19786_v6  ;;  %17979 = vmatpush3.bf16.msra.mxu1 %v19788_v16 }
 0x20c   : > { %17701 = vmatpush3.bf16.msra.mxu0 %v19786_v6  ;;  %17980 = vmatprep.subr.bf16.mxu1 %v19790_v1 }
 0x20d   : > { %17702 = vmatprep.subr.bf16.mxu0 %v19787_v19 }
 0x20f   : > { %17981 = vmatpush3.bf16.msra.mxu1 %v19790_v1 }
 0x210   : > { %17703 = vmatpush3.bf16.msra.mxu0 %v19787_v19  ;;  %17982 = vmatprep.subr.bf16.mxu1 %v19792_v27  ;;  %v19801_v19 = vld [vmem:[%s24287_s3 + $0x268] sm:$0xff]  }
 0x211   : > { %17679 = vmatmul.mubr.bf16.gmra.mrb[20].mxu1 %v5236_v46  ;;  %17704 = vmatprep.subr.bf16.mxu0 %v19789_v56  ;;  %v19797_v46 = vld [vmem:[%s24287_s3 + $0x258] sm:$0xff]  }
 0x212   : > { %17682 = vmatprep.mubr.bf16.mxu1 %v5248_v45 }
 0x213   : > { %17983 = vmatpush3.bf16.msra.mxu1 %v19792_v27 }
 0x214   : > { %17705 = vmatpush3.bf16.msra.mxu0 %v19789_v56  ;;  %17984 = vmatprep.subr.bf16.mxu1 %v19794_v13 }
 0x215   : > { %17722 = vmatprep.subr.bf16.mxu0 %v19791_v54 }
 0x217   : > { %17985 = vmatpush3.bf16.msra.mxu1 %v19794_v13 }
 0x218   : > { %17986 = vmatprep.subr.bf16.mxu1 %v19796_v31 }
 0x219   : > { %17683 = vmatmul.mubr.bf16.gmra.mrb[24].mxu1 %v5260_v20  ;;  %v5521_v20 = vld [vmem:[#allocation3] sm:$0x80] }
 0x21a   : > { %17686 = vmatprep.mubr.bf16.mxu1 %v5272_v50  ;;  %v5538_v16 = vshrl.u32 %v5521_v20, 16 }
 0x21b   : > { %17987 = vmatpush3.bf16.msra.mxu1 %v19796_v31 }
 0x21c   : > { %17988 = vmatprep.subr.bf16.mxu1 %v19798_v34 }
 0x21f   : > { %17989 = vmatpush3.bf16.msra.mxu1 %v19798_v34 }
 0x220   : > { %17990 = vmatprep.subr.bf16.mxu1 %v19800_v53 }
 0x221   : > { %17687 = vmatmul.mubr.bf16.gmra.mrb[28].mxu1 %v5284_v4 }
 0x223   : > { %17991 = vmatpush3.bf16.msra.mxu1 %v19800_v53 }
 0x224   : > { %17992 = vmatprep.subr.bf16.mxu1 %v19802_v15 }
 0x227   : > { %17993 = vmatpush3.bf16.msra.mxu1 %v19802_v15 }
 0x228   : > { %18010 = vmatprep.subr.bf16.mxu1 %v21878_v40 }
 0x2c4   : > { %v17388_v62 = vpop.f32.mrb[16].mxu0 }
 0x2c5   : > { %v3140_v24 = vadd.f32 %v17388_v62, %v21884_v25  ;;  %v3053_v3 = vpop.f32.mrb[17].mxu0 }
 0x2c6   : > { %v3138_v23 = vadd.f32 %v21884_v25, %v3053_v3  ;;  %v17389_v22 = vpop.f32.mrb[18].mxu0 }
 0x2c7   : > { %v3141_v42 = vadd.f32 %v17389_v22, %v21884_v25  ;;  %v3056_v32 = vpop.f32.mrb[19].mxu0  ;;  %v3156_v17 = vmax.f32 %v3140_v24, 0.0 }
 0x2c8   : > { %v3139_v14 = vadd.f32 %v21884_v25, %v3056_v32  ;;  %v3154_v43 = vmax.f32 %v3138_v23, 0.0  ;;  %v19803_v32 = vld [vmem:[%s24287_s3 + $0x270] sm:$0xff]  }
 0x2c9   : > { %v3157_v10 = vmax.f32 %v3141_v42, 0.0 }
 0x2ca   : > { %v3155_v63 = vmax.f32 %v3139_v14, 0.0  ;;  %v5540_v14 = vrot.slane %v5538_v16, 7 }
 0x2cb   : > { %v21890_v59 = vpack.c.bf16 %v3157_v10, %v3156_v17 }
 0x2cc   : > { %v21892_v7 = vpack.c.bf16 %v3155_v63, %v3154_v43  ;;  %v17392_v18 = vpop.f32.mrb[20].mxu0 }
 0x2cd   : > { %3180 = vst [vmem:[#allocation3 + $0x38] sm:$0xff] %v21890_v59  ;;  %v3144_v37 = vadd.f32 %v17392_v18, %v21884_v25  ;;  %v3069_v61 = vpop.f32.mrb[21].mxu0  ;;  %v5523_v18 = vld [vmem:[#allocation3 + $0x18] sm:$0x80]  ;;  %v5569_v20 = vshll.u32 %v21890_v59, 16 }
 0x2ce   : > { %3179 = vst [vmem:[#allocation3 + $0x20] sm:$0xff] %v21892_v7  ;;  %v3142_v21 = vadd.f32 %v21884_v25, %v3069_v61  ;;  %v17393_v51 = vpop.f32.mrb[22].mxu0  ;;  %17707 = vmatmul.mubr.bf16.vlgmr.msra.gmra.mrb[32].mxu0 %v21892_v7  ;;  %v5554_v23 = vshrl.u32 %v21892_v7, 16 }
 0x2cf   : > { %v3145_v58 = vadd.f32 %v17393_v51, %v21884_v25  ;;  %v3072_v60 = vpop.f32.mrb[23].mxu0  ;;  %17723 = vmatpush3.bf16.msra.mxu0 %v19791_v54  ;;  %17710 = vmatprep.mubr.bf16.mxu0 %v21890_v59  ;;  %v3160_v8 = vmax.f32 %v3144_v37, 0.0  ;;  %v5566_v51 = vshrl.u32 %v21890_v59, 16  ;;  %v19826_v59 = vld [vmem:[%s24287_s3 + $0x2d8] sm:$0xff]  }
 0x2d0   : > { %v3143_v30 = vadd.f32 %v21884_v25, %v3072_v60  ;;  %17724 = vmatprep.subr.bf16.mxu0 %v19793_v39  ;;  %v3158_v9 = vmax.f32 %v3142_v21, 0.0 }
 0x2d1   : > { %v3161_v49 = vmax.f32 %v3145_v58, 0.0 }
 0x2d2   : > { %v3159_v11 = vmax.f32 %v3143_v30, 0.0 }
 0x2d3   : > { %v21908_v52 = vpack.c.bf16 %v3161_v49, %v3160_v8  ;;  %17725 = vmatpush3.bf16.msra.mxu0 %v19793_v39  ;;  %v19805_v49 = vld [vmem:[%s24287_s3 + $0x278] sm:$0xff]  }
 0x2d4   : > { %v21910_v26 = vpack.c.bf16 %v3159_v11, %v3158_v9  ;;  %v17396_v57 = vpop.f32.mrb[24].mxu0  ;;  %17726 = vmatprep.subr.bf16.mxu0 %v19795_v28  ;;  %v5550_v9 = vshrl.u32 %v5523_v18, 16  ;;  %v5525_v11 = vld [vmem:[#allocation3 + $0x30] sm:$0x80] }
 0x2d5   : > { %3182 = vst [vmem:[#allocation3 + $0x68] sm:$0xff] %v21908_v52  ;;  %v3148_v47 = vadd.f32 %v17396_v57, %v21884_v25  ;;  %v3085_v45 = vpop.f32.mrb[25].mxu0  ;;  %v5556_v57 = vrot.slane %v5554_v23, 7 }
 0x2d6   : > { %3181 = vst [vmem:[#allocation3 + $0x50] sm:$0xff] %v21910_v26  ;;  %v3146_v12 = vadd.f32 %v21884_v25, %v3085_v45  ;;  %v17397_v33 = vpop.f32.mrb[26].mxu0  ;;  %17711 = vmatmul.mubr.bf16.gmra.mrb[36].mxu0 %v21910_v26  ;;  %v19806_v45 = vld [vmem:[%s24287_s3 + $0x248] sm:$0xff]  }
 0x2d7   : > { %v3149_v36 = vadd.f32 %v17397_v33, %v21884_v25  ;;  %v3088_v35 = vpop.f32.mrb[27].mxu0  ;;  %17727 = vmatpush3.bf16.msra.mxu0 %v19795_v28  ;;  %17714 = vmatprep.mubr.bf16.mxu0 %v21908_v52  ;;  %v3164_v29 = vmax.f32 %v3148_v47, 0.0 }
 0x2d8   : > { %v3147_v44 = vadd.f32 %v21884_v25, %v3088_v35  ;;  %17728 = vmatprep.subr.bf16.mxu0 %v19797_v46  ;;  %v3162_v50 = vmax.f32 %v3146_v12, 0.0  ;;  %v5557_v35 = vshll.u32 %v21892_v7, 16 }
 0x2d9   : > { %v3165_v48 = vmax.f32 %v3149_v36, 0.0  ;;  %v5548_v36 = vsel %vm856_vm1, %v5540_v14, %v21727_v2  ;;  %v19807_v2 = vld [vmem:[%s24287_s3 + $0x2c0] sm:$0xff]   ;;  %v19809_v14 = vld [vmem:[%s24287_s3 + $0x2c8] sm:$0xff]  }
 0x2da   : > { %v3163_v0 = vmax.f32 %v3147_v44, 0.0  ;;  %v5568_v44 = vrot.slane %v5566_v51, 7 }
 0x2db   : > { %v21926_v55 = vpack.c.bf16 %v3165_v48, %v3164_v29  ;;  %17729 = vmatpush3.bf16.msra.mxu0 %v19797_v46  ;;  %v5562_v48 = vshrl.u32 %v5525_v11, 16 }
 0x2dc   : > { %v21928_v4 = vpack.c.bf16 %v3163_v0, %v3162_v50  ;;  %v17400_v41 = vpop.f32.mrb[28].mxu0  ;;  %v17676_v6 = vpop.f32.mrb[16].mxu1  ;;  %17730 = vmatprep.subr.bf16.mxu0 %v19799_v5  ;;  %v19808_v0 = vld [vmem:[%s24287_s3 + $0x250] sm:$0xff]  }
 0x2dd   : > { %3184 = vst [vmem:[#allocation3 + $0x98] sm:$0xff] %v21926_v55  ;;  %v3152_v56 = vadd.f32 %v17400_v41, %v21884_v25  ;;  %v5472_v1 = vadd.f32 %v17676_v6, %v21884_v25  ;;  %v3101_v54 = vpop.f32.mrb[29].mxu0  ;;  %v5391_v27 = vpop.f32.mrb[17].mxu1  ;;  %v5552_v41 = vrot.slane %v5550_v9, 7  ;;  %v5578_v6 = vshrl.u32 %v21910_v26, 16 }
 0x2de   : > { %3183 = vst [vmem:[#allocation3 + $0x80] sm:$0xff] %v21928_v4  ;;  %v3150_v13 = vadd.f32 %v21884_v25, %v3101_v54  ;;  %v5470_v31 = vadd.f32 %v21884_v25, %v5391_v27  ;;  %v17401_v34 = vpop.f32.mrb[30].mxu0  ;;  %v17677_v53 = vpop.f32.mrb[18].mxu1  ;;  %17715 = vmatmul.mubr.bf16.gmra.mrb[40].mxu0 %v21928_v4  ;;  %v5571_v27 = vor.u32 %v5569_v20, %v5568_v44  ;;  %v5602_v9 = vshrl.u32 %v21928_v4, 16 }
 0x2df   : > { %v3153_v15 = vadd.f32 %v17401_v34, %v21884_v25  ;;  %v5473_v62 = vadd.f32 %v17677_v53, %v21884_v25  ;;  %v3104_v24 = vpop.f32.mrb[31].mxu0  ;;  %v5394_v3 = vpop.f32.mrb[19].mxu1  ;;  %17731 = vmatpush3.bf16.msra.mxu0 %v19799_v5  ;;  %17718 = vmatprep.mubr.bf16.mxu0 %v21926_v55  ;;  %v3168_v17 = vmax.f32 %v3152_v56, 0.0  ;;  %v5488_v10 = vmax.f32 %v5472_v1, 0.0  ;;  %v5527_v56 = vld [vmem:[#allocation3 + $0x48] sm:$0x80] }
 0x2e0   : > { %v3151_v22 = vadd.f32 %v21884_v25, %v3104_v24  ;;  %v5471_v42 = vadd.f32 %v21884_v25, %v5394_v3  ;;  %17732 = vmatprep.subr.bf16.mxu0 %v19801_v19  ;;  %v3166_v39 = vmax.f32 %v3150_v13, 0.0  ;;  %v5486_v37 = vmax.f32 %v5470_v31, 0.0  ;;  %v5529_v53 = vld [vmem:[#allocation3 + $0x60] sm:$0x80] }
 0x2e1   : > { %v3169_v43 = vmax.f32 %v3153_v15, 0.0  ;;  %v5489_v63 = vmax.f32 %v5473_v62, 0.0  ;;  %v5590_v13 = vshrl.u32 %v21908_v52, 16  ;;  %v5564_v34 = vrot.slane %v5562_v48, 7 }
 0x2e2   : > { %v3167_v61 = vmax.f32 %v3151_v22, 0.0  ;;  %v5487_v21 = vmax.f32 %v5471_v42, 0.0  ;;  %v5574_v24 = vshrl.u32 %v5527_v56, 16  ;;  %v5580_v3 = vrot.slane %v5578_v6, 7 }
 0x2e3   : > { %v21950_v58 = vpack.c.bf16 %v3169_v43, %v3168_v17  ;;  %v21952_v60 = vpack.c.bf16 %v5489_v63, %v5488_v10  ;;  %17733 = vmatpush3.bf16.msra.mxu0 %v19801_v19  ;;  %v19810_v17 = vld [vmem:[%s24287_s3 + $0x258] sm:$0xff]   ;;  %v5531_v10 = vld [vmem:[#allocation3 + $0x78] sm:$0x80]  ;;  %v5586_v18 = vshrl.u32 %v5529_v53, 16 }
 0x2e4   : > { %v21954_v30 = vpack.c.bf16 %v3167_v61, %v3166_v39  ;;  %v21956_v28 = vpack.c.bf16 %v5487_v21, %v5486_v37  ;;  %v17680_v8 = vpop.f32.mrb[20].mxu1  ;;  %17734 = vmatprep.subr.bf16.mxu0 %v19803_v32  ;;  %v5581_v39 = vshll.u32 %v21910_v26, 16  ;;  %v5592_v37 = vrot.slane %v5590_v13, 7  ;;  %v19813_v53 = vld [vmem:[%s24287_s3 + $0x2d8] sm:$0xff]  }
 0x2e5   : > { %3186 = vst [vmem:[#allocation3 + $0xc8] sm:$0xff] %v21950_v58  ;;  %5512 = vst [vmem:[#allocation3 + $0xf8] sm:$0xff] %v21952_v60  ;;  %v5476_v46 = vadd.f32 %v17680_v8, %v21884_v25  ;;  %v5407_v47 = vpop.f32.mrb[21].mxu1  ;;  %17994 = vmatprep.mubr.bf16.mxu1 %v21950_v58  ;;  %v5572_v8 = vsel %vm856_vm1, %v5564_v34, %v5571_v27  ;;  %v5588_v48 = vrot.slane %v5586_v18, 7 }
 0x2e6   : > { %3185 = vst [vmem:[#allocation3 + $0xb0] sm:$0xff] %v21954_v30  ;;  %5511 = vst [vmem:[#allocation3 + $0xe0] sm:$0xff] %v21956_v28  ;;  %v5474_v12 = vadd.f32 %v21884_v25, %v5407_v47  ;;  %v17681_v33 = vpop.f32.mrb[22].mxu1  ;;  %17719 = vmatmul.mubr.bf16.gmra.mrb[44].mxu0 %v21954_v30  ;;  %17995 = vmatmul.mubr.bf16.vlgmr.msra.gmra.mrb[32].mxu1 %v21956_v28  ;;  %v5576_v47 = vrot.slane %v5574_v24, 7 }
 0x2e7   : > { %v5477_v5 = vadd.f32 %v17681_v33, %v21884_v25  ;;  %v5410_v29 = vpop.f32.mrb[23].mxu1  ;;  %17735 = vmatpush3.bf16.msra.mxu0 %v19803_v32  ;;  %18011 = vmatpush3.bf16.msra.mxu1 %v21878_v40  ;;  %v5559_v40 = vor.u32 %v5557_v35, %v5556_v57  ;;  %v5492_v19 = vmax.f32 %v5476_v46, 0.0  ;;  %v19811_v57 = vld [vmem:[%s24287_s3 + $0x2d0] sm:$0xff]   ;;  %v19812_v46 = vld [vmem:[%s24287_s3 + $0x260] sm:$0xff]   ;;  %v5593_v33 = vshll.u32 %v21908_v52, 16 }
 0x2e8   : > { %v5475_v50 = vadd.f32 %v21884_v25, %v5410_v29  ;;  %17998 = vmatprep.mubr.bf16.mxu1 %v21952_v60  ;;  %17736 = vmatprep.subr.bf16.mxu0 %v19805_v49  ;;  %v5490_v1 = vmax.f32 %v5474_v12, 0.0  ;;  %v5583_v12 = vor.u32 %v5581_v39, %v5580_v3  ;;  %v5605_v3 = vshll.u32 %v21928_v4, 16  ;;  %v8314_v4 = vld [vmem:[#allocation3 + $0x100] sm:$0x1] }
 0x2e9   : > { %v5493_v16 = vmax.f32 %v5477_v5, 0.0  ;;  %18012 = vmatprep.subr.bf16.mxu1 %v19806_v45  ;;  %17738 = vmatprep.mubr.bf16.mxu0 %v5548_v36  ;;  %v5560_v32 = vsel %vm856_vm1, %v5552_v41, %v5559_v40  ;;  %v5614_v41 = vshrl.u32 %v21926_v55, 16  ;;  %v7888_v40 = vshrl.u32 %v21950_v58, 16 }
 0x2ea   : > { %v5491_v54 = vmax.f32 %v5475_v50, 0.0  ;;  %v5584_v34 = vsel %vm856_vm1, %v5576_v47, %v5583_v12 }
 0x2eb   : > { %v21997_v31 = vpack.c.bf16 %v5493_v16, %v5492_v19  ;;  %17737 = vmatpush3.bf16.msra.mxu0 %v19805_v49  ;;  %18013 = vmatpush3.bf16.msra.mxu1 %v19806_v45  ;;  %v5533_v49 = vld [vmem:[#allocation3 + $0x90] sm:$0x80]  ;;  %v5598_v45 = vshrl.u32 %v5531_v10, 16  ;;  %v5604_v16 = vrot.slane %v5602_v9, 7  ;;  %v7890_v10 = vrot.slane %v7888_v40, 7 }
 0x2ec   : > { %v21999_v15 = vpack.c.bf16 %v5491_v54, %v5490_v1  ;;  %v17684_v62 = vpop.f32.mrb[24].mxu1  ;;  %17754 = vmatprep.subr.bf16.mxu0 %v19807_v2  ;;  %18014 = vmatprep.subr.bf16.mxu1 %v19808_v0  ;;  %v5610_v50 = vshrl.u32 %v5533_v49, 16  ;;  %v19815_v49 = vld [vmem:[%s24287_s3 + $0x2e0] sm:$0xff]  }
 0x2ed   : > { %5514 = vst [vmem:[#allocation3 + $0x128] sm:$0xff] %v21997_v31  ;;  %v5480_v22 = vadd.f32 %v17684_v62, %v21884_v25  ;;  %v5423_v42 = vpop.f32.mrb[25].mxu1  ;;  %v19814_v62 = vld [vmem:[%s24287_s3 + $0x268] sm:$0xff]  }
 0x2ee   : > { %5513 = vst [vmem:[#allocation3 + $0x110] sm:$0xff] %v21999_v15  ;;  %v5478_v43 = vadd.f32 %v21884_v25, %v5423_v42  ;;  %v17685_v63 = vpop.f32.mrb[26].mxu1  ;;  %17739 = vmatmul.mubr.bf16.vlgmr.msra.gmra.mrb[32].mxu0 %v5560_v32  ;;  %17999 = vmatmul.mubr.bf16.gmra.mrb[36].mxu1 %v21999_v15  ;;  %v5600_v32 = vrot.slane %v5598_v45, 7 }
 0x2ef   : > { %v5481_v61 = vadd.f32 %v17685_v63, %v21884_v25  ;;  %v5426_v21 = vpop.f32.mrb[27].mxu1  ;;  %17755 = vmatpush3.bf16.msra.mxu0 %v19807_v2  ;;  %18015 = vmatpush3.bf16.msra.mxu1 %v19808_v0  ;;  %v5496_v36 = vmax.f32 %v5480_v22, 0.0  ;;  %v7867_v2 = vld [vmem:[#allocation3 + $0xc0] sm:$0x80]  ;;  %v5595_v0 = vor.u32 %v5593_v33, %v5592_v37  ;;  %v5607_v37 = vor.u32 %v5605_v3, %v5604_v16 }
 0x2f0   : > { %v5479_v11 = vadd.f32 %v21884_v25, %v5426_v21  ;;  %17742 = vmatprep.mubr.bf16.mxu0 %v5572_v8  ;;  %18002 = vmatprep.mubr.bf16.mxu1 %v21997_v31  ;;  %v5494_v5 = vmax.f32 %v5478_v43, 0.0  ;;  %v7884_v24 = vshrl.u32 %v7867_v2, 16  ;;  %v7891_v21 = vshll.u32 %v21950_v58, 16  ;;  %v19834_v58 = vld [vmem:[%s24287_s3 + $0x2f8] sm:$0xff]  }
 0x2f1   : > { %v5497_v44 = vmax.f32 %v5481_v61, 0.0  ;;  %17756 = vmatprep.subr.bf16.mxu0 %v19809_v14  ;;  %18016 = vmatprep.subr.bf16.mxu1 %v19810_v17  ;;  %v5596_v18 = vsel %vm856_vm1, %v5588_v48, %v5595_v0  ;;  %v5617_v61 = vshll.u32 %v21926_v55, 16  ;;  %v7900_v55 = vshrl.u32 %v21956_v28, 16 }
 0x2f2   : > { %v5495_v29 = vmax.f32 %v5479_v11, 0.0  ;;  %v19816_v11 = vld [vmem:[%s24287_s3 + $0x270] sm:$0xff]   ;;  %v7912_v2 = vshrl.u32 %v21952_v60, 16 }
 0x2f3   : > { %v22036_v19 = vpack.c.bf16 %v5497_v44, %v5496_v36  ;;  %17757 = vmatpush3.bf16.msra.mxu0 %v19809_v14  ;;  %18017 = vmatpush3.bf16.msra.mxu1 %v19810_v17  ;;  %v5612_v14 = vrot.slane %v5610_v50, 7  ;;  %v5616_v17 = vrot.slane %v5614_v41, 7  ;;  %v7886_v44 = vrot.slane %v7884_v24, 7  ;;  %v5966_v41 = vld [vmem:[#allocation3 + $0x10] sm:$0x1] }
 0x2f4   : > { %v22040_v56 = vpack.c.bf16 %v5495_v29, %v5494_v5  ;;  %v17688_v1 = vpop.f32.mrb[28].mxu1  ;;  %17758 = vmatprep.subr.bf16.mxu0 %v19811_v57  ;;  %18018 = vmatprep.subr.bf16.mxu1 %v19812_v46  ;;  %v7871_v5 = vld [vmem:[#allocation3 + $0xf0] sm:$0x80]  ;;  %v5984_v29 = vshll.u32 %v21809_v38, 16  ;;  %v7893_v50 = vor.u32 %v7891_v21, %v7890_v10  ;;  %v5608_v24 = vsel %vm856_vm1, %v5600_v32, %v5607_v37 }
 0x2f5   : > { %5516 = vst [vmem:[#allocation3 + $0x158] sm:$0xff] %v22036_v19  ;;  %v5484_v54 = vadd.f32 %v17688_v1, %v21884_v25  ;;  %v5439_v27 = vpop.f32.mrb[29].mxu1  ;;  %v5619_v48 = vor.u32 %v5617_v61, %v5616_v17  ;;  %v5982_v17 = vshrl.u32 %v21809_v38, 16  ;;  %v5989_v32 = vshll.u32 %v5966_v41, 16  ;;  %v19819_v61 = vld [vmem:[%s24287_s3 + $0x2f0] sm:$0xff]   ;;  %v19820_v38 = vld [vmem:[%s24287_s3 + $0x2c0] sm:$0xff]  }
 0x2f6   : > { %5515 = vst [vmem:[#allocation3 + $0x140] sm:$0xff] %v22040_v56  ;;  %v5482_v22 = vadd.f32 %v21884_v25, %v5439_v27  ;;  %v17689_v42 = vpop.f32.mrb[30].mxu1  ;;  %17743 = vmatmul.mubr.bf16.gmra.mrb[36].mxu0 %v5584_v34  ;;  %18003 = vmatmul.mubr.bf16.gmra.mrb[40].mxu1 %v22040_v56  ;;  %v7902_v34 = vrot.slane %v7900_v55, 7  ;;  %v5986_v10 = vrot.slane %v5984_v29, 1  ;;  %v7894_v37 = vsel %vm856_vm1, %v7886_v44, %v7893_v50  ;;  %v7875_v50 = vld [vmem:[#allocation3 + $0x120] sm:$0x80] }
 0x2f7   : > { %v5485_v43 = vadd.f32 %v17689_v42, %v21884_v25  ;;  %v5442_v63 = vpop.f32.mrb[31].mxu1  ;;  %17759 = vmatpush3.bf16.msra.mxu0 %v19811_v57  ;;  %18019 = vmatpush3.bf16.msra.mxu1 %v19812_v46  ;;  %v5535_v57 = vld [vmem:[#allocation3 + $0xa8] sm:$0x80]  ;;  %v5626_v46 = vshrl.u32 %v21954_v30, 16  ;;  %v5500_v47 = vmax.f32 %v5484_v54, 0.0  ;;  %v5629_v42 = vshll.u32 %v21954_v30, 16 }
 0x2f8   : > { %v5483_v8 = vadd.f32 %v21884_v25, %v5442_v63  ;;  %17746 = vmatprep.mubr.bf16.mxu0 %v5596_v18  ;;  %18006 = vmatprep.mubr.bf16.mxu1 %v22036_v19  ;;  %v7869_v25 = vld [vmem:[#allocation3 + $0xd8] sm:$0x80]  ;;  %v5498_v12 = vmax.f32 %v5482_v22, 0.0  ;;  %v5622_v1 = vshrl.u32 %v5535_v57, 16  ;;  %v7908_v22 = vshrl.u32 %v7871_v5, 16 }
 0x2f9   : > { %v5501_v45 = vmax.f32 %v5485_v43, 0.0  ;;  %17760 = vmatprep.subr.bf16.mxu0 %v19813_v53  ;;  %18020 = vmatprep.subr.bf16.mxu1 %v19814_v62  ;;  %v7896_v54 = vshrl.u32 %v7869_v25, 16  ;;  %v5628_v27 = vrot.slane %v5626_v46, 7  ;;  %v7903_v43 = vshll.u32 %v21956_v28, 16  ;;  %v7873_v25 = vld [vmem:[#allocation3 + $0x108] sm:$0x80] }
 0x2fa   : > { %v5499_v36 = vmax.f32 %v5483_v8, 0.0  ;;  %v7914_v63 = vrot.slane %v7912_v2, 7  ;;  %v5620_v18 = vsel %vm856_vm1, %v5612_v14, %v5619_v48  ;;  %v5624_v8 = vrot.slane %v5622_v1, 7  ;;  %v5970_v48 = vld [vmem:[#allocation3 + $0x40] sm:$0x1] }
 0x2fb   : > { %v5509_v0 = vpack.c.bf16 %v5501_v45, %v5500_v47  ;;  %17761 = vmatpush3.bf16.msra.mxu0 %v19813_v53  ;;  %18021 = vmatpush3.bf16.msra.mxu1 %v19814_v62  ;;  %v19817_v53 = vld [vmem:[%s24287_s3 + $0x2e8] sm:$0xff]   ;;  %v19818_v62 = vld [vmem:[%s24287_s3 + $0x278] sm:$0xff]   ;;  %v7898_v57 = vrot.slane %v7896_v54, 7  ;;  %v7905_v14 = vor.u32 %v7903_v43, %v7902_v34  ;;  %v7924_v47 = vshrl.u32 %v21999_v15, 16 }
 0x2fc   : > { %v22077_v16 = vpack.c.bf16 %v5499_v36, %v5498_v12  ;;  %17762 = vmatprep.subr.bf16.mxu0 %v19815_v49  ;;  %18022 = vmatprep.subr.bf16.mxu1 %v19816_v11  ;;  %v5968_v45 = vld [vmem:[#allocation3 + $0x28] sm:$0x1]  ;;  %v5987_v12 = vor.u32 %v5986_v10, %v5982_v17  ;;  %v5991_v36 = vrot.slane %v5989_v32, 1  ;;  %v7936_v5 = vshrl.u32 %v21997_v31, 16 }
 0x2fd   : > { %5518 = vst [vmem:[#allocation3 + $0x188] sm:$0xff] %v5509_v0  ;;  %v7910_v29 = vrot.slane %v7908_v22, 7  ;;  %v6001_v2 = vshll.u32 %v5968_v45, 16  ;;  %v7920_v0 = vshrl.u32 %v7873_v25, 16  ;;  %v7926_v41 = vrot.slane %v7924_v47, 7 }
 0x2fe   : > { %5517 = vst [vmem:[#allocation3 + $0x170] sm:$0xff] %v22077_v16  ;;  %17747 = vmatmul.mubr.bf16.gmra.mrb[40].mxu0 %v5608_v24  ;;  %18007 = vmatmul.mubr.bf16.gmra.mrb[44].mxu1 %v22077_v16  ;;  %v7906_v54 = vsel %vm856_vm1, %v7898_v57, %v7905_v14  ;;  %v5998_v34 = vrot.slane %v5557_v35, 1  ;;  %v5992_v24 = vsel %vm1300_vm2, %v5987_v12, %v5991_v36  ;;  %v7927_v22 = vshll.u32 %v21999_v15, 16  ;;  %v19823_v35 = vld [vmem:[%s24287_s3 + $0x300] sm:$0xff]   ;;  %v5972_v57 = vld [vmem:[#allocation3 + $0x58] sm:$0x1] }
 0x2ff   : > { %17763 = vmatpush3.bf16.msra.mxu0 %v19815_v49  ;;  %18023 = vmatpush3.bf16.msra.mxu1 %v19816_v11  ;;  %v5631_v49 = vor.u32 %v5629_v42, %v5628_v27  ;;  %v7915_v11 = vshll.u32 %v21952_v60, 16  ;;  %v19821_v60 = vld [vmem:[%s24287_s3 + $0x2f8] sm:$0xff]   ;;  %v19822_v27 = vld [vmem:[%s24287_s3 + $0x2c8] sm:$0xff]   ;;  %v7938_v17 = vrot.slane %v7936_v5, 7  ;;  %v6010_v32 = vrot.slane %v5569_v20, 1 }
 0x300   : > { %17750 = vmatprep.mubr.bf16.mxu0 %v5620_v18  ;;  %18026 = vmatprep.mubr.bf16.mxu1 %v7894_v37  ;;  %v6003_v18 = vrot.slane %v6001_v2, 1  ;;  %v7922_v37 = vrot.slane %v7920_v0, 7  ;;  %v5999_v20 = vor.u32 %v5998_v34, %v5554_v23  ;;  %v7960_v45 = vshrl.u32 %v22036_v19, 16  ;;  %v7879_v36 = vld [vmem:[#allocation3 + $0x150] sm:$0x80] }
 0x301   : > { %17764 = vmatprep.subr.bf16.mxu0 %v19817_v53  ;;  %18024 = vmatprep.subr.bf16.mxu1 %v19818_v62  ;;  %v7917_v44 = vor.u32 %v7915_v11, %v7914_v63  ;;  %v5632_v1 = vsel %vm856_vm1, %v5624_v8, %v5631_v49  ;;  %v19824_v63 = vld [vmem:[%s24287_s3 + $0x2d0] sm:$0xff]   ;;  %v7948_v8 = vshrl.u32 %v22040_v56, 16  ;;  %v7877_v49 = vld [vmem:[#allocation3 + $0x138] sm:$0x80]  ;;  %v6011_v25 = vor.u32 %v6010_v32, %v5566_v51  ;;  %v5976_v32 = vld [vmem:[#allocation3 + $0x88] sm:$0x1] }
 0x302   : > { %v7944_v5 = vshrl.u32 %v7877_v49, 16  ;;  %v6004_v23 = vsel %vm1300_vm2, %v5999_v20, %v6003_v18  ;;  %v6022_v51 = vrot.slane %v5581_v39, 1  ;;  %v7956_v2 = vshrl.u32 %v7879_v36, 16  ;;  %v19827_v39 = vld [vmem:[%s24287_s3 + $0x310] sm:$0xff]   ;;  %v8310_v20 = vld [vmem:[#allocation3 + $0xd0] sm:$0x1] }
 0x303   : > { %17765 = vmatpush3.bf16.msra.mxu0 %v19817_v53  ;;  %18025 = vmatpush3.bf16.msra.mxu1 %v19818_v62  ;;  %v6013_v53 = vshll.u32 %v5970_v48, 16  ;;  %v7932_v62 = vshrl.u32 %v7875_v50, 16  ;;  %v7918_v10 = vsel %vm856_vm1, %v7910_v29, %v7917_v44  ;;  %v6025_v44 = vshll.u32 %v5972_v57, 16  ;;  %v19825_v48 = vld [vmem:[%s24287_s3 + $0x308] sm:$0xff]  }
 0x304   : > { %17766 = vmatprep.subr.bf16.mxu0 %v19819_v61  ;;  %18042 = vmatprep.subr.bf16.mxu1 %v19820_v38  ;;  %v7950_v7 = vrot.slane %v7948_v8, 7  ;;  %v6034_v50 = vrot.slane %v5593_v33, 1  ;;  %v7951_v0 = vshll.u32 %v22040_v56, 16  ;;  %v19828_v33 = vld [vmem:[%s24287_s3 + $0x2e0] sm:$0xff]   ;;  %v7946_v34 = vrot.slane %v7944_v5, 7 }
 0x305   : > { %v6015_v14 = vrot.slane %v6013_v53, 1  ;;  %v7934_v12 = vrot.slane %v7932_v62, 7  ;;  %v7963_v62 = vshll.u32 %v22036_v19, 16  ;;  %v6049_v57 = vshll.u32 %v5976_v32, 16  ;;  %v19833_v32 = vld [vmem:[%s24287_s3 + $0x328] sm:$0xff]  }
 0x306   : > { %17751 = vmatmul.mubr.bf16.gmra.mrb[44].mxu0 %v5632_v1  ;;  %18027 = vmatmul.mubr.bf16.vlgmr.msra.gmra.mrb[32].mxu1 %v7906_v54  ;;  %v7953_v53 = vor.u32 %v7951_v0, %v7950_v7  ;;  %v19832_v7 = vld [vmem:[%s24287_s3 + $0x2f0] sm:$0xff]  }
 0x307   : > { %17767 = vmatpush3.bf16.msra.mxu0 %v19819_v61  ;;  %18043 = vmatpush3.bf16.msra.mxu1 %v19820_v38  ;;  %v7929_v61 = vor.u32 %v7927_v22, %v7926_v41  ;;  %v7939_v38 = vshll.u32 %v21997_v31, 16  ;;  %v5974_v31 = vld [vmem:[#allocation3 + $0x70] sm:$0x1]  ;;  %v7962_v41 = vrot.slane %v7960_v45, 7  ;;  %v6016_v1 = vsel %vm1300_vm2, %v6011_v25, %v6015_v14  ;;  %v19830_v14 = vld [vmem:[%s24287_s3 + $0x2e8] sm:$0xff]  }
 0x308   : > { %18030 = vmatprep.mubr.bf16.mxu1 %v7918_v10  ;;  %17768 = vmatprep.subr.bf16.mxu0 %v19821_v60  ;;  %v6023_v10 = vor.u32 %v6022_v51, %v5578_v6  ;;  %v7954_v52 = vsel %vm856_vm1, %v7946_v34, %v7953_v53 }
 0x309   : > { %18044 = vmatprep.subr.bf16.mxu1 %v19822_v27  ;;  %17770 = vmatprep.mubr.bf16.mxu0 %v5992_v24  ;;  %v7941_v11 = vor.u32 %v7939_v38, %v7938_v17  ;;  %v7930_v29 = vsel %vm856_vm1, %v7922_v37, %v7929_v61  ;;  %v22165_v24 = vld [vmem:[#allocation3 + $0x98] sm:$0xff]  ;;  %v7972_v17 = vshrl.u32 %v22077_v16, 16  ;;  %v7965_v37 = vor.u32 %v7963_v62, %v7962_v41  ;;  %v5978_v38 = vld [vmem:[#allocation3 + $0xa0] sm:$0x1] }
 0x30a   : > { %v7958_v61 = vrot.slane %v7956_v2, 7  ;;  %v6056_v19 = vshll.u32 %v22165_v24, 16  ;;  %v6061_v25 = vshll.u32 %v5978_v38, 16  ;;  %v8312_v2 = vld [vmem:[#allocation3 + $0xe8] sm:$0x1] }
 0x30b   : > { %17769 = vmatpush3.bf16.msra.mxu0 %v19821_v60  ;;  %18045 = vmatpush3.bf16.msra.mxu1 %v19822_v27  ;;  %v6037_v60 = vshll.u32 %v5974_v31, 16  ;;  %v7942_v54 = vsel %vm856_vm1, %v7934_v12, %v7941_v11  ;;  %v6027_v27 = vrot.slane %v6025_v44, 1  ;;  %v7974_v26 = vrot.slane %v7972_v17, 7  ;;  %v19831_v44 = vld [vmem:[%s24287_s3 + $0x320] sm:$0xff]  }
 0x30c   : > { %17786 = vmatprep.subr.bf16.mxu0 %v19823_v35  ;;  %18046 = vmatprep.subr.bf16.mxu1 %v19824_v63  ;;  %v6046_v11 = vrot.slane %v5605_v3, 1  ;;  %v8333_v12 = vshll.u32 %v8310_v20, 16  ;;  %v7975_v31 = vshll.u32 %v22077_v16, 16  ;;  %v7966_v36 = vsel %vm856_vm1, %v7958_v61, %v7965_v37  ;;  %v19835_v20 = vld [vmem:[%s24287_s3 + $0x330] sm:$0xff]  }
 0x30d   : > { %v6039_v18 = vrot.slane %v6037_v60, 1  ;;  %v6028_v6 = vsel %vm1300_vm2, %v6023_v10, %v6027_v27  ;;  %v6058_v5 = vrot.slane %v6056_v19, 1  ;;  %v8330_v3 = vrot.slane %v7891_v21, 1  ;;  %v5980_v60 = vld [vmem:[#allocation3 + $0xb8] sm:$0x1] }
 0x30e   : > { %17771 = vmatmul.mubr.bf16.vlgmr.msra.gmra.mrb[32].mxu0 %v6004_v23  ;;  %18031 = vmatmul.mubr.bf16.gmra.mrb[36].mxu1 %v7930_v29  ;;  %v6051_v23 = vrot.slane %v6049_v57, 1  ;;  %v22201_v29 = vld [vmem:[#allocation3 + $0x20] sm:$0xff]  ;;  %v6047_v51 = vor.u32 %v6046_v11, %v5602_v9  ;;  %v6063_v41 = vrot.slane %v6061_v25, 1  ;;  %v6073_v34 = vshll.u32 %v5980_v60, 16  ;;  %v19836_v57 = vld [vmem:[%s24287_s3 + $0x300] sm:$0xff]  }
 0x30f   : > { %17787 = vmatpush3.bf16.msra.mxu0 %v19823_v35  ;;  %18047 = vmatpush3.bf16.msra.mxu1 %v19824_v63  ;;  %v7881_v35 = vld [vmem:[#allocation3 + $0x168] sm:$0x80]  ;;  %v6035_v63 = vor.u32 %v6034_v50, %v5590_v13  ;;  %v6054_v50 = vshrl.u32 %v22165_v24, 16  ;;  %v6284_v27 = vshrl.u32 %v22201_v29, 16  ;;  %v8345_v53 = vshll.u32 %v8312_v2, 16 }
 0x310   : > { %17774 = vmatprep.mubr.bf16.mxu0 %v6016_v1  ;;  %18034 = vmatprep.mubr.bf16.mxu1 %v7942_v54  ;;  %v7968_v49 = vshrl.u32 %v7881_v35, 16  ;;  %v19829_v13 = vld [vmem:[%s24287_s3 + $0x318] sm:$0xff]   ;;  %v8335_v1 = vrot.slane %v8333_v12, 1  ;;  %v6052_v62 = vsel %vm1300_vm2, %v6047_v51, %v6051_v23  ;;  %v8342_v35 = vrot.slane %v7903_v43, 1  ;;  %v6265_v12 = vld [vmem:[#allocation3 + $0x30] sm:$0x80] }
 0x311   : > { %17788 = vmatprep.subr.bf16.mxu0 %v19825_v48  ;;  %18048 = vmatprep.subr.bf16.mxu1 %v19826_v59  ;;  %v6040_v45 = vsel %vm1300_vm2, %v6035_v63, %v6039_v18  ;;  %v6059_v54 = vor.u32 %v6058_v5, %v6054_v50  ;;  %v22228_v63 = vld [vmem:[#allocation3 + $0x38] sm:$0xff]  ;;  %v8357_v37 = vshll.u32 %v8314_v4, 16  ;;  %v6292_v23 = vshrl.u32 %v6265_v12, 16  ;;  %v19837_v2 = vld [vmem:[%s24287_s3 + $0x338] sm:$0xff]  }
 0x312   : > { %v7970_v21 = vrot.slane %v7968_v49, 7  ;;  %v6075_v49 = vrot.slane %v6073_v34, 1  ;;  %v8343_v11 = vor.u32 %v8342_v35, %v7900_v55  ;;  %v8318_v55 = vld [vmem:[#allocation3 + $0x130] sm:$0x1]  ;;  %v22272_v4 = vld [vmem:[#allocation3 + $0x68] sm:$0xff] }
 0x313   : > { %17789 = vmatpush3.bf16.msra.mxu0 %v19825_v48  ;;  %18049 = vmatpush3.bf16.msra.mxu1 %v19826_v59  ;;  %v22203_v48 = vld [vmem:[#allocation3 + $0xf8] sm:$0xff]  ;;  %v7977_v59 = vor.u32 %v7975_v31, %v7974_v26  ;;  %v6064_v61 = vsel %vm1300_vm2, %v6059_v54, %v6063_v41  ;;  %v8347_v26 = vrot.slane %v8345_v53, 1  ;;  %v8359_v5 = vrot.slane %v8357_v37, 1  ;;  %v22288_v37 = vld [vmem:[#allocation3 + $0x80] sm:$0xff] }
 0x314   : > { %17790 = vmatprep.subr.bf16.mxu0 %v19827_v39  ;;  %18050 = vmatprep.subr.bf16.mxu1 %v19828_v33  ;;  %v8352_v9 = vshll.u32 %v22203_v48, 16  ;;  %v8350_v25 = vshrl.u32 %v22203_v48, 16  ;;  %v19838_v41 = vld [vmem:[%s24287_s3 + $0x308] sm:$0xff]   ;;  %v6299_v54 = vshll.u32 %v22228_v63, 16  ;;  %v6332_v15 = vshrl.u32 %v22288_v37, 16 }
 0x315   : > { %v7978_v10 = vsel %vm856_vm1, %v7970_v21, %v7977_v59  ;;  %v8348_v60 = vsel %vm1300_vm2, %v8343_v11, %v8347_v26  ;;  %v6271_v12 = vld [vmem:[#allocation3 + $0x78] sm:$0x80] }
 0x316   : > { %17775 = vmatmul.mubr.bf16.gmra.mrb[36].mxu0 %v6028_v6  ;;  %18035 = vmatmul.mubr.bf16.gmra.mrb[40].mxu1 %v7954_v52  ;;  %v8354_v43 = vrot.slane %v8352_v9, 1  ;;  %v6296_v6 = vshrl.u32 %v22228_v63, 16  ;;  %v22243_v52 = vld [vmem:[#allocation3 + $0x50] sm:$0xff] }
 0x317   : > { %17791 = vmatpush3.bf16.msra.mxu0 %v19827_v39  ;;  %18051 = vmatpush3.bf16.msra.mxu1 %v19828_v33  ;;  %v8331_v39 = vor.u32 %v8330_v3, %v7888_v40  ;;  %v6263_v33 = vld [vmem:[#allocation3 + $0x18] sm:$0x80]  ;;  %v6070_v40 = vrot.slane %v5629_v42, 1  ;;  %v6286_v42 = vrot.slane %v6284_v27, 7  ;;  %v6308_v28 = vshrl.u32 %v22243_v52, 16 }
 0x318   : > { %17778 = vmatprep.mubr.bf16.mxu0 %v6040_v45  ;;  %18038 = vmatprep.mubr.bf16.mxu1 %v7966_v36  ;;  %v6280_v18 = vshrl.u32 %v6263_v33, 16  ;;  %v6287_v45 = vshll.u32 %v22201_v29, 16  ;;  %v8316_v36 = vld [vmem:[#allocation3 + $0x118] sm:$0x1]  ;;  %v8355_v30 = vor.u32 %v8354_v43, %v8350_v25  ;;  %v6298_v59 = vrot.slane %v6296_v6, 7 }
 0x319   : > { %17792 = vmatprep.subr.bf16.mxu0 %v19829_v13  ;;  %18052 = vmatprep.subr.bf16.mxu1 %v19830_v14  ;;  %v8336_v38 = vsel %vm1300_vm2, %v8331_v39, %v8335_v1  ;;  %v8369_v51 = vshll.u32 %v8316_v36, 16  ;;  %v8366_v1 = vrot.slane %v7927_v22, 1  ;;  %v8381_v33 = vshll.u32 %v8318_v55, 16  ;;  %v19840_v22 = vld [vmem:[%s24287_s3 + $0x310] sm:$0xff]   ;;  %v19842_v55 = vld [vmem:[%s24287_s3 + $0x318] sm:$0xff]  }
 0x31a   : > { %v6289_v3 = vor.u32 %v6287_v45, %v6286_v42  ;;  %v8360_v53 = vsel %vm1300_vm2, %v8355_v30, %v8359_v5  ;;  %v6320_v43 = vshrl.u32 %v22272_v4, 16 }
 0x31b   : > { %17793 = vmatpush3.bf16.msra.mxu0 %v19829_v13  ;;  %18053 = vmatpush3.bf16.msra.mxu1 %v19830_v14  ;;  %v22245_v13 = vld [vmem:[#allocation3 + $0x128] sm:$0xff]  ;;  %v6071_v14 = vor.u32 %v6070_v40, %v5626_v46  ;;  %v6301_v40 = vor.u32 %v6299_v54, %v6298_v59  ;;  %v8371_v35 = vrot.slane %v8369_v51, 1  ;;  %v8383_v26 = vrot.slane %v8381_v33, 1  ;;  %v19844_v33 = vld [vmem:[%s24287_s3 + $0x320] sm:$0xff]  }
 0x31c   : > { %17794 = vmatprep.subr.bf16.mxu0 %v19831_v44  ;;  %18054 = vmatprep.subr.bf16.mxu1 %v19832_v7  ;;  %v6267_v46 = vld [vmem:[#allocation3 + $0x48] sm:$0x80]  ;;  %v8374_v42 = vshrl.u32 %v22245_v13, 16  ;;  %v8390_v59 = vrot.slane %v7951_v0, 1  ;;  %v6323_v51 = vshll.u32 %v22272_v4, 16 }
 0x31d   : > { %v6076_v21 = vsel %vm1300_vm2, %v6071_v14, %v6075_v49  ;;  %v6304_v39 = vshrl.u32 %v6267_v46, 16  ;;  %v19841_v46 = vld [vmem:[%s24287_s3 + $0x348] sm:$0xff]  }
 0x31e   : > { %17779 = vmatmul.mubr.bf16.gmra.mrb[40].mxu0 %v6052_v62  ;;  %18039 = vmatmul.mubr.bf16.gmra.mrb[44].mxu1 %v7978_v10  ;;  %v19839_v62 = vld [vmem:[%s24287_s3 + $0x340] sm:$0xff]   ;;  %v6310_v10 = vrot.slane %v6308_v28, 7 }
 0x31f   : > { %17795 = vmatpush3.bf16.msra.mxu0 %v19831_v44  ;;  %18055 = vmatpush3.bf16.msra.mxu1 %v19832_v7  ;;  %v6282_v44 = vrot.slane %v6280_v18, 7  ;;  %v8376_v7 = vshll.u32 %v22245_v13, 16  ;;  %v6269_v18 = vld [vmem:[#allocation3 + $0x60] sm:$0x80]  ;;  %v6306_v49 = vrot.slane %v6304_v39, 7  ;;  %v6334_v39 = vrot.slane %v6332_v15, 7 }
 0x320   : > { %17782 = vmatprep.mubr.bf16.mxu0 %v6064_v61  ;;  %18058 = vmatprep.mubr.bf16.mxu1 %v8336_v38  ;;  %v22290_v61 = vld [vmem:[#allocation3 + $0x158] sm:$0xff]  ;;  %v8367_v38 = vor.u32 %v8366_v1, %v7924_v47  ;;  %v8322_v47 = vld [vmem:[#allocation3 + $0x160] sm:$0x1] }
 0x321   : > { %17796 = vmatprep.subr.bf16.mxu0 %v19833_v32  ;;  %18056 = vmatprep.subr.bf16.mxu1 %v19834_v58  ;;  %v6290_v34 = vsel %vm856_vm1, %v6282_v44, %v6289_v3  ;;  %v8400_v36 = vshll.u32 %v22290_v61, 16  ;;  %v6316_v44 = vshrl.u32 %v6269_v18, 16  ;;  %v19843_v1 = vld [vmem:[%s24287_s3 + $0x350] sm:$0xff]   ;;  %v8324_v18 = vld [vmem:[#allocation3 + $0x178] sm:$0x1] }
 0x322   : > { %v8372_v30 = vsel %vm1300_vm2, %v8367_v38, %v8371_v35  ;;  %v6273_v35 = vld [vmem:[#allocation3 + $0x90] sm:$0x80] }
 0x323   : > { %17797 = vmatpush3.bf16.msra.mxu0 %v19833_v32  ;;  %18057 = vmatpush3.bf16.msra.mxu1 %v19834_v58  ;;  %v8378_v32 = vrot.slane %v8376_v7, 1  ;;  %v6294_v58 = vrot.slane %v6292_v23, 7  ;;  %v6322_v23 = vrot.slane %v6320_v43, 7  ;;  %v8402_v0 = vrot.slane %v8400_v36, 1 }
 0x324   : > { %17798 = vmatprep.subr.bf16.mxu0 %v19835_v20  ;;  %18074 = vmatprep.subr.bf16.mxu1 %v19836_v57 }
 0x325   : > { %v8379_v11 = vor.u32 %v8378_v32, %v8374_v42  ;;  %v6302_v3 = vsel %vm856_vm1, %v6294_v58, %v6301_v40  ;;  %v8391_v32 = vor.u32 %v8390_v59, %v7948_v8  ;;  %v6335_v58 = vshll.u32 %v22288_v37, 16  ;;  %v8606_v8 = vld [vmem:[#allocation3 + $0xd8] sm:$0x80]  ;;  %v22356_v59 = vld [vmem:[#allocation3 + $0xc8] sm:$0xff] }
 0x326   : > { %17783 = vmatmul.mubr.bf16.gmra.mrb[44].mxu0 %v6076_v21  ;;  %18059 = vmatmul.mubr.bf16.vlgmr.msra.gmra.mrb[32].mxu1 %v8348_v60  ;;  %v6328_v21 = vshrl.u32 %v6271_v12, 16  ;;  %v8405_v60 = vshll.u32 %v8322_v47, 16  ;;  %v8398_v40 = vshrl.u32 %v22290_v61, 16  ;;  %v6340_v12 = vshrl.u32 %v6273_v35, 16 }
 0x327   : > { %17799 = vmatpush3.bf16.msra.mxu0 %v19835_v20  ;;  %18075 = vmatpush3.bf16.msra.mxu1 %v19836_v57  ;;  %v6311_v20 = vshll.u32 %v22243_v52, 16  ;;  %v8320_v57 = vld [vmem:[#allocation3 + $0x148] sm:$0x1]  ;;  %v6346_v47 = vrot.slane %v6054_v50, 7  ;;  %v8623_v50 = vshrl.u32 %v8606_v8, 16 }
 0x328   : > { %17802 = vmatprep.mubr.bf16.mxu0 %v6290_v34  ;;  %18062 = vmatprep.mubr.bf16.mxu1 %v8360_v53  ;;  %v8393_v5 = vshll.u32 %v8320_v57, 16  ;;  %v6318_v34 = vrot.slane %v6316_v44, 7  ;;  %v6330_v38 = vrot.slane %v6328_v21, 7  ;;  %v8407_v57 = vrot.slane %v8405_v60, 1 }
 0x329   : > { %17800 = vmatprep.subr.bf16.mxu0 %v19837_v2  ;;  %18076 = vmatprep.subr.bf16.mxu1 %v19838_v41  ;;  %v6313_v14 = vor.u32 %v6311_v20, %v6310_v10  ;;  %v6325_v10 = vor.u32 %v6323_v51, %v6322_v23  ;;  %v8417_v44 = vshll.u32 %v8324_v18, 16  ;;  %v6368_v18 = vshrl.u32 %v22356_v59, 16 }
 0x32a   : > { %v8395_v53 = vrot.slane %v8393_v5, 1 }
 0x32b   : > { %17801 = vmatpush3.bf16.msra.mxu0 %v19837_v2  ;;  %18077 = vmatpush3.bf16.msra.mxu1 %v19838_v41  ;;  %v6314_v2 = vsel %vm856_vm1, %v6306_v49, %v6313_v14  ;;  %v8384_v41 = vsel %vm1300_vm2, %v8379_v11, %v8383_v26  ;;  %v6337_v49 = vor.u32 %v6335_v58, %v6334_v39  ;;  %v6275_v14 = vld [vmem:[#allocation3 + $0xa8] sm:$0x80]  ;;  %v6342_v39 = vrot.slane %v6340_v12, 7 }
 0x32c   : > { %17818 = vmatprep.subr.bf16.mxu0 %v19839_v62  ;;  %18078 = vmatprep.subr.bf16.mxu1 %v19840_v22  ;;  %v8403_v26 = vor.u32 %v8402_v0, %v8398_v40  ;;  %v6326_v5 = vsel %vm856_vm1, %v6318_v34, %v6325_v10  ;;  %v6352_v23 = vshrl.u32 %v6275_v14, 16  ;;  %v6349_v0 = vor.u32 %v6346_v47, %v6056_v19  ;;  %v6277_v34 = vld [vmem:[#allocation3 + $0xc0] sm:$0x80]  ;;  %v8610_v14 = vld [vmem:[#allocation3 + $0x108] sm:$0x80] }
 0x32d   : > { %v6338_v21 = vsel %vm856_vm1, %v6330_v38, %v6337_v49  ;;  %v8608_v38 = vld [vmem:[#allocation3 + $0xf0] sm:$0x80]  ;;  %v8625_v49 = vrot.slane %v8623_v50, 7  ;;  %v6371_v50 = vshll.u32 %v22356_v59, 16 }
 0x32e   : > { %17803 = vmatmul.mubr.bf16.vlgmr.msra.gmra.mrb[32].mxu0 %v6302_v3  ;;  %18063 = vmatmul.mubr.bf16.gmra.mrb[36].mxu1 %v8372_v30  ;;  %v8396_v3 = vsel %vm1300_vm2, %v8391_v32, %v8395_v53  ;;  %v19845_v30 = vld [vmem:[%s24287_s3 + $0x358] sm:$0xff]   ;;  %v8408_v60 = vsel %vm1300_vm2, %v8403_v26, %v8407_v57  ;;  %v22372_v53 = vld [vmem:[#allocation3 + $0x110] sm:$0xff]  ;;  %v6354_v57 = vrot.slane %v6352_v23, 7  ;;  %v8635_v8 = vshrl.u32 %v8608_v38, 16 }
 0x32f   : > { %17819 = vmatpush3.bf16.msra.mxu0 %v19839_v62  ;;  %18079 = vmatpush3.bf16.msra.mxu1 %v19840_v22  ;;  %v22328_v62 = vld [vmem:[#allocation3 + $0xb0] sm:$0xff]  ;;  %v22330_v22 = vld [vmem:[#allocation3 + $0xe0] sm:$0xff]  ;;  %v8651_v16 = vshrl.u32 %v22372_v53, 16  ;;  %v6350_v12 = vsel %vm856_vm1, %v6342_v39, %v6349_v0  ;;  %v8654_v0 = vshll.u32 %v22372_v53, 16 }
 0x330   : > { %17806 = vmatprep.mubr.bf16.mxu0 %v6314_v2  ;;  %18066 = vmatprep.mubr.bf16.mxu1 %v8384_v41  ;;  %v6356_v56 = vshrl.u32 %v22328_v62, 16  ;;  %v8627_v11 = vshrl.u32 %v22330_v22, 16  ;;  %v19847_v2 = vld [vmem:[%s24287_s3 + $0x360] sm:$0xff]   ;;  %v6359_v32 = vshll.u32 %v22328_v62, 16  ;;  %v8630_v35 = vshll.u32 %v22330_v22, 16 }
 0x331   : > { %17820 = vmatprep.subr.bf16.mxu0 %v19841_v46  ;;  %18080 = vmatprep.subr.bf16.mxu1 %v19842_v55 }
 0x332   : > { %v6358_v41 = vrot.slane %v6356_v56, 7 }
 0x333   : > { %17821 = vmatpush3.bf16.msra.mxu0 %v19841_v46  ;;  %18081 = vmatpush3.bf16.msra.mxu1 %v19842_v55  ;;  %v19846_v46 = vld [vmem:[%s24287_s3 + $0x328] sm:$0xff]   ;;  %v8414_v55 = vrot.slane %v7975_v31, 1  ;;  %v8629_v31 = vrot.slane %v8627_v11, 7 }
 0x334   : > { %17822 = vmatprep.subr.bf16.mxu0 %v19843_v1  ;;  %18082 = vmatprep.subr.bf16.mxu1 %v19844_v33  ;;  %v6361_v19 = vor.u32 %v6359_v32, %v6358_v41  ;;  %v22407_v41 = vld [vmem:[#allocation3 + $0x140] sm:$0xff] }
 0x335   : > { %v8415_v10 = vor.u32 %v8414_v55, %v7972_v17  ;;  %v8632_v26 = vor.u32 %v8630_v35, %v8629_v31  ;;  %v6364_v17 = vshrl.u32 %v6277_v34, 16  ;;  %v8675_v38 = vshrl.u32 %v22407_v41, 16 }
 0x336   : > { %17807 = vmatmul.mubr.bf16.gmra.mrb[36].mxu0 %v6326_v5  ;;  %18067 = vmatmul.mubr.bf16.gmra.mrb[40].mxu1 %v8396_v3  ;;  %v19850_v5 = vld [vmem:[%s24287_s3 + $0x338] sm:$0xff]   ;;  %v6370_v3 = vrot.slane %v6368_v18, 7  ;;  %v6362_v55 = vsel %vm856_vm1, %v6354_v57, %v6361_v19  ;;  %v8614_v57 = vld [vmem:[#allocation3 + $0x138] sm:$0x80] }
 0x337   : > { %17823 = vmatpush3.bf16.msra.mxu0 %v19843_v1  ;;  %18083 = vmatpush3.bf16.msra.mxu1 %v19844_v33  ;;  %v19848_v1 = vld [vmem:[%s24287_s3 + $0x330] sm:$0xff]   ;;  %v8419_v33 = vrot.slane %v8417_v44, 1  ;;  %v19849_v44 = vld [vmem:[%s24287_s3 + $0x368] sm:$0xff]   ;;  %v8633_v23 = vsel %vm856_vm1, %v8625_v49, %v8632_v26 }
 0x338   : > { %17810 = vmatprep.mubr.bf16.mxu0 %v6338_v21  ;;  %18070 = vmatprep.mubr.bf16.mxu1 %v8408_v60  ;;  %v8653_v21 = vrot.slane %v8651_v16, 7  ;;  %v19852_v60 = vld [vmem:[%s24287_s3 + $0x340] sm:$0xff]   ;;  %v6373_v31 = vor.u32 %v6371_v50, %v6370_v3  ;;  %v19854_v26 = vld [vmem:[%s24287_s3 + $0x348] sm:$0xff]  }
 0x339   : > { %17824 = vmatprep.subr.bf16.mxu0 %v19845_v30  ;;  %18084 = vmatprep.subr.bf16.mxu1 %v19846_v46  ;;  %v8420_v47 = vsel %vm1300_vm2, %v8415_v10, %v8419_v33  ;;  %v8612_v33 = vld [vmem:[#allocation3 + $0x120] sm:$0x80] }
 0x33a   : > { %v8656_v10 = vor.u32 %v8654_v0, %v8653_v21 }
 0x33b   : > { %17825 = vmatpush3.bf16.msra.mxu0 %v19845_v30  ;;  %18085 = vmatpush3.bf16.msra.mxu1 %v19846_v46  ;;  %v8641_v30 = vrot.slane %v8350_v25, 7  ;;  %v8647_v46 = vshrl.u32 %v8610_v14, 16  ;;  %v19851_v25 = vld [vmem:[%s24287_s3 + $0x370] sm:$0xff]   ;;  %v8659_v14 = vshrl.u32 %v8612_v33, 16  ;;  %v22455_v33 = vld [vmem:[#allocation3 + $0x188] sm:$0xff] }
 0x33c   : > { %17826 = vmatprep.subr.bf16.mxu0 %v19847_v2  ;;  %18086 = vmatprep.subr.bf16.mxu1 %v19848_v1 }
 0x33d   : > { %v8644_v39 = vor.u32 %v8641_v30, %v8352_v9  ;;  %v8649_v34 = vrot.slane %v8647_v46, 7  ;;  %v19853_v9 = vld [vmem:[%s24287_s3 + $0x378] sm:$0xff]   ;;  %v8661_v3 = vrot.slane %v8659_v14, 7  ;;  %v8678_v46 = vshll.u32 %v22407_v41, 16 }
 0x33e   : > { %17811 = vmatmul.mubr.bf16.gmra.mrb[40].mxu0 %v6350_v12  ;;  %18071 = vmatmul.mubr.bf16.gmra.mrb[44].mxu1 %v8420_v47  ;;  %v8671_v12 = vshrl.u32 %v8614_v57, 16  ;;  %v8677_v47 = vrot.slane %v8675_v38, 7  ;;  %v8711_v14 = vshrl.u32 %v22455_v33, 16 }
 0x33f   : > { %17827 = vmatpush3.bf16.msra.mxu0 %v19847_v2  ;;  %18087 = vmatpush3.bf16.msra.mxu1 %v19848_v1  ;;  %v6366_v2 = vrot.slane %v6364_v17, 7  ;;  %v8637_v1 = vrot.slane %v8635_v8, 7  ;;  %v8665_v17 = vrot.slane %v8374_v42, 7  ;;  %v8657_v8 = vsel %vm856_vm1, %v8649_v34, %v8656_v10  ;;  %v19856_v42 = vld [vmem:[%s24287_s3 + $0x350] sm:$0xff]  }
 0x340   : > { %17814 = vmatprep.mubr.bf16.mxu0 %v6362_v55  ;;  %18090 = vmatprep.mubr.bf16.mxu1 %v8633_v23  ;;  %v8616_v55 = vld [vmem:[#allocation3 + $0x150] sm:$0x80]  ;;  %v8673_v23 = vrot.slane %v8671_v12, 7  ;;  %v8680_v21 = vor.u32 %v8678_v46, %v8677_v47 }
 0x341   : > { %17828 = vmatprep.subr.bf16.mxu0 %v19849_v44  ;;  %18088 = vmatprep.subr.bf16.mxu1 %v19850_v5  ;;  %v6374_v19 = vsel %vm856_vm1, %v6366_v2, %v6373_v31  ;;  %v8645_v49 = vsel %vm856_vm1, %v8637_v1, %v8644_v39  ;;  %v8668_v30 = vor.u32 %v8665_v17, %v8376_v7  ;;  %v19857_v7 = vld [vmem:[%s24287_s3 + $0x388] sm:$0xff]   ;;  %v19858_v31 = vld [vmem:[%s24287_s3 + $0x358] sm:$0xff]   ;;  %v8683_v1 = vshrl.u32 %v8616_v55, 16  ;;  %v8620_v17 = vld [vmem:[#allocation3 + $0x180] sm:$0x80] }
 0x342   : > { %v8689_v39 = vrot.slane %v8398_v40, 7  ;;  %v8681_v34 = vsel %vm856_vm1, %v8673_v23, %v8680_v21  ;;  %v19859_v40 = vld [vmem:[%s24287_s3 + $0x390] sm:$0xff]   ;;  %v8714_v55 = vshll.u32 %v22455_v33, 16  ;;  %v19863_v23 = vld [vmem:[%s24287_s3 + $0x3a0] sm:$0xff]  }
 0x343   : > { %17829 = vmatpush3.bf16.msra.mxu0 %v19849_v44  ;;  %18089 = vmatpush3.bf16.msra.mxu1 %v19850_v5  ;;  %v19855_v44 = vld [vmem:[%s24287_s3 + $0x380] sm:$0xff]   ;;  %v8669_v2 = vsel %vm856_vm1, %v8661_v3, %v8668_v30  ;;  %v8713_v3 = vrot.slane %v8711_v14, 7  ;;  %v19864_v21 = vld [vmem:[%s24287_s3 + $0x370] sm:$0xff]  }
 0x344   : > { %17830 = vmatprep.subr.bf16.mxu0 %v19851_v25  ;;  %18106 = vmatprep.subr.bf16.mxu1 %v19852_v60  ;;  %v22437_v5 = vld [vmem:[#allocation3 + $0x170] sm:$0xff] }
 0x346   : > { %17815 = vmatmul.mubr.bf16.gmra.mrb[44].mxu0 %v6374_v19  ;;  %18091 = vmatmul.mubr.bf16.vlgmr.msra.gmra.mrb[32].mxu1 %v8645_v49  ;;  %v19860_v19 = vld [vmem:[%s24287_s3 + $0x360] sm:$0xff]   ;;  %v8685_v49 = vrot.slane %v8683_v1, 7  ;;  %v19865_v1 = vld [vmem:[%s24287_s3 + $0x3a8] sm:$0xff]  }
 0x347   : > { %17831 = vmatpush3.bf16.msra.mxu0 %v19851_v25  ;;  %18107 = vmatpush3.bf16.msra.mxu1 %v19852_v60  ;;  %v8699_v25 = vshrl.u32 %v22437_v5, 16  ;;  %v8618_v60 = vld [vmem:[#allocation3 + $0x168] sm:$0x80] }
 0x348   : > { %17834 = vmatprep.mubr.bf16.mxu0 %v22201_v29  ;;  %18094 = vmatprep.mubr.bf16.mxu1 %v8657_v8  ;;  %v8695_v10 = vshrl.u32 %v8618_v60, 16 }
 0x349   : > { %17832 = vmatprep.subr.bf16.mxu0 %v19853_v9  ;;  %18108 = vmatprep.subr.bf16.mxu1 %v19854_v26  ;;  %v8701_v57 = vrot.slane %v8699_v25, 7 }
 0x34a   : > { %v8697_v8 = vrot.slane %v8695_v10, 7 }
 0x34b   : > { %17833 = vmatpush3.bf16.msra.mxu0 %v19853_v9  ;;  %18109 = vmatpush3.bf16.msra.mxu1 %v19854_v26  ;;  %v8692_v9 = vor.u32 %v8689_v39, %v8400_v36  ;;  %v8702_v26 = vshll.u32 %v22437_v5, 16  ;;  %v19862_v36 = vld [vmem:[%s24287_s3 + $0x368] sm:$0xff]   ;;  %v19866_v39 = vld [vmem:[%s24287_s3 + $0x378] sm:$0xff]  }
 0x34c   : > { %17850 = vmatprep.subr.bf16.mxu0 %v19855_v44  ;;  %18110 = vmatprep.subr.bf16.mxu1 %v19856_v42 }
 0x34d   : > { %v8704_v12 = vor.u32 %v8702_v26, %v8701_v57  ;;  %v8693_v47 = vsel %vm856_vm1, %v8685_v49, %v8692_v9  ;;  %v19867_v57 = vld [vmem:[%s24287_s3 + $0x3b0] sm:$0xff]   ;;  %v6744_v49 = vld [vmem:[#allocation3 + $0x58] sm:$0x1]  ;;  %v19869_v9 = vld [vmem:[%s24287_s3 + $0x3b8] sm:$0xff]  }
 0x34e   : > { %17835 = vmatmul.mubr.bf16.vlgmr.msra.gmra.mrb[32].mxu0 %v22228_v63  ;;  %18095 = vmatmul.mubr.bf16.gmra.mrb[36].mxu1 %v8669_v2  ;;  %v8716_v2 = vor.u32 %v8714_v55, %v8713_v3  ;;  %v19874_v63 = vld [vmem:[%s24287_s3 + $0x398] sm:$0xff]  }
 0x34f   : > { %17851 = vmatpush3.bf16.msra.mxu0 %v19855_v44  ;;  %18111 = vmatpush3.bf16.msra.mxu1 %v19856_v42  ;;  %v19861_v44 = vld [vmem:[%s24287_s3 + $0x398] sm:$0xff]   ;;  %v8707_v42 = vshrl.u32 %v8620_v17, 16  ;;  %v8705_v30 = vsel %vm856_vm1, %v8697_v8, %v8704_v12  ;;  %v19870_v17 = vld [vmem:[%s24287_s3 + $0x388] sm:$0xff]   ;;  %v6772_v8 = vrot.slane %v6299_v54, 1  ;;  %v19871_v54 = vld [vmem:[%s24287_s3 + $0x3c0] sm:$0xff]  }
 0x350   : > { %17838 = vmatprep.mubr.bf16.mxu0 %v22243_v52  ;;  %18098 = vmatprep.mubr.bf16.mxu1 %v8681_v34  ;;  %v6760_v34 = vrot.slane %v6287_v45, 1  ;;  %v22548_v52 = vld [vmem:[#allocation3 + $0x98] sm:$0xff] }
 0x351   : > { %17852 = vmatprep.subr.bf16.mxu0 %v19857_v7  ;;  %18112 = vmatprep.subr.bf16.mxu1 %v19858_v31  ;;  %v8709_v60 = vrot.slane %v8707_v42, 7  ;;  %v6746_v42 = vld [vmem:[#allocation3 + $0x70] sm:$0x1] }
 0x352   : > { %v6761_v45 = vor.u32 %v6760_v34, %v6284_v27  ;;  %v6784_v27 = vrot.slane %v6311_v20, 1 }
 0x353   : > { %17853 = vmatpush3.bf16.msra.mxu0 %v19857_v7  ;;  %18113 = vmatpush3.bf16.msra.mxu1 %v19858_v31  ;;  %v6740_v7 = vld [vmem:[#allocation3 + $0x28] sm:$0x1]  ;;  %v8717_v31 = vsel %vm856_vm1, %v8709_v60, %v8716_v2  ;;  %v6799_v60 = vshll.u32 %v6746_v42, 16  ;;  %v6808_v2 = vrot.slane %v6335_v58, 1  ;;  %v6818_v58 = vshll.u32 %v22548_v52, 16 }
 0x354   : > { %17854 = vmatprep.subr.bf16.mxu0 %v19859_v40  ;;  %18114 = vmatprep.subr.bf16.mxu1 %v19860_v19  ;;  %v6763_v10 = vshll.u32 %v6740_v7, 16  ;;  %v6785_v20 = vor.u32 %v6784_v27, %v6308_v28  ;;  %v19880_v27 = vld [vmem:[%s24287_s3 + $0x3b0] sm:$0xff]  }
 0x355   : > { %v6809_v34 = vor.u32 %v6808_v2, %v6332_v15 }
 0x356   : > { %17839 = vmatmul.mubr.bf16.gmra.mrb[36].mxu0 %v22272_v4  ;;  %18099 = vmatmul.mubr.bf16.gmra.mrb[40].mxu1 %v8693_v47  ;;  %v6787_v47 = vshll.u32 %v6744_v49, 16  ;;  %v19877_v4 = vld [vmem:[%s24287_s3 + $0x3d8] sm:$0xff]   ;;  %v22575_v49 = vld [vmem:[#allocation3 + $0xf8] sm:$0xff] }
 0x357   : > { %17855 = vmatpush3.bf16.msra.mxu0 %v19859_v40  ;;  %18115 = vmatpush3.bf16.msra.mxu1 %v19860_v19  ;;  %v19868_v40 = vld [vmem:[%s24287_s3 + $0x380] sm:$0xff]   ;;  %v6765_v19 = vrot.slane %v6763_v10, 1 }
 0x358   : > { %17842 = vmatprep.mubr.bf16.mxu0 %v22288_v37  ;;  %18102 = vmatprep.mubr.bf16.mxu1 %v8705_v30  ;;  %v6789_v3 = vrot.slane %v6787_v47, 1  ;;  %v6748_v30 = vld [vmem:[#allocation3 + $0x88] sm:$0x1] }
 0x359   : > { %17856 = vmatprep.subr.bf16.mxu0 %v19861_v44  ;;  %18116 = vmatprep.subr.bf16.mxu1 %v19862_v36  ;;  %v6766_v29 = vsel %vm1300_vm2, %v6761_v45, %v6765_v19  ;;  %v6811_v7 = vshll.u32 %v6748_v30, 16  ;;  %v6820_v45 = vrot.slane %v6818_v58, 1  ;;  %v7038_v30 = vld [vmem:[#allocation3 + $0x30] sm:$0x80] }
 0x35a   : > { %v6790_v28 = vsel %vm1300_vm2, %v6785_v20, %v6789_v3  ;;  %v7055_v2 = vshrl.u32 %v7038_v30, 16 }
 0x35b   : > { %17857 = vmatpush3.bf16.msra.mxu0 %v19861_v44  ;;  %18117 = vmatpush3.bf16.msra.mxu1 %v19862_v36  ;;  %v19872_v44 = vld [vmem:[%s24287_s3 + $0x390] sm:$0xff]   ;;  %v6813_v10 = vrot.slane %v6811_v7, 1 }
 0x35c   : > { %17858 = vmatprep.subr.bf16.mxu0 %v19863_v23  ;;  %18118 = vmatprep.subr.bf16.mxu1 %v19864_v21 }
 0x35e   : > { %17843 = vmatmul.mubr.bf16.gmra.mrb[40].mxu0 %v22165_v24  ;;  %18103 = vmatmul.mubr.bf16.gmra.mrb[44].mxu1 %v8717_v31  ;;  %v6742_v24 = vld [vmem:[#allocation3 + $0x40] sm:$0x1] }
 0x35f   : > { %17859 = vmatpush3.bf16.msra.mxu0 %v19863_v23  ;;  %18119 = vmatpush3.bf16.msra.mxu1 %v19864_v21  ;;  %v6775_v12 = vshll.u32 %v6742_v24, 16  ;;  %v19873_v21 = vld [vmem:[%s24287_s3 + $0x3c8] sm:$0xff]  }
 0x360   : > { %17846 = vmatprep.mubr.bf16.mxu0 %v22328_v62  ;;  %18122 = vmatprep.mubr.bf16.mxu1 %v22330_v22  ;;  %v19882_v62 = vld [vmem:[%s24287_s3 + $0x3b8] sm:$0xff]   ;;  %v6844_v22 = vrot.slane %v6371_v50, 1 }
 0x361   : > { %17860 = vmatprep.subr.bf16.mxu0 %v19865_v1  ;;  %18120 = vmatprep.subr.bf16.mxu1 %v19866_v39  ;;  %v6777_v36 = vrot.slane %v6775_v12, 1  ;;  %v9101_v12 = vrot.slane %v8630_v35, 1  ;;  %v6754_v35 = vld [vmem:[#allocation3 + $0xd0] sm:$0x1] }
 0x363   : > { %17861 = vmatpush3.bf16.msra.mxu0 %v19865_v1  ;;  %18121 = vmatpush3.bf16.msra.mxu1 %v19866_v39  ;;  %v6801_v1 = vrot.slane %v6799_v60, 1  ;;  %v6750_v39 = vld [vmem:[#allocation3 + $0xa0] sm:$0x1]  ;;  %v9102_v20 = vor.u32 %v9101_v12, %v8627_v11  ;;  %v22611_v60 = vld [vmem:[#allocation3 + $0x50] sm:$0xff] }
 0x364   : > { %17862 = vmatprep.subr.bf16.mxu0 %v19867_v57  ;;  %18138 = vmatprep.subr.bf16.mxu1 %v19868_v40  ;;  %v6823_v37 = vshll.u32 %v6750_v39, 16  ;;  %v19883_v39 = vld [vmem:[%s24287_s3 + $0x3f0] sm:$0xff]  }
 0x366   : > { %17847 = vmatmul.mubr.bf16.gmra.mrb[44].mxu0 %v22356_v59  ;;  %18123 = vmatmul.mubr.bf16.vlgmr.msra.gmra.mrb[32].mxu1 %v22203_v48  ;;  %v6773_v48 = vor.u32 %v6772_v8, %v6296_v6  ;;  %v6796_v6 = vrot.slane %v6323_v51, 1  ;;  %v19875_v51 = vld [vmem:[%s24287_s3 + $0x3d0] sm:$0xff]   ;;  %v6832_v8 = vrot.slane %v6359_v32, 1  ;;  %v6825_v47 = vrot.slane %v6823_v37, 1 }
 0x367   : > { %17863 = vmatpush3.bf16.msra.mxu0 %v19867_v57  ;;  %18139 = vmatpush3.bf16.msra.mxu1 %v19868_v40  ;;  %v6752_v57 = vld [vmem:[#allocation3 + $0xb8] sm:$0x1]  ;;  %v9081_v40 = vld [vmem:[#allocation3 + $0xe8] sm:$0x1] }
 0x368   : > { %17866 = vmatprep.mubr.bf16.mxu0 %v6766_v29  ;;  %18126 = vmatprep.mubr.bf16.mxu1 %v22372_v53  ;;  %v6778_v23 = vsel %vm1300_vm2, %v6773_v48, %v6777_v36  ;;  %v6797_v31 = vor.u32 %v6796_v6, %v6320_v43  ;;  %v19878_v43 = vld [vmem:[%s24287_s3 + $0x3a8] sm:$0xff]   ;;  %v6835_v15 = vshll.u32 %v6752_v57, 16  ;;  %v9104_v19 = vshll.u32 %v9081_v40, 16  ;;  %v19885_v53 = vld [vmem:[%s24287_s3 + $0x3f8] sm:$0xff]  }
 0x369   : > { %17864 = vmatprep.subr.bf16.mxu0 %v19869_v9  ;;  %18140 = vmatprep.subr.bf16.mxu1 %v19870_v17  ;;  %v22583_v29 = vld [vmem:[#allocation3 + $0x38] sm:$0xff]  ;;  %v6833_v36 = vor.u32 %v6832_v8, %v6356_v56  ;;  %v7071_v40 = vshrl.u32 %v22611_v60, 16 }
 0x36a   : > { %v6802_v24 = vsel %vm1300_vm2, %v6797_v31, %v6801_v1  ;;  %v7059_v48 = vshrl.u32 %v22583_v29, 16  ;;  %v6837_v42 = vrot.slane %v6835_v15, 1  ;;  %v9106_v3 = vrot.slane %v9104_v19, 1  ;;  %v19881_v6 = vld [vmem:[%s24287_s3 + $0x3e8] sm:$0xff]  }
 0x36b   : > { %17865 = vmatpush3.bf16.msra.mxu0 %v19869_v9  ;;  %18141 = vmatpush3.bf16.msra.mxu1 %v19870_v17  ;;  %v6814_v9 = vsel %vm1300_vm2, %v6809_v34, %v6813_v10  ;;  %v6816_v17 = vshrl.u32 %v22548_v52, 16  ;;  %v9125_v31 = vrot.slane %v8654_v0, 1  ;;  %v19884_v34 = vld [vmem:[%s24287_s3 + $0x3c0] sm:$0xff]   ;;  %v7062_v57 = vshll.u32 %v22583_v29, 16 }
 0x36c   : > { %17882 = vmatprep.subr.bf16.mxu0 %v19871_v54  ;;  %18142 = vmatprep.subr.bf16.mxu1 %v19872_v44  ;;  %v7061_v7 = vrot.slane %v7059_v48, 7  ;;  %v6838_v50 = vsel %vm1300_vm2, %v6833_v36, %v6837_v42  ;;  %v6845_v0 = vor.u32 %v6844_v22, %v6368_v18  ;;  %v7057_v15 = vrot.slane %v7055_v2, 7  ;;  %v7042_v18 = vld [vmem:[#allocation3 + $0x60] sm:$0x80] }
 0x36d   : > { %v6821_v32 = vor.u32 %v6820_v45, %v6816_v17  ;;  %v7040_v45 = vld [vmem:[#allocation3 + $0x48] sm:$0x80]  ;;  %v9126_v8 = vor.u32 %v9125_v31, %v8651_v16  ;;  %v19886_v16 = vld [vmem:[%s24287_s3 + $0x3c8] sm:$0xff]   ;;  %v7079_v30 = vshrl.u32 %v7042_v18, 16 }
 0x36e   : > { %17867 = vmatmul.mubr.bf16.vlgmr.msra.gmra.mrb[32].mxu0 %v6778_v23  ;;  %18127 = vmatmul.mubr.bf16.gmra.mrb[36].mxu1 %v22245_v13  ;;  %v19876_v13 = vld [vmem:[%s24287_s3 + $0x3a0] sm:$0xff]   ;;  %v6847_v23 = vshll.u32 %v6754_v35, 16  ;;  %v7064_v19 = vor.u32 %v7062_v57, %v7061_v7  ;;  %v7044_v31 = vld [vmem:[#allocation3 + $0x78] sm:$0x80] }
 0x36f   : > { %17883 = vmatpush3.bf16.msra.mxu0 %v19871_v54  ;;  %18143 = vmatpush3.bf16.msra.mxu1 %v19872_v44  ;;  %v9111_v54 = vshll.u32 %v22575_v49, 16  ;;  %v9083_v44 = vld [vmem:[#allocation3 + $0x100] sm:$0x1]  ;;  %v19889_v18 = vld [vmem:[%s24287_s3 + $0x408] sm:$0xff]  }
 0x370   : > { %17870 = vmatprep.mubr.bf16.mxu0 %v6790_v28  ;;  %18130 = vmatprep.mubr.bf16.mxu1 %v22407_v41  ;;  %v9116_v11 = vshll.u32 %v9083_v44, 16  ;;  %v9109_v28 = vshrl.u32 %v22575_v49, 16  ;;  %v6849_v10 = vrot.slane %v6847_v23, 1  ;;  %v7065_v42 = vsel %vm856_vm1, %v7057_v15, %v7064_v19  ;;  %v22661_v23 = vld [vmem:[#allocation3 + $0x80] sm:$0xff]  ;;  %v7046_v15 = vld [vmem:[#allocation3 + $0x90] sm:$0x80] }
 0x371   : > { %17884 = vmatprep.subr.bf16.mxu0 %v19873_v21  ;;  %18144 = vmatprep.subr.bf16.mxu1 %v19874_v63  ;;  %v9113_v56 = vrot.slane %v9111_v54, 1  ;;  %v9093_v19 = vld [vmem:[#allocation3 + $0x178] sm:$0x1]  ;;  %v19890_v41 = vld [vmem:[%s24287_s3 + $0x3d8] sm:$0xff]  }
 0x373   : > { %17885 = vmatpush3.bf16.msra.mxu0 %v19873_v21  ;;  %18145 = vmatpush3.bf16.msra.mxu1 %v19874_v63  ;;  %v9085_v21 = vld [vmem:[#allocation3 + $0x118] sm:$0x1]  ;;  %v6826_v63 = vsel %vm1300_vm2, %v6821_v32, %v6825_v47  ;;  %v9089_v32 = vld [vmem:[#allocation3 + $0x148] sm:$0x1]  ;;  %v6850_v47 = vsel %vm1300_vm2, %v6845_v0, %v6849_v10  ;;  %v7081_v10 = vrot.slane %v7079_v30, 7 }
 0x374   : > { %17886 = vmatprep.subr.bf16.mxu0 %v19875_v51  ;;  %18146 = vmatprep.subr.bf16.mxu1 %v19876_v13  ;;  %v9128_v1 = vshll.u32 %v9085_v21, 16  ;;  %v22663_v21 = vld [vmem:[#allocation3 + $0x158] sm:$0xff]  ;;  %v9152_v22 = vshll.u32 %v9089_v32, 16  ;;  %v22702_v32 = vld [vmem:[#allocation3 + $0xb0] sm:$0xff] }
 0x375   : > { %v9157_v30 = vshrl.u32 %v22663_v21, 16 }
 0x376   : > { %17871 = vmatmul.mubr.bf16.gmra.mrb[36].mxu0 %v6802_v24  ;;  %18131 = vmatmul.mubr.bf16.gmra.mrb[40].mxu1 %v22290_v61  ;;  %v19879_v61 = vld [vmem:[%s24287_s3 + $0x3e0] sm:$0xff]   ;;  %v22631_v24 = vld [vmem:[#allocation3 + $0x68] sm:$0xff]  ;;  %v9130_v59 = vrot.slane %v9128_v1, 1  ;;  %v7095_v1 = vshrl.u32 %v22661_v23, 16 }
 0x377   : > { %17887 = vmatpush3.bf16.msra.mxu0 %v19875_v51  ;;  %18147 = vmatpush3.bf16.msra.mxu1 %v19876_v13  ;;  %v22617_v51 = vld [vmem:[#allocation3 + $0x128] sm:$0xff]  ;;  %v9107_v13 = vsel %vm1300_vm2, %v9102_v20, %v9106_v3  ;;  %v7083_v12 = vshrl.u32 %v22631_v24, 16  ;;  %v7074_v20 = vshll.u32 %v22611_v60, 16 }
 0x378   : > { %17874 = vmatprep.mubr.bf16.mxu0 %v6814_v9  ;;  %18134 = vmatprep.mubr.bf16.mxu1 %v22437_v5  ;;  %v9135_v37 = vshll.u32 %v22617_v51, 16  ;;  %v9087_v9 = vld [vmem:[#allocation3 + $0x130] sm:$0x1]  ;;  %v9133_v3 = vshrl.u32 %v22617_v51, 16 }
 0x379   : > { %17888 = vmatprep.subr.bf16.mxu0 %v19877_v4  ;;  %18148 = vmatprep.subr.bf16.mxu1 %v19878_v43  ;;  %v9140_v36 = vshll.u32 %v9087_v9, 16 }
 0x37a   : > { %v9137_v44 = vrot.slane %v9135_v37, 1 }
 0x37b   : > { %17889 = vmatpush3.bf16.msra.mxu0 %v19877_v4  ;;  %18149 = vmatpush3.bf16.msra.mxu1 %v19878_v43  ;;  %v22637_v4 = vor.u32 %v9113_v56, %v9109_v28  ;;  %v9118_v43 = vrot.slane %v9116_v11, 1  ;;  %v19887_v56 = vld [vmem:[%s24287_s3 + $0x400] sm:$0xff]   ;;  %v19888_v11 = vld [vmem:[%s24287_s3 + $0x3d0] sm:$0xff]  }
 0x37c   : > { %17890 = vmatprep.subr.bf16.mxu0 %v19879_v61  ;;  %18150 = vmatprep.subr.bf16.mxu1 %v19880_v27 }
 0x37d   : > { %v9119_v35 = vsel %vm1300_vm2, %v22637_v4, %v9118_v43 }
 0x37e   : > { %17875 = vmatmul.mubr.bf16.gmra.mrb[40].mxu0 %v6826_v63  ;;  %18135 = vmatmul.mubr.bf16.gmra.mrb[44].mxu1 %v22455_v33  ;;  %v9131_v63 = vsel %vm1300_vm2, %v9126_v8, %v9130_v59  ;;  %v7091_v8 = vshrl.u32 %v7044_v31, 16 }
 0x37f   : > { %17891 = vmatpush3.bf16.msra.mxu0 %v19879_v61  ;;  %18151 = vmatpush3.bf16.msra.mxu1 %v19880_v27  ;;  %v7067_v61 = vshrl.u32 %v7040_v45, 16  ;;  %v7073_v27 = vrot.slane %v7071_v40, 7  ;;  %v9154_v45 = vrot.slane %v9152_v22, 1 }
 0x380   : > { %17878 = vmatprep.mubr.bf16.mxu0 %v6838_v50  ;;  %18154 = vmatprep.mubr.bf16.mxu1 %v9107_v13  ;;  %v7086_v50 = vshll.u32 %v22631_v24, 16  ;;  %v9142_v13 = vrot.slane %v9140_v36, 1 }
 0x381   : > { %17892 = vmatprep.subr.bf16.mxu0 %v19881_v6  ;;  %18152 = vmatprep.subr.bf16.mxu1 %v19882_v62  ;;  %v7069_v2 = vrot.slane %v7067_v61, 7  ;;  %v7076_v7 = vor.u32 %v7074_v20, %v7073_v27 }
 0x383   : > { %17893 = vmatpush3.bf16.msra.mxu0 %v19881_v6  ;;  %18153 = vmatpush3.bf16.msra.mxu1 %v19882_v62  ;;  %v7085_v6 = vrot.slane %v7083_v12, 7  ;;  %v9149_v62 = vrot.slane %v8678_v46, 1  ;;  %v22681_v46 = vor.u32 %v9137_v44, %v9133_v3  ;;  %v7077_v9 = vsel %vm856_vm1, %v7069_v2, %v7076_v7  ;;  %v7048_v2 = vld [vmem:[#allocation3 + $0xa8] sm:$0x80] }
 0x384   : > { %17894 = vmatprep.subr.bf16.mxu0 %v19883_v39  ;;  %18170 = vmatprep.subr.bf16.mxu1 %v19884_v34 }
 0x385   : > { %v7088_v0 = vor.u32 %v7086_v50, %v7085_v6  ;;  %v9150_v43 = vor.u32 %v9149_v62, %v8675_v38  ;;  %v9143_v59 = vsel %vm1300_vm2, %v22681_v46, %v9142_v13  ;;  %v7097_v38 = vrot.slane %v7095_v1, 7  ;;  %v22719_v6 = vld [vmem:[#allocation3 + $0xc8] sm:$0xff] }
 0x386   : > { %17879 = vmatmul.mubr.bf16.gmra.mrb[44].mxu0 %v6850_v47  ;;  %18155 = vmatmul.mubr.bf16.vlgmr.msra.gmra.mrb[32].mxu1 %v9119_v35  ;;  %v7103_v47 = vshrl.u32 %v7046_v15, 16  ;;  %v7109_v35 = vrot.slane %v6816_v17, 7  ;;  %v19891_v17 = vld [vmem:[%s24287_s3 + $0x410] sm:$0xff]   ;;  %v7093_v62 = vrot.slane %v7091_v8, 7  ;;  %v19894_v8 = vld [vmem:[%s24287_s3 + $0x3e8] sm:$0xff]  }
 0x387   : > { %17895 = vmatpush3.bf16.msra.mxu0 %v19883_v39  ;;  %18171 = vmatpush3.bf16.msra.mxu1 %v19884_v34  ;;  %v9159_v39 = vshll.u32 %v22663_v21, 16  ;;  %v9091_v34 = vld [vmem:[#allocation3 + $0x160] sm:$0x1]  ;;  %v7089_v44 = vsel %vm856_vm1, %v7081_v10, %v7088_v0  ;;  %v9155_v36 = vsel %vm1300_vm2, %v9150_v43, %v9154_v45  ;;  %v9095_v10 = vld [vmem:[#allocation3 + $0x190] sm:$0x1]  ;;  %v7131_v43 = vshrl.u32 %v22719_v6, 16 }
 0x388   : > { %17898 = vmatprep.mubr.bf16.mxu0 %v7065_v42  ;;  %18158 = vmatprep.mubr.bf16.mxu1 %v9131_v63  ;;  %v9164_v27 = vshll.u32 %v9091_v34, 16  ;;  %v7098_v42 = vshll.u32 %v22661_v23, 16  ;;  %v7119_v63 = vshrl.u32 %v22702_v32, 16  ;;  %v7105_v7 = vrot.slane %v7103_v47, 7  ;;  %v7050_v0 = vld [vmem:[#allocation3 + $0xc0] sm:$0x80] }
 0x389   : > { %17896 = vmatprep.subr.bf16.mxu0 %v19885_v53  ;;  %18172 = vmatprep.subr.bf16.mxu1 %v19886_v16  ;;  %v9161_v61 = vrot.slane %v9159_v39, 1  ;;  %v7112_v13 = vor.u32 %v7109_v35, %v6818_v58  ;;  %v7115_v45 = vshrl.u32 %v7048_v2, 16  ;;  %v9378_v58 = vld [vmem:[#allocation3 + $0xf0] sm:$0x80]  ;;  %v7133_v47 = vrot.slane %v7131_v43, 7 }
 0x38a   : > { %v7100_v22 = vor.u32 %v7098_v42, %v7097_v38  ;;  %v7121_v15 = vrot.slane %v7119_v63, 7  ;;  %v22748_v38 = vld [vmem:[#allocation3 + $0xe0] sm:$0xff]  ;;  %v9395_v35 = vshrl.u32 %v9378_v58, 16 }
 0x38b   : > { %17897 = vmatpush3.bf16.msra.mxu0 %v19885_v53  ;;  %18173 = vmatpush3.bf16.msra.mxu1 %v19886_v16  ;;  %v9173_v53 = vrot.slane %v8702_v26, 1  ;;  %v9176_v16 = vshll.u32 %v9093_v19, 16  ;;  %v19892_v26 = vld [vmem:[%s24287_s3 + $0x3e0] sm:$0xff]   ;;  %v9185_v19 = vrot.slane %v8714_v55, 1 }
 0x38c   : > { %17914 = vmatprep.subr.bf16.mxu0 %v19887_v56  ;;  %18174 = vmatprep.subr.bf16.mxu1 %v19888_v11  ;;  %v7101_v5 = vsel %vm856_vm1, %v7093_v62, %v7100_v22  ;;  %v7134_v62 = vshll.u32 %v22719_v6, 16  ;;  %v7052_v22 = vld [vmem:[#allocation3 + $0xd8] sm:$0x80] }
 0x38d   : > { %v9174_v31 = vor.u32 %v9173_v53, %v8699_v25  ;;  %v9178_v34 = vrot.slane %v9176_v16, 1  ;;  %v9401_v53 = vrot.slane %v9109_v28, 7  ;;  %v19895_v16 = vld [vmem:[%s24287_s3 + $0x420] sm:$0xff]  }
 0x38e   : > { %17899 = vmatmul.mubr.bf16.vlgmr.msra.gmra.mrb[32].mxu0 %v7077_v9  ;;  %18159 = vmatmul.mubr.bf16.gmra.mrb[36].mxu1 %v9143_v59  ;;  %v19893_v9 = vld [vmem:[%s24287_s3 + $0x418] sm:$0xff]   ;;  %v9188_v59 = vshll.u32 %v9095_v10, 16  ;;  %v7139_v10 = vshrl.u32 %v7052_v22, 16  ;;  %v9386_v22 = vld [vmem:[#allocation3 + $0x150] sm:$0x80] }
 0x38f   : > { %17915 = vmatpush3.bf16.msra.mxu0 %v19887_v56  ;;  %18175 = vmatpush3.bf16.msra.mxu1 %v19888_v11  ;;  %v22725_v56 = vor.u32 %v9161_v61, %v9157_v30  ;;  %v9166_v11 = vrot.slane %v9164_v27, 1  ;;  %v9179_v55 = vsel %vm1300_vm2, %v9174_v31, %v9178_v34  ;;  %v22750_v61 = vld [vmem:[#allocation3 + $0x110] sm:$0xff]  ;;  %v7127_v27 = vshrl.u32 %v7050_v0, 16  ;;  %v9382_v0 = vld [vmem:[#allocation3 + $0x120] sm:$0x80] }
 0x390   : > { %17902 = vmatprep.mubr.bf16.mxu0 %v7089_v44  ;;  %18162 = vmatprep.mubr.bf16.mxu1 %v9155_v36  ;;  %v19896_v44 = vld [vmem:[%s24287_s3 + $0x3f0] sm:$0xff]   ;;  %v7117_v36 = vrot.slane %v7115_v45, 7  ;;  %v9190_v28 = vrot.slane %v9188_v59, 1  ;;  %v9411_v2 = vshrl.u32 %v22750_v61, 16  ;;  %v7136_v31 = vor.u32 %v7134_v62, %v7133_v47 }
 0x391   : > { %17916 = vmatprep.subr.bf16.mxu0 %v19889_v18  ;;  %18176 = vmatprep.subr.bf16.mxu1 %v19890_v41  ;;  %v9167_v25 = vsel %vm1300_vm2, %v22725_v56, %v9166_v11  ;;  %v7143_v11 = vshrl.u32 %v22748_v38, 16  ;;  %v9397_v34 = vrot.slane %v9395_v35, 7  ;;  %v9404_v33 = vor.u32 %v9401_v53, %v9111_v54  ;;  %v19899_v47 = vld [vmem:[%s24287_s3 + $0x430] sm:$0xff]   ;;  %v19900_v35 = vld [vmem:[%s24287_s3 + $0x400] sm:$0xff]  }
 0x392   : > { %v7141_v53 = vrot.slane %v7139_v10, 7 }
 0x393   : > { %17917 = vmatpush3.bf16.msra.mxu0 %v19889_v18  ;;  %18177 = vmatpush3.bf16.msra.mxu1 %v19890_v41  ;;  %v7113_v18 = vsel %vm856_vm1, %v7105_v7, %v7112_v13  ;;  %v7122_v41 = vshll.u32 %v22702_v32, 16  ;;  %v9380_v7 = vld [vmem:[#allocation3 + $0x108] sm:$0x80]  ;;  %v7129_v13 = vrot.slane %v7127_v27, 7  ;;  %v7145_v58 = vrot.slane %v7143_v11, 7 }
 0x394   : > { %17918 = vmatprep.subr.bf16.mxu0 %v19891_v17  ;;  %18178 = vmatprep.subr.bf16.mxu1 %v19892_v26  ;;  %v9407_v54 = vshrl.u32 %v9380_v7, 16  ;;  %v9425_v27 = vrot.slane %v9133_v3, 7 }
 0x395   : > { %v7137_v59 = vsel %vm856_vm1, %v7129_v13, %v7136_v31  ;;  %v19901_v31 = vld [vmem:[%s24287_s3 + $0x438] sm:$0xff]  }
 0x396   : > { %17903 = vmatmul.mubr.bf16.gmra.mrb[36].mxu0 %v7101_v5  ;;  %18163 = vmatmul.mubr.bf16.gmra.mrb[40].mxu1 %v9167_v25  ;;  %v9413_v5 = vrot.slane %v9411_v2, 7  ;;  %v7146_v25 = vshll.u32 %v22748_v38, 16 }
 0x397   : > { %17919 = vmatpush3.bf16.msra.mxu0 %v19891_v17  ;;  %18179 = vmatpush3.bf16.msra.mxu1 %v19892_v26  ;;  %v7124_v17 = vor.u32 %v7122_v41, %v7121_v15  ;;  %v9186_v26 = vor.u32 %v9185_v19, %v8711_v14  ;;  %v19897_v15 = vld [vmem:[%s24287_s3 + $0x428] sm:$0xff]   ;;  %v19898_v19 = vld [vmem:[%s24287_s3 + $0x3f8] sm:$0xff]  }
 0x398   : > { %17906 = vmatprep.mubr.bf16.mxu0 %v7113_v18  ;;  %18166 = vmatprep.mubr.bf16.mxu1 %v9179_v55  ;;  %v9405_v18 = vsel %vm856_vm1, %v9397_v34, %v9404_v33  ;;  %v9419_v55 = vshrl.u32 %v9382_v0, 16  ;;  %v19902_v34 = vld [vmem:[%s24287_s3 + $0x408] sm:$0xff]  }
 0x399   : > { %17920 = vmatprep.subr.bf16.mxu0 %v19893_v9  ;;  %18180 = vmatprep.subr.bf16.mxu1 %v19894_v8  ;;  %v7125_v14 = vsel %vm856_vm1, %v7117_v36, %v7124_v17  ;;  %v9191_v45 = vsel %vm1300_vm2, %v9186_v26, %v9190_v28  ;;  %v9384_v17 = vld [vmem:[#allocation3 + $0x138] sm:$0x80]  ;;  %v9428_v28 = vor.u32 %v9425_v27, %v9135_v37  ;;  %v22816_v37 = vld [vmem:[#allocation3 + $0x170] sm:$0xff] }
 0x39a   : > { %v9421_v26 = vrot.slane %v9419_v55, 7  ;;  %v9431_v33 = vshrl.u32 %v9384_v17, 16 }
 0x39b   : > { %17921 = vmatpush3.bf16.msra.mxu0 %v19893_v9  ;;  %18181 = vmatpush3.bf16.msra.mxu1 %v19894_v8  ;;  %v9414_v9 = vshll.u32 %v22750_v61, 16  ;;  %v22787_v8 = vld [vmem:[#allocation3 + $0x140] sm:$0xff] }
 0x39c   : > { %17922 = vmatprep.subr.bf16.mxu0 %v19895_v16  ;;  %18182 = vmatprep.subr.bf16.mxu1 %v19896_v44  ;;  %v9435_v36 = vshrl.u32 %v22787_v8, 16  ;;  %v9429_v10 = vsel %vm856_vm1, %v9421_v26, %v9428_v28  ;;  %v9438_v0 = vshll.u32 %v22787_v8, 16  ;;  %v9462_v28 = vshll.u32 %v22816_v37, 16 }
 0x39d   : > { %v9416_v3 = vor.u32 %v9414_v9, %v9413_v5  ;;  %v9433_v5 = vrot.slane %v9431_v33, 7  ;;  %v9392_v33 = vld [vmem:[#allocation3 + $0x198] sm:$0x80] }
 0x39e   : > { %17907 = vmatmul.mubr.bf16.gmra.mrb[40].mxu0 %v7125_v14  ;;  %18167 = vmatmul.mubr.bf16.gmra.mrb[44].mxu1 %v9191_v45  ;;  %v9437_v14 = vrot.slane %v9435_v36, 7  ;;  %v9443_v45 = vshrl.u32 %v9386_v22, 16 }
 0x39f   : > { %17923 = vmatpush3.bf16.msra.mxu0 %v19895_v16  ;;  %18183 = vmatpush3.bf16.msra.mxu1 %v19896_v44  ;;  %v7148_v16 = vor.u32 %v7146_v25, %v7145_v58  ;;  %v9409_v44 = vrot.slane %v9407_v54, 7  ;;  %v19904_v58 = vld [vmem:[%s24287_s3 + $0x410] sm:$0xff]   ;;  %v22829_v54 = vld [vmem:[#allocation3 + $0x188] sm:$0xff] }
 0x3a0   : > { %17910 = vmatprep.mubr.bf16.mxu0 %v7137_v59  ;;  %18186 = vmatprep.mubr.bf16.mxu1 %v9405_v18  ;;  %v9440_v59 = vor.u32 %v9438_v0, %v9437_v14  ;;  %v9388_v18 = vld [vmem:[#allocation3 + $0x168] sm:$0x80]  ;;  %v9445_v55 = vrot.slane %v9443_v45, 7  ;;  %v9474_v45 = vshll.u32 %v22829_v54, 16 }
 0x3a1   : > { %17924 = vmatprep.subr.bf16.mxu0 %v19897_v15  ;;  %18184 = vmatprep.subr.bf16.mxu1 %v19898_v19  ;;  %v7149_v7 = vsel %vm856_vm1, %v7141_v53, %v7148_v16  ;;  %v9417_v13 = vsel %vm856_vm1, %v9409_v44, %v9416_v3  ;;  %v19905_v16 = vld [vmem:[%s24287_s3 + $0x448] sm:$0xff]   ;;  %v19906_v44 = vld [vmem:[%s24287_s3 + $0x418] sm:$0xff]   ;;  %v9455_v3 = vshrl.u32 %v9388_v18, 16 }
 0x3a2   : > { %v9441_v53 = vsel %vm856_vm1, %v9433_v5, %v9440_v59 }
 0x3a3   : > { %17925 = vmatpush3.bf16.msra.mxu0 %v19897_v15  ;;  %18185 = vmatpush3.bf16.msra.mxu1 %v19898_v19  ;;  %v9449_v15 = vrot.slane %v9157_v30, 7  ;;  %v19903_v19 = vld [vmem:[%s24287_s3 + $0x440] sm:$0xff]   ;;  %v9459_v30 = vshrl.u32 %v22816_v37, 16  ;;  %v9457_v14 = vrot.slane %v9455_v3, 7  ;;  %v19912_v3 = vld [vmem:[%s24287_s3 + $0x430] sm:$0xff]  }
 0x3a4   : > { %17926 = vmatprep.subr.bf16.mxu0 %v19899_v47  ;;  %18202 = vmatprep.subr.bf16.mxu1 %v19900_v35 }
 0x3a5   : > { %v9452_v27 = vor.u32 %v9449_v15, %v9159_v39  ;;  %v9461_v17 = vrot.slane %v9459_v30, 7 }
 0x3a6   : > { %17911 = vmatmul.mubr.bf16.gmra.mrb[44].mxu0 %v7149_v7  ;;  %18187 = vmatmul.mubr.bf16.vlgmr.msra.gmra.mrb[32].mxu1 %v9417_v13  ;;  %v22851_v7 = vld [vmem:[#allocation2] sm:$0xff] }
 0x3a7   : > { %17927 = vmatpush3.bf16.msra.mxu0 %v19899_v47  ;;  %18203 = vmatpush3.bf16.msra.mxu1 %v19900_v35  ;;  %v9390_v47 = vld [vmem:[#allocation3 + $0x180] sm:$0x80]  ;;  %v9471_v35 = vshrl.u32 %v22829_v54, 16  ;;  %v9453_v26 = vsel %vm856_vm1, %v9445_v55, %v9452_v27  ;;  %v9483_v13 = vshrl.u32 %v22851_v7, 16  ;;  %v9486_v59 = vshll.u32 %v22851_v7, 16  ;;  %v19909_v55 = vld [vmem:[%s24287_s3 + $0x458] sm:$0xff]  }
 0x3a8   : > { %17930 = vmatprep.mubr.bf16.mxu0 %v22583_v29  ;;  %18190 = vmatprep.mubr.bf16.mxu1 %v9429_v10  ;;  %v9467_v39 = vshrl.u32 %v9390_v47, 16  ;;  %v9464_v10 = vor.u32 %v9462_v28, %v9461_v17  ;;  %v19910_v27 = vld [vmem:[%s24287_s3 + $0x428] sm:$0xff]   ;;  %v7559_v29 = vrot.slane %v7086_v50, 1 }
 0x3a9   : > { %17928 = vmatprep.subr.bf16.mxu0 %v19901_v31  ;;  %18204 = vmatprep.subr.bf16.mxu1 %v19902_v34  ;;  %v9473_v22 = vrot.slane %v9471_v35, 7  ;;  %v9485_v5 = vrot.slane %v9483_v13, 7 }
 0x3aa   : > { %v9469_v15 = vrot.slane %v9467_v39, 7  ;;  %v9465_v18 = vsel %vm856_vm1, %v9457_v14, %v9464_v10  ;;  %v7515_v39 = vld [vmem:[#allocation3 + $0x40] sm:$0x1]  ;;  %v7517_v14 = vld [vmem:[#allocation3 + $0x58] sm:$0x1] }
 0x3ab   : > { %17929 = vmatpush3.bf16.msra.mxu0 %v19901_v31  ;;  %18205 = vmatpush3.bf16.msra.mxu1 %v19902_v34  ;;  %v19907_v31 = vld [vmem:[%s24287_s3 + $0x450] sm:$0xff]   ;;  %v19908_v34 = vld [vmem:[%s24287_s3 + $0x420] sm:$0xff]  }
 0x3ac   : > { %17946 = vmatprep.subr.bf16.mxu0 %v19903_v19  ;;  %18206 = vmatprep.subr.bf16.mxu1 %v19904_v58 }
 0x3ae   : > { %17931 = vmatmul.mubr.bf16.vlgmr.msra.gmra.mrb[32].mxu0 %v22611_v60  ;;  %18191 = vmatmul.mubr.bf16.gmra.mrb[36].mxu1 %v9441_v53  ;;  %v7571_v60 = vrot.slane %v7098_v42, 1  ;;  %v19921_v42 = vld [vmem:[%s24287_s3 + $0x460] sm:$0xff]  }
 0x3af   : > { %17947 = vmatpush3.bf16.msra.mxu0 %v19903_v19  ;;  %18207 = vmatpush3.bf16.msra.mxu1 %v19904_v58  ;;  %v9476_v19 = vor.u32 %v9474_v45, %v9473_v22  ;;  %v9479_v58 = vshrl.u32 %v9392_v33, 16  ;;  %v7535_v22 = vrot.slane %v7062_v57, 1  ;;  %v19916_v33 = vld [vmem:[%s24287_s3 + $0x440] sm:$0xff]  }
 0x3b0   : > { %17934 = vmatprep.mubr.bf16.mxu0 %v22631_v24  ;;  %18194 = vmatprep.mubr.bf16.mxu1 %v9453_v26  ;;  %v19914_v26 = vld [vmem:[%s24287_s3 + $0x438] sm:$0xff]  }
 0x3b1   : > { %17948 = vmatprep.subr.bf16.mxu0 %v19905_v16  ;;  %18208 = vmatprep.subr.bf16.mxu1 %v19906_v44  ;;  %v9477_v47 = vsel %vm856_vm1, %v9469_v15, %v9476_v19  ;;  %v9481_v53 = vrot.slane %v9479_v58, 7  ;;  %v7536_v57 = vor.u32 %v7535_v22, %v7059_v48  ;;  %v7519_v15 = vld [vmem:[#allocation3 + $0x70] sm:$0x1]  ;;  %v19918_v19 = vld [vmem:[%s24287_s3 + $0x448] sm:$0xff]   ;;  %v7547_v58 = vrot.slane %v7074_v20, 1  ;;  %v19919_v20 = vld [vmem:[%s24287_s3 + $0x450] sm:$0xff]  }
 0x3b2   : > { %v7562_v48 = vshll.u32 %v7519_v15, 16  ;;  %v19926_v22 = vld [vmem:[%s24289_s5 + $0x48] sm:$0xff]   ;;  %v7527_v15 = vld [vmem:[#allocation3 + $0xd0] sm:$0x1] }
 0x3b3   : > { %17949 = vmatpush3.bf16.msra.mxu0 %v19905_v16  ;;  %18209 = vmatpush3.bf16.msra.mxu1 %v19906_v44  ;;  %v22880_v16 = vor.u32 %v9486_v59, %v9485_v5  ;;  %v19911_v44 = vld [vmem:[%s24287_s3 + $0x460] sm:$0xff]   ;;  %v7550_v5 = vshll.u32 %v7517_v14, 16  ;;  %v7548_v50 = vor.u32 %v7547_v58, %v7071_v40  ;;  %v19927_v58 = vld [vmem:[%s24289_s5 + $0x50] sm:$0xff]  }
 0x3b4   : > { %17950 = vmatprep.subr.bf16.mxu0 %v19907_v31  ;;  %18210 = vmatprep.subr.bf16.mxu1 %v19908_v34 }
 0x3b5   : > { %v9489_v17 = vsel %vm856_vm1, %v9481_v53, %v22880_v16  ;;  %v7560_v53 = vor.u32 %v7559_v29, %v7083_v12  ;;  %v7607_v29 = vrot.slane %v7134_v62, 1 }
 0x3b6   : > { %17935 = vmatmul.mubr.bf16.gmra.mrb[36].mxu0 %v22661_v23  ;;  %18195 = vmatmul.mubr.bf16.gmra.mrb[40].mxu1 %v9465_v18  ;;  %v7595_v23 = vrot.slane %v7122_v41, 1  ;;  %v19928_v41 = vld [vmem:[%s24289_s5 + $0x58] sm:$0xff]  }
 0x3b7   : > { %17951 = vmatpush3.bf16.msra.mxu0 %v19907_v31  ;;  %18211 = vmatpush3.bf16.msra.mxu1 %v19908_v34  ;;  %v7538_v31 = vshll.u32 %v7515_v39, 16  ;;  %v19915_v34 = vld [vmem:[%s24287_s3 + $0x470] sm:$0xff]   ;;  %v19920_v39 = vld [vmem:[%s24287_s3 + $0x458] sm:$0xff]   ;;  %v7608_v62 = vor.u32 %v7607_v29, %v7131_v43  ;;  %v9885_v43 = vrot.slane %v9414_v9, 1 }
 0x3b8   : > { %17938 = vmatprep.mubr.bf16.mxu0 %v22548_v52  ;;  %18198 = vmatprep.mubr.bf16.mxu1 %v9477_v47  ;;  %v19913_v52 = vld [vmem:[%s24287_s3 + $0x468] sm:$0xff]   ;;  %v7552_v47 = vrot.slane %v7550_v5, 1  ;;  %v19934_v29 = vld [vmem:[%s24289_s5 + $0x78] sm:$0xff]  }
 0x3b9   : > { %17952 = vmatprep.subr.bf16.mxu0 %v19909_v55  ;;  %18212 = vmatprep.subr.bf16.mxu1 %v19910_v27  ;;  %v7540_v10 = vrot.slane %v7538_v31, 1  ;;  %v9886_v9 = vor.u32 %v9885_v43, %v9411_v2 }
 0x3bb   : > { %17953 = vmatpush3.bf16.msra.mxu0 %v19909_v55  ;;  %18213 = vmatpush3.bf16.msra.mxu1 %v19910_v27  ;;  %v7541_v18 = vsel %vm1300_vm2, %v7536_v57, %v7540_v10  ;;  %v7522_v55 = vld [vmem:[#allocation3 + $0x98] sm:$0xff]  ;;  %v19925_v27 = vld [vmem:[%s24289_s5 + $0x40] sm:$0xff]  }
 0x3bc   : > { %17954 = vmatprep.subr.bf16.mxu0 %v19911_v44  ;;  %18214 = vmatprep.subr.bf16.mxu1 %v19912_v3  ;;  %v7579_v31 = vshrl.u32 %v7522_v55, 16  ;;  %v7525_v10 = vld [vmem:[#allocation3 + $0xb8] sm:$0x1] }
 0x3be   : > { %17939 = vmatmul.mubr.bf16.gmra.mrb[40].mxu0 %v22702_v32  ;;  %18199 = vmatmul.mubr.bf16.gmra.mrb[44].mxu1 %v9489_v17  ;;  %v7523_v17 = vld [vmem:[#allocation3 + $0xa0] sm:$0x1]  ;;  %v7619_v32 = vrot.slane %v7146_v25, 1 }
 0x3bf   : > { %17955 = vmatpush3.bf16.msra.mxu0 %v19911_v44  ;;  %18215 = vmatpush3.bf16.msra.mxu1 %v19912_v3  ;;  %v7564_v44 = vrot.slane %v7562_v48, 1  ;;  %v7521_v3 = vld [vmem:[#allocation3 + $0x88] sm:$0x1]  ;;  %v7610_v48 = vshll.u32 %v7527_v15, 16 }
 0x3c0   : > { %17942 = vmatprep.mubr.bf16.mxu0 %v22719_v6  ;;  %18218 = vmatprep.mubr.bf16.mxu1 %v22575_v49  ;;  %v19917_v49 = vld [vmem:[%s24287_s3 + $0x478] sm:$0xff]   ;;  %v7574_v40 = vshll.u32 %v7521_v3, 16  ;;  %v9857_v3 = vld [vmem:[#allocation3 + $0x130] sm:$0x1]  ;;  %v7620_v25 = vor.u32 %v7619_v32, %v7143_v11 }
 0x3c1   : > { %17956 = vmatprep.subr.bf16.mxu0 %v19913_v52  ;;  %18216 = vmatprep.subr.bf16.mxu1 %v19914_v26  ;;  %v7565_v24 = vsel %vm1300_vm2, %v7560_v53, %v7564_v44  ;;  %v9855_v53 = vld [vmem:[#allocation3 + $0x118] sm:$0x1] }
 0x3c3   : > { %17957 = vmatpush3.bf16.msra.mxu0 %v19913_v52  ;;  %18217 = vmatpush3.bf16.msra.mxu1 %v19914_v26  ;;  %v7553_v52 = vsel %vm1300_vm2, %v7548_v50, %v7552_v47  ;;  %v7586_v26 = vshll.u32 %v7523_v17, 16  ;;  %v7612_v50 = vrot.slane %v7610_v48, 1  ;;  %v7529_v47 = vld [vmem:[#allocation3 + $0xe8] sm:$0x1]  ;;  %v9888_v17 = vshll.u32 %v9855_v53, 16  ;;  %v19935_v48 = vld [vmem:[%s24289_s5 + $0x50] sm:$0xff]  }
 0x3c4   : > { %17958 = vmatprep.subr.bf16.mxu0 %v19915_v34  ;;  %18234 = vmatprep.subr.bf16.mxu1 %v19916_v33  ;;  %v7622_v6 = vshll.u32 %v7529_v47, 16  ;;  %v23069_v47 = vld [vmem:[%s24288_s4 + $0x1] ss:$0 sm:$0xff] }
 0x3c5   : > { %v7588_v57 = vrot.slane %v7586_v26, 1  ;;  %v9859_v26 = vld [vmem:[#allocation3 + $0x148] sm:$0x1] }
 0x3c6   : > { %17943 = vmatmul.mubr.bf16.gmra.mrb[44].mxu0 %v22748_v38  ;;  %18219 = vmatmul.mubr.bf16.vlgmr.msra.gmra.mrb[32].mxu1 %v22750_v61 }
 0x3c7   : > { %17959 = vmatpush3.bf16.msra.mxu0 %v19915_v34  ;;  %18235 = vmatpush3.bf16.msra.mxu1 %v19916_v33  ;;  %v7572_v34 = vor.u32 %v7571_v60, %v7095_v1  ;;  %v7576_v33 = vrot.slane %v7574_v40, 1  ;;  %v7598_v1 = vshll.u32 %v7525_v10, 16  ;;  %v7624_v40 = vrot.slane %v7622_v6, 1 }
 0x3c8   : > { %17962 = vmatprep.mubr.bf16.mxu0 %v7541_v18  ;;  %18222 = vmatprep.mubr.bf16.mxu1 %v22617_v51  ;;  %v7581_v51 = vshll.u32 %v7522_v55, 16  ;;  %v19923_v55 = vld [vmem:[%s24287_s3 + $0x470] sm:$0xff]  }
 0x3c9   : > { %17960 = vmatprep.subr.bf16.mxu0 %v19917_v49  ;;  %18236 = vmatprep.subr.bf16.mxu1 %v19918_v19 }
 0x3ca   : > { %v7583_v12 = vrot.slane %v7581_v51, 1  ;;  %v19924_v51 = vld [vmem:[%s24287_s3 + $0x478] sm:$0xff]  }
 0x3cb   : > { %17961 = vmatpush3.bf16.msra.mxu0 %v19917_v49  ;;  %18237 = vmatpush3.bf16.msra.mxu1 %v19918_v19  ;;  %v9853_v49 = vld [vmem:[#allocation3 + $0x100] sm:$0x1]  ;;  %v7577_v19 = vsel %vm1300_vm2, %v7572_v34, %v7576_v33  ;;  %v9912_v34 = vshll.u32 %v9859_v26, 16 }
 0x3cc   : > { %18238 = vmatprep.subr.bf16.mxu1 %v19919_v20  ;;  %18266 = vmatprep.subr.bf16.mxu0 %v19925_v27  ;;  %v7584_v14 = vor.u32 %v7583_v12, %v7579_v31  ;;  %v9876_v18 = vshll.u32 %v9853_v49, 16 }
 0x3cd   : > { %v9914_v2 = vrot.slane %v9912_v34, 1 }
 0x3ce   : > { %17963 = vmatmul.mubr.bf16.vlgmr.msra.gmra.mrb[32].mxu0 %v7553_v52  ;;  %18223 = vmatmul.mubr.bf16.gmra.mrb[36].mxu1 %v22787_v8  ;;  %v7589_v5 = vsel %vm1300_vm2, %v7584_v14, %v7588_v57  ;;  %v9878_v44 = vrot.slane %v9876_v18, 1  ;;  %v9900_v52 = vshll.u32 %v9857_v3, 16  ;;  %v9863_v14 = vld [vmem:[#allocation3 + $0x178] sm:$0x1]  ;;  %v9865_v57 = vld [vmem:[#allocation3 + $0x190] sm:$0x1] }
 0x3cf   : > { %18239 = vmatpush3.bf16.msra.mxu1 %v19919_v20  ;;  %17966 = vmatprep.mubr.bf16.mxu0 %v7565_v24  ;;  %v7596_v20 = vor.u32 %v7595_v23, %v7119_v63  ;;  %v9890_v24 = vrot.slane %v9888_v17, 1  ;;  %v9936_v15 = vshll.u32 %v9863_v14, 16  ;;  %v9948_v49 = vshll.u32 %v9865_v57, 16  ;;  %v9867_v8 = vld [vmem:[#allocation3 + $0x1a8] sm:$0x1]  ;;  %v19936_v18 = vld [vmem:[%s24289_s5] sm:$0xff]  }
 0x3d0   : > { %18226 = vmatprep.mubr.bf16.mxu1 %v22663_v21  ;;  %18240 = vmatprep.subr.bf16.mxu1 %v19920_v39  ;;  %v19922_v21 = vld [vmem:[%s24287_s3 + $0x468] sm:$0xff]   ;;  %v9879_v60 = vsel %vm1300_vm2, %v22637_v4, %v9878_v44  ;;  %v9902_v12 = vrot.slane %v9900_v52, 1  ;;  %v9909_v4 = vrot.slane %v9438_v0, 1  ;;  %v9933_v0 = vrot.slane %v9462_v28, 1 }
 0x3d1   : > { %18267 = vmatpush3.bf16.msra.mxu0 %v19925_v27  ;;  %v7600_v27 = vrot.slane %v7598_v1, 1  ;;  %v9891_v31 = vsel %vm1300_vm2, %v9886_v9, %v9890_v24  ;;  %v9950_v1 = vrot.slane %v9948_v49, 1  ;;  %v23013_v28 = vrot.slane %v9486_v59, 1  ;;  %v19930_v59 = vld [vmem:[%s24289_s5 + $0x68] sm:$0xff]  }
 0x3d2   : > { %18268 = vmatprep.subr.bf16.mxu0 %v19926_v22  ;;  %v9903_v38 = vsel %vm1300_vm2, %v22681_v46, %v9902_v12  ;;  %v9910_v11 = vor.u32 %v9909_v4, %v9435_v36  ;;  %v9934_v36 = vor.u32 %v9933_v0, %v9459_v30  ;;  %v19938_v24 = vld [vmem:[%s24289_s5 + $0x8] sm:$0xff]   ;;  %v19942_v0 = vld [vmem:[%s24289_s5 + $0x18] sm:$0xff]  }
 0x3d3   : > { %18241 = vmatpush3.bf16.msra.mxu1 %v19920_v39  ;;  %v7601_v63 = vsel %vm1300_vm2, %v7596_v20, %v7600_v27  ;;  %v7613_v39 = vsel %vm1300_vm2, %v7608_v62, %v7612_v50  ;;  %v19941_v20 = vld [vmem:[%s24289_s5 + $0x68] sm:$0xff]   ;;  %v19943_v27 = vld [vmem:[%s24289_s5 + $0x70] sm:$0xff]   ;;  %v19945_v62 = vld [vmem:[%s24289_s5 + $0x78] sm:$0xff]  }
 0x3d4   : > { %18242 = vmatprep.subr.bf16.mxu1 %v19921_v42  ;;  %v9915_v10 = vsel %vm1300_vm2, %v9910_v11, %v9914_v2  ;;  %v23063_v50 = vld [vmem:[%s24289_s5] sm:$0xff]  }
 0x3d5   : > { %18269 = vmatpush3.bf16.msra.mxu0 %v19926_v22  ;;  %v9861_v22 = vld [vmem:[#allocation3 + $0x160] sm:$0x1] }
 0x3d6   : > { %17967 = vmatmul.mubr.bf16.gmra.mrb[36].mxu0 %v7577_v19  ;;  %18227 = vmatmul.mubr.bf16.gmra.mrb[40].mxu1 %v22816_v37  ;;  %v9924_v61 = vshll.u32 %v9861_v22, 16  ;;  %v9938_v19 = vrot.slane %v9936_v15, 1  ;;  %v9958_v37 = vor.u32 %v23013_v28, %v9483_v13  ;;  %v19932_v13 = vld [vmem:[%s24289_s5 + $0x70] sm:$0xff]  }
 0x3d7   : > { %18243 = vmatpush3.bf16.msra.mxu1 %v19921_v42  ;;  %17970 = vmatprep.mubr.bf16.mxu0 %v7589_v5  ;;  %v7625_v42 = vsel %vm1300_vm2, %v7620_v25, %v7624_v40  ;;  %v19933_v5 = vld [vmem:[%s24289_s5 + $0x48] sm:$0xff]  }
 0x3d8   : > { %18230 = vmatprep.mubr.bf16.mxu1 %v22829_v54  ;;  %18244 = vmatprep.subr.bf16.mxu1 %v19922_v21  ;;  %v9926_v33 = vrot.slane %v9924_v61, 1 }
 0x3d9   : > { %18270 = vmatprep.subr.bf16.mxu0 %v19927_v58 }
 0x3da   : > { %18271 = vmatpush3.bf16.msra.mxu0 %v19927_v58  ;;  %v9927_v46 = vsel %vm1300_vm2, %v22725_v56, %v9926_v33  ;;  %v9960_v58 = vshll.u32 %v9867_v8, 16  ;;  %v9939_v56 = vsel %vm1300_vm2, %v9934_v36, %v9938_v19 }
 0x3db   : > { %18245 = vmatpush3.bf16.msra.mxu1 %v19922_v21  ;;  %18272 = vmatprep.subr.bf16.mxu0 %v19928_v41  ;;  %v9945_v21 = vrot.slane %v9474_v45, 1 }
 0x3dc   : > { %18246 = vmatprep.subr.bf16.mxu1 %v19923_v55  ;;  %v9962_v30 = vrot.slane %v9960_v58, 1 }
 0x3dd   : > { %v9946_v23 = vor.u32 %v9945_v21, %v9471_v35  ;;  %v19929_v35 = vld [vmem:[%s24289_s5 + $0x60] sm:$0xff]  }
 0x3de   : > { %17971 = vmatmul.mubr.bf16.gmra.mrb[40].mxu0 %v7601_v63  ;;  %18231 = vmatmul.mubr.bf16.gmra.mrb[44].mxu1 %v22851_v7  ;;  %v9963_v54 = vsel %vm1300_vm2, %v9958_v37, %v9962_v30 }
 0x3df   : > { %18247 = vmatpush3.bf16.msra.mxu1 %v19923_v55  ;;  %17974 = vmatprep.mubr.bf16.mxu0 %v7613_v39  ;;  %v9951_v45 = vsel %vm1300_vm2, %v9946_v23, %v9950_v1  ;;  %v19939_v55 = vld [vmem:[%s24289_s5 + $0x60] sm:$0xff]  }
 0x3e0   : > { %18250 = vmatprep.mubr.bf16.mxu1 %v9879_v60  ;;  %18248 = vmatprep.subr.bf16.mxu1 %v19924_v51  ;;  %v19944_v23 = vld [vmem:[%s24289_s5 + $0x20] sm:$0xff]  }
 0x3e1   : > { %18273 = vmatpush3.bf16.msra.mxu0 %v19928_v41  ;;  %v19937_v41 = vld [vmem:[%s24289_s5 + $0x58] sm:$0xff]   ;;  %v10198_v1 = vld [vmem:[#allocation2] sm:$0x80] }
 0x3e2   : > { %18274 = vmatprep.subr.bf16.mxu0 %v19929_v35 }
 0x3e3   : > { %18249 = vmatpush3.bf16.msra.mxu1 %v19924_v51 }
 0x3e5   : > { %18275 = vmatpush3.bf16.msra.mxu0 %v19929_v35 }
 0x3e6   : > { %17975 = vmatmul.mubr.bf16.gmra.mrb[44].mxu0 %v7625_v42  ;;  %18251 = vmatmul.mubr.bf16.vlgmr.msra.gmra.mrb[32].mxu1 %v9891_v31 }
 0x3e7   : > { %18254 = vmatprep.mubr.bf16.mxu1 %v9903_v38  ;;  %18282 = vmatprep.mubr.bf16.mxu0 %v22851_v7  ;;  %v19931_v7 = vld [vmem:[%s24289_s5 + $0x40] sm:$0xff]   ;;  %v19940_v38 = vld [vmem:[%s24289_s5 + $0x10] sm:$0xff]  }
 0x3e8   : > { %18276 = vmatprep.subr.bf16.mxu0 %v19930_v59  ;;  %18554 = vmatprep.subr.bf16.mxu1 %v19931_v7 }
 0x3e9   : > { %18555 = vmatpush3.bf16.msra.mxu1 %v19931_v7  ;;  %18277 = vmatpush3.bf16.msra.mxu0 %v19930_v59 }
 0x3ea   : > { %18278 = vmatprep.subr.bf16.mxu0 %v19932_v13  ;;  %18556 = vmatprep.subr.bf16.mxu1 %v19933_v5 }
 0x3ed   : > { %18279 = vmatpush3.bf16.msra.mxu0 %v19932_v13  ;;  %18557 = vmatpush3.bf16.msra.mxu1 %v19933_v5  ;;  %v19946_v13 = vld [vmem:[%s24289_s5 + $0x28] sm:$0xff]  }
 0x3ee   : > { %18255 = vmatmul.mubr.bf16.gmra.mrb[36].mxu1 %v9915_v10  ;;  %18280 = vmatprep.subr.bf16.mxu0 %v19934_v29 }
 0x3ef   : > { %18258 = vmatprep.mubr.bf16.mxu1 %v9927_v46  ;;  %18558 = vmatprep.subr.bf16.mxu1 %v19935_v48 }
 0x3f1   : > { %18281 = vmatpush3.bf16.msra.mxu0 %v19934_v29  ;;  %18559 = vmatpush3.bf16.msra.mxu1 %v19935_v48 }
 0x3f2   : > { %18298 = vmatprep.subr.bf16.mxu0 %v19936_v18  ;;  %18560 = vmatprep.subr.bf16.mxu1 %v19937_v41 }
 0x3f5   : > { %18561 = vmatpush3.bf16.msra.mxu1 %v19937_v41 }
 0x3f6   : > { %18259 = vmatmul.mubr.bf16.gmra.mrb[40].mxu1 %v9939_v56  ;;  %18562 = vmatprep.subr.bf16.mxu1 %v19939_v55 }
 0x3f7   : > { %18262 = vmatprep.mubr.bf16.mxu1 %v9951_v45 }
 0x3f9   : > { %18563 = vmatpush3.bf16.msra.mxu1 %v19939_v55 }
 0x3fa   : > { %18564 = vmatprep.subr.bf16.mxu1 %v19941_v20 }
 0x3fd   : > { %18565 = vmatpush3.bf16.msra.mxu1 %v19941_v20 }
 0x3fe   : > { %18263 = vmatmul.mubr.bf16.gmra.mrb[44].mxu1 %v9963_v54  ;;  %18566 = vmatprep.subr.bf16.mxu1 %v19943_v27  ;;  %v10215_v54 = vshrl.u32 %v10198_v1, 16 }
 0x401   : > { %18567 = vmatpush3.bf16.msra.mxu1 %v19943_v27 }
 0x402   : > { %18568 = vmatprep.subr.bf16.mxu1 %v19945_v62 }
 0x405   : > { %18569 = vmatpush3.bf16.msra.mxu1 %v19945_v62 }
 0x406   : > { %18586 = vmatprep.subr.bf16.mxu1 %v23063_v50 }
 0x4a1   : > { %v17964_v53 = vpop.f32.mrb[32].mxu0 }
 0x4a2   : > { %v7820_v44 = vadd.f32 %v17964_v53, %v23069_v47  ;;  %v7733_v3 = vpop.f32.mrb[33].mxu0 }
 0x4a3   : > { %v7818_v51 = vadd.f32 %v23069_v47, %v7733_v3  ;;  %v17965_v32 = vpop.f32.mrb[34].mxu0 }
 0x4a4   : > { %v7821_v63 = vadd.f32 %v17965_v32, %v23069_v47  ;;  %v7736_v6 = vpop.f32.mrb[35].mxu0  ;;  %v7836_v17 = vmax.f32 %v7820_v44, 0.0 }
 0x4a5   : > { %v7819_v43 = vadd.f32 %v23069_v47, %v7736_v6  ;;  %v7834_v52 = vmax.f32 %v7818_v51, 0.0  ;;  %v10217_v51 = vrot.slane %v10215_v54, 7  ;;  %v19952_v54 = vld [vmem:[%s24289_s5 + $0x80] sm:$0xff]  }
 0x4a6   : > { %v7837_v39 = vmax.f32 %v7821_v63, 0.0 }
 0x4a7   : > { %v7835_v60 = vmax.f32 %v7819_v43, 0.0 }
 0x4a8   : > { %v23075_v25 = vpack.c.bf16 %v7837_v39, %v7836_v17  ;;  %v19948_v17 = vld [vmem:[%s24289_s5 + $0x30] sm:$0xff]   ;;  %v10200_v39 = vld [vmem:[#allocation2 + $0x18] sm:$0x80] }
 0x4a9   : > { %v23077_v40 = vpack.c.bf16 %v7835_v60, %v7834_v52  ;;  %v17968_v9 = vpop.f32.mrb[36].mxu0 }
 0x4aa   : > { %7859 = vst [vmem:[#allocation2 + $0x38] sm:$0xff] %v23075_v25  ;;  %v7824_v12 = vadd.f32 %v17968_v9, %v23069_v47  ;;  %v7749_v26 = vpop.f32.mrb[37].mxu0  ;;  %v10243_v63 = vshrl.u32 %v23075_v25, 16 }
 0x4ab   : > { %7858 = vst [vmem:[#allocation2 + $0x20] sm:$0xff] %v23077_v40  ;;  %v7822_v22 = vadd.f32 %v23069_v47, %v7749_v26  ;;  %v17969_v42 = vpop.f32.mrb[38].mxu0  ;;  %18283 = vmatmul.mubr.bf16.vlgmr.msra.gmra.mrb[48].mxu0 %v23077_v40  ;;  %v10231_v32 = vshrl.u32 %v23077_v40, 16 }
 0x4ac   : > { %v7825_v31 = vadd.f32 %v17969_v42, %v23069_v47  ;;  %v7752_v4 = vpop.f32.mrb[39].mxu0  ;;  %18286 = vmatprep.mubr.bf16.mxu0 %v23075_v25  ;;  %18299 = vmatpush3.bf16.msra.mxu0 %v19936_v18  ;;  %v7840_v61 = vmax.f32 %v7824_v12, 0.0  ;;  %v10202_v12 = vld [vmem:[#allocation2 + $0x30] sm:$0x80] }
 0x4ad   : > { %v7823_v34 = vadd.f32 %v23069_v47, %v7752_v4  ;;  %18300 = vmatprep.subr.bf16.mxu0 %v19938_v24  ;;  %v7838_v2 = vmax.f32 %v7822_v22, 0.0 }
 0x4ae   : > { %v7841_v11 = vmax.f32 %v7825_v31, 0.0 }
 0x4af   : > { %v7839_v33 = vmax.f32 %v7823_v34, 0.0 }
 0x4b0   : > { %v23093_v14 = vpack.c.bf16 %v7841_v11, %v7840_v61  ;;  %18301 = vmatpush3.bf16.msra.mxu0 %v19938_v24 }
 0x4b1   : > { %v23095_v57 = vpack.c.bf16 %v7839_v33, %v7838_v2  ;;  %v17972_v10 = vpop.f32.mrb[40].mxu0  ;;  %18302 = vmatprep.subr.bf16.mxu0 %v19940_v38  ;;  %v19949_v2 = vld [vmem:[%s24289_s5 + $0x8] sm:$0xff]   ;;  %v10227_v33 = vshrl.u32 %v10200_v39, 16 }
 0x4b2   : > { %7861 = vst [vmem:[#allocation2 + $0x68] sm:$0xff] %v23093_v14  ;;  %v7828_v15 = vadd.f32 %v17972_v10, %v23069_v47  ;;  %v7765_v46 = vpop.f32.mrb[41].mxu0  ;;  %v10239_v10 = vshrl.u32 %v10202_v12, 16  ;;  %v19954_v39 = vld [vmem:[%s24289_s5 + $0x88] sm:$0xff]  }
 0x4b3   : > { %7860 = vst [vmem:[#allocation2 + $0x50] sm:$0xff] %v23095_v57  ;;  %v7826_v21 = vadd.f32 %v23069_v47, %v7765_v46  ;;  %v17973_v49 = vpop.f32.mrb[42].mxu0  ;;  %18287 = vmatmul.mubr.bf16.gmra.mrb[52].mxu0 %v23095_v57 }
 0x4b4   : > { %v7829_v8 = vadd.f32 %v17973_v49, %v23069_v47  ;;  %v7768_v36 = vpop.f32.mrb[43].mxu0  ;;  %18290 = vmatprep.mubr.bf16.mxu0 %v23093_v14  ;;  %18303 = vmatpush3.bf16.msra.mxu0 %v19940_v38  ;;  %v7844_v58 = vmax.f32 %v7828_v15, 0.0  ;;  %v10245_v49 = vrot.slane %v10243_v63, 7 }
 0x4b5   : > { %v7827_v19 = vadd.f32 %v23069_v47, %v7768_v36  ;;  %18304 = vmatprep.subr.bf16.mxu0 %v19942_v0  ;;  %v7842_v45 = vmax.f32 %v7826_v21, 0.0  ;;  %v19950_v21 = vld [vmem:[%s24289_s5 + $0x38] sm:$0xff]  }
 0x4b6   : > { %v7845_v56 = vmax.f32 %v7829_v8, 0.0 }
 0x4b7   : > { %v7843_v37 = vmax.f32 %v7827_v19, 0.0  ;;  %v10225_v19 = vsel %vm856_vm1, %v10217_v51, %v22880_v16  ;;  %v10229_v16 = vrot.slane %v10227_v33, 7 }
 0x4b8   : > { %v23111_v30 = vpack.c.bf16 %v7845_v56, %v7844_v58  ;;  %18305 = vmatpush3.bf16.msra.mxu0 %v19942_v0  ;;  %v10233_v0 = vrot.slane %v10231_v32, 7  ;;  %v19951_v56 = vld [vmem:[%s24289_s5 + $0x10] sm:$0xff]  }
 0x4b9   : > { %v23113_v35 = vpack.c.bf16 %v7843_v37, %v7842_v45  ;;  %v17976_v59 = vpop.f32.mrb[44].mxu0  ;;  %v18252_v7 = vpop.f32.mrb[32].mxu1  ;;  %18306 = vmatprep.subr.bf16.mxu0 %v19944_v23  ;;  %v10246_v45 = vshll.u32 %v23075_v25, 16  ;;  %v19969_v25 = vld [vmem:[%s24289_s5 + $0x98] sm:$0xff]  }
 0x4ba   : > { %7863 = vst [vmem:[#allocation2 + $0x98] sm:$0xff] %v23111_v30  ;;  %v7832_v5 = vadd.f32 %v17976_v59, %v23069_v47  ;;  %v10151_v29 = vadd.f32 %v18252_v7, %v23069_v47  ;;  %v7781_v48 = vpop.f32.mrb[45].mxu0  ;;  %v10070_v18 = vpop.f32.mrb[33].mxu1  ;;  %v10241_v59 = vrot.slane %v10239_v10, 7  ;;  %v10204_v7 = vld [vmem:[#allocation2 + $0x48] sm:$0x80] }
 0x4bb   : > { %7862 = vst [vmem:[#allocation2 + $0x80] sm:$0xff] %v23113_v35  ;;  %v7830_v41 = vadd.f32 %v23069_v47, %v7781_v48  ;;  %v10149_v55 = vadd.f32 %v23069_v47, %v10070_v18  ;;  %v17977_v20 = vpop.f32.mrb[46].mxu0  ;;  %v18253_v27 = vpop.f32.mrb[34].mxu1  ;;  %18291 = vmatmul.mubr.bf16.gmra.mrb[56].mxu0 %v23113_v35  ;;  %v10248_v48 = vor.u32 %v10246_v45, %v10245_v49  ;;  %v10267_v18 = vshrl.u32 %v23093_v14, 16 }
 0x4bc   : > { %v7833_v62 = vadd.f32 %v17977_v20, %v23069_v47  ;;  %v10152_v53 = vadd.f32 %v18253_v27, %v23069_v47  ;;  %v7784_v44 = vpop.f32.mrb[47].mxu0  ;;  %v10073_v3 = vpop.f32.mrb[35].mxu1  ;;  %18294 = vmatprep.mubr.bf16.mxu0 %v23111_v30  ;;  %18307 = vmatpush3.bf16.msra.mxu0 %v19944_v23  ;;  %v7848_v52 = vmax.f32 %v7832_v5, 0.0  ;;  %v10167_v60 = vmax.f32 %v10151_v29, 0.0  ;;  %v10206_v20 = vld [vmem:[#allocation2 + $0x60] sm:$0x80] }
 0x4bd   : > { %v7831_v6 = vadd.f32 %v23069_v47, %v7784_v44  ;;  %v10150_v43 = vadd.f32 %v23069_v47, %v10073_v3  ;;  %18308 = vmatprep.subr.bf16.mxu0 %v19946_v13  ;;  %v7846_v26 = vmax.f32 %v7830_v41, 0.0  ;;  %v10165_v22 = vmax.f32 %v10149_v55, 0.0  ;;  %v19953_v3 = vld [vmem:[%s24289_s5 + $0x18] sm:$0xff]  }
 0x4be   : > { %v7849_v9 = vmax.f32 %v7833_v62, 0.0  ;;  %v10168_v24 = vmax.f32 %v10152_v53, 0.0  ;;  %v10234_v23 = vshll.u32 %v23077_v40, 16  ;;  %v10251_v62 = vshrl.u32 %v10204_v7, 16 }
 0x4bf   : > { %v7847_v42 = vmax.f32 %v7831_v6, 0.0  ;;  %v10166_v31 = vmax.f32 %v10150_v43, 0.0  ;;  %v10279_v33 = vshrl.u32 %v23113_v35, 16 }
 0x4c0   : > { %v23135_v4 = vpack.c.bf16 %v7849_v9, %v7848_v52  ;;  %v23137_v34 = vpack.c.bf16 %v10168_v24, %v10167_v60  ;;  %18309 = vmatpush3.bf16.msra.mxu0 %v19946_v13  ;;  %v10255_v13 = vshrl.u32 %v23095_v57, 16  ;;  %v10263_v52 = vshrl.u32 %v10206_v20, 16  ;;  %v10208_v60 = vld [vmem:[#allocation2 + $0x78] sm:$0x80] }
 0x4c1   : > { %v23139_v38 = vpack.c.bf16 %v7847_v42, %v7846_v26  ;;  %v23141_v61 = vpack.c.bf16 %v10166_v31, %v10165_v22  ;;  %v18256_v11 = vpop.f32.mrb[36].mxu1  ;;  %18310 = vmatprep.subr.bf16.mxu0 %v19948_v17  ;;  %v10269_v9 = vrot.slane %v10267_v18, 7  ;;  %v10249_v26 = vsel %vm856_vm1, %v10241_v59, %v10248_v48 }
 0x4c2   : > { %7865 = vst [vmem:[#allocation2 + $0xc8] sm:$0xff] %v23135_v4  ;;  %10190 = vst [vmem:[#allocation2 + $0xf8] sm:$0xff] %v23137_v34  ;;  %v10155_v15 = vadd.f32 %v18256_v11, %v23069_v47  ;;  %v10086_v46 = vpop.f32.mrb[37].mxu1  ;;  %18570 = vmatprep.mubr.bf16.mxu1 %v23135_v4  ;;  %v10257_v51 = vrot.slane %v10255_v13, 7  ;;  %v10258_v22 = vshll.u32 %v23095_v57, 16  ;;  %v10253_v11 = vrot.slane %v10251_v62, 7 }
 0x4c3   : > { %7864 = vst [vmem:[#allocation2 + $0xb0] sm:$0xff] %v23139_v38  ;;  %10189 = vst [vmem:[#allocation2 + $0xe0] sm:$0xff] %v23141_v61  ;;  %v10153_v8 = vadd.f32 %v23069_v47, %v10086_v46  ;;  %v18257_v36 = vpop.f32.mrb[38].mxu1  ;;  %18295 = vmatmul.mubr.bf16.gmra.mrb[60].mxu0 %v23139_v38  ;;  %18571 = vmatmul.mubr.bf16.vlgmr.msra.gmra.mrb[48].mxu1 %v23141_v61  ;;  %v10210_v46 = vld [vmem:[#allocation2 + $0x90] sm:$0x80]  ;;  %v10281_v7 = vrot.slane %v10279_v33, 7 }
 0x4c4   : > { %v10156_v1 = vadd.f32 %v18257_v36, %v23069_v47  ;;  %v10089_v58 = vpop.f32.mrb[39].mxu1  ;;  %18587 = vmatpush3.bf16.msra.mxu1 %v23063_v50  ;;  %18311 = vmatpush3.bf16.msra.mxu0 %v19948_v17  ;;  %v10236_v50 = vor.u32 %v10234_v23, %v10233_v0  ;;  %v10171_v5 = vmax.f32 %v10155_v15, 0.0  ;;  %v19955_v0 = vld [vmem:[%s24289_s5 + $0x20] sm:$0xff]   ;;  %v10275_v15 = vshrl.u32 %v10208_v60, 16  ;;  %v19959_v60 = vld [vmem:[%s24289_s5 + $0x30] sm:$0xff]  }
 0x4c5   : > { %v10154_v37 = vadd.f32 %v23069_v47, %v10089_v58  ;;  %18574 = vmatprep.mubr.bf16.mxu1 %v23137_v34  ;;  %18588 = vmatprep.subr.bf16.mxu1 %v19949_v2  ;;  %v10169_v41 = vmax.f32 %v10153_v8, 0.0  ;;  %v10265_v36 = vrot.slane %v10263_v52, 7  ;;  %v10287_v59 = vshrl.u32 %v10210_v46, 16 }
 0x4c6   : > { %v10172_v29 = vmax.f32 %v10156_v1, 0.0  ;;  %18312 = vmatprep.subr.bf16.mxu0 %v19950_v21  ;;  %18314 = vmatprep.mubr.bf16.mxu0 %v10225_v19  ;;  %v10237_v17 = vsel %vm856_vm1, %v10229_v16, %v10236_v50  ;;  %v10291_v1 = vshrl.u32 %v23111_v30, 16  ;;  %v12547_v16 = vshrl.u32 %v23135_v4, 16 }
 0x4c7   : > { %v10170_v55 = vmax.f32 %v10154_v37, 0.0  ;;  %v12526_v37 = vld [vmem:[#allocation2 + $0xc0] sm:$0x80]  ;;  %v10277_v20 = vrot.slane %v10275_v15, 7 }
 0x4c8   : > { %v23182_v27 = vpack.c.bf16 %v10172_v29, %v10171_v5  ;;  %18589 = vmatpush3.bf16.msra.mxu1 %v19949_v2  ;;  %18313 = vmatpush3.bf16.msra.mxu0 %v19950_v21  ;;  %v10270_v2 = vshll.u32 %v23093_v14, 16  ;;  %v10260_v21 = vor.u32 %v10258_v22, %v10257_v51  ;;  %v19956_v14 = vld [vmem:[%s24289_s5 + $0x90] sm:$0xff]   ;;  %v12543_v62 = vshrl.u32 %v12526_v37, 16 }
 0x4c9   : > { %v23184_v53 = vpack.c.bf16 %v10170_v55, %v10169_v41  ;;  %v18260_v44 = vpop.f32.mrb[40].mxu1  ;;  %18590 = vmatprep.subr.bf16.mxu1 %v19951_v56  ;;  %18330 = vmatprep.subr.bf16.mxu0 %v19952_v54  ;;  %v19957_v41 = vld [vmem:[%s24289_s5 + $0x28] sm:$0xff]   ;;  %v19958_v55 = vld [vmem:[%s24289_s5 + $0x98] sm:$0xff]  }
 0x4ca   : > { %10192 = vst [vmem:[#allocation2 + $0x128] sm:$0xff] %v23182_v27  ;;  %v10159_v6 = vadd.f32 %v18260_v44, %v23069_v47  ;;  %v10102_v43 = vpop.f32.mrb[41].mxu1  ;;  %v10272_v19 = vor.u32 %v10270_v2, %v10269_v9  ;;  %v10261_v18 = vsel %vm856_vm1, %v10253_v11, %v10260_v21  ;;  %v10282_v44 = vshll.u32 %v23113_v35, 16  ;;  %v19960_v9 = vld [vmem:[%s24289_s5 + $0xa0] sm:$0xff]   ;;  %v10212_v11 = vld [vmem:[#allocation2 + $0xa8] sm:$0x80] }
 0x4cb   : > { %10191 = vst [vmem:[#allocation2 + $0x110] sm:$0xff] %v23184_v53  ;;  %v10157_v24 = vadd.f32 %v23069_v47, %v10102_v43  ;;  %v18261_v12 = vpop.f32.mrb[42].mxu1  ;;  %18315 = vmatmul.mubr.bf16.vlgmr.msra.gmra.mrb[48].mxu0 %v10237_v17  ;;  %18575 = vmatmul.mubr.bf16.gmra.mrb[52].mxu1 %v23184_v53  ;;  %v12549_v17 = vrot.slane %v12547_v16, 7  ;;  %v12528_v2 = vld [vmem:[#allocation2 + $0xd8] sm:$0x80] }
 0x4cc   : > { %v10160_v42 = vadd.f32 %v18261_v12, %v23069_v47  ;;  %v10105_v31 = vpop.f32.mrb[43].mxu1  ;;  %18591 = vmatpush3.bf16.msra.mxu1 %v19951_v56  ;;  %18318 = vmatprep.mubr.bf16.mxu0 %v10249_v26  ;;  %v10175_v49 = vmax.f32 %v10159_v6, 0.0  ;;  %v10273_v43 = vsel %vm856_vm1, %v10265_v36, %v10272_v19  ;;  %v10284_v12 = vor.u32 %v10282_v44, %v10281_v7  ;;  %v12530_v21 = vld [vmem:[#allocation2 + $0xf0] sm:$0x80] }
 0x4cd   : > { %v10158_v10 = vadd.f32 %v23069_v47, %v10105_v31  ;;  %18331 = vmatpush3.bf16.msra.mxu0 %v19952_v54  ;;  %18578 = vmatprep.mubr.bf16.mxu1 %v23182_v27  ;;  %v10173_v58 = vmax.f32 %v10157_v24, 0.0  ;;  %v10289_v24 = vrot.slane %v10287_v59, 7  ;;  %v10294_v26 = vshll.u32 %v23111_v30, 16 }
 0x4ce   : > { %v10176_v8 = vmax.f32 %v10160_v42, 0.0  ;;  %18592 = vmatprep.subr.bf16.mxu1 %v19953_v3  ;;  %18332 = vmatprep.subr.bf16.mxu0 %v19954_v39  ;;  %v12550_v42 = vshll.u32 %v23135_v4, 16  ;;  %v12571_v30 = vshrl.u32 %v23137_v34, 16  ;;  %v12545_v19 = vrot.slane %v12543_v62, 7  ;;  %v19978_v4 = vld [vmem:[%s24289_s5 + $0xe8] sm:$0xff]  }
 0x4cf   : > { %v10174_v56 = vmax.f32 %v10158_v10, 0.0  ;;  %v10303_v10 = vshrl.u32 %v23139_v38, 16  ;;  %v12555_v37 = vshrl.u32 %v12528_v2, 16  ;;  %v12567_v59 = vshrl.u32 %v12530_v21, 16 }
 0x4d0   : > { %v23217_v54 = vpack.c.bf16 %v10176_v8, %v10175_v49  ;;  %18593 = vmatpush3.bf16.msra.mxu1 %v19953_v3  ;;  %v10293_v3 = vrot.slane %v10291_v1, 7  ;;  %v10642_v1 = vld [vmem:[#allocation2 + $0x10] sm:$0x1]  ;;  %v12573_v62 = vrot.slane %v12571_v30, 7  ;;  %v12595_v21 = vshrl.u32 %v23182_v27, 16 }
 0x4d1   : > { %v23221_v50 = vpack.c.bf16 %v10174_v56, %v10173_v58  ;;  %v18264_v5 = vpop.f32.mrb[44].mxu1  ;;  %18333 = vmatpush3.bf16.msra.mxu0 %v19954_v39  ;;  %18594 = vmatprep.subr.bf16.mxu1 %v19955_v0  ;;  %v10299_v56 = vshrl.u32 %v10212_v11, 16  ;;  %v10305_v7 = vrot.slane %v10303_v10, 7  ;;  %v10646_v30 = vld [vmem:[#allocation2 + $0x40] sm:$0x1] }
 0x4d2   : > { %10194 = vst [vmem:[#allocation2 + $0x158] sm:$0xff] %v23217_v54  ;;  %v10163_v29 = vadd.f32 %v18264_v5, %v23069_v47  ;;  %v10118_v48 = vpop.f32.mrb[45].mxu1  ;;  %18334 = vmatprep.subr.bf16.mxu0 %v19956_v14  ;;  %v10296_v49 = vor.u32 %v10294_v26, %v10293_v3 }
 0x4d3   : > { %10193 = vst [vmem:[#allocation2 + $0x140] sm:$0xff] %v23221_v50  ;;  %v10161_v51 = vadd.f32 %v23069_v47, %v10118_v48  ;;  %v18265_v6 = vpop.f32.mrb[46].mxu1  ;;  %18319 = vmatmul.mubr.bf16.gmra.mrb[52].mxu0 %v10261_v18  ;;  %18579 = vmatmul.mubr.bf16.gmra.mrb[56].mxu1 %v23221_v50  ;;  %v19961_v48 = vld [vmem:[%s24289_s5 + $0x38] sm:$0xff]   ;;  %v19962_v18 = vld [vmem:[%s24289_s5 + $0xa8] sm:$0xff]  }
 0x4d4   : > { %v10164_v39 = vadd.f32 %v18265_v6, %v23069_v47  ;;  %v10121_v52 = vpop.f32.mrb[47].mxu1  ;;  %18595 = vmatpush3.bf16.msra.mxu1 %v19955_v0  ;;  %18322 = vmatprep.mubr.bf16.mxu0 %v10273_v43  ;;  %v12559_v0 = vshrl.u32 %v23141_v61, 16  ;;  %v10179_v15 = vmax.f32 %v10163_v29, 0.0  ;;  %v10285_v29 = vsel %vm856_vm1, %v10277_v20, %v10284_v12 }
 0x4d5   : > { %v10162_v31 = vadd.f32 %v23069_v47, %v10121_v52  ;;  %18335 = vmatpush3.bf16.msra.mxu0 %v19956_v14  ;;  %18582 = vmatprep.mubr.bf16.mxu1 %v23217_v54  ;;  %v10177_v8 = vmax.f32 %v10161_v51, 0.0  ;;  %v12552_v47 = vor.u32 %v12550_v42, %v12549_v17  ;;  %v10297_v3 = vsel %vm856_vm1, %v10289_v24, %v10296_v49  ;;  %v19965_v49 = vld [vmem:[%s24289_s5 + $0x88] sm:$0xff]  }
 0x4d6   : > { %v10180_v46 = vmax.f32 %v10164_v39, 0.0  ;;  %18596 = vmatprep.subr.bf16.mxu1 %v19957_v41  ;;  %18336 = vmatprep.subr.bf16.mxu0 %v19958_v55  ;;  %v12561_v5 = vrot.slane %v12559_v0, 7  ;;  %v10665_v20 = vshll.u32 %v10642_v1, 16  ;;  %v10306_v51 = vshll.u32 %v23139_v38, 16  ;;  %v19963_v39 = vld [vmem:[%s24289_s5 + $0x80] sm:$0xff]  }
 0x4d7   : > { %v10178_v36 = vmax.f32 %v10162_v31, 0.0  ;;  %v12562_v6 = vshll.u32 %v23141_v61, 16  ;;  %v12553_v43 = vsel %vm856_vm1, %v12545_v19, %v12552_v47  ;;  %v12574_v17 = vshll.u32 %v23137_v34, 16  ;;  %v19964_v34 = vld [vmem:[%s24289_s5 + $0xb0] sm:$0xff]   ;;  %v19966_v47 = vld [vmem:[%s24289_s5 + $0xb8] sm:$0xff]  }
 0x4d8   : > { %v10188_v14 = vpack.c.bf16 %v10180_v46, %v10179_v15  ;;  %18597 = vmatpush3.bf16.msra.mxu1 %v19957_v41  ;;  %v20091_v41 = vld [vmem:[#allocation2] sm:$0xff]  ;;  %v10301_v52 = vrot.slane %v10299_v56, 7  ;;  %v10308_v24 = vor.u32 %v10306_v51, %v10305_v7  ;;  %v12569_v31 = vrot.slane %v12567_v59, 7  ;;  %v12532_v15 = vld [vmem:[#allocation2 + $0x108] sm:$0x80] }
 0x4d9   : > { %v23257_v58 = vpack.c.bf16 %v10178_v36, %v10177_v8  ;;  %18337 = vmatpush3.bf16.msra.mxu0 %v19958_v55  ;;  %18598 = vmatprep.subr.bf16.mxu1 %v19959_v60  ;;  %v10658_v55 = vshrl.u32 %v20091_v41, 16  ;;  %v12564_v12 = vor.u32 %v12562_v6, %v12561_v5  ;;  %v12576_v26 = vor.u32 %v12574_v17, %v12573_v62  ;;  %v10644_v46 = vld [vmem:[#allocation2 + $0x28] sm:$0x1]  ;;  %v12534_v19 = vld [vmem:[#allocation2 + $0x120] sm:$0x80] }
 0x4da   : > { %10196 = vst [vmem:[#allocation2 + $0x188] sm:$0xff] %v10188_v14  ;;  %18338 = vmatprep.subr.bf16.mxu0 %v19960_v9  ;;  %v10667_v2 = vrot.slane %v10665_v20, 1  ;;  %v10309_v36 = vsel %vm856_vm1, %v10301_v52, %v10308_v24  ;;  %v12579_v14 = vshrl.u32 %v12532_v15, 16  ;;  %v10677_v59 = vshll.u32 %v10644_v46, 16  ;;  %v19970_v15 = vld [vmem:[%s24289_s5 + $0xc8] sm:$0xff]  }
 0x4db   : > { %10195 = vst [vmem:[#allocation2 + $0x170] sm:$0xff] %v23257_v58  ;;  %18323 = vmatmul.mubr.bf16.gmra.mrb[56].mxu0 %v10285_v29  ;;  %18583 = vmatmul.mubr.bf16.gmra.mrb[60].mxu1 %v23257_v58  ;;  %v10663_v11 = vor.u32 %v10658_v55, %v23013_v28  ;;  %v12577_v1 = vsel %vm856_vm1, %v12569_v31, %v12576_v26  ;;  %v12586_v7 = vshll.u32 %v23184_v53, 16  ;;  %v10686_v5 = vrot.slane %v10246_v45, 1  ;;  %v23310_v55 = vld [vmem:[#allocation2 + $0x68] sm:$0xff]  ;;  %v19968_v45 = vld [vmem:[%s24289_s5 + $0xc0] sm:$0xff]  }
 0x4dc   : > { %18599 = vmatpush3.bf16.msra.mxu1 %v19959_v60  ;;  %18326 = vmatprep.mubr.bf16.mxu0 %v10297_v3  ;;  %v12583_v60 = vshrl.u32 %v23184_v53, 16  ;;  %v10689_v29 = vshll.u32 %v10646_v30, 16  ;;  %v12591_v41 = vshrl.u32 %v12534_v19, 16  ;;  %v12607_v62 = vshrl.u32 %v23221_v50, 16  ;;  %v23345_v19 = vld [vmem:[#allocation2 + $0x98] sm:$0xff] }
 0x4dd   : > { %18339 = vmatpush3.bf16.msra.mxu0 %v19960_v9  ;;  %18602 = vmatprep.mubr.bf16.mxu1 %v12553_v43  ;;  %v12557_v9 = vrot.slane %v12555_v37, 7  ;;  %v10668_v56 = vsel %vm1300_vm2, %v10663_v11, %v10667_v2  ;;  %v10674_v37 = vrot.slane %v10234_v23, 1  ;;  %v12581_v3 = vrot.slane %v12579_v14, 7  ;;  %v12538_v11 = vld [vmem:[#allocation2 + $0x150] sm:$0x80] }
 0x4de   : > { %18600 = vmatprep.subr.bf16.mxu1 %v19961_v48  ;;  %18340 = vmatprep.subr.bf16.mxu0 %v19962_v18  ;;  %v12585_v8 = vrot.slane %v12583_v60, 7  ;;  %v12598_v20 = vshll.u32 %v23182_v27, 16  ;;  %v10679_v17 = vrot.slane %v10677_v59, 1  ;;  %v10687_v52 = vor.u32 %v10686_v5, %v10243_v63  ;;  %v10650_v27 = vld [vmem:[#allocation2 + $0x70] sm:$0x1] }
 0x4df   : > { %v12565_v28 = vsel %vm856_vm1, %v12557_v9, %v12564_v12  ;;  %v10675_v43 = vor.u32 %v10674_v37, %v10231_v32  ;;  %v10691_v24 = vrot.slane %v10689_v29, 1  ;;  %v10648_v12 = vld [vmem:[#allocation2 + $0x58] sm:$0x1]  ;;  %v12619_v26 = vshrl.u32 %v23217_v54, 16  ;;  %v19972_v37 = vld [vmem:[%s24289_s5 + $0xd0] sm:$0xff]  }
 0x4e0   : > { %18601 = vmatpush3.bf16.msra.mxu1 %v19961_v48  ;;  %v12597_v48 = vrot.slane %v12595_v21, 7  ;;  %v12588_v23 = vor.u32 %v12586_v7, %v12585_v8  ;;  %v12593_v31 = vrot.slane %v12591_v41, 7  ;;  %v12609_v40 = vrot.slane %v12607_v62, 7  ;;  %v12540_v41 = vld [vmem:[#allocation2 + $0x168] sm:$0x80] }
 0x4e1   : > { %18341 = vmatpush3.bf16.msra.mxu0 %v19962_v18  ;;  %18618 = vmatprep.subr.bf16.mxu1 %v19963_v39  ;;  %v19967_v18 = vld [vmem:[%s24289_s5 + $0x90] sm:$0xff]   ;;  %v10680_v2 = vsel %vm1300_vm2, %v10675_v43, %v10679_v17  ;;  %v10698_v46 = vrot.slane %v10258_v22, 1  ;;  %v10701_v21 = vshll.u32 %v10648_v12, 16  ;;  %v10692_v30 = vsel %vm1300_vm2, %v10687_v52, %v10691_v24  ;;  %v19971_v22 = vld [vmem:[%s24289_s5 + $0xa0] sm:$0xff]  }
 0x4e2   : > { %18342 = vmatprep.subr.bf16.mxu0 %v19964_v34  ;;  %v12600_v9 = vor.u32 %v12598_v20, %v12597_v48  ;;  %v12589_v32 = vsel %vm856_vm1, %v12581_v3, %v12588_v23  ;;  %v12615_v14 = vshrl.u32 %v12538_v11, 16  ;;  %v10706_v5 = vshrl.u32 %v23310_v55, 16  ;;  %v10652_v3 = vld [vmem:[#allocation2 + $0x88] sm:$0x1]  ;;  %v12969_v24 = vld [vmem:[#allocation2 + $0xd0] sm:$0x1] }
 0x4e3   : > { %18327 = vmatmul.mubr.bf16.gmra.mrb[60].mxu0 %v10309_v36  ;;  %18603 = vmatmul.mubr.bf16.vlgmr.msra.gmra.mrb[48].mxu1 %v12565_v28  ;;  %v10713_v36 = vshll.u32 %v10650_v27, 16  ;;  %v12621_v28 = vrot.slane %v12619_v26, 7  ;;  %v12622_v29 = vshll.u32 %v23217_v54, 16  ;;  %v10699_v48 = vor.u32 %v10698_v46, %v10255_v13  ;;  %v19973_v13 = vld [vmem:[%s24289_s5 + $0xa8] sm:$0xff]   ;;  %v19975_v11 = vld [vmem:[%s24289_s5 + $0xb0] sm:$0xff]  }
 0x4e4   : > { %18619 = vmatpush3.bf16.msra.mxu1 %v19963_v39  ;;  %18606 = vmatprep.mubr.bf16.mxu1 %v12577_v1  ;;  %v12536_v39 = vld [vmem:[#allocation2 + $0x138] sm:$0x80]  ;;  %v10732_v20 = vshll.u32 %v23345_v19, 16  ;;  %v12617_v17 = vrot.slane %v12615_v14, 7  ;;  %v12627_v52 = vshrl.u32 %v12540_v41, 16  ;;  %v10722_v26 = vrot.slane %v10282_v44, 1 }
 0x4e5   : > { %18343 = vmatpush3.bf16.msra.mxu0 %v19964_v34  ;;  %18620 = vmatprep.subr.bf16.mxu1 %v19965_v49  ;;  %v10708_v34 = vshll.u32 %v23310_v55, 16  ;;  %v12603_v63 = vshrl.u32 %v12536_v39, 16  ;;  %v12624_v43 = vor.u32 %v12622_v29, %v12621_v28  ;;  %v10654_v39 = vld [vmem:[#allocation2 + $0xa0] sm:$0x1]  ;;  %v12634_v27 = vshll.u32 %v23257_v58, 16 }
 0x4e6   : > { %18344 = vmatprep.subr.bf16.mxu0 %v19966_v47  ;;  %18346 = vmatprep.mubr.bf16.mxu0 %v10668_v56  ;;  %v12631_v56 = vshrl.u32 %v23257_v58, 16  ;;  %v12989_v44 = vrot.slane %v12550_v42, 1  ;;  %v10723_v42 = vor.u32 %v10722_v26, %v10279_v33  ;;  %v13001_v41 = vrot.slane %v12562_v6, 1  ;;  %v10945_v53 = vld [vmem:[#allocation2 + $0x60] sm:$0x80] }
 0x4e7   : > { %v10710_v8 = vrot.slane %v10708_v34, 1  ;;  %v12605_v59 = vrot.slane %v12603_v63, 7  ;;  %v12625_v63 = vsel %vm856_vm1, %v12617_v17, %v12624_v43 }
 0x4e8   : > { %18621 = vmatpush3.bf16.msra.mxu1 %v19965_v49  ;;  %v12610_v49 = vshll.u32 %v23221_v50, 16  ;;  %v12633_v54 = vrot.slane %v12631_v56, 7  ;;  %v10949_v50 = vld [vmem:[#allocation2 + $0x90] sm:$0x80] }
 0x4e9   : > { %18345 = vmatpush3.bf16.msra.mxu0 %v19966_v47  ;;  %18622 = vmatprep.subr.bf16.mxu1 %v19967_v18  ;;  %v12601_v47 = vsel %vm856_vm1, %v12593_v31, %v12600_v9  ;;  %v10711_v23 = vor.u32 %v10710_v8, %v10706_v5  ;;  %v19974_v9 = vld [vmem:[%s24289_s5 + $0xd8] sm:$0xff]   ;;  %v10725_v31 = vshll.u32 %v10652_v3, 16  ;;  %v10730_v8 = vshrl.u32 %v23345_v19, 16 }
 0x4ea   : > { %18362 = vmatprep.subr.bf16.mxu0 %v19968_v45  ;;  %v12612_v1 = vor.u32 %v12610_v49, %v12609_v40  ;;  %v12636_v46 = vor.u32 %v12634_v27, %v12633_v54  ;;  %v23415_v54 = vld [vmem:[#allocation2 + $0x38] sm:$0xff] }
 0x4eb   : > { %18607 = vmatmul.mubr.bf16.gmra.mrb[52].mxu1 %v12589_v32  ;;  %v10734_v32 = vrot.slane %v10732_v20, 1  ;;  %v10727_v28 = vrot.slane %v10725_v31, 1 }
 0x4ec   : > { %18347 = vmatmul.mubr.bf16.vlgmr.msra.gmra.mrb[48].mxu0 %v10680_v2  ;;  %18623 = vmatpush3.bf16.msra.mxu1 %v19967_v18  ;;  %v10703_v18 = vrot.slane %v10701_v21, 1  ;;  %v12613_v57 = vsel %vm856_vm1, %v12605_v59, %v12612_v1  ;;  %v12992_v2 = vshll.u32 %v12969_v24, 16  ;;  %v19976_v21 = vld [vmem:[%s24289_s5 + $0xe0] sm:$0xff]   ;;  %v10656_v1 = vld [vmem:[#allocation2 + $0xb8] sm:$0x1]  ;;  %v12990_v59 = vor.u32 %v12989_v44, %v12547_v16  ;;  %v23423_v24 = vld [vmem:[#allocation2 + $0x50] sm:$0xff] }
 0x4ed   : > { %18350 = vmatprep.mubr.bf16.mxu0 %v10692_v30  ;;  %18363 = vmatpush3.bf16.msra.mxu0 %v19968_v45  ;;  %v10715_v45 = vrot.slane %v10713_v36, 1  ;;  %v12629_v30 = vrot.slane %v12627_v52, 7  ;;  %v23390_v36 = vld [vmem:[#allocation2 + $0xf8] sm:$0xff]  ;;  %v10728_v3 = vsel %vm1300_vm2, %v10723_v42, %v10727_v28  ;;  %v10746_v16 = vrot.slane %v10306_v51, 1  ;;  %v19981_v28 = vld [vmem:[%s24289_s5 + $0xc8] sm:$0xff]  }
 0x4ee   : > { %18610 = vmatprep.mubr.bf16.mxu1 %v12601_v47  ;;  %18624 = vmatprep.subr.bf16.mxu1 %v19969_v25  ;;  %v10704_v12 = vsel %vm1300_vm2, %v10699_v48, %v10703_v18  ;;  %v12971_v47 = vld [vmem:[#allocation2 + $0xe8] sm:$0x1]  ;;  %v12994_v29 = vrot.slane %v12992_v2, 1  ;;  %v10939_v48 = vld [vmem:[#allocation2 + $0x18] sm:$0x80]  ;;  %v13011_v35 = vshll.u32 %v23390_v36, 16 }
 0x4ef   : > { %18364 = vmatprep.subr.bf16.mxu0 %v19970_v15  ;;  %v10716_v40 = vsel %vm1300_vm2, %v10711_v23, %v10715_v45  ;;  %v12637_v33 = vsel %vm856_vm1, %v12629_v30, %v12636_v46  ;;  %v19977_v18 = vld [vmem:[%s24289_s5 + $0xb8] sm:$0xff]   ;;  %v13004_v23 = vshll.u32 %v12971_v47, 16  ;;  %v12973_v45 = vld [vmem:[#allocation2 + $0x100] sm:$0x1]  ;;  %v10749_v43 = vshll.u32 %v10656_v1, 16 }
 0x4f0   : > { %18625 = vmatpush3.bf16.msra.mxu1 %v19969_v25  ;;  %v10737_v25 = vshll.u32 %v10654_v39, 16  ;;  %v10956_v39 = vshrl.u32 %v10939_v48, 16  ;;  %v13013_v51 = vrot.slane %v13011_v35, 1  ;;  %v13016_v52 = vshll.u32 %v12973_v45, 16  ;;  %v12975_v44 = vld [vmem:[#allocation2 + $0x118] sm:$0x1] }
 0x4f1   : > { %18365 = vmatpush3.bf16.msra.mxu0 %v19970_v15  ;;  %18626 = vmatprep.subr.bf16.mxu1 %v19971_v22  ;;  %v23382_v15 = vld [vmem:[#allocation2 + $0x20] sm:$0xff]  ;;  %v13006_v26 = vrot.slane %v13004_v23, 1  ;;  %v10984_v46 = vshrl.u32 %v23423_v24, 16  ;;  %v13025_v47 = vrot.slane %v12586_v7, 1  ;;  %v19983_v23 = vld [vmem:[%s24289_s5 + $0xd0] sm:$0xff]   ;;  %v10975_v45 = vshll.u32 %v23415_v54, 16 }
 0x4f2   : > { %18366 = vmatprep.subr.bf16.mxu0 %v19972_v37  ;;  %v10739_v14 = vrot.slane %v10737_v25, 1  ;;  %v10963_v31 = vshll.u32 %v23382_v15, 16  ;;  %v10751_v25 = vrot.slane %v10749_v43, 1  ;;  %v10958_v2 = vrot.slane %v10956_v39, 7  ;;  %v19984_v43 = vld [vmem:[%s24289_s5 + $0x100] sm:$0xff]  }
 0x4f3   : > { %18611 = vmatmul.mubr.bf16.gmra.mrb[56].mxu1 %v12613_v57  ;;  %v12995_v57 = vsel %vm1300_vm2, %v12990_v59, %v12994_v29  ;;  %v19982_v59 = vld [vmem:[%s24289_s5 + $0xf8] sm:$0xff]   ;;  %v10986_v7 = vrot.slane %v10984_v46, 7 }
 0x4f4   : > { %18351 = vmatmul.mubr.bf16.gmra.mrb[52].mxu0 %v10704_v12  ;;  %18627 = vmatpush3.bf16.msra.mxu1 %v19971_v22  ;;  %v10735_v22 = vor.u32 %v10734_v32, %v10730_v8  ;;  %v19980_v12 = vld [vmem:[%s24289_s5 + $0xf0] sm:$0xff]   ;;  %v10747_v32 = vor.u32 %v10746_v16, %v10303_v10  ;;  %v13018_v10 = vrot.slane %v13016_v52, 1  ;;  %v23465_v16 = vld [vmem:[#allocation2 + $0x80] sm:$0xff] }
 0x4f5   : > { %18354 = vmatprep.mubr.bf16.mxu0 %v10716_v40  ;;  %18367 = vmatpush3.bf16.msra.mxu0 %v19972_v37  ;;  %v10960_v37 = vshrl.u32 %v23382_v15, 16  ;;  %v23431_v40 = vld [vmem:[#allocation2 + $0x128] sm:$0xff] }
 0x4f6   : > { %18614 = vmatprep.mubr.bf16.mxu1 %v12625_v63  ;;  %18628 = vmatprep.subr.bf16.mxu1 %v19973_v13  ;;  %v10740_v17 = vsel %vm1300_vm2, %v10735_v22, %v10739_v14  ;;  %v13009_v63 = vshrl.u32 %v23390_v36, 16  ;;  %v13035_v30 = vshll.u32 %v23431_v40, 16  ;;  %v13028_v22 = vshll.u32 %v12975_v44, 16  ;;  %v12977_v14 = vld [vmem:[#allocation2 + $0x130] sm:$0x1] }
 0x4f7   : > { %18368 = vmatprep.subr.bf16.mxu0 %v19974_v9  ;;  %v10962_v6 = vrot.slane %v10960_v37, 7  ;;  %v10752_v1 = vsel %vm1300_vm2, %v10747_v32, %v10751_v25  ;;  %v13033_v52 = vshrl.u32 %v23431_v40, 16  ;;  %v10947_v44 = vld [vmem:[#allocation2 + $0x78] sm:$0x80] }
 0x4f8   : > { %18629 = vmatpush3.bf16.msra.mxu1 %v19973_v13  ;;  %v19979_v13 = vld [vmem:[%s24289_s5 + $0xc0] sm:$0xff]   ;;  %v13014_v38 = vor.u32 %v13013_v51, %v13009_v63  ;;  %v13030_v39 = vrot.slane %v13028_v22, 1  ;;  %v10998_v22 = vrot.slane %v10706_v5, 7 }
 0x4f9   : > { %18369 = vmatpush3.bf16.msra.mxu0 %v19974_v9  ;;  %18630 = vmatprep.subr.bf16.mxu1 %v19975_v11  ;;  %v13002_v9 = vor.u32 %v13001_v41, %v12559_v0  ;;  %v10965_v61 = vor.u32 %v10963_v31, %v10962_v6  ;;  %v10941_v0 = vld [vmem:[#allocation2 + $0x30] sm:$0x80]  ;;  %v10987_v6 = vshll.u32 %v23423_v24, 16 }
 0x4fa   : > { %18370 = vmatprep.subr.bf16.mxu0 %v19976_v21  ;;  %v10968_v29 = vshrl.u32 %v10941_v0, 16  ;;  %v13019_v41 = vsel %vm1300_vm2, %v13014_v38, %v13018_v10  ;;  %v19985_v0 = vld [vmem:[%s24289_s5 + $0xd8] sm:$0xff]   ;;  %v13049_v38 = vrot.slane %v12610_v49, 1 }
 0x4fb   : > { %18615 = vmatmul.mubr.bf16.gmra.mrb[60].mxu1 %v12637_v33  ;;  %v13007_v42 = vsel %vm1300_vm2, %v13002_v9, %v13006_v26  ;;  %v10966_v33 = vsel %vm856_vm1, %v10958_v2, %v10965_v61  ;;  %v10989_v26 = vor.u32 %v10987_v6, %v10986_v7 }
 0x4fc   : > { %18355 = vmatmul.mubr.bf16.gmra.mrb[56].mxu0 %v10728_v3  ;;  %18631 = vmatpush3.bf16.msra.mxu1 %v19975_v11  ;;  %v10972_v11 = vshrl.u32 %v23415_v54, 16  ;;  %v13037_v3 = vrot.slane %v13035_v30, 1  ;;  %v13050_v7 = vor.u32 %v13049_v38, %v12607_v62  ;;  %v19990_v38 = vld [vmem:[%s24289_s5 + $0x118] sm:$0xff]  }
 0x4fd   : > { %18358 = vmatprep.mubr.bf16.mxu0 %v10740_v17  ;;  %18371 = vmatpush3.bf16.msra.mxu0 %v19976_v21  ;;  %v10943_v21 = vld [vmem:[#allocation2 + $0x48] sm:$0x80]  ;;  %v13026_v17 = vor.u32 %v13025_v47, %v12583_v60  ;;  %v11008_v60 = vshrl.u32 %v23465_v16, 16  ;;  %v10992_v47 = vshrl.u32 %v10945_v53, 16 }
 0x4fe   : > { %18634 = vmatprep.mubr.bf16.mxu1 %v12995_v57  ;;  %18632 = vmatprep.subr.bf16.mxu1 %v19977_v18  ;;  %v10974_v48 = vrot.slane %v10972_v11, 7  ;;  %v23473_v57 = vld [vmem:[#allocation2 + $0x158] sm:$0xff]  ;;  %v13038_v32 = vor.u32 %v13037_v3, %v13033_v52  ;;  %v23513_v3 = vld [vmem:[#allocation2 + $0xe0] sm:$0xff] }
 0x4ff   : > { %18372 = vmatprep.subr.bf16.mxu0 %v19978_v4  ;;  %v13059_v2 = vshll.u32 %v23473_v57, 16  ;;  %v13031_v61 = vsel %vm1300_vm2, %v13026_v17, %v13030_v39  ;;  %v11010_v49 = vrot.slane %v11008_v60, 7  ;;  %v13057_v17 = vshrl.u32 %v23473_v57, 16  ;;  %v12983_v39 = vld [vmem:[#allocation2 + $0x178] sm:$0x1] }
 0x500   : > { %18633 = vmatpush3.bf16.msra.mxu1 %v19977_v18  ;;  %v10980_v18 = vshrl.u32 %v10943_v21, 16  ;;  %v10977_v51 = vor.u32 %v10975_v45, %v10974_v48  ;;  %v12981_v21 = vld [vmem:[#allocation2 + $0x160] sm:$0x1] }
 0x501   : > { %18373 = vmatpush3.bf16.msra.mxu0 %v19978_v4  ;;  %18650 = vmatprep.subr.bf16.mxu1 %v19979_v13  ;;  %v13040_v4 = vshll.u32 %v12977_v14, 16  ;;  %v13061_v48 = vrot.slane %v13059_v2, 1  ;;  %v13064_v5 = vshll.u32 %v12981_v21, 16  ;;  %v11022_v21 = vrot.slane %v10730_v8, 7 }
 0x502   : > { %18374 = vmatprep.subr.bf16.mxu0 %v19980_v12  ;;  %v10982_v9 = vrot.slane %v10980_v18, 7  ;;  %v19988_v18 = vld [vmem:[%s24289_s5 + $0x110] sm:$0xff]  }
 0x503   : > { %18635 = vmatmul.mubr.bf16.vlgmr.msra.gmra.mrb[48].mxu1 %v13007_v42  ;;  %v13042_v25 = vrot.slane %v13040_v4, 1  ;;  %v10994_v4 = vrot.slane %v10992_v47, 7  ;;  %v23539_v47 = vld [vmem:[#allocation2 + $0xc8] sm:$0xff] }
 0x504   : > { %18359 = vmatmul.mubr.bf16.gmra.mrb[60].mxu0 %v10752_v1  ;;  %18651 = vmatpush3.bf16.msra.mxu1 %v19979_v13  ;;  %v10970_v13 = vrot.slane %v10968_v29, 7  ;;  %v10990_v14 = vsel %vm856_vm1, %v10982_v9, %v10989_v26  ;;  %v11004_v1 = vshrl.u32 %v10947_v44, 16  ;;  %v19987_v29 = vld [vmem:[%s24289_s5 + $0xe0] sm:$0xff]   ;;  %v13066_v9 = vrot.slane %v13064_v5, 1  ;;  %v10951_v26 = vld [vmem:[#allocation2 + $0xa8] sm:$0x80] }
 0x505   : > { %18375 = vmatpush3.bf16.msra.mxu0 %v19980_v12  ;;  %18378 = vmatprep.mubr.bf16.mxu0 %v10966_v33  ;;  %v12979_v12 = vld [vmem:[#allocation2 + $0x148] sm:$0x1]  ;;  %v23505_v33 = vld [vmem:[#allocation2 + $0xb0] sm:$0xff]  ;;  %v13076_v44 = vshll.u32 %v12983_v39, 16 }
 0x506   : > { %18638 = vmatprep.mubr.bf16.mxu1 %v13019_v41  ;;  %18652 = vmatprep.subr.bf16.mxu1 %v19981_v28  ;;  %v13052_v10 = vshll.u32 %v12979_v12, 16  ;;  %v10978_v42 = vsel %vm856_vm1, %v10970_v13, %v10977_v51  ;;  %v11006_v13 = vrot.slane %v11004_v1, 7  ;;  %v11032_v62 = vshrl.u32 %v23505_v33, 16  ;;  %v23553_v5 = vld [vmem:[#allocation2 + $0x110] sm:$0xff] }
 0x507   : > { %18376 = vmatprep.subr.bf16.mxu0 %v19982_v59  ;;  %v13062_v12 = vor.u32 %v13061_v48, %v13057_v17  ;;  %v11035_v48 = vshll.u32 %v23505_v33, 16 }
 0x508   : > { %18653 = vmatpush3.bf16.msra.mxu1 %v19981_v28  ;;  %v19986_v28 = vld [vmem:[%s24289_s5 + $0x108] sm:$0xff]   ;;  %v13054_v41 = vrot.slane %v13052_v10, 1  ;;  %v11016_v10 = vshrl.u32 %v10949_v50, 16  ;;  %v13310_v50 = vshrl.u32 %v23553_v5, 16 }
 0x509   : > { %18377 = vmatpush3.bf16.msra.mxu0 %v19982_v59  ;;  %18654 = vmatprep.subr.bf16.mxu1 %v19983_v23  ;;  %v13043_v59 = vsel %vm1300_vm2, %v13038_v32, %v13042_v25  ;;  %v19989_v32 = vld [vmem:[%s24289_s5 + $0xe8] sm:$0xff]   ;;  %v13073_v25 = vrot.slane %v12634_v27, 1  ;;  %v11034_v27 = vrot.slane %v11032_v62, 7 }
 0x50a   : > { %18394 = vmatprep.subr.bf16.mxu0 %v19984_v43  ;;  %v13055_v53 = vsel %vm1300_vm2, %v13050_v7, %v13054_v41  ;;  %v11025_v7 = vor.u32 %v11022_v21, %v10732_v20  ;;  %v13289_v41 = vshll.u32 %v23513_v3, 16 }
 0x50b   : > { %18639 = vmatmul.mubr.bf16.gmra.mrb[52].mxu1 %v13031_v61  ;;  %v13265_v61 = vld [vmem:[#allocation2 + $0xd8] sm:$0x80]  ;;  %v11037_v58 = vor.u32 %v11035_v48, %v11034_v27 }
 0x50c   : > { %18379 = vmatmul.mubr.bf16.vlgmr.msra.gmra.mrb[48].mxu0 %v10978_v42  ;;  %18655 = vmatpush3.bf16.msra.mxu1 %v19983_v23  ;;  %v11011_v23 = vshll.u32 %v23465_v16, 16  ;;  %v13282_v1 = vshrl.u32 %v13265_v61, 16 }
 0x50d   : > { %18382 = vmatprep.mubr.bf16.mxu0 %v10990_v14  ;;  %18395 = vmatpush3.bf16.msra.mxu0 %v19984_v43  ;;  %v11001_v43 = vor.u32 %v10998_v22, %v10708_v34  ;;  %v13286_v34 = vshrl.u32 %v23513_v3, 16  ;;  %v13067_v22 = vsel %vm1300_vm2, %v13062_v12, %v13066_v9  ;;  %v19991_v14 = vld [vmem:[%s24289_s5 + $0xf0] sm:$0xff]   ;;  %v19993_v12 = vld [vmem:[%s24289_s5 + $0xf8] sm:$0xff]  }
 0x50e   : > { %18642 = vmatprep.mubr.bf16.mxu1 %v13043_v59  ;;  %18656 = vmatprep.subr.bf16.mxu1 %v19985_v0  ;;  %v11013_v51 = vor.u32 %v11011_v23, %v11010_v49  ;;  %v19992_v49 = vld [vmem:[%s24289_s5 + $0x120] sm:$0xff]   ;;  %v13074_v59 = vor.u32 %v13073_v25, %v12631_v56  ;;  %v19994_v25 = vld [vmem:[%s24289_s5 + $0x128] sm:$0xff]  }
 0x50f   : > { %18396 = vmatprep.subr.bf16.mxu0 %v19986_v28  ;;  %v13288_v8 = vrot.slane %v13286_v34, 7  ;;  %v10953_v56 = vld [vmem:[#allocation2 + $0xc0] sm:$0x80] }
 0x510   : > { %18657 = vmatpush3.bf16.msra.mxu1 %v19985_v0  ;;  %v11002_v0 = vsel %vm856_vm1, %v10994_v4, %v11001_v43  ;;  %v11014_v42 = vsel %vm856_vm1, %v11006_v13, %v11013_v51  ;;  %v11044_v4 = vshrl.u32 %v23539_v47, 16  ;;  %v13267_v43 = vld [vmem:[#allocation2 + $0xf0] sm:$0x80]  ;;  %v13284_v13 = vrot.slane %v13282_v1, 7 }
 0x511   : > { %18397 = vmatpush3.bf16.msra.mxu0 %v19986_v28  ;;  %18658 = vmatprep.subr.bf16.mxu1 %v19987_v29  ;;  %v11028_v28 = vshrl.u32 %v10951_v26, 16  ;;  %v13291_v51 = vor.u32 %v13289_v41, %v13288_v8  ;;  %v13294_v9 = vshrl.u32 %v13267_v43, 16  ;;  %v13300_v26 = vrot.slane %v13009_v63, 7  ;;  %v19997_v43 = vld [vmem:[%s24289_s5 + $0x108] sm:$0xff]  }
 0x512   : > { %18398 = vmatprep.subr.bf16.mxu0 %v19988_v18  ;;  %v11046_v61 = vrot.slane %v11044_v4, 7 }
 0x513   : > { %18643 = vmatmul.mubr.bf16.gmra.mrb[56].mxu1 %v13055_v53  ;;  %v11030_v39 = vrot.slane %v11028_v28, 7  ;;  %v13269_v53 = vld [vmem:[#allocation2 + $0x108] sm:$0x80]  ;;  %v13292_v63 = vsel %vm856_vm1, %v13284_v13, %v13291_v51  ;;  %v19996_v28 = vld [vmem:[%s24289_s5 + $0x130] sm:$0xff]   ;;  %v13296_v27 = vrot.slane %v13294_v9, 7  ;;  %v19998_v51 = vld [vmem:[%s24289_s5 + $0x138] sm:$0xff]  }
 0x514   : > { %18383 = vmatmul.mubr.bf16.gmra.mrb[52].mxu0 %v11002_v0  ;;  %18659 = vmatpush3.bf16.msra.mxu1 %v19987_v29  ;;  %v13078_v29 = vrot.slane %v13076_v44, 1  ;;  %v11040_v44 = vshrl.u32 %v10953_v56, 16  ;;  %v13306_v21 = vshrl.u32 %v13269_v53, 16  ;;  %v13273_v56 = vld [vmem:[#allocation2 + $0x138] sm:$0x80] }
 0x515   : > { %18386 = vmatprep.mubr.bf16.mxu0 %v11014_v42  ;;  %18399 = vmatpush3.bf16.msra.mxu0 %v19988_v18  ;;  %v11018_v18 = vrot.slane %v11016_v10, 7  ;;  %v11038_v0 = vsel %vm856_vm1, %v11030_v39, %v11037_v58  ;;  %v11047_v10 = vshll.u32 %v23539_v47, 16  ;;  %v13312_v42 = vrot.slane %v13310_v50, 7 }
 0x516   : > { %18646 = vmatprep.mubr.bf16.mxu1 %v13067_v22  ;;  %18660 = vmatprep.subr.bf16.mxu1 %v19989_v32  ;;  %v13079_v20 = vsel %vm1300_vm2, %v13074_v59, %v13078_v29  ;;  %v13303_v22 = vor.u32 %v13300_v26, %v13011_v35  ;;  %v11042_v1 = vrot.slane %v11040_v44, 7  ;;  %v13271_v59 = vld [vmem:[#allocation2 + $0x120] sm:$0x80]  ;;  %v13308_v29 = vrot.slane %v13306_v21, 7 }
 0x517   : > { %18400 = vmatprep.subr.bf16.mxu0 %v19990_v38  ;;  %v11049_v8 = vor.u32 %v11047_v10, %v11046_v61  ;;  %v13318_v39 = vshrl.u32 %v13271_v59, 16  ;;  %v13324_v58 = vrot.slane %v13033_v52, 7  ;;  %v13330_v52 = vshrl.u32 %v13273_v56, 16  ;;  %v20000_v26 = vld [vmem:[%s24289_s5 + $0x140] sm:$0xff]   ;;  %v13275_v61 = vld [vmem:[#allocation2 + $0x150] sm:$0x80] }
 0x518   : > { %18661 = vmatpush3.bf16.msra.mxu1 %v19989_v32  ;;  %v11026_v32 = vsel %vm856_vm1, %v11018_v18, %v11025_v7  ;;  %v13304_v35 = vsel %vm856_vm1, %v13296_v27, %v13303_v22  ;;  %v13277_v27 = vld [vmem:[#allocation2 + $0x168] sm:$0x80]  ;;  %v13279_v56 = vld [vmem:[#allocation2 + $0x180] sm:$0x80] }
 0x519   : > { %18401 = vmatpush3.bf16.msra.mxu0 %v19990_v38  ;;  %18662 = vmatprep.subr.bf16.mxu1 %v19991_v14  ;;  %v19995_v38 = vld [vmem:[%s24289_s5 + $0x100] sm:$0xff]   ;;  %v11050_v13 = vsel %vm856_vm1, %v11042_v1, %v11049_v8  ;;  %v13320_v53 = vrot.slane %v13318_v39, 7  ;;  %v20002_v22 = vld [vmem:[%s24289_s5 + $0x148] sm:$0xff]   ;;  %v13354_v59 = vshrl.u32 %v13277_v27, 16 }
 0x51a   : > { %18402 = vmatprep.subr.bf16.mxu0 %v19992_v49  ;;  %v23634_v1 = vld [vmem:[#allocation2 + $0x188] sm:$0xff] }
 0x51b   : > { %18647 = vmatmul.mubr.bf16.gmra.mrb[60].mxu1 %v13079_v20  ;;  %v13370_v39 = vshrl.u32 %v23634_v1, 16 }
 0x51c   : > { %18387 = vmatmul.mubr.bf16.gmra.mrb[56].mxu0 %v11026_v32  ;;  %18663 = vmatpush3.bf16.msra.mxu1 %v19991_v14  ;;  %v23589_v14 = vld [vmem:[#allocation2 + $0x140] sm:$0xff]  ;;  %v13327_v32 = vor.u32 %v13324_v58, %v13035_v30  ;;  %v20001_v30 = vld [vmem:[%s24289_s5 + $0x118] sm:$0xff]  }
 0x51d   : > { %18390 = vmatprep.mubr.bf16.mxu0 %v11038_v0  ;;  %18403 = vmatpush3.bf16.msra.mxu0 %v19992_v49  ;;  %v13313_v49 = vshll.u32 %v23553_v5, 16  ;;  %v13334_v7 = vshrl.u32 %v23589_v14, 16  ;;  %v13337_v44 = vshll.u32 %v23589_v14, 16  ;;  %v13332_v0 = vrot.slane %v13330_v52, 7 }
 0x51e   : > { %18666 = vmatprep.mubr.bf16.mxu1 %v13292_v63  ;;  %18664 = vmatprep.subr.bf16.mxu1 %v19993_v12  ;;  %v13328_v21 = vsel %vm856_vm1, %v13320_v53, %v13327_v32  ;;  %v13372_v52 = vrot.slane %v13370_v39, 7  ;;  %v20007_v32 = vld [vmem:[%s24289_s5 + $0x130] sm:$0xff]  }
 0x51f   : > { %18404 = vmatprep.subr.bf16.mxu0 %v19994_v25  ;;  %v13315_v18 = vor.u32 %v13313_v49, %v13312_v42  ;;  %v13336_v9 = vrot.slane %v13334_v7, 7  ;;  %v13342_v42 = vshrl.u32 %v13275_v61, 16  ;;  %v20008_v61 = vld [vmem:[%s24289_s5 + $0x160] sm:$0xff]  }
 0x520   : > { %18665 = vmatpush3.bf16.msra.mxu1 %v19993_v12  ;;  %v19999_v12 = vld [vmem:[%s24289_s5 + $0x110] sm:$0xff]  }
 0x521   : > { %18405 = vmatpush3.bf16.msra.mxu0 %v19994_v25  ;;  %18682 = vmatprep.subr.bf16.mxu1 %v19995_v38  ;;  %v13316_v20 = vsel %vm856_vm1, %v13308_v29, %v13315_v18  ;;  %v23619_v25 = vld [vmem:[#allocation2 + $0x170] sm:$0xff]  ;;  %v13339_v63 = vor.u32 %v13337_v44, %v13336_v9  ;;  %v20006_v9 = vld [vmem:[%s24289_s5 + $0x158] sm:$0xff]  }
 0x522   : > { %18406 = vmatprep.subr.bf16.mxu0 %v19996_v28  ;;  %v20004_v18 = vld [vmem:[%s24289_s5 + $0x150] sm:$0xff]   ;;  %v13361_v58 = vshll.u32 %v23619_v25, 16 }
 0x523   : > { %18667 = vmatmul.mubr.bf16.vlgmr.msra.gmra.mrb[48].mxu1 %v13304_v35  ;;  %v13340_v8 = vsel %vm856_vm1, %v13332_v0, %v13339_v63  ;;  %v13344_v35 = vrot.slane %v13342_v42, 7  ;;  %v11416_v63 = vld [vmem:[#allocation2 + $0x28] sm:$0x1] }
 0x524   : > { %18391 = vmatmul.mubr.bf16.gmra.mrb[60].mxu0 %v11050_v13  ;;  %18683 = vmatpush3.bf16.msra.mxu1 %v19995_v38  ;;  %v13358_v38 = vshrl.u32 %v23619_v25, 16  ;;  %v13356_v13 = vrot.slane %v13354_v59, 7  ;;  %v20010_v42 = vld [vmem:[%s24289_s5 + $0x168] sm:$0xff]   ;;  %v11439_v27 = vshll.u32 %v11416_v63, 16  ;;  %v11420_v59 = vld [vmem:[#allocation2 + $0x58] sm:$0x1] }
 0x525   : > { %18407 = vmatpush3.bf16.msra.mxu0 %v19996_v28  ;;  %18410 = vmatprep.mubr.bf16.mxu0 %v23382_v15  ;;  %v13348_v28 = vrot.slane %v13057_v17, 7  ;;  %v20003_v17 = vld [vmem:[%s24289_s5 + $0x120] sm:$0xff]   ;;  %v11448_v15 = vrot.slane %v10975_v45, 1 }
 0x526   : > { %18670 = vmatprep.mubr.bf16.mxu1 %v13316_v20  ;;  %18684 = vmatprep.subr.bf16.mxu1 %v19997_v43  ;;  %v13360_v29 = vrot.slane %v13358_v38, 7  ;;  %v20016_v45 = vld [vmem:[%s24289_s5 + $0x180] sm:$0xff]  }
 0x527   : > { %18408 = vmatprep.subr.bf16.mxu0 %v19998_v51 }
 0x528   : > { %18685 = vmatpush3.bf16.msra.mxu1 %v19997_v43  ;;  %v13351_v43 = vor.u32 %v13348_v28, %v13059_v2  ;;  %v20005_v2 = vld [vmem:[%s24289_s5 + $0x128] sm:$0xff]   ;;  %v11436_v28 = vrot.slane %v10963_v31, 1  ;;  %v11441_v31 = vrot.slane %v11439_v27, 1 }
 0x529   : > { %18409 = vmatpush3.bf16.msra.mxu0 %v19998_v51  ;;  %18686 = vmatprep.subr.bf16.mxu1 %v19999_v12  ;;  %v13363_v51 = vor.u32 %v13361_v58, %v13360_v29  ;;  %v20013_v29 = vld [vmem:[%s24289_s5 + $0x148] sm:$0xff]  }
 0x52a   : > { %18426 = vmatprep.subr.bf16.mxu0 %v20000_v26  ;;  %v13352_v20 = vsel %vm856_vm1, %v13344_v35, %v13351_v43  ;;  %v11460_v43 = vrot.slane %v10987_v6, 1  ;;  %v11449_v6 = vor.u32 %v11448_v15, %v10972_v11  ;;  %v20018_v11 = vld [vmem:[%s24289_s5 + $0x188] sm:$0xff]   ;;  %v11508_v15 = vrot.slane %v11035_v48, 1  ;;  %v20024_v48 = vld [vmem:[%s24289_s5 + $0x1a0] sm:$0xff]  }
 0x52b   : > { %18671 = vmatmul.mubr.bf16.gmra.mrb[52].mxu1 %v13328_v21  ;;  %v13364_v53 = vsel %vm856_vm1, %v13356_v13, %v13363_v51  ;;  %v23707_v13 = vld [vmem:[#allocation2 + $0x68] sm:$0xff] }
 0x52c   : > { %18411 = vmatmul.mubr.bf16.vlgmr.msra.gmra.mrb[48].mxu0 %v23415_v54  ;;  %18687 = vmatpush3.bf16.msra.mxu1 %v19999_v12  ;;  %v13366_v12 = vshrl.u32 %v13279_v56, 16  ;;  %v11463_v56 = vshll.u32 %v11420_v59, 16  ;;  %v11468_v63 = vshrl.u32 %v23707_v13, 16 }
 0x52d   : > { %18414 = vmatprep.mubr.bf16.mxu0 %v23423_v24  ;;  %18427 = vmatpush3.bf16.msra.mxu0 %v20000_v26  ;;  %v13373_v26 = vshll.u32 %v23634_v1, 16 }
 0x52e   : > { %18674 = vmatprep.mubr.bf16.mxu1 %v13340_v8  ;;  %18688 = vmatprep.subr.bf16.mxu1 %v20001_v30  ;;  %v13368_v0 = vrot.slane %v13366_v12, 7  ;;  %v20012_v8 = vld [vmem:[%s24289_s5 + $0x170] sm:$0xff]   ;;  %v11465_v12 = vrot.slane %v11463_v56, 1 }
 0x52f   : > { %18428 = vmatprep.subr.bf16.mxu0 %v20002_v22 }
 0x530   : > { %18689 = vmatpush3.bf16.msra.mxu1 %v20001_v30  ;;  %v20009_v30 = vld [vmem:[%s24289_s5 + $0x138] sm:$0xff]  }
 0x531   : > { %18429 = vmatpush3.bf16.msra.mxu0 %v20002_v22  ;;  %18690 = vmatprep.subr.bf16.mxu1 %v20003_v17  ;;  %v20011_v22 = vld [vmem:[%s24289_s5 + $0x140] sm:$0xff]  }
 0x532   : > { %18430 = vmatprep.subr.bf16.mxu0 %v20004_v18 }
 0x533   : > { %18675 = vmatmul.mubr.bf16.gmra.mrb[56].mxu1 %v13352_v20  ;;  %v11470_v20 = vshll.u32 %v23707_v13, 16 }
 0x534   : > { %18415 = vmatmul.mubr.bf16.gmra.mrb[52].mxu0 %v23310_v55  ;;  %18691 = vmatpush3.bf16.msra.mxu1 %v20003_v17  ;;  %v13375_v55 = vor.u32 %v13373_v26, %v13372_v52  ;;  %v11418_v17 = vld [vmem:[#allocation2 + $0x40] sm:$0x1]  ;;  %v11422_v52 = vld [vmem:[#allocation2 + $0x70] sm:$0x1] }
 0x535   : > { %18418 = vmatprep.mubr.bf16.mxu0 %v23465_v16  ;;  %18431 = vmatpush3.bf16.msra.mxu0 %v20004_v18  ;;  %v20014_v18 = vld [vmem:[%s24289_s5 + $0x178] sm:$0xff]   ;;  %v11472_v24 = vrot.slane %v11470_v20, 1 }
 0x536   : > { %18678 = vmatprep.mubr.bf16.mxu1 %v13364_v53  ;;  %18692 = vmatprep.subr.bf16.mxu1 %v20005_v2  ;;  %v13376_v21 = vsel %vm856_vm1, %v13368_v0, %v13375_v55  ;;  %v20017_v53 = vld [vmem:[%s24289_s5 + $0x158] sm:$0xff]  }
 0x537   : > { %18432 = vmatprep.subr.bf16.mxu0 %v20006_v9  ;;  %v23734_v55 = vld [vmem:[#allocation2 + $0x98] sm:$0xff] }
 0x538   : > { %18693 = vmatpush3.bf16.msra.mxu1 %v20005_v2  ;;  %v11461_v2 = vor.u32 %v11460_v43, %v10984_v46  ;;  %v11475_v46 = vshll.u32 %v11422_v52, 16  ;;  %v20022_v16 = vld [vmem:[%s24289_s5 + $0x198] sm:$0xff]   ;;  %v13760_v43 = vrot.slane %v13289_v41, 1  ;;  %v11509_v41 = vor.u32 %v11508_v15, %v11032_v62  ;;  %v11430_v52 = vld [vmem:[#allocation2 + $0xd0] sm:$0x1] }
 0x539   : > { %18433 = vmatpush3.bf16.msra.mxu0 %v20006_v9  ;;  %18694 = vmatprep.subr.bf16.mxu1 %v20007_v32  ;;  %v11424_v9 = vld [vmem:[#allocation2 + $0x88] sm:$0x1]  ;;  %v13746_v15 = vld [vmem:[#allocation2 + $0x130] sm:$0x1] }
 0x53a   : > { %18434 = vmatprep.subr.bf16.mxu0 %v20008_v61  ;;  %v11487_v0 = vshll.u32 %v11424_v9, 16 }
 0x53b   : > { %18679 = vmatmul.mubr.bf16.gmra.mrb[60].mxu1 %v13376_v21  ;;  %v20020_v21 = vld [vmem:[%s24289_s5 + $0x190] sm:$0xff]  }
 0x53c   : > { %18419 = vmatmul.mubr.bf16.gmra.mrb[56].mxu0 %v23345_v19  ;;  %18695 = vmatpush3.bf16.msra.mxu1 %v20007_v32  ;;  %v11437_v19 = vor.u32 %v11436_v28, %v10960_v37  ;;  %v11451_v37 = vshll.u32 %v11418_v17, 16  ;;  %v11466_v32 = vsel %vm1300_vm2, %v11461_v2, %v11465_v12  ;;  %v11489_v27 = vrot.slane %v11487_v0, 1  ;;  %v13742_v2 = vld [vmem:[#allocation2 + $0x100] sm:$0x1]  ;;  %v23796_v0 = vld [vmem:[#allocation2 + $0x128] sm:$0xff] }
 0x53d   : > { %18422 = vmatprep.mubr.bf16.mxu0 %v23505_v33  ;;  %18435 = vmatpush3.bf16.msra.mxu0 %v20008_v61  ;;  %v11484_v61 = vrot.slane %v11011_v23, 1  ;;  %v11473_v23 = vor.u32 %v11472_v24, %v11468_v63  ;;  %v20025_v24 = vld [vmem:[%s24289_s5 + $0x178] sm:$0xff]   ;;  %v13775_v62 = vshll.u32 %v13742_v2, 16  ;;  %v13799_v2 = vshll.u32 %v13746_v15, 16 }
 0x53e   : > { %18698 = vmatprep.mubr.bf16.mxu1 %v23513_v3  ;;  %18696 = vmatprep.subr.bf16.mxu1 %v20009_v30  ;;  %v11442_v35 = vsel %vm1300_vm2, %v11437_v19, %v11441_v31  ;;  %v11453_v51 = vrot.slane %v11451_v37, 1  ;;  %v20021_v19 = vld [vmem:[%s24289_s5 + $0x168] sm:$0xff]  }
 0x53f   : > { %18436 = vmatprep.subr.bf16.mxu0 %v20010_v42  ;;  %v11485_v28 = vor.u32 %v11484_v61, %v11008_v60  ;;  %v13740_v31 = vld [vmem:[#allocation2 + $0xe8] sm:$0x1]  ;;  %v11523_v61 = vshll.u32 %v11430_v52, 16 }
 0x540   : > { %18697 = vmatpush3.bf16.msra.mxu1 %v20009_v30  ;;  %v11454_v54 = vsel %vm1300_vm2, %v11449_v6, %v11453_v51  ;;  %v11477_v30 = vrot.slane %v11475_v46, 1  ;;  %v13763_v56 = vshll.u32 %v13740_v31, 16  ;;  %v13744_v46 = vld [vmem:[#allocation2 + $0x118] sm:$0x1]  ;;  %v20026_v3 = vld [vmem:[%s24289_s5 + $0x1a8] sm:$0xff]  }
 0x541   : > { %18437 = vmatpush3.bf16.msra.mxu0 %v20010_v42  ;;  %18714 = vmatprep.subr.bf16.mxu1 %v20011_v22  ;;  %v11494_v42 = vshll.u32 %v23734_v55, 16 }
 0x542   : > { %18438 = vmatprep.subr.bf16.mxu0 %v20012_v8  ;;  %v11478_v17 = vsel %vm1300_vm2, %v11473_v23, %v11477_v30 }
 0x543   : > { %18699 = vmatmul.mubr.bf16.vlgmr.msra.gmra.mrb[48].mxu1 %v23390_v36  ;;  %v20015_v36 = vld [vmem:[%s24289_s5 + $0x150] sm:$0xff]   ;;  %v11496_v60 = vrot.slane %v11494_v42, 1 }
 0x544   : > { %18423 = vmatmul.mubr.bf16.gmra.mrb[60].mxu0 %v23539_v47  ;;  %18715 = vmatpush3.bf16.msra.mxu1 %v20011_v22  ;;  %v11426_v22 = vld [vmem:[#allocation2 + $0xa0] sm:$0x1] }
 0x545   : > { %18439 = vmatpush3.bf16.msra.mxu0 %v20012_v8  ;;  %18442 = vmatprep.mubr.bf16.mxu0 %v11442_v35  ;;  %v11428_v8 = vld [vmem:[#allocation2 + $0xb8] sm:$0x1]  ;;  %v11499_v59 = vshll.u32 %v11426_v22, 16  ;;  %v11492_v35 = vshrl.u32 %v23734_v55, 16  ;;  %v13784_v22 = vrot.slane %v13313_v49, 1  ;;  %v11525_v49 = vrot.slane %v11523_v61, 1 }
 0x546   : > { %18702 = vmatprep.mubr.bf16.mxu1 %v23553_v5  ;;  %18716 = vmatprep.subr.bf16.mxu1 %v20013_v29  ;;  %v11511_v37 = vshll.u32 %v11428_v8, 16  ;;  %v13787_v8 = vshll.u32 %v13744_v46, 16  ;;  %v20030_v5 = vld [vmem:[%s24289_s5 + $0x1b8] sm:$0xff]  }
 0x547   : > { %18440 = vmatprep.subr.bf16.mxu0 %v20014_v18  ;;  %v11497_v6 = vor.u32 %v11496_v60, %v11492_v35  ;;  %v11501_v51 = vrot.slane %v11499_v59, 1  ;;  %v13794_v60 = vshll.u32 %v23796_v0, 16 }
 0x548   : > { %18717 = vmatpush3.bf16.msra.mxu1 %v20013_v29  ;;  %v23759_v29 = vld [vmem:[#allocation2 + $0xf8] sm:$0xff]  ;;  %v11513_v12 = vrot.slane %v11511_v37, 1 }
 0x549   : > { %18441 = vmatpush3.bf16.msra.mxu0 %v20014_v18  ;;  %18718 = vmatprep.subr.bf16.mxu1 %v20015_v36  ;;  %v11490_v18 = vsel %vm1300_vm2, %v11485_v28, %v11489_v27  ;;  %v23802_v28 = vld [vmem:[#allocation2 + $0x50] sm:$0xff] }
 0x54a   : > { %18458 = vmatprep.subr.bf16.mxu0 %v20016_v45 }
 0x54b   : > { %18703 = vmatmul.mubr.bf16.gmra.mrb[52].mxu1 %v23431_v40  ;;  %v20019_v40 = vld [vmem:[%s24289_s5 + $0x160] sm:$0xff]  }
 0x54c   : > { %18443 = vmatmul.mubr.bf16.vlgmr.msra.gmra.mrb[48].mxu0 %v11454_v54  ;;  %18719 = vmatpush3.bf16.msra.mxu1 %v20015_v36  ;;  %v23770_v36 = vld [vmem:[#allocation2 + $0x38] sm:$0xff]  ;;  %v13765_v54 = vrot.slane %v13763_v56, 1  ;;  %v13785_v56 = vor.u32 %v13784_v22, %v13310_v50  ;;  %v13750_v22 = vld [vmem:[#allocation2 + $0x160] sm:$0x1] }
 0x54d   : > { %18446 = vmatprep.mubr.bf16.mxu0 %v11466_v32  ;;  %18459 = vmatpush3.bf16.msra.mxu0 %v20016_v45  ;;  %v13770_v45 = vshll.u32 %v23759_v29, 16  ;;  %v11734_v9 = vshrl.u32 %v23770_v36, 16  ;;  %v11502_v32 = vsel %vm1300_vm2, %v11497_v6, %v11501_v51  ;;  %v11717_v6 = vld [vmem:[#allocation2 + $0x60] sm:$0x80]  ;;  %v13796_v51 = vrot.slane %v13794_v60, 1 }
 0x54e   : > { %18706 = vmatprep.mubr.bf16.mxu1 %v23589_v14  ;;  %18720 = vmatprep.subr.bf16.mxu1 %v20017_v53  ;;  %v20034_v14 = vld [vmem:[%s24289_s5 + $0x1c8] sm:$0xff]  }
 0x54f   : > { %18460 = vmatprep.subr.bf16.mxu0 %v20018_v11  ;;  %v13772_v33 = vrot.slane %v13770_v45, 1  ;;  %v11736_v30 = vrot.slane %v11734_v9, 7 }
 0x550   : > { %18721 = vmatpush3.bf16.msra.mxu1 %v20017_v53  ;;  %v13761_v53 = vor.u32 %v13760_v43, %v13286_v34  ;;  %v11520_v34 = vrot.slane %v11047_v10, 1  ;;  %v20027_v10 = vld [vmem:[%s24289_s5 + $0x180] sm:$0xff]   ;;  %v11715_v43 = vld [vmem:[#allocation2 + $0x48] sm:$0x80] }
 0x551   : > { %18461 = vmatpush3.bf16.msra.mxu0 %v20018_v11  ;;  %18722 = vmatprep.subr.bf16.mxu1 %v20019_v40  ;;  %v11713_v11 = vld [vmem:[#allocation2 + $0x30] sm:$0x80]  ;;  %v11742_v50 = vshrl.u32 %v11715_v43, 16  ;;  %v13752_v43 = vld [vmem:[#allocation2 + $0x178] sm:$0x1] }
 0x552   : > { %18462 = vmatprep.subr.bf16.mxu0 %v20020_v21  ;;  %v11730_v23 = vshrl.u32 %v11713_v11, 16  ;;  %v13766_v27 = vsel %vm1300_vm2, %v13761_v53, %v13765_v54  ;;  %v11521_v59 = vor.u32 %v11520_v34, %v11044_v4  ;;  %v20029_v4 = vld [vmem:[%s24289_s5 + $0x188] sm:$0xff]   ;;  %v23836_v53 = vld [vmem:[#allocation2 + $0x158] sm:$0xff]  ;;  %v13792_v11 = vshrl.u32 %v23796_v0, 16 }
 0x553   : > { %18707 = vmatmul.mubr.bf16.gmra.mrb[56].mxu1 %v23473_v57  ;;  %v20023_v57 = vld [vmem:[%s24289_s5 + $0x170] sm:$0xff]   ;;  %v13808_v34 = vrot.slane %v13337_v44, 1 }
 0x554   : > { %18447 = vmatmul.mubr.bf16.gmra.mrb[52].mxu0 %v11478_v17  ;;  %18723 = vmatpush3.bf16.msra.mxu1 %v20019_v40  ;;  %v11514_v40 = vsel %vm1300_vm2, %v11509_v41, %v11513_v12  ;;  %v13777_v17 = vrot.slane %v13775_v62, 1  ;;  %v11732_v37 = vrot.slane %v11730_v23, 7  ;;  %v13748_v41 = vld [vmem:[#allocation2 + $0x148] sm:$0x1]  ;;  %v11526_v12 = vsel %vm1300_vm2, %v11521_v59, %v11525_v49  ;;  %v23842_v62 = vld [vmem:[#allocation2 + $0x80] sm:$0xff] }
 0x555   : > { %18450 = vmatprep.mubr.bf16.mxu0 %v11490_v18  ;;  %18463 = vmatpush3.bf16.msra.mxu0 %v20020_v21  ;;  %v13768_v21 = vshrl.u32 %v23759_v29, 16  ;;  %v11746_v18 = vshrl.u32 %v23802_v28, 16  ;;  %v13811_v61 = vshll.u32 %v13748_v41, 16  ;;  %v13801_v23 = vrot.slane %v13799_v2, 1  ;;  %v11721_v49 = vld [vmem:[#allocation2 + $0x90] sm:$0x80] }
 0x556   : > { %18710 = vmatprep.mubr.bf16.mxu1 %v23619_v25  ;;  %18724 = vmatprep.subr.bf16.mxu1 %v20021_v19  ;;  %v11770_v44 = vshrl.u32 %v23842_v62, 16  ;;  %v23883_v2 = vld [vmem:[#allocation2 + $0xb0] sm:$0xff]  ;;  %v20038_v25 = vld [vmem:[%s24289_s5 + $0x1d8] sm:$0xff]  }
 0x557   : > { %18464 = vmatprep.subr.bf16.mxu0 %v20022_v16  ;;  %v13773_v31 = vor.u32 %v13772_v33, %v13768_v21  ;;  %v11748_v52 = vrot.slane %v11746_v18, 7  ;;  %v11760_v33 = vrot.slane %v11468_v63, 7  ;;  %v20032_v63 = vld [vmem:[%s24289_s5 + $0x1c0] sm:$0xff]   ;;  %v13813_v59 = vrot.slane %v13811_v61, 1 }
 0x558   : > { %18725 = vmatpush3.bf16.msra.mxu1 %v20021_v19  ;;  %v20028_v19 = vld [vmem:[%s24289_s5 + $0x1b0] sm:$0xff]  }
 0x559   : > { %18465 = vmatpush3.bf16.msra.mxu0 %v20022_v16  ;;  %18726 = vmatprep.subr.bf16.mxu1 %v20023_v57  ;;  %v11737_v16 = vshll.u32 %v23770_v36, 16  ;;  %v13778_v47 = vsel %vm1300_vm2, %v13773_v31, %v13777_v17  ;;  %v11719_v31 = vld [vmem:[#allocation2 + $0x78] sm:$0x80]  ;;  %v13809_v17 = vor.u32 %v13808_v34, %v13334_v7  ;;  %v13754_v34 = vld [vmem:[#allocation2 + $0x190] sm:$0x1] }
 0x55a   : > { %18466 = vmatprep.subr.bf16.mxu0 %v20024_v48  ;;  %v11766_v7 = vshrl.u32 %v11719_v31, 16  ;;  %v20037_v31 = vld [vmem:[%s24289_s5 + $0x1a8] sm:$0xff]  }
 0x55b   : > { %18711 = vmatmul.mubr.bf16.gmra.mrb[60].mxu1 %v23634_v1  ;;  %v13814_v41 = vsel %vm1300_vm2, %v13809_v17, %v13813_v59  ;;  %v13847_v17 = vshll.u32 %v13754_v34, 16  ;;  %v14036_v59 = vld [vmem:[#allocation2 + $0xf0] sm:$0x80]  ;;  %v11727_v1 = vld [vmem:[#allocation2 + $0xd8] sm:$0x80] }
 0x55c   : > { %18451 = vmatmul.mubr.bf16.gmra.mrb[56].mxu0 %v11502_v32  ;;  %18727 = vmatpush3.bf16.msra.mxu1 %v20023_v57  ;;  %v11739_v57 = vor.u32 %v11737_v16, %v11736_v30  ;;  %v20031_v32 = vld [vmem:[%s24289_s5 + $0x190] sm:$0xff]   ;;  %v13818_v30 = vshll.u32 %v23836_v53, 16 }
 0x55d   : > { %18454 = vmatprep.mubr.bf16.mxu0 %v11514_v40  ;;  %18467 = vmatpush3.bf16.msra.mxu0 %v20024_v48  ;;  %v13789_v48 = vrot.slane %v13787_v8, 1  ;;  %v23856_v40 = vor.u32 %v13796_v51, %v13792_v11  ;;  %v11784_v51 = vrot.slane %v11492_v35, 7  ;;  %v20036_v35 = vld [vmem:[%s24289_s5 + $0x1d0] sm:$0xff]  }
 0x55e   : > { %18730 = vmatprep.mubr.bf16.mxu1 %v13766_v27  ;;  %18728 = vmatprep.subr.bf16.mxu1 %v20025_v24  ;;  %v11740_v54 = vsel %vm856_vm1, %v11732_v37, %v11739_v57  ;;  %v11744_v27 = vrot.slane %v11742_v50, 7  ;;  %v20033_v37 = vld [vmem:[%s24289_s5 + $0x198] sm:$0xff]   ;;  %v13820_v57 = vrot.slane %v13818_v30, 1  ;;  %v13832_v50 = vrot.slane %v13361_v58, 1 }
 0x55f   : > { %18468 = vmatprep.subr.bf16.mxu0 %v20026_v3  ;;  %v13790_v46 = vsel %vm1300_vm2, %v13785_v56, %v13789_v48  ;;  %v13802_v15 = vsel %vm1300_vm2, %v23856_v40, %v13801_v23  ;;  %v11772_v48 = vrot.slane %v11770_v44, 7  ;;  %v11794_v58 = vshrl.u32 %v23883_v2, 16  ;;  %v11723_v23 = vld [vmem:[#allocation2 + $0xa8] sm:$0x80] }
 0x560   : > { %18729 = vmatpush3.bf16.msra.mxu1 %v20025_v24  ;;  %v11754_v24 = vshrl.u32 %v11717_v6, 16 }
 0x561   : > { %18469 = vmatpush3.bf16.msra.mxu0 %v20026_v3  ;;  %18746 = vmatprep.subr.bf16.mxu1 %v20027_v10  ;;  %v11749_v3 = vshll.u32 %v23802_v28, 16 }
 0x562   : > { %18470 = vmatprep.subr.bf16.mxu0 %v20028_v19  ;;  %v11756_v8 = vrot.slane %v11754_v24, 7 }
 0x563   : > { %18731 = vmatmul.mubr.bf16.vlgmr.msra.gmra.mrb[48].mxu1 %v13778_v47  ;;  %v13816_v47 = vshrl.u32 %v23836_v53, 16 }
 0x564   : > { %18455 = vmatmul.mubr.bf16.gmra.mrb[60].mxu0 %v11526_v12  ;;  %18747 = vmatpush3.bf16.msra.mxu1 %v20027_v10  ;;  %v11751_v10 = vor.u32 %v11749_v3, %v11748_v52  ;;  %v20035_v12 = vld [vmem:[%s24289_s5 + $0x1a0] sm:$0xff]   ;;  %v13835_v52 = vshll.u32 %v13752_v43, 16 }
 0x565   : > { %18471 = vmatpush3.bf16.msra.mxu0 %v20028_v19  ;;  %18474 = vmatprep.mubr.bf16.mxu0 %v11740_v54  ;;  %v11763_v19 = vor.u32 %v11760_v33, %v11470_v20  ;;  %v13823_v20 = vshll.u32 %v13750_v22, 16  ;;  %v23892_v54 = vld [vmem:[#allocation2 + $0xc8] sm:$0xff]  ;;  %v23899_v24 = vor.u32 %v13820_v57, %v13816_v47  ;;  %v23927_v43 = vld [vmem:[#allocation2 + $0xe0] sm:$0xff] }
 0x566   : > { %18734 = vmatprep.mubr.bf16.mxu1 %v13790_v46  ;;  %18748 = vmatprep.subr.bf16.mxu1 %v20029_v4  ;;  %v11752_v56 = vsel %vm856_vm1, %v11744_v27, %v11751_v10  ;;  %v11768_v46 = vrot.slane %v11766_v7, 7  ;;  %v11806_v27 = vshrl.u32 %v23892_v54, 16  ;;  %v13833_v10 = vor.u32 %v13832_v50, %v13358_v38 }
 0x567   : > { %18472 = vmatprep.subr.bf16.mxu0 %v20030_v5  ;;  %v11764_v6 = vsel %vm856_vm1, %v11756_v8, %v11763_v19  ;;  %v13825_v33 = vrot.slane %v13823_v20, 1  ;;  %v13837_v22 = vrot.slane %v13835_v52, 1  ;;  %v11725_v8 = vld [vmem:[#allocation2 + $0xc0] sm:$0x80]  ;;  %v11790_v38 = vshrl.u32 %v11723_v23, 16 }
 0x568   : > { %18749 = vmatpush3.bf16.msra.mxu1 %v20029_v4  ;;  %v11778_v4 = vshrl.u32 %v11721_v49, 16  ;;  %v11808_v20 = vrot.slane %v11806_v27, 7  ;;  %v11797_v7 = vshll.u32 %v23883_v2, 16 }
 0x569   : > { %18473 = vmatpush3.bf16.msra.mxu0 %v20030_v5  ;;  %18750 = vmatprep.subr.bf16.mxu1 %v20031_v32  ;;  %v11773_v5 = vshll.u32 %v23842_v62, 16  ;;  %v13826_v19 = vsel %vm1300_vm2, %v23899_v24, %v13825_v33  ;;  %v11792_v52 = vrot.slane %v11790_v38, 7  ;;  %v14038_v33 = vld [vmem:[#allocation2 + $0x108] sm:$0x80]  ;;  %v11821_v38 = vshll.u32 %v23927_v43, 16 }
 0x56a   : > { %18490 = vmatprep.subr.bf16.mxu0 %v20032_v63  ;;  %v11780_v61 = vrot.slane %v11778_v4, 7  ;;  %v20040_v4 = vld [vmem:[%s24289_s5 + $0x1e0] sm:$0xff]   ;;  %v14065_v23 = vshrl.u32 %v14038_v33, 16 }
 0x56b   : > { %18735 = vmatmul.mubr.bf16.gmra.mrb[52].mxu1 %v13802_v15  ;;  %v11796_v15 = vrot.slane %v11794_v58, 7 }
 0x56c   : > { %18475 = vmatmul.mubr.bf16.vlgmr.msra.gmra.mrb[48].mxu0 %v11752_v56  ;;  %18751 = vmatpush3.bf16.msra.mxu1 %v20031_v32  ;;  %v11775_v32 = vor.u32 %v11773_v5, %v11772_v48  ;;  %v13838_v56 = vsel %vm1300_vm2, %v13833_v10, %v13837_v22  ;;  %v14053_v48 = vshrl.u32 %v14036_v59, 16  ;;  %v14040_v22 = vld [vmem:[#allocation2 + $0x120] sm:$0x80] }
 0x56d   : > { %18478 = vmatprep.mubr.bf16.mxu0 %v11764_v6  ;;  %18491 = vmatpush3.bf16.msra.mxu0 %v20032_v63  ;;  %v11787_v63 = vor.u32 %v11784_v51, %v11494_v42  ;;  %v13844_v42 = vrot.slane %v13373_v26, 1  ;;  %v11802_v26 = vshrl.u32 %v11725_v8, 16  ;;  %v14059_v6 = vrot.slane %v13768_v21, 7 }
 0x56e   : > { %18738 = vmatprep.mubr.bf16.mxu1 %v13814_v41  ;;  %18752 = vmatprep.subr.bf16.mxu1 %v20033_v37  ;;  %v11776_v49 = vsel %vm856_vm1, %v11768_v46, %v11775_v32  ;;  %v13849_v41 = vrot.slane %v13847_v17, 1  ;;  %v11818_v21 = vshrl.u32 %v23927_v43, 16 }
 0x56f   : > { %18492 = vmatprep.subr.bf16.mxu0 %v20034_v14  ;;  %v11788_v57 = vsel %vm856_vm1, %v11780_v61, %v11787_v63  ;;  %v13845_v51 = vor.u32 %v13844_v42, %v13370_v39  ;;  %v11804_v46 = vrot.slane %v11802_v26, 7  ;;  %v14055_v39 = vrot.slane %v14053_v48, 7  ;;  %v20041_v63 = vld [vmem:[%s24289_s5 + $0x1b8] sm:$0xff]   ;;  %v23962_v42 = vld [vmem:[#allocation2 + $0x140] sm:$0xff]  ;;  %v20044_v26 = vld [vmem:[%s24289_s5 + $0x1f0] sm:$0xff]  }
 0x570   : > { %18753 = vmatpush3.bf16.msra.mxu1 %v20033_v37  ;;  %v23922_v37 = vld [vmem:[#allocation2 + $0x110] sm:$0xff]  ;;  %v14062_v34 = vor.u32 %v14059_v6, %v13770_v45  ;;  %v11814_v45 = vshrl.u32 %v11727_v1, 16  ;;  %v20046_v1 = vld [vmem:[%s24289_s5 + $0x1f8] sm:$0xff]  }
 0x571   : > { %18493 = vmatpush3.bf16.msra.mxu0 %v20034_v14  ;;  %18754 = vmatprep.subr.bf16.mxu1 %v20035_v12  ;;  %v20039_v14 = vld [vmem:[%s24289_s5 + $0x1b0] sm:$0xff]   ;;  %v14069_v50 = vshrl.u32 %v23922_v37, 16  ;;  %v13850_v61 = vsel %vm1300_vm2, %v13845_v51, %v13849_v41  ;;  %v14072_v59 = vshll.u32 %v23922_v37, 16 }
 0x572   : > { %18494 = vmatprep.subr.bf16.mxu0 %v20036_v35  ;;  %v11816_v48 = vrot.slane %v11814_v45, 7  ;;  %v24009_v45 = vld [vmem:[#allocation2 + $0x188] sm:$0xff] }
 0x573   : > { %18739 = vmatmul.mubr.bf16.gmra.mrb[56].mxu1 %v13826_v19  ;;  %v14071_v10 = vrot.slane %v14069_v50, 7  ;;  %v20042_v19 = vld [vmem:[%s24289_s5 + $0x1e8] sm:$0xff]  }
 0x574   : > { %18479 = vmatmul.mubr.bf16.gmra.mrb[52].mxu0 %v11776_v49  ;;  %18755 = vmatpush3.bf16.msra.mxu1 %v20035_v12  ;;  %v11809_v12 = vshll.u32 %v23892_v54, 16  ;;  %v14063_v49 = vsel %vm856_vm1, %v14055_v39, %v14062_v34  ;;  %v14096_v39 = vshll.u32 %v23962_v42, 16 }
 0x575   : > { %18482 = vmatprep.mubr.bf16.mxu0 %v11788_v57  ;;  %18495 = vmatpush3.bf16.msra.mxu0 %v20036_v35  ;;  %v11799_v35 = vor.u32 %v11797_v7, %v11796_v15  ;;  %v14077_v15 = vshrl.u32 %v14040_v22, 16  ;;  %v14083_v57 = vrot.slane %v13792_v11, 7 }
 0x576   : > { %18742 = vmatprep.mubr.bf16.mxu1 %v13838_v56  ;;  %18756 = vmatprep.subr.bf16.mxu1 %v20037_v31  ;;  %v11811_v32 = vor.u32 %v11809_v12, %v11808_v20  ;;  %v14067_v20 = vrot.slane %v14065_v23, 7  ;;  %v14074_v56 = vor.u32 %v14072_v59, %v14071_v10  ;;  %v14107_v23 = vrot.slane %v13816_v47, 7  ;;  %v20048_v10 = vld [vmem:[%s24289_s5 + $0x200] sm:$0xff]  }
 0x577   : > { %18496 = vmatprep.subr.bf16.mxu0 %v20038_v25  ;;  %v11800_v8 = vsel %vm856_vm1, %v11792_v52, %v11799_v35  ;;  %v14079_v11 = vrot.slane %v14077_v15, 7  ;;  %v14086_v51 = vor.u32 %v14083_v57, %v13794_v60  ;;  %v20045_v52 = vld [vmem:[%s24289_s5 + $0x1c8] sm:$0xff]   ;;  %v23993_v60 = vld [vmem:[#allocation2 + $0x170] sm:$0xff]  ;;  %v20049_v15 = vld [vmem:[%s24289_s5 + $0x1d8] sm:$0xff]  }
 0x578   : > { %18757 = vmatpush3.bf16.msra.mxu1 %v20037_v31  ;;  %v11820_v31 = vrot.slane %v11818_v21, 7  ;;  %v11812_v17 = vsel %vm856_vm1, %v11804_v46, %v11811_v32  ;;  %v14075_v41 = vsel %vm856_vm1, %v14067_v20, %v14074_v56  ;;  %v14044_v46 = vld [vmem:[#allocation2 + $0x150] sm:$0x80]  ;;  %v14048_v20 = vld [vmem:[#allocation2 + $0x180] sm:$0x80]  ;;  %v20050_v56 = vld [vmem:[%s24289_s5 + $0x208] sm:$0xff]  }
 0x579   : > { %18497 = vmatpush3.bf16.msra.mxu0 %v20038_v25  ;;  %18758 = vmatprep.subr.bf16.mxu1 %v20039_v14  ;;  %v20043_v25 = vld [vmem:[%s24289_s5 + $0x1c0] sm:$0xff]   ;;  %v14087_v34 = vsel %vm856_vm1, %v14079_v11, %v14086_v51  ;;  %v14125_v51 = vshrl.u32 %v14048_v20, 16  ;;  %v12210_v20 = vrot.slane %v11737_v16, 1 }
 0x57a   : > { %18498 = vmatprep.subr.bf16.mxu0 %v20040_v4  ;;  %v11823_v6 = vor.u32 %v11821_v38, %v11820_v31  ;;  %v14046_v31 = vld [vmem:[#allocation2 + $0x168] sm:$0x80]  ;;  %v20051_v11 = vld [vmem:[%s24289_s5 + $0x1e0] sm:$0xff]  }
 0x57b   : > { %18743 = vmatmul.mubr.bf16.gmra.mrb[60].mxu1 %v13850_v61  ;;  %v20047_v61 = vld [vmem:[%s24289_s5 + $0x1d0] sm:$0xff]   ;;  %v14113_v57 = vshrl.u32 %v14046_v31, 16  ;;  %v12211_v16 = vor.u32 %v12210_v20, %v11734_v9  ;;  %v20065_v20 = vld [vmem:[%s24289_s5 + $0x220] sm:$0xff]  }
 0x57c   : > { %18483 = vmatmul.mubr.bf16.gmra.mrb[56].mxu0 %v11800_v8  ;;  %18759 = vmatpush3.bf16.msra.mxu1 %v20039_v14  ;;  %v14093_v14 = vshrl.u32 %v23962_v42, 16  ;;  %v11824_v32 = vsel %vm856_vm1, %v11816_v48, %v11823_v6  ;;  %v24025_v48 = vld [vmem:[#allocation2] sm:$0xff] }
 0x57d   : > { %18486 = vmatprep.mubr.bf16.mxu0 %v11812_v17  ;;  %18499 = vmatpush3.bf16.msra.mxu0 %v20040_v4  ;;  %v14042_v4 = vld [vmem:[#allocation2 + $0x138] sm:$0x80]  ;;  %v14110_v17 = vor.u32 %v14107_v23, %v13818_v30  ;;  %v14120_v30 = vshll.u32 %v23993_v60, 16  ;;  %v14141_v6 = vshrl.u32 %v24025_v48, 16 }
 0x57e   : > { %18762 = vmatprep.mubr.bf16.mxu1 %v14063_v49  ;;  %18760 = vmatprep.subr.bf16.mxu1 %v20041_v63  ;;  %v14089_v35 = vshrl.u32 %v14042_v4, 16  ;;  %v14095_v33 = vrot.slane %v14093_v14, 7  ;;  %v14129_v49 = vshrl.u32 %v24009_v45, 16 }
 0x57f   : > { %18500 = vmatprep.subr.bf16.mxu0 %v20042_v19 }
 0x580   : > { %18761 = vmatpush3.bf16.msra.mxu1 %v20041_v63  ;;  %v14101_v63 = vshrl.u32 %v14044_v46, 16  ;;  %v14091_v22 = vrot.slane %v14089_v35, 7  ;;  %v14098_v8 = vor.u32 %v14096_v39, %v14095_v33  ;;  %v20052_v35 = vld [vmem:[%s24289_s5 + $0x210] sm:$0xff]   ;;  %v14115_v33 = vrot.slane %v14113_v57, 7  ;;  %v20057_v57 = vld [vmem:[%s24289_s5 + $0x1f8] sm:$0xff]  }
 0x581   : > { %18501 = vmatpush3.bf16.msra.mxu0 %v20042_v19  ;;  %18778 = vmatprep.subr.bf16.mxu1 %v20043_v25  ;;  %v14117_v19 = vshrl.u32 %v23993_v60, 16  ;;  %v14132_v46 = vshll.u32 %v24009_v45, 16 }
 0x582   : > { %18502 = vmatprep.subr.bf16.mxu0 %v20044_v26  ;;  %v14103_v47 = vrot.slane %v14101_v63, 7 }
 0x583   : > { %18763 = vmatmul.mubr.bf16.vlgmr.msra.gmra.mrb[48].mxu1 %v14075_v41  ;;  %v14131_v41 = vrot.slane %v14129_v49, 7 }
 0x584   : > { %18487 = vmatmul.mubr.bf16.gmra.mrb[60].mxu0 %v11824_v32  ;;  %18779 = vmatpush3.bf16.msra.mxu1 %v20043_v25  ;;  %v14099_v25 = vsel %vm856_vm1, %v14091_v22, %v14098_v8  ;;  %v14111_v4 = vsel %vm856_vm1, %v14103_v47, %v14110_v17  ;;  %v20054_v22 = vld [vmem:[%s24289_s5 + $0x218] sm:$0xff]   ;;  %v20055_v17 = vld [vmem:[%s24289_s5 + $0x1f0] sm:$0xff]  }
 0x585   : > { %18503 = vmatpush3.bf16.msra.mxu0 %v20044_v26  ;;  %18506 = vmatprep.mubr.bf16.mxu0 %v23770_v36  ;;  %v14119_v26 = vrot.slane %v14117_v19, 7  ;;  %v14134_v63 = vor.u32 %v14132_v46, %v14131_v41  ;;  %v12222_v36 = vrot.slane %v11749_v3, 1 }
 0x586   : > { %18766 = vmatprep.mubr.bf16.mxu1 %v14087_v34  ;;  %18780 = vmatprep.subr.bf16.mxu1 %v20045_v52  ;;  %v14144_v34 = vshll.u32 %v24025_v48, 16 }
 0x587   : > { %18504 = vmatprep.subr.bf16.mxu0 %v20046_v1  ;;  %v12223_v3 = vor.u32 %v12222_v36, %v11746_v18 }
 0x588   : > { %18781 = vmatpush3.bf16.msra.mxu1 %v20045_v52  ;;  %v14050_v52 = vld [vmem:[#allocation2 + $0x198] sm:$0x80] }
 0x589   : > { %18505 = vmatpush3.bf16.msra.mxu0 %v20046_v1  ;;  %18782 = vmatprep.subr.bf16.mxu1 %v20047_v61  ;;  %v14137_v32 = vshrl.u32 %v14050_v52, 16  ;;  %v14143_v1 = vrot.slane %v14141_v6, 7  ;;  %v12192_v52 = vld [vmem:[#allocation2 + $0x58] sm:$0x1] }
 0x58a   : > { %18522 = vmatprep.subr.bf16.mxu0 %v20048_v10  ;;  %v12225_v9 = vshll.u32 %v12192_v52, 16 }
 0x58b   : > { %18767 = vmatmul.mubr.bf16.gmra.mrb[52].mxu1 %v14099_v25  ;;  %v14139_v8 = vrot.slane %v14137_v32, 7  ;;  %v14146_v31 = vor.u32 %v14144_v34, %v14143_v1  ;;  %v20056_v25 = vld [vmem:[%s24289_s5 + $0x220] sm:$0xff]  }
 0x58c   : > { %18507 = vmatmul.mubr.bf16.vlgmr.msra.gmra.mrb[48].mxu0 %v23802_v28  ;;  %18783 = vmatpush3.bf16.msra.mxu1 %v20047_v61  ;;  %v14127_v61 = vrot.slane %v14125_v51, 7  ;;  %v20060_v51 = vld [vmem:[%s24289_s5 + $0x230] sm:$0xff]   ;;  %v12246_v28 = vrot.slane %v11773_v5, 1 }
 0x58d   : > { %18510 = vmatprep.mubr.bf16.mxu0 %v23707_v13  ;;  %18523 = vmatpush3.bf16.msra.mxu0 %v20048_v10  ;;  %v14122_v13 = vor.u32 %v14120_v30, %v14119_v26  ;;  %v20053_v10 = vld [vmem:[%s24289_s5 + $0x1e8] sm:$0xff]  }
 0x58e   : > { %18770 = vmatprep.mubr.bf16.mxu1 %v14111_v4  ;;  %18784 = vmatprep.subr.bf16.mxu1 %v20049_v15  ;;  %v14135_v47 = vsel %vm856_vm1, %v14127_v61, %v14134_v63  ;;  %v20058_v26 = vld [vmem:[%s24289_s5 + $0x228] sm:$0xff]   ;;  %v20059_v4 = vld [vmem:[%s24289_s5 + $0x200] sm:$0xff]   ;;  %v20063_v63 = vld [vmem:[%s24289_s5 + $0x210] sm:$0xff]   ;;  %v12247_v5 = vor.u32 %v12246_v28, %v11770_v44 }
 0x58f   : > { %18524 = vmatprep.subr.bf16.mxu0 %v20050_v56  ;;  %v14123_v23 = vsel %vm856_vm1, %v14115_v33, %v14122_v13  ;;  %v12194_v33 = vld [vmem:[#allocation2 + $0x70] sm:$0x1]  ;;  %v20062_v13 = vld [vmem:[%s24289_s5 + $0x238] sm:$0xff]  }
 0x590   : > { %18785 = vmatpush3.bf16.msra.mxu1 %v20049_v15  ;;  %v14147_v15 = vsel %vm856_vm1, %v14139_v8, %v14146_v31  ;;  %v12237_v61 = vshll.u32 %v12194_v33, 16  ;;  %v14511_v33 = vld [vmem:[#allocation2 + $0x100] sm:$0x1] }
 0x591   : > { %18525 = vmatpush3.bf16.msra.mxu0 %v20050_v56  ;;  %18786 = vmatprep.subr.bf16.mxu1 %v20051_v11 }
 0x592   : > { %18526 = vmatprep.subr.bf16.mxu0 %v20052_v35  ;;  %v12239_v31 = vrot.slane %v12237_v61, 1  ;;  %v20067_v61 = vld [vmem:[%s24289_s5 + $0x230] sm:$0xff]  }
 0x593   : > { %18771 = vmatmul.mubr.bf16.gmra.mrb[56].mxu1 %v14123_v23  ;;  %v12197_v23 = vld [vmem:[#allocation2 + $0x98] sm:$0xff] }
 0x594   : > { %18511 = vmatmul.mubr.bf16.gmra.mrb[52].mxu0 %v23842_v62  ;;  %18787 = vmatpush3.bf16.msra.mxu1 %v20051_v11  ;;  %v12193_v11 = vld [vmem:[#allocation2 + $0x68] sm:$0xff]  ;;  %v12270_v62 = vrot.slane %v11797_v7, 1 }
 0x595   : > { %18514 = vmatprep.mubr.bf16.mxu0 %v23734_v55  ;;  %18527 = vmatpush3.bf16.msra.mxu0 %v20052_v35  ;;  %v12190_v55 = vld [vmem:[#allocation2 + $0x40] sm:$0x1]  ;;  %v12232_v35 = vshll.u32 %v12193_v11, 16 }
 0x596   : > { %18774 = vmatprep.mubr.bf16.mxu1 %v14135_v47  ;;  %18788 = vmatprep.subr.bf16.mxu1 %v20053_v10  ;;  %v12213_v56 = vshll.u32 %v12190_v55, 16  ;;  %v12196_v47 = vld [vmem:[#allocation2 + $0x88] sm:$0x1] }
 0x597   : > { %18528 = vmatprep.subr.bf16.mxu0 %v20054_v22  ;;  %v12234_v1 = vrot.slane %v12232_v35, 1  ;;  %v12249_v18 = vshll.u32 %v12196_v47, 16  ;;  %v12202_v35 = vld [vmem:[#allocation2 + $0xd0] sm:$0x1] }
 0x598   : > { %18789 = vmatpush3.bf16.msra.mxu1 %v20053_v10  ;;  %v12215_v41 = vrot.slane %v12213_v56, 1  ;;  %v12230_v10 = vshrl.u32 %v12193_v11, 16  ;;  %v14510_v56 = vld [vmem:[#allocation2 + $0xf8] sm:$0xff]  ;;  %v14515_v47 = vld [vmem:[#allocation2 + $0x130] sm:$0x1] }
 0x599   : > { %18529 = vmatpush3.bf16.msra.mxu0 %v20054_v22  ;;  %18790 = vmatprep.subr.bf16.mxu1 %v20055_v17  ;;  %v12227_v22 = vrot.slane %v12225_v9, 1  ;;  %v12251_v11 = vrot.slane %v12249_v18, 1  ;;  %v14529_v52 = vshll.u32 %v14510_v56, 16  ;;  %v12285_v9 = vshll.u32 %v12202_v35, 16 }
 0x59a   : > { %18530 = vmatprep.subr.bf16.mxu0 %v20056_v25  ;;  %v12216_v32 = vsel %vm1300_vm2, %v12211_v16, %v12215_v41  ;;  %v12235_v8 = vor.u32 %v12234_v1, %v12230_v10  ;;  %v12200_v41 = vld [vmem:[#allocation2 + $0xb8] sm:$0x1]  ;;  %v14534_v1 = vshll.u32 %v14511_v33, 16  ;;  %v14527_v7 = vshrl.u32 %v14510_v56, 16 }
 0x59b   : > { %18775 = vmatmul.mubr.bf16.gmra.mrb[60].mxu1 %v14147_v15  ;;  %v20064_v15 = vld [vmem:[%s24289_s5 + $0x218] sm:$0xff]   ;;  %v12273_v44 = vshll.u32 %v12200_v41, 16  ;;  %v14523_v41 = vld [vmem:[#allocation2 + $0x190] sm:$0x1]  ;;  %v14603_v33 = vrot.slane %v14132_v46, 1 }
 0x59c   : > { %18515 = vmatmul.mubr.bf16.gmra.mrb[56].mxu0 %v23883_v2  ;;  %18791 = vmatpush3.bf16.msra.mxu1 %v20055_v17  ;;  %v12256_v17 = vshll.u32 %v12197_v23, 16  ;;  %v12240_v55 = vsel %vm1300_vm2, %v12235_v8, %v12239_v31  ;;  %v14536_v8 = vrot.slane %v14534_v1, 1  ;;  %v12204_v31 = vld [vmem:[#allocation2 + $0xe8] sm:$0x1]  ;;  %v14543_v2 = vrot.slane %v14072_v59, 1 }
 0x59d   : > { %18518 = vmatprep.mubr.bf16.mxu0 %v23892_v54  ;;  %18531 = vmatpush3.bf16.msra.mxu0 %v20056_v25  ;;  %v12198_v25 = vld [vmem:[#allocation2 + $0xa0] sm:$0x1]  ;;  %v12294_v54 = vrot.slane %v11821_v38, 1 }
 0x59e   : > { %18794 = vmatprep.mubr.bf16.mxu1 %v23759_v29  ;;  %18792 = vmatprep.subr.bf16.mxu1 %v20057_v57  ;;  %v20061_v29 = vld [vmem:[%s24289_s5 + $0x208] sm:$0xff]   ;;  %v14544_v59 = vor.u32 %v14543_v2, %v14069_v50 }
 0x59f   : > { %18532 = vmatprep.subr.bf16.mxu0 %v20058_v26 }
 0x5a0   : > { %18793 = vmatpush3.bf16.msra.mxu1 %v20057_v57  ;;  %v12258_v57 = vrot.slane %v12256_v17, 1  ;;  %v20068_v17 = vld [vmem:[%s24289_s5 + $0x238] sm:$0xff]  }
 0x5a1   : > { %18533 = vmatpush3.bf16.msra.mxu0 %v20058_v26  ;;  %18810 = vmatprep.subr.bf16.mxu1 %v20059_v4  ;;  %v12261_v26 = vshll.u32 %v12198_v25, 16 }
 0x5a2   : > { %18534 = vmatprep.subr.bf16.mxu0 %v20060_v51 }
 0x5a3   : > { %18795 = vmatmul.mubr.bf16.vlgmr.msra.gmra.mrb[48].mxu1 %v23922_v37  ;;  %v12263_v16 = vrot.slane %v12261_v26, 1  ;;  %v14517_v26 = vld [vmem:[#allocation2 + $0x148] sm:$0x1] }
 0x5a4   : > { %18519 = vmatmul.mubr.bf16.gmra.mrb[60].mxu0 %v23927_v43  ;;  %18811 = vmatpush3.bf16.msra.mxu1 %v20059_v4  ;;  %v12254_v4 = vshrl.u32 %v12197_v23, 16  ;;  %v14513_v23 = vld [vmem:[#allocation2 + $0x118] sm:$0x1] }
 0x5a5   : > { %18535 = vmatpush3.bf16.msra.mxu0 %v20060_v51  ;;  %18538 = vmatprep.mubr.bf16.mxu0 %v12216_v32  ;;  %v14531_v32 = vrot.slane %v14529_v52, 1 }
 0x5a6   : > { %18798 = vmatprep.mubr.bf16.mxu1 %v23796_v0  ;;  %18812 = vmatprep.subr.bf16.mxu1 %v20061_v29  ;;  %v12228_v0 = vsel %vm1300_vm2, %v12223_v3, %v12227_v22  ;;  %v12259_v51 = vor.u32 %v12258_v57, %v12254_v4  ;;  %v12287_v3 = vrot.slane %v12285_v9, 1  ;;  %v14567_v4 = vrot.slane %v14096_v39, 1 }
 0x5a7   : > { %18536 = vmatprep.subr.bf16.mxu0 %v20062_v13  ;;  %v14532_v22 = vor.u32 %v14531_v32, %v14527_v7  ;;  %v14591_v39 = vrot.slane %v14120_v30, 1 }
 0x5a8   : > { %18813 = vmatpush3.bf16.msra.mxu1 %v20061_v29  ;;  %v12252_v29 = vsel %vm1300_vm2, %v12247_v5, %v12251_v11  ;;  %v12264_v36 = vsel %vm1300_vm2, %v12259_v51, %v12263_v16  ;;  %v14570_v5 = vshll.u32 %v14517_v26, 16  ;;  %v14568_v43 = vor.u32 %v14567_v4, %v14093_v14  ;;  %v14521_v16 = vld [vmem:[#allocation2 + $0x178] sm:$0x1] }
 0x5a9   : > { %18537 = vmatpush3.bf16.msra.mxu0 %v20062_v13  ;;  %18814 = vmatprep.subr.bf16.mxu1 %v20063_v63  ;;  %v12282_v13 = vrot.slane %v11809_v12, 1  ;;  %v12275_v12 = vrot.slane %v12273_v44, 1  ;;  %v14537_v28 = vsel %vm1300_vm2, %v14532_v22, %v14536_v8  ;;  %v14594_v35 = vshll.u32 %v14521_v16, 16 }
 0x5aa   : > { %v14592_v14 = vor.u32 %v14591_v39, %v14117_v19  ;;  %v14615_v44 = vrot.slane %v14144_v34, 1 }
 0x5ab   : > { %18799 = vmatmul.mubr.bf16.gmra.mrb[52].mxu1 %v23962_v42  ;;  %v12283_v10 = vor.u32 %v12282_v13, %v11806_v27  ;;  %v12297_v27 = vshll.u32 %v12204_v31, 16  ;;  %v14525_v42 = vld [vmem:[#allocation2 + $0x1a8] sm:$0x1] }
 0x5ac   : > { %18539 = vmatmul.mubr.bf16.vlgmr.msra.gmra.mrb[48].mxu0 %v12228_v0  ;;  %18815 = vmatpush3.bf16.msra.mxu1 %v20063_v63  ;;  %v12271_v63 = vor.u32 %v12270_v62, %v11794_v58  ;;  %v14546_v58 = vshll.u32 %v14513_v23, 16  ;;  %v14604_v62 = vor.u32 %v14603_v33, %v14129_v49  ;;  %v14618_v13 = vshll.u32 %v14525_v42, 16 }
 0x5ad   : > { %18542 = vmatprep.mubr.bf16.mxu0 %v12240_v55  ;;  %18802 = vmatprep.mubr.bf16.mxu1 %v23836_v53  ;;  %v20066_v53 = vld [vmem:[%s24289_s5 + $0x228] sm:$0xff]   ;;  %v12288_v0 = vsel %vm1300_vm2, %v12283_v10, %v12287_v3  ;;  %v12295_v55 = vor.u32 %v12294_v54, %v11818_v21  ;;  %v12299_v57 = vrot.slane %v12297_v27, 1  ;;  %v14572_v21 = vrot.slane %v14570_v5, 1 }
 0x5ae   : > { %18816 = vmatprep.subr.bf16.mxu1 %v20064_v15  ;;  %v12276_v25 = vsel %vm1300_vm2, %v12271_v63, %v12275_v12  ;;  %v14548_v18 = vrot.slane %v14546_v58, 1 }
 0x5af   : > { %v12300_v11 = vsel %vm1300_vm2, %v12295_v55, %v12299_v57  ;;  %v14573_v52 = vsel %vm1300_vm2, %v14568_v43, %v14572_v21 }
 0x5b0   : > { %18817 = vmatpush3.bf16.msra.mxu1 %v20064_v15  ;;  %v14558_v15 = vshll.u32 %v14515_v47, 16  ;;  %v14549_v56 = vsel %vm1300_vm2, %v14544_v59, %v14548_v18 }
 0x5b1   : > { %18818 = vmatprep.subr.bf16.mxu1 %v20065_v20 }
 0x5b2   : > { %v14560_v38 = vrot.slane %v14558_v15, 1 }
 0x5b3   : > { %18803 = vmatmul.mubr.bf16.gmra.mrb[56].mxu1 %v23993_v60  ;;  %v14620_v60 = vrot.slane %v14618_v13, 1 }
 0x5b4   : > { %18543 = vmatmul.mubr.bf16.gmra.mrb[52].mxu0 %v12252_v29  ;;  %18819 = vmatpush3.bf16.msra.mxu1 %v20065_v20  ;;  %v14519_v20 = vld [vmem:[#allocation2 + $0x160] sm:$0x1]  ;;  %v14561_v37 = vsel %vm1300_vm2, %v23856_v40, %v14560_v38  ;;  %v14596_v29 = vrot.slane %v14594_v35, 1 }
 0x5b5   : > { %18546 = vmatprep.mubr.bf16.mxu0 %v12264_v36  ;;  %18806 = vmatprep.mubr.bf16.mxu1 %v24009_v45  ;;  %v14582_v50 = vshll.u32 %v14519_v20, 16  ;;  %v14616_v36 = vor.u32 %v14615_v44, %v14141_v6  ;;  %v24178_v45 = vld [vmem:[%s24290_s6] ss:$0 sm:$0xff] }
 0x5b6   : > { %18820 = vmatprep.subr.bf16.mxu1 %v20066_v53 }
 0x5b7   : > { %v14584_v51 = vrot.slane %v14582_v50, 1  ;;  %v14621_v19 = vsel %vm1300_vm2, %v14616_v36, %v14620_v60 }
 0x5b8   : > { %18821 = vmatpush3.bf16.msra.mxu1 %v20066_v53  ;;  %v14606_v53 = vshll.u32 %v14523_v41, 16 }
 0x5b9   : > { %18822 = vmatprep.subr.bf16.mxu1 %v20067_v61  ;;  %v14585_v40 = vsel %vm1300_vm2, %v23899_v24, %v14584_v51  ;;  %v14597_v24 = vsel %vm1300_vm2, %v14592_v14, %v14596_v29 }
 0x5ba   : > { %v14608_v30 = vrot.slane %v14606_v53, 1 }
 0x5bb   : > { %18807 = vmatmul.mubr.bf16.gmra.mrb[60].mxu1 %v24025_v48 }
 0x5bc   : > { %18547 = vmatmul.mubr.bf16.gmra.mrb[56].mxu0 %v12276_v25  ;;  %18823 = vmatpush3.bf16.msra.mxu1 %v20067_v61  ;;  %v14609_v46 = vsel %vm1300_vm2, %v14604_v62, %v14608_v30 }
 0x5bd   : > { %18550 = vmatprep.mubr.bf16.mxu0 %v12288_v0  ;;  %18826 = vmatprep.mubr.bf16.mxu1 %v14537_v28 }
 0x5be   : > { %18824 = vmatprep.subr.bf16.mxu1 %v20068_v17 }
 0x5c0   : > { %18825 = vmatpush3.bf16.msra.mxu1 %v20068_v17 }
 0x5c3   : > { %18827 = vmatmul.mubr.bf16.vlgmr.msra.gmra.mrb[48].mxu1 %v14549_v56 }
 0x5c4   : > { %18551 = vmatmul.mubr.bf16.gmra.mrb[60].mxu0 %v12300_v11  ;;  %18830 = vmatprep.mubr.bf16.mxu1 %v14561_v37 }
 0x5cb   : > { %18831 = vmatmul.mubr.bf16.gmra.mrb[52].mxu1 %v14573_v52 }
 0x5cc   : > { %18834 = vmatprep.mubr.bf16.mxu1 %v14585_v40 }
 0x5d3   : > { %18835 = vmatmul.mubr.bf16.gmra.mrb[56].mxu1 %v14597_v24 }
 0x5d4   : > { %18838 = vmatprep.mubr.bf16.mxu1 %v14609_v46 }
 0x5db   : > { %18839 = vmatmul.mubr.bf16.gmra.mrb[60].mxu1 %v14621_v19 }
 0x67f   : > { %v18540_v49 = vpop.f32.mrb[48].mxu0 }
 0x680   : > { %v12495_v48 = vadd.f32 %v18540_v49, %v24178_v45  ;;  %v12408_v6 = vpop.f32.mrb[49].mxu0 }
 0x681   : > { %v12493_v34 = vadd.f32 %v24178_v45, %v12408_v6  ;;  %v18541_v9 = vpop.f32.mrb[50].mxu0 }
 0x682   : > { %12512 = vst.msk [vmem:[%s24183_s27 + $0x10] sm:$0xff] %vm12509_vm3, %v12495_v48  ;;  %v12496_v32 = vadd.f32 %v18541_v9, %v24178_v45  ;;  %v12411_v1 = vpop.f32.mrb[51].mxu0 }
 0x683   : > { %12510 = vst.msk [vmem:[%s24183_s27] sm:$0xff] %vm12509_vm3, %v12493_v34  ;;  %v12494_v61 = vadd.f32 %v24178_v45, %v12411_v1 }
 0x684   : > { %12513 = vst.msk [vmem:[%s24183_s27 + $0x18] sm:$0xff] %vm12509_vm3, %v12496_v32 }
 0x685   : > { %12511 = vst.msk [vmem:[%s24183_s27 + $0x8] sm:$0xff] %vm12509_vm3, %v12494_v61 }
 0x687   : > { %v18544_v7 = vpop.f32.mrb[52].mxu0 }
 0x688   : > { %v12499_v63 = vadd.f32 %v18544_v7, %v24178_v45  ;;  %v12424_v12 = vpop.f32.mrb[53].mxu0 }
 0x689   : > { %v12497_v23 = vadd.f32 %v24178_v45, %v12424_v12  ;;  %v18545_v10 = vpop.f32.mrb[54].mxu0 }
 0x68a   : > { %12516 = vst.msk [vmem:[%s24183_s27 + $0x30] sm:$0xff] %vm12509_vm3, %v12499_v63  ;;  %v12500_v3 = vadd.f32 %v18545_v10, %v24178_v45  ;;  %v12427_v22 = vpop.f32.mrb[55].mxu0 }
 0x68b   : > { %12514 = vst.msk [vmem:[%s24183_s27 + $0x20] sm:$0xff] %vm12509_vm3, %v12497_v23  ;;  %v12498_v8 = vadd.f32 %v24178_v45, %v12427_v22 }
 0x68c   : > { %12517 = vst.msk [vmem:[%s24183_s27 + $0x38] sm:$0xff] %vm12509_vm3, %v12500_v3 }
 0x68d   : > { %12515 = vst.msk [vmem:[%s24183_s27 + $0x28] sm:$0xff] %vm12509_vm3, %v12498_v8 }
 0x68f   : > { %v18548_v31 = vpop.f32.mrb[56].mxu0 }
 0x690   : > { %v12503_v47 = vadd.f32 %v18548_v31, %v24178_v45  ;;  %v12440_v17 = vpop.f32.mrb[57].mxu0 }
 0x691   : > { %v12501_v2 = vadd.f32 %v24178_v45, %v12440_v17  ;;  %v18549_v58 = vpop.f32.mrb[58].mxu0 }
 0x692   : > { %12520 = vst.msk [vmem:[%s24183_s27 + $0x50] sm:$0xff] %vm12509_vm3, %v12503_v47  ;;  %v12504_v25 = vadd.f32 %v18549_v58, %v24178_v45  ;;  %v12443_v54 = vpop.f32.mrb[59].mxu0 }
 0x693   : > { %12518 = vst.msk [vmem:[%s24183_s27 + $0x40] sm:$0xff] %vm12509_vm3, %v12501_v2  ;;  %v12502_v27 = vadd.f32 %v24178_v45, %v12443_v54 }
 0x694   : > { %12521 = vst.msk [vmem:[%s24183_s27 + $0x58] sm:$0xff] %vm12509_vm3, %v12504_v25 }
 0x695   : > { %12519 = vst.msk [vmem:[%s24183_s27 + $0x48] sm:$0xff] %vm12509_vm3, %v12502_v27 }
 0x696   : > { %v18828_v15 = vpop.f32.mrb[48].mxu1 }
 0x697   : > { %v18552_v0 = vpop.f32.mrb[60].mxu0  ;;  %v14809_v28 = vadd.f32 %v18828_v15, %v24178_v45  ;;  %v14728_v59 = vpop.f32.mrb[49].mxu1 }
 0x698   : > { %v12507_v18 = vadd.f32 %v18552_v0, %v24178_v45  ;;  %v12456_v55 = vpop.f32.mrb[61].mxu0  ;;  %v14807_v57 = vadd.f32 %v24178_v45, %v14728_v59  ;;  %v18829_v38 = vpop.f32.mrb[50].mxu1 }
 0x699   : > { %16178 = vst.msk [vmem:[%s24183_s27 + $0x90] sm:$0xff] %vm12509_vm3, %v14809_v28  ;;  %v12505_v26 = vadd.f32 %v24178_v45, %v12456_v55  ;;  %v18553_v20 = vpop.f32.mrb[62].mxu0  ;;  %v14810_v56 = vadd.f32 %v18829_v38, %v24178_v45  ;;  %v14731_v4 = vpop.f32.mrb[51].mxu1 }
 0x69a   : > { %12524 = vst.msk [vmem:[%s24183_s27 + $0x70] sm:$0xff] %vm12509_vm3, %v12507_v18  ;;  %16176 = vst.msk [vmem:[%s24183_s27 + $0x80] sm:$0xff] %vm12509_vm3, %v14807_v57  ;;  %v12508_v5 = vadd.f32 %v18553_v20, %v24178_v45  ;;  %v12459_v11 = vpop.f32.mrb[63].mxu0  ;;  %v14808_v37 = vadd.f32 %v24178_v45, %v14731_v4 }
 0x69b   : > { %12522 = vst.msk [vmem:[%s24183_s27 + $0x60] sm:$0xff] %vm12509_vm3, %v12505_v26  ;;  %16179 = vst.msk [vmem:[%s24183_s27 + $0x98] sm:$0xff] %vm12509_vm3, %v14810_v56  ;;  %v12506_v50 = vadd.f32 %v24178_v45, %v12459_v11 }
 0x69c   : > { %12525 = vst.msk [vmem:[%s24183_s27 + $0x78] sm:$0xff] %vm12509_vm3, %v12508_v5  ;;  %16177 = vst.msk [vmem:[%s24183_s27 + $0x88] sm:$0xff] %vm12509_vm3, %v14808_v37 }
 0x69d   : > { %12523 = vst.msk [vmem:[%s24183_s27 + $0x68] sm:$0xff] %vm12509_vm3, %v12506_v50 }
 0x69e   : > { %v18832_v43 = vpop.f32.mrb[52].mxu1 }
 0x69f   : > { %v14813_v21 = vadd.f32 %v18832_v43, %v24178_v45  ;;  %v14744_v51 = vpop.f32.mrb[53].mxu1 }
 0x6a0   : > { %v14811_v16 = vadd.f32 %v24178_v45, %v14744_v51  ;;  %v18833_v41 = vpop.f32.mrb[54].mxu1 }
 0x6a1   : > { %16182 = vst.msk [vmem:[%s24183_s27 + $0xb0] sm:$0xff] %vm12509_vm3, %v14813_v21  ;;  %v14814_v52 = vadd.f32 %v18833_v41, %v24178_v45  ;;  %v14747_v39 = vpop.f32.mrb[55].mxu1 }
 0x6a2   : > { %16180 = vst.msk [vmem:[%s24183_s27 + $0xa0] sm:$0xff] %vm12509_vm3, %v14811_v16  ;;  %v14812_v35 = vadd.f32 %v24178_v45, %v14747_v39 }
 0x6a3   : > { %16183 = vst.msk [vmem:[%s24183_s27 + $0xb8] sm:$0xff] %vm12509_vm3, %v14814_v52 }
 0x6a4   : > { %16181 = vst.msk [vmem:[%s24183_s27 + $0xa8] sm:$0xff] %vm12509_vm3, %v14812_v35 }
 0x6a6   : > { %v18836_v40 = vpop.f32.mrb[56].mxu1 }
 0x6a7   : > { %v14817_v33 = vadd.f32 %v18836_v40, %v24178_v45  ;;  %v14760_v53 = vpop.f32.mrb[57].mxu1 }
 0x6a8   : > { %v14815_v42 = vadd.f32 %v24178_v45, %v14760_v53  ;;  %v18837_v14 = vpop.f32.mrb[58].mxu1 }
 0x6a9   : > { %16186 = vst.msk [vmem:[%s24183_s27 + $0xd0] sm:$0xff] %vm12509_vm3, %v14817_v33  ;;  %v14818_v29 = vadd.f32 %v18837_v14, %v24178_v45  ;;  %v14763_v62 = vpop.f32.mrb[59].mxu1 }
 0x6aa   : > { %16184 = vst.msk [vmem:[%s24183_s27 + $0xc0] sm:$0xff] %vm12509_vm3, %v14815_v42  ;;  %v14816_v30 = vadd.f32 %v24178_v45, %v14763_v62 }
 0x6ab   : > { %16187 = vst.msk [vmem:[%s24183_s27 + $0xd8] sm:$0xff] %vm12509_vm3, %v14818_v29 }
 0x6ac   : > { %16185 = vst.msk [vmem:[%s24183_s27 + $0xc8] sm:$0xff] %vm12509_vm3, %v14816_v30 }
 0x6ae   : > { %v18840_v44 = vpop.f32.mrb[60].mxu1 }
 0x6af   : > { %v14821_v13 = vadd.f32 %v18840_v44, %v24178_v45  ;;  %v14776_v24 = vpop.f32.mrb[61].mxu1 }
 0x6b0   : > { %v14819_v46 = vadd.f32 %v24178_v45, %v14776_v24  ;;  %v18841_v36 = vpop.f32.mrb[62].mxu1 }
 0x6b1   : > { %16190 = vst.msk [vmem:[%s24183_s27 + $0xf0] sm:$0xff] %vm12509_vm3, %v14821_v13  ;;  %v14822_v60 = vadd.f32 %v18841_v36, %v24178_v45  ;;  %v14779_v19 = vpop.f32.mrb[63].mxu1 }
 0x6b2   : > { %16188 = vst.msk [vmem:[%s24183_s27 + $0xe0] sm:$0xff] %vm12509_vm3, %v14819_v46  ;;  %v14820_v49 = vadd.f32 %v24178_v45, %v14779_v19 }
 0x6b3   : > { %16191 = vst.msk [vmem:[%s24183_s27 + $0xf8] sm:$0xff] %vm12509_vm3, %v14822_v60 }
 0x6b4   : > { %16189 = vst.msk [vmem:[%s24183_s27 + $0xe8] sm:$0xff] %vm12509_vm3, %v14820_v49 }
 0x6b5 PF: > { %s17_s24 = sadd.s32 1, %s20099_s24  }
 0x6b6   : > { %p14_p4 = scmp.ge.s32.totalorder %s17_s24, 4  }
 0x6b8   :  { %16 = sbr.rel (!%p14_p4) target bundleno = 1 (0x1), region = 115 }

</bundles_post_ra>
